<compile_context>
chip_gen: v6e
topology: v6e:2x2x1
jax: 0.10.0
libtpu: 0.0.40
codegen_flags: <defaults>
</compile_context>

<pallas_src>
import functools

import jax
import jax.numpy as jnp
from jax import lax
from jax.experimental import pallas as pl
from jax.experimental.pallas import tpu as pltpu

BN_EPS = 1e-3  # nn.BatchNorm2d(..., eps=0.001)


# ----------------------------- Pallas kernel ------------------------------- #
def _block17_kernel(Nb, H, W,
                    x_ref,
                    w_stem, b_stem,
                    w_1x7, b_1x7,
                    w_7x1, b_7x1,
                    w_out, b_out,
                    o_ref,
                    pad_w_ref, im2col_ref, pad_h_ref):
    f32, bf16 = jnp.float32, jnp.bfloat16
    C = x_ref.shape[-1]          # 1088
    M = Nb * H * W

    x = x_ref[...]                               # (Nb, H, W, C) f32
    xm = x.reshape(M, C)                         # residual path stays f32

    # ---- fused 1x1 stem: [b1a (128) | b0 (192) | zero-pad (64)] ------------
    stem = jnp.dot(xm.astype(bf16), w_stem[...],
                   preferred_element_type=f32) + b_stem[...]
    stem = jnp.maximum(stem, 0.0)                # (M, 384)
    t1 = stem[:, 0:128].astype(bf16)             # branch1 1x1 output (M, 128)
    y0 = stem[:, 128:384].astype(bf16)           # branch0 output, padded (M, 256)

    # ---- branch1: (1,7) conv, padding (0,3), 128 -> 160 (padded to 256) ----
    # fused-K im2col: single K=896 matmul instead of 7 K=128 taps
    pad_w_ref[:, 0:3, :] = jnp.zeros((Nb * H, 3, 128), bf16)
    pad_w_ref[:, W + 3:W + 6, :] = jnp.zeros((Nb * H, 3, 128), bf16)
    pad_w_ref[:, 3:W + 3, :] = t1.reshape(Nb * H, W, 128)
    for k in range(7):                           # lane-tile-aligned writes
        im2col_ref[:, :, k * 128:(k + 1) * 128] = pad_w_ref[:, k:k + W, :]
    t2 = jnp.dot(im2col_ref[...].reshape(M, 7 * 128), w_1x7[...],
                 preferred_element_type=f32) + b_1x7[...]
    t2 = jnp.maximum(t2, 0.0)                    # (M, 256); cols 160:256 == 0

    # ---- branch1: (7,1) conv, padding (3,0), 160(256) -> 192 (padded 256) --
    # taps along H are pure addressing; each dot is full depth K=256
    pad_h_ref[:, 0:3, :, :] = jnp.zeros((Nb, 3, W, 256), bf16)
    pad_h_ref[:, H + 3:H + 6, :, :] = jnp.zeros((Nb, 3, W, 256), bf16)
    pad_h_ref[:, 3:H + 3, :, :] = t2.astype(bf16).reshape(Nb, H, W, 256)
    acc = jnp.dot(pad_h_ref[:, 0:H, :, :].reshape(M, 256), w_7x1[0],
                  preferred_element_type=f32) + b_7x1[...]
    for k in range(1, 7):
        acc = acc + jnp.dot(pad_h_ref[:, k:k + H, :, :].reshape(M, 256),
                            w_7x1[k], preferred_element_type=f32)
    y1 = jnp.maximum(acc, 0.0).astype(bf16)      # (M, 256); cols 192:256 == 0

    # ---- output 1x1 conv: single K=512 dot over lane-aligned concat --------
    cat = jnp.concatenate([y0, y1], axis=-1)     # (M, 512) bf16, offsets 0/256
    out = jnp.dot(cat, w_out[...], preferred_element_type=f32) + b_out[...]
    out = jnp.maximum(out + xm, 0.0)             # residual + final ReLU (f32)
    o_ref[...] = out.reshape(Nb, H, W, C)


# --------------------------- parameter building ---------------------------- #
def _fold_bn(w, gamma, beta, mean, var):
    s = gamma / jnp.sqrt(var + BN_EPS)
    return w * s[:, None, None, None], beta - mean * s


def _make_basic_conv(key, cin, cout, kh, kw):
    k1, k2, k3, k4, k5 = jax.random.split(key, 5)
    fan_in = cin * kh * kw
    w = jax.random.normal(k1, (cout, cin, kh, kw), jnp.float32) / jnp.sqrt(fan_in)
    gamma = 1.0 + 0.1 * jax.random.normal(k2, (cout,), jnp.float32)
    beta = 0.1 * jax.random.normal(k3, (cout,), jnp.float32)
    mean = 0.1 * jax.random.normal(k4, (cout,), jnp.float32)
    var = jnp.abs(jax.random.normal(k5, (cout,), jnp.float32)) + 0.5
    return _fold_bn(w, gamma, beta, mean, var)


def make_params(key):
    ks = jax.random.split(key, 5)
    p = {
        "b0":  _make_basic_conv(ks[0], 1088, 192, 1, 1),
        "b1a": _make_basic_conv(ks[1], 1088, 128, 1, 1),
        "b1b": _make_basic_conv(ks[2], 128, 160, 1, 7),
        "b1c": _make_basic_conv(ks[3], 160, 192, 7, 1),
    }
    k1, k2 = jax.random.split(ks[4])
    w = jax.random.normal(k1, (1088, 384, 1, 1), jnp.float32) / jnp.sqrt(384.0)
    b = 0.1 * jax.random.normal(k2, (1088,), jnp.float32)
    p["out"] = (w, b)                        # final conv has a bias, no BN/ReLU
    return p


def _to_1x1(w):                                   # OIHW -> (Cin, Cout)
    return jnp.transpose(w[:, :, 0, 0])


def _kernel_operands(p, scale):
    bf16, f32 = jnp.bfloat16, jnp.float32
    # fused stem weight: [branch1a (128) | branch0 (192) | zero-pad (64)]
    w_stem = jnp.concatenate(
        [_to_1x1(p["b1a"][0]), _to_1x1(p["b0"][0]),
         jnp.zeros((1088, 64), f32)], axis=1).astype(bf16)        # (1088, 384)
    b_stem = jnp.concatenate(
        [p["b1a"][1], p["b0"][1], jnp.zeros((64,), f32)]).reshape(1, -1)

    # (1,7) conv: OIHW (160,128,1,7) -> fused im2col weight (7*128, 256)
    w17 = jnp.transpose(p["b1b"][0][:, :, 0, :], (2, 1, 0))       # (7,128,160)
    w17 = w17.reshape(7 * 128, 160)
    w_1x7 = jnp.concatenate([w17, jnp.zeros((7 * 128, 96), f32)],
                            axis=1).astype(bf16)                  # (896, 256)
    b_1x7 = jnp.concatenate([p["b1b"][1], jnp.zeros((96,), f32)]).reshape(1, -1)

    # (7,1) conv: OIHW (192,160,7,1) -> (7, 256, 256) zero-padded in/out chans
    w71 = jnp.transpose(p["b1c"][0][:, :, :, 0], (2, 1, 0))       # (7,160,192)
    w_7x1 = jnp.pad(w71, ((0, 0), (0, 96), (0, 64))).astype(bf16)  # (7,256,256)
    b_7x1 = jnp.concatenate([p["b1c"][1], jnp.zeros((64,), f32)]).reshape(1, -1)

    # output conv with residual scale folded; rows padded to K=512 (256+256)
    w_o = scale * _to_1x1(p["out"][0])                            # (384, 1088)
    w_out = jnp.concatenate(
        [w_o[0:192], jnp.zeros((64, 1088), f32),
         w_o[192:384], jnp.zeros((64, 1088), f32)], axis=0).astype(bf16)
    b_out = (scale * p["out"][1]).reshape(1, -1).astype(f32)
    return [w_stem, b_stem.astype(f32),
            w_1x7, b_1x7.astype(f32),
            w_7x1, b_7x1.astype(f32),
            w_out, b_out]


# ------------------------------ wrapper ------------------------------------ #
def _pick_batch_block(N, H, W, max_rows=1024):
    best = 1
    for nb in range(1, N + 1):
        if N % nb == 0 and nb * H * W <= max_rows:
            best = nb
    return best


def block17_pallas(x_nchw, params, scale=1.0, batch_block=None):
    # TODO(synk): wrapper-level NCHW<->NHWC transposes could be avoided if the
    # surrounding model is kept in NHWC; kept here to preserve PyTorch I/O.
    x = jnp.transpose(x_nchw, (0, 2, 3, 1)).astype(jnp.float32)   # -> NHWC
    N, H, W, C = x.shape
    assert C == 1088, "Block17 requires 1088 input channels"
    Nb = _pick_batch_block(N, H, W) if batch_block is None else batch_block
    assert N % Nb == 0
    grid_len = N // Nb
    operands = _kernel_operands(params, scale)

    def full_spec(arr):
        nd = arr.ndim
        return pl.BlockSpec(arr.shape, lambda n, _nd=nd: (0,) * _nd)

    # Only shard the batch axis across TensorCores when the grid has real work
    # per core (avoids duplicated weight DMA on v7x at tiny N).
    semantics = ("parallel",) if grid_len > 1 else ("arbitrary",)

    kernel = functools.partial(_block17_kernel, Nb, H, W)
    out = pl.pallas_call(
        kernel,
        out_shape=jax.ShapeDtypeStruct((N, H, W, C), jnp.float32),
        grid_spec=pltpu.PrefetchScalarGridSpec(
            num_scalar_prefetch=0,
            grid=(grid_len,),                                     # batch blocks
            in_specs=[pl.BlockSpec((Nb, H, W, C), lambda n: (n, 0, 0, 0))]
                     + [full_spec(a) for a in operands],
            out_specs=pl.BlockSpec((Nb, H, W, C), lambda n: (n, 0, 0, 0)),
            scratch_shapes=[
                pltpu.VMEM((Nb * H, W + 6, 128), jnp.bfloat16),   # W-padded t1
                pltpu.VMEM((Nb * H, W, 7 * 128), jnp.bfloat16),   # 1x7 im2col
                pltpu.VMEM((Nb, H + 6, W, 256), jnp.bfloat16),    # H-padded t2
            ],
        ),
        compiler_params=pltpu.CompilerParams(
            dimension_semantics=semantics,
            vmem_limit_bytes=64 * 1024 * 1024),
    )(x, *operands)
    return jnp.transpose(out, (0, 3, 1, 2))                       # -> NCHW


# --------------------------- pure-JAX reference ----------------------------- #
def _conv_nhwc(x, w_oihw, b, pad_hw):
    w_hwio = jnp.transpose(w_oihw, (2, 3, 1, 0))
    y = lax.conv_general_dilated(
        x, w_hwio, window_strides=(1, 1),
        padding=[(pad_hw[0], pad_hw[0]), (pad_hw[1], pad_hw[1])],
        dimension_numbers=("NHWC", "HWIO", "NHWC"),
        precision=lax.Precision.HIGHEST)
    return y + b.reshape(1, 1, 1, -1)


def block17_ref(x_nchw, p, scale=1.0):
    x = jnp.transpose(x_nchw, (0, 2, 3, 1)).astype(jnp.float32)
    br = lambda z, wp, pad: jax.nn.relu(_conv_nhwc(z, wp[0], wp[1], pad))
    y0 = br(x, p["b0"], (0, 0))
    t = br(x, p["b1a"], (0, 0))
    t = br(t, p["b1b"], (0, 3))
    y1 = br(t, p["b1c"], (3, 0))
    cat = jnp.concatenate([y0, y1], axis=-1)
    out = _conv_nhwc(cat, p["out"][0], p["out"][1], (0, 0))
    out = jax.nn.relu(out * scale + x)
    return jnp.transpose(out, (0, 3, 1, 2))


# --------------------------------- main ------------------------------------ #
if __name__ == "__main__":
    key = jax.random.PRNGKey(0)
    kx, kp = jax.random.split(key)

    # channels fixed at 1088 by Block17; keep batch/spatial small
    N, C, H, W = 2, 1088, 8, 8
    x = jax.random.normal(kx, (N, C, H, W), jnp.float32)
    params = make_params(kp)
    scale = 0.10

    out = block17_pallas(x, params, scale)
    out = jax.block_until_ready(out)

    ref = block17_ref(x, params, scale)
    assert out.shape == (N, C, H, W)
    max_err = float(jnp.max(jnp.abs(out - ref)))
    # bf16 matmuls with f32 accumulation: allow ~2e-2 tolerance
    assert jnp.allclose(out, ref, rtol=2e-2, atol=2e-2), f"max abs err {max_err}"

    print("KERNEL_OK")
</pallas_src>

<mosaic_0001>
module attributes {stable_mosaic.version = 11 : i64} {
  func.func @_block17_kernel(%arg0: i32, %arg1: memref<2x8x8x1088xf32, #tpu.memory_space<vmem>>, %arg2: memref<1088x384xbf16, #tpu.memory_space<vmem>>, %arg3: memref<1x384xf32, #tpu.memory_space<vmem>>, %arg4: memref<896x256xbf16, #tpu.memory_space<vmem>>, %arg5: memref<1x256xf32, #tpu.memory_space<vmem>>, %arg6: memref<7x256x256xbf16, #tpu.memory_space<vmem>>, %arg7: memref<1x256xf32, #tpu.memory_space<vmem>>, %arg8: memref<512x1088xbf16, #tpu.memory_space<vmem>>, %arg9: memref<1x1088xf32, #tpu.memory_space<vmem>>, %arg10: memref<2x8x8x1088xf32, #tpu.memory_space<vmem>>, %arg11: memref<16x14x128xbf16, #tpu.memory_space<vmem>>, %arg12: memref<16x8x896xbf16, #tpu.memory_space<vmem>>, %arg13: memref<2x14x8x256xbf16, #tpu.memory_space<vmem>>) attributes {dimension_semantics = [#tpu.dimension_semantics<arbitrary>], iteration_bounds = array<i64: 1>, scalar_prefetch = 0 : i64, scratch_operands = 3 : i64, tpu.core_type = #tpu.core_type<tc>, window_params = [{transform_indices = @transform_0, window_bounds = array<i64: 2, 8, 8, 1088>}, {pipeline_mode = #tpu.pipeline_mode<synchronous>, transform_indices = @transform_1, window_bounds = array<i64: 1088, 384>}, {pipeline_mode = #tpu.pipeline_mode<synchronous>, transform_indices = @transform_2, window_bounds = array<i64: 1, 384>}, {pipeline_mode = #tpu.pipeline_mode<synchronous>, transform_indices = @transform_3, window_bounds = array<i64: 896, 256>}, {pipeline_mode = #tpu.pipeline_mode<synchronous>, transform_indices = @transform_4, window_bounds = array<i64: 1, 256>}, {pipeline_mode = #tpu.pipeline_mode<synchronous>, transform_indices = @transform_5, window_bounds = array<i64: 7, 256, 256>}, {pipeline_mode = #tpu.pipeline_mode<synchronous>, transform_indices = @transform_6, window_bounds = array<i64: 1, 256>}, {pipeline_mode = #tpu.pipeline_mode<synchronous>, transform_indices = @transform_7, window_bounds = array<i64: 512, 1088>}, {pipeline_mode = #tpu.pipeline_mode<synchronous>, transform_indices = @transform_8, window_bounds = array<i64: 1, 1088>}, {transform_indices = @transform_9, window_bounds = array<i64: 2, 8, 8, 1088>}]} {
    %c0 = arith.constant 0 : index
    %c0_0 = arith.constant 0 : index
    %c0_1 = arith.constant 0 : index
    %c0_2 = arith.constant 0 : index
    %0 = vector.load %arg1[%c0, %c0_0, %c0_1, %c0_2] : memref<2x8x8x1088xf32, #tpu.memory_space<vmem>>, vector<2x8x8x1088xf32>
    %1 = vector.shape_cast %0 : vector<2x8x8x1088xf32> to vector<128x1088xf32>
    %2 = arith.truncf %1 : vector<128x1088xf32> to vector<128x1088xbf16>
    %c0_3 = arith.constant 0 : index
    %c0_4 = arith.constant 0 : index
    %3 = vector.load %arg2[%c0_3, %c0_4] : memref<1088x384xbf16, #tpu.memory_space<vmem>>, vector<1088x384xbf16>
    %cst = arith.constant dense<0.000000e+00> : vector<128x384xf32>
    %4 = tpu.matmul %2, %3, %cst {dimension_numbers = #tpu.dot_dimension_numbers<[1], [0], [0], [1], [0, 0, 1, 1], [], []>} : vector<128x1088xbf16>, vector<1088x384xbf16>, vector<128x384xf32> -> vector<128x384xf32>
    %c0_5 = arith.constant 0 : index
    %c0_6 = arith.constant 0 : index
    %5 = vector.load %arg3[%c0_5, %c0_6] : memref<1x384xf32, #tpu.memory_space<vmem>>, vector<1x384xf32>
    %6 = vector.broadcast %5 : vector<1x384xf32> to vector<128x384xf32>
    %7 = arith.addf %4, %6 : vector<128x384xf32>
    %cst_7 = arith.constant 0.000000e+00 : f32
    %8 = vector.broadcast %cst_7 : f32 to vector<128x384xf32>
    %9 = arith.maximumf %7, %8 : vector<128x384xf32>
    %10 = vector.extract_strided_slice %9 {offsets = [0, 0], sizes = [128, 128], strides = [1, 1]} : vector<128x384xf32> to vector<128x128xf32>
    %11 = arith.truncf %10 : vector<128x128xf32> to vector<128x128xbf16>
    %12 = vector.extract_strided_slice %9 {offsets = [0, 128], sizes = [128, 256], strides = [1, 1]} : vector<128x384xf32> to vector<128x256xf32>
    %13 = arith.truncf %12 : vector<128x256xf32> to vector<128x256xbf16>
    %cst_8 = arith.constant 0.000000e+00 : bf16
    %14 = vector.broadcast %cst_8 : bf16 to vector<16x3x128xbf16>
    %c0_9 = arith.constant 0 : index
    %c0_10 = arith.constant 0 : index
    %c0_11 = arith.constant 0 : index
    %15 = vector.load %arg11[%c0_9, %c0_10, %c0_11] : memref<16x14x128xbf16, #tpu.memory_space<vmem>>, vector<16x3x128xbf16>
    tpu.vector_store %arg11[%c0_9, %c0_10, %c0_11], %14 {strides = array<i32>} : memref<16x14x128xbf16, #tpu.memory_space<vmem>>, vector<16x3x128xbf16>,
    %cst_12 = arith.constant 0.000000e+00 : bf16
    %16 = vector.broadcast %cst_12 : bf16 to vector<16x3x128xbf16>
    %c0_13 = arith.constant 0 : index
    %c11 = arith.constant 11 : index
    %c0_14 = arith.constant 0 : index
    %17 = vector.load %arg11[%c0_13, %c11, %c0_14] : memref<16x14x128xbf16, #tpu.memory_space<vmem>>, vector<16x3x128xbf16>
    tpu.vector_store %arg11[%c0_13, %c11, %c0_14], %16 {strides = array<i32>} : memref<16x14x128xbf16, #tpu.memory_space<vmem>>, vector<16x3x128xbf16>,
    %18 = vector.shape_cast %11 : vector<128x128xbf16> to vector<16x8x128xbf16>
    %c0_15 = arith.constant 0 : index
    %c3 = arith.constant 3 : index
    %c0_16 = arith.constant 0 : index
    %19 = vector.load %arg11[%c0_15, %c3, %c0_16] : memref<16x14x128xbf16, #tpu.memory_space<vmem>>, vector<16x8x128xbf16>
    tpu.vector_store %arg11[%c0_15, %c3, %c0_16], %18 {strides = array<i32>} : memref<16x14x128xbf16, #tpu.memory_space<vmem>>, vector<16x8x128xbf16>,
    %c0_17 = arith.constant 0 : index
    %c0_18 = arith.constant 0 : index
    %c0_19 = arith.constant 0 : index
    %20 = vector.load %arg11[%c0_17, %c0_18, %c0_19] : memref<16x14x128xbf16, #tpu.memory_space<vmem>>, vector<16x8x128xbf16>
    %c0_20 = arith.constant 0 : index
    %c0_21 = arith.constant 0 : index
    %c0_22 = arith.constant 0 : index
    %21 = vector.load %arg12[%c0_20, %c0_21, %c0_22] : memref<16x8x896xbf16, #tpu.memory_space<vmem>>, vector<16x8x128xbf16>
    tpu.vector_store %arg12[%c0_20, %c0_21, %c0_22], %20 {strides = array<i32>} : memref<16x8x896xbf16, #tpu.memory_space<vmem>>, vector<16x8x128xbf16>,
    %c0_23 = arith.constant 0 : index
    %c1 = arith.constant 1 : index
    %c0_24 = arith.constant 0 : index
    %22 = vector.load %arg11[%c0_23, %c1, %c0_24] : memref<16x14x128xbf16, #tpu.memory_space<vmem>>, vector<16x8x128xbf16>
    %c0_25 = arith.constant 0 : index
    %c0_26 = arith.constant 0 : index
    %c128 = arith.constant 128 : index
    %23 = vector.load %arg12[%c0_25, %c0_26, %c128] : memref<16x8x896xbf16, #tpu.memory_space<vmem>>, vector<16x8x128xbf16>
    tpu.vector_store %arg12[%c0_25, %c0_26, %c128], %22 {strides = array<i32>} : memref<16x8x896xbf16, #tpu.memory_space<vmem>>, vector<16x8x128xbf16>,
    %c0_27 = arith.constant 0 : index
    %c2 = arith.constant 2 : index
    %c0_28 = arith.constant 0 : index
    %24 = vector.load %arg11[%c0_27, %c2, %c0_28] : memref<16x14x128xbf16, #tpu.memory_space<vmem>>, vector<16x8x128xbf16>
    %c0_29 = arith.constant 0 : index
    %c0_30 = arith.constant 0 : index
    %c256 = arith.constant 256 : index
    %25 = vector.load %arg12[%c0_29, %c0_30, %c256] : memref<16x8x896xbf16, #tpu.memory_space<vmem>>, vector<16x8x128xbf16>
    tpu.vector_store %arg12[%c0_29, %c0_30, %c256], %24 {strides = array<i32>} : memref<16x8x896xbf16, #tpu.memory_space<vmem>>, vector<16x8x128xbf16>,
    %c0_31 = arith.constant 0 : index
    %c3_32 = arith.constant 3 : index
    %c0_33 = arith.constant 0 : index
    %26 = vector.load %arg11[%c0_31, %c3_32, %c0_33] : memref<16x14x128xbf16, #tpu.memory_space<vmem>>, vector<16x8x128xbf16>
    %c0_34 = arith.constant 0 : index
    %c0_35 = arith.constant 0 : index
    %c384 = arith.constant 384 : index
    %27 = vector.load %arg12[%c0_34, %c0_35, %c384] : memref<16x8x896xbf16, #tpu.memory_space<vmem>>, vector<16x8x128xbf16>
    tpu.vector_store %arg12[%c0_34, %c0_35, %c384], %26 {strides = array<i32>} : memref<16x8x896xbf16, #tpu.memory_space<vmem>>, vector<16x8x128xbf16>,
    %c0_36 = arith.constant 0 : index
    %c4 = arith.constant 4 : index
    %c0_37 = arith.constant 0 : index
    %28 = vector.load %arg11[%c0_36, %c4, %c0_37] : memref<16x14x128xbf16, #tpu.memory_space<vmem>>, vector<16x8x128xbf16>
    %c0_38 = arith.constant 0 : index
    %c0_39 = arith.constant 0 : index
    %c512 = arith.constant 512 : index
    %29 = vector.load %arg12[%c0_38, %c0_39, %c512] : memref<16x8x896xbf16, #tpu.memory_space<vmem>>, vector<16x8x128xbf16>
    tpu.vector_store %arg12[%c0_38, %c0_39, %c512], %28 {strides = array<i32>} : memref<16x8x896xbf16, #tpu.memory_space<vmem>>, vector<16x8x128xbf16>,
    %c0_40 = arith.constant 0 : index
    %c5 = arith.constant 5 : index
    %c0_41 = arith.constant 0 : index
    %30 = vector.load %arg11[%c0_40, %c5, %c0_41] : memref<16x14x128xbf16, #tpu.memory_space<vmem>>, vector<16x8x128xbf16>
    %c0_42 = arith.constant 0 : index
    %c0_43 = arith.constant 0 : index
    %c640 = arith.constant 640 : index
    %31 = vector.load %arg12[%c0_42, %c0_43, %c640] : memref<16x8x896xbf16, #tpu.memory_space<vmem>>, vector<16x8x128xbf16>
    tpu.vector_store %arg12[%c0_42, %c0_43, %c640], %30 {strides = array<i32>} : memref<16x8x896xbf16, #tpu.memory_space<vmem>>, vector<16x8x128xbf16>,
    %c0_44 = arith.constant 0 : index
    %c6 = arith.constant 6 : index
    %c0_45 = arith.constant 0 : index
    %32 = vector.load %arg11[%c0_44, %c6, %c0_45] : memref<16x14x128xbf16, #tpu.memory_space<vmem>>, vector<16x8x128xbf16>
    %c0_46 = arith.constant 0 : index
    %c0_47 = arith.constant 0 : index
    %c768 = arith.constant 768 : index
    %33 = vector.load %arg12[%c0_46, %c0_47, %c768] : memref<16x8x896xbf16, #tpu.memory_space<vmem>>, vector<16x8x128xbf16>
    tpu.vector_store %arg12[%c0_46, %c0_47, %c768], %32 {strides = array<i32>} : memref<16x8x896xbf16, #tpu.memory_space<vmem>>, vector<16x8x128xbf16>,
    %c0_48 = arith.constant 0 : index
    %c0_49 = arith.constant 0 : index
    %c0_50 = arith.constant 0 : index
    %34 = vector.load %arg12[%c0_48, %c0_49, %c0_50] : memref<16x8x896xbf16, #tpu.memory_space<vmem>>, vector<16x8x896xbf16>
    %35 = vector.shape_cast %34 : vector<16x8x896xbf16> to vector<128x896xbf16>
    %c0_51 = arith.constant 0 : index
    %c0_52 = arith.constant 0 : index
    %36 = vector.load %arg4[%c0_51, %c0_52] : memref<896x256xbf16, #tpu.memory_space<vmem>>, vector<896x256xbf16>
    %cst_53 = arith.constant dense<0.000000e+00> : vector<128x256xf32>
    %37 = tpu.matmul %35, %36, %cst_53 {dimension_numbers = #tpu.dot_dimension_numbers<[1], [0], [0], [1], [0, 0, 1, 1], [], []>} : vector<128x896xbf16>, vector<896x256xbf16>, vector<128x256xf32> -> vector<128x256xf32>
    %c0_54 = arith.constant 0 : index
    %c0_55 = arith.constant 0 : index
    %38 = vector.load %arg5[%c0_54, %c0_55] : memref<1x256xf32, #tpu.memory_space<vmem>>, vector<1x256xf32>
    %39 = vector.broadcast %38 : vector<1x256xf32> to vector<128x256xf32>
    %40 = arith.addf %37, %39 : vector<128x256xf32>
    %cst_56 = arith.constant 0.000000e+00 : f32
    %41 = vector.broadcast %cst_56 : f32 to vector<128x256xf32>
    %42 = arith.maximumf %40, %41 : vector<128x256xf32>
    %cst_57 = arith.constant 0.000000e+00 : bf16
    %43 = vector.broadcast %cst_57 : bf16 to vector<2x3x8x256xbf16>
    %c0_58 = arith.constant 0 : index
    %c0_59 = arith.constant 0 : index
    %c0_60 = arith.constant 0 : index
    %c0_61 = arith.constant 0 : index
    %44 = vector.load %arg13[%c0_58, %c0_59, %c0_60, %c0_61] : memref<2x14x8x256xbf16, #tpu.memory_space<vmem>>, vector<2x3x8x256xbf16>
    tpu.vector_store %arg13[%c0_58, %c0_59, %c0_60, %c0_61], %43 {strides = array<i32>} : memref<2x14x8x256xbf16, #tpu.memory_space<vmem>>, vector<2x3x8x256xbf16>,
    %cst_62 = arith.constant 0.000000e+00 : bf16
    %45 = vector.broadcast %cst_62 : bf16 to vector<2x3x8x256xbf16>
    %c0_63 = arith.constant 0 : index
    %c11_64 = arith.constant 11 : index
    %c0_65 = arith.constant 0 : index
    %c0_66 = arith.constant 0 : index
    %46 = vector.load %arg13[%c0_63, %c11_64, %c0_65, %c0_66] : memref<2x14x8x256xbf16, #tpu.memory_space<vmem>>, vector<2x3x8x256xbf16>
    tpu.vector_store %arg13[%c0_63, %c11_64, %c0_65, %c0_66], %45 {strides = array<i32>} : memref<2x14x8x256xbf16, #tpu.memory_space<vmem>>, vector<2x3x8x256xbf16>,
    %47 = arith.truncf %42 : vector<128x256xf32> to vector<128x256xbf16>
    %48 = vector.shape_cast %47 : vector<128x256xbf16> to vector<2x8x8x256xbf16>
    %c0_67 = arith.constant 0 : index
    %c3_68 = arith.constant 3 : index
    %c0_69 = arith.constant 0 : index
    %c0_70 = arith.constant 0 : index
    %49 = vector.load %arg13[%c0_67, %c3_68, %c0_69, %c0_70] : memref<2x14x8x256xbf16, #tpu.memory_space<vmem>>, vector<2x8x8x256xbf16>
    tpu.vector_store %arg13[%c0_67, %c3_68, %c0_69, %c0_70], %48 {strides = array<i32>} : memref<2x14x8x256xbf16, #tpu.memory_space<vmem>>, vector<2x8x8x256xbf16>,
    %c0_71 = arith.constant 0 : index
    %c0_72 = arith.constant 0 : index
    %c0_73 = arith.constant 0 : index
    %c0_74 = arith.constant 0 : index
    %50 = vector.load %arg13[%c0_71, %c0_72, %c0_73, %c0_74] : memref<2x14x8x256xbf16, #tpu.memory_space<vmem>>, vector<2x8x8x256xbf16>
    %51 = vector.shape_cast %50 : vector<2x8x8x256xbf16> to vector<128x256xbf16>
    %c0_75 = arith.constant 0 : index
    %c0_76 = arith.constant 0 : index
    %c0_77 = arith.constant 0 : index
    %52 = vector.load %arg6[%c0_75, %c0_76, %c0_77] : memref<7x256x256xbf16, #tpu.memory_space<vmem>>, vector<1x256x256xbf16>
    %53 = vector.shape_cast %52 : vector<1x256x256xbf16> to vector<256x256xbf16>
    %cst_78 = arith.constant dense<0.000000e+00> : vector<128x256xf32>
    %54 = tpu.matmul %51, %53, %cst_78 {dimension_numbers = #tpu.dot_dimension_numbers<[1], [0], [0], [1], [0, 0, 1, 1], [], []>} : vector<128x256xbf16>, vector<256x256xbf16>, vector<128x256xf32> -> vector<128x256xf32>
    %c0_79 = arith.constant 0 : index
    %c0_80 = arith.constant 0 : index
    %55 = vector.load %arg7[%c0_79, %c0_80] : memref<1x256xf32, #tpu.memory_space<vmem>>, vector<1x256xf32>
    %56 = vector.broadcast %55 : vector<1x256xf32> to vector<128x256xf32>
    %57 = arith.addf %54, %56 : vector<128x256xf32>
    %c0_81 = arith.constant 0 : index
    %c1_82 = arith.constant 1 : index
    %c0_83 = arith.constant 0 : index
    %c0_84 = arith.constant 0 : index
    %58 = vector.load %arg13[%c0_81, %c1_82, %c0_83, %c0_84] : memref<2x14x8x256xbf16, #tpu.memory_space<vmem>>, vector<2x8x8x256xbf16>
    %59 = vector.shape_cast %58 : vector<2x8x8x256xbf16> to vector<128x256xbf16>
    %c1_85 = arith.constant 1 : index
    %c0_86 = arith.constant 0 : index
    %c0_87 = arith.constant 0 : index
    %60 = vector.load %arg6[%c1_85, %c0_86, %c0_87] : memref<7x256x256xbf16, #tpu.memory_space<vmem>>, vector<1x256x256xbf16>
    %61 = vector.shape_cast %60 : vector<1x256x256xbf16> to vector<256x256xbf16>
    %cst_88 = arith.constant dense<0.000000e+00> : vector<128x256xf32>
    %62 = tpu.matmul %59, %61, %cst_88 {dimension_numbers = #tpu.dot_dimension_numbers<[1], [0], [0], [1], [0, 0, 1, 1], [], []>} : vector<128x256xbf16>, vector<256x256xbf16>, vector<128x256xf32> -> vector<128x256xf32>
    %63 = arith.addf %57, %62 : vector<128x256xf32>
    %c0_89 = arith.constant 0 : index
    %c2_90 = arith.constant 2 : index
    %c0_91 = arith.constant 0 : index
    %c0_92 = arith.constant 0 : index
    %64 = vector.load %arg13[%c0_89, %c2_90, %c0_91, %c0_92] : memref<2x14x8x256xbf16, #tpu.memory_space<vmem>>, vector<2x8x8x256xbf16>
    %65 = vector.shape_cast %64 : vector<2x8x8x256xbf16> to vector<128x256xbf16>
    %c2_93 = arith.constant 2 : index
    %c0_94 = arith.constant 0 : index
    %c0_95 = arith.constant 0 : index
    %66 = vector.load %arg6[%c2_93, %c0_94, %c0_95] : memref<7x256x256xbf16, #tpu.memory_space<vmem>>, vector<1x256x256xbf16>
    %67 = vector.shape_cast %66 : vector<1x256x256xbf16> to vector<256x256xbf16>
    %cst_96 = arith.constant dense<0.000000e+00> : vector<128x256xf32>
    %68 = tpu.matmul %65, %67, %cst_96 {dimension_numbers = #tpu.dot_dimension_numbers<[1], [0], [0], [1], [0, 0, 1, 1], [], []>} : vector<128x256xbf16>, vector<256x256xbf16>, vector<128x256xf32> -> vector<128x256xf32>
    %69 = arith.addf %63, %68 : vector<128x256xf32>
    %c0_97 = arith.constant 0 : index
    %c3_98 = arith.constant 3 : index
    %c0_99 = arith.constant 0 : index
    %c0_100 = arith.constant 0 : index
    %70 = vector.load %arg13[%c0_97, %c3_98, %c0_99, %c0_100] : memref<2x14x8x256xbf16, #tpu.memory_space<vmem>>, vector<2x8x8x256xbf16>
    %71 = vector.shape_cast %70 : vector<2x8x8x256xbf16> to vector<128x256xbf16>
    %c3_101 = arith.constant 3 : index
    %c0_102 = arith.constant 0 : index
    %c0_103 = arith.constant 0 : index
    %72 = vector.load %arg6[%c3_101, %c0_102, %c0_103] : memref<7x256x256xbf16, #tpu.memory_space<vmem>>, vector<1x256x256xbf16>
    %73 = vector.shape_cast %72 : vector<1x256x256xbf16> to vector<256x256xbf16>
    %cst_104 = arith.constant dense<0.000000e+00> : vector<128x256xf32>
    %74 = tpu.matmul %71, %73, %cst_104 {dimension_numbers = #tpu.dot_dimension_numbers<[1], [0], [0], [1], [0, 0, 1, 1], [], []>} : vector<128x256xbf16>, vector<256x256xbf16>, vector<128x256xf32> -> vector<128x256xf32>
    %75 = arith.addf %69, %74 : vector<128x256xf32>
    %c0_105 = arith.constant 0 : index
    %c4_106 = arith.constant 4 : index
    %c0_107 = arith.constant 0 : index
    %c0_108 = arith.constant 0 : index
    %76 = vector.load %arg13[%c0_105, %c4_106, %c0_107, %c0_108] : memref<2x14x8x256xbf16, #tpu.memory_space<vmem>>, vector<2x8x8x256xbf16>
    %77 = vector.shape_cast %76 : vector<2x8x8x256xbf16> to vector<128x256xbf16>
    %c4_109 = arith.constant 4 : index
    %c0_110 = arith.constant 0 : index
    %c0_111 = arith.constant 0 : index
    %78 = vector.load %arg6[%c4_109, %c0_110, %c0_111] : memref<7x256x256xbf16, #tpu.memory_space<vmem>>, vector<1x256x256xbf16>
    %79 = vector.shape_cast %78 : vector<1x256x256xbf16> to vector<256x256xbf16>
    %cst_112 = arith.constant dense<0.000000e+00> : vector<128x256xf32>
    %80 = tpu.matmul %77, %79, %cst_112 {dimension_numbers = #tpu.dot_dimension_numbers<[1], [0], [0], [1], [0, 0, 1, 1], [], []>} : vector<128x256xbf16>, vector<256x256xbf16>, vector<128x256xf32> -> vector<128x256xf32>
    %81 = arith.addf %75, %80 : vector<128x256xf32>
    %c0_113 = arith.constant 0 : index
    %c5_114 = arith.constant 5 : index
    %c0_115 = arith.constant 0 : index
    %c0_116 = arith.constant 0 : index
    %82 = vector.load %arg13[%c0_113, %c5_114, %c0_115, %c0_116] : memref<2x14x8x256xbf16, #tpu.memory_space<vmem>>, vector<2x8x8x256xbf16>
    %83 = vector.shape_cast %82 : vector<2x8x8x256xbf16> to vector<128x256xbf16>
    %c5_117 = arith.constant 5 : index
    %c0_118 = arith.constant 0 : index
    %c0_119 = arith.constant 0 : index
    %84 = vector.load %arg6[%c5_117, %c0_118, %c0_119] : memref<7x256x256xbf16, #tpu.memory_space<vmem>>, vector<1x256x256xbf16>
    %85 = vector.shape_cast %84 : vector<1x256x256xbf16> to vector<256x256xbf16>
    %cst_120 = arith.constant dense<0.000000e+00> : vector<128x256xf32>
    %86 = tpu.matmul %83, %85, %cst_120 {dimension_numbers = #tpu.dot_dimension_numbers<[1], [0], [0], [1], [0, 0, 1, 1], [], []>} : vector<128x256xbf16>, vector<256x256xbf16>, vector<128x256xf32> -> vector<128x256xf32>
    %87 = arith.addf %81, %86 : vector<128x256xf32>
    %c0_121 = arith.constant 0 : index
    %c6_122 = arith.constant 6 : index
    %c0_123 = arith.constant 0 : index
    %c0_124 = arith.constant 0 : index
    %88 = vector.load %arg13[%c0_121, %c6_122, %c0_123, %c0_124] : memref<2x14x8x256xbf16, #tpu.memory_space<vmem>>, vector<2x8x8x256xbf16>
    %89 = vector.shape_cast %88 : vector<2x8x8x256xbf16> to vector<128x256xbf16>
    %c6_125 = arith.constant 6 : index
    %c0_126 = arith.constant 0 : index
    %c0_127 = arith.constant 0 : index
    %90 = vector.load %arg6[%c6_125, %c0_126, %c0_127] : memref<7x256x256xbf16, #tpu.memory_space<vmem>>, vector<1x256x256xbf16>
    %91 = vector.shape_cast %90 : vector<1x256x256xbf16> to vector<256x256xbf16>
    %cst_128 = arith.constant dense<0.000000e+00> : vector<128x256xf32>
    %92 = tpu.matmul %89, %91, %cst_128 {dimension_numbers = #tpu.dot_dimension_numbers<[1], [0], [0], [1], [0, 0, 1, 1], [], []>} : vector<128x256xbf16>, vector<256x256xbf16>, vector<128x256xf32> -> vector<128x256xf32>
    %93 = arith.addf %87, %92 : vector<128x256xf32>
    %cst_129 = arith.constant 0.000000e+00 : f32
    %94 = vector.broadcast %cst_129 : f32 to vector<128x256xf32>
    %95 = arith.maximumf %93, %94 : vector<128x256xf32>
    %96 = arith.truncf %95 : vector<128x256xf32> to vector<128x256xbf16>
    %97 = tpu.concatenate %13, %96 in 1 : vector<128x256xbf16>, vector<128x256xbf16> -> vector<128x512xbf16>
    %c0_130 = arith.constant 0 : index
    %c0_131 = arith.constant 0 : index
    %98 = vector.load %arg8[%c0_130, %c0_131] : memref<512x1088xbf16, #tpu.memory_space<vmem>>, vector<512x1088xbf16>
    %cst_132 = arith.constant dense<0.000000e+00> : vector<128x1088xf32>
    %99 = tpu.matmul %97, %98, %cst_132 {dimension_numbers = #tpu.dot_dimension_numbers<[1], [0], [0], [1], [0, 0, 1, 1], [], []>} : vector<128x512xbf16>, vector<512x1088xbf16>, vector<128x1088xf32> -> vector<128x1088xf32>
    %c0_133 = arith.constant 0 : index
    %c0_134 = arith.constant 0 : index
    %100 = vector.load %arg9[%c0_133, %c0_134] : memref<1x1088xf32, #tpu.memory_space<vmem>>, vector<1x1088xf32>
    %101 = vector.broadcast %100 : vector<1x1088xf32> to vector<128x1088xf32>
    %102 = arith.addf %99, %101 : vector<128x1088xf32>
    %103 = arith.addf %102, %1 : vector<128x1088xf32>
    %cst_135 = arith.constant 0.000000e+00 : f32
    %104 = vector.broadcast %cst_135 : f32 to vector<128x1088xf32>
    %105 = arith.maximumf %103, %104 : vector<128x1088xf32>
    %106 = vector.shape_cast %105 : vector<128x1088xf32> to vector<2x8x8x1088xf32>
    %c0_136 = arith.constant 0 : index
    %c0_137 = arith.constant 0 : index
    %c0_138 = arith.constant 0 : index
    %c0_139 = arith.constant 0 : index
    %107 = vector.load %arg10[%c0_136, %c0_137, %c0_138, %c0_139] : memref<2x8x8x1088xf32, #tpu.memory_space<vmem>>, vector<2x8x8x1088xf32>
    tpu.vector_store %arg10[%c0_136, %c0_137, %c0_138, %c0_139], %106 {strides = array<i32>} : memref<2x8x8x1088xf32, #tpu.memory_space<vmem>>, vector<2x8x8x1088xf32>,
    return
  }
  func.func @transform_0(%arg0: i32) -> (i32, i32, i32, i32) {
    %c0_i32 = arith.constant 0 : i32
    %c0_i32_0 = arith.constant 0 : i32
    %c0_i32_1 = arith.constant 0 : i32
    %c0_i32_2 = arith.constant 0 : i32
    return %arg0, %c0_i32, %c0_i32_0, %c0_i32_1 : i32, i32, i32, i32
  }
  func.func @transform_1(%arg0: i32) -> (i32, i32) {
    %c0_i32 = arith.constant 0 : i32
    %c0_i32_0 = arith.constant 0 : i32
    %c0_i32_1 = arith.constant 0 : i32
    return %c0_i32, %c0_i32_0 : i32, i32
  }
  func.func @transform_2(%arg0: i32) -> (i32, i32) {
    %c0_i32 = arith.constant 0 : i32
    %c0_i32_0 = arith.constant 0 : i32
    %c0_i32_1 = arith.constant 0 : i32
    return %c0_i32, %c0_i32_0 : i32, i32
  }
  func.func @transform_3(%arg0: i32) -> (i32, i32) {
    %c0_i32 = arith.constant 0 : i32
    %c0_i32_0 = arith.constant 0 : i32
    %c0_i32_1 = arith.constant 0 : i32
    return %c0_i32, %c0_i32_0 : i32, i32
  }
  func.func @transform_4(%arg0: i32) -> (i32, i32) {
    %c0_i32 = arith.constant 0 : i32
    %c0_i32_0 = arith.constant 0 : i32
    %c0_i32_1 = arith.constant 0 : i32
    return %c0_i32, %c0_i32_0 : i32, i32
  }
  func.func @transform_5(%arg0: i32) -> (i32, i32, i32) {
    %c0_i32 = arith.constant 0 : i32
    %c0_i32_0 = arith.constant 0 : i32
    %c0_i32_1 = arith.constant 0 : i32
    %c0_i32_2 = arith.constant 0 : i32
    return %c0_i32, %c0_i32_0, %c0_i32_1 : i32, i32, i32
  }
  func.func @transform_6(%arg0: i32) -> (i32, i32) {
    %c0_i32 = arith.constant 0 : i32
    %c0_i32_0 = arith.constant 0 : i32
    %c0_i32_1 = arith.constant 0 : i32
    return %c0_i32, %c0_i32_0 : i32, i32
  }
  func.func @transform_7(%arg0: i32) -> (i32, i32) {
    %c0_i32 = arith.constant 0 : i32
    %c0_i32_0 = arith.constant 0 : i32
    %c0_i32_1 = arith.constant 0 : i32
    return %c0_i32, %c0_i32_0 : i32, i32
  }
  func.func @transform_8(%arg0: i32) -> (i32, i32) {
    %c0_i32 = arith.constant 0 : i32
    %c0_i32_0 = arith.constant 0 : i32
    %c0_i32_1 = arith.constant 0 : i32
    return %c0_i32, %c0_i32_0 : i32, i32
  }
  func.func @transform_9(%arg0: i32) -> (i32, i32, i32, i32) {
    %c0_i32 = arith.constant 0 : i32
    %c0_i32_0 = arith.constant 0 : i32
    %c0_i32_1 = arith.constant 0 : i32
    %c0_i32_2 = arith.constant 0 : i32
    return %arg0, %c0_i32, %c0_i32_0, %c0_i32_1 : i32, i32, i32, i32
  }
}

</mosaic_0001>

<bundles_post_ra>
// kernel: tpu_custom_call.1
= control target key start
LH: loop header
LB: loop body
LE: loop exit
PB: predicated region body
PF: predicated region fallthrough
CT: control target
= control target key end

     0   :  { %14 = vsyncpa [#allocation6], 0  ;;  %s22088_s0 = inlined_call_operand.hbm [shape: f32[2,8,8,1088], index: 0, kind: input, shape index: {}]   ;;  %s22089_s1 = inlined_call_operand.vmem [shape: bf16[1088,384], index: 1, kind: input, shape index: {}]   ;;  %s22090_s2 = inlined_call_operand.vmem [shape: f32[1,384], index: 2, kind: input, shape index: {}]   ;;  %s22091_s3 = inlined_call_operand.vmem [shape: bf16[896,256], index: 3, kind: input, shape index: {}]   ;;  %s22092_s4 = inlined_call_operand.vmem [shape: f32[1,256], index: 4, kind: input, shape index: {}]   ;;  %s22093_s5 = inlined_call_operand.vmem [shape: bf16[7,256,256], index: 5, kind: input, shape index: {}]   ;;  %s22094_s6 = inlined_call_operand.vmem [shape: f32[1,256], index: 6, kind: input, shape index: {}]   ;;  %s22095_s7 = inlined_call_operand.vmem [shape: bf16[512,1088], index: 7, kind: input, shape index: {}]   ;;  %s22096_s8 = inlined_call_operand.vmem [shape: f32[1,1088], index: 8, kind: input, shape index: {}]   ;;  %s22097_s9 = inlined_call_operand.hbm [shape: f32[2,8,8,1088], index: 9, kind: output, shape index: {}]  }
   0x1   :  { %15 = vsyncpa [#allocation7], 0  ;;  %s16068_s30 = smov [#allocation5]  }
   0x2   :  { %s21_s10 = sshll.u32 %s16068_s30, 4  ;;  %s22_s10 = int_to_ptr.vmem [resolvable:$true] %s21_s10 }
   0x3   :  { %s16032_s11 = scalar_lea.vmem %s22_s10, 18432  ;;  %p16037_p1 = scmp.lt.s32.totalorder %s22_s10, %s22_s10 }
   0x4   :  { %p16033_p0 = scmp.ne.s32.totalorder %s22_s10, %s16032_s11  ;;  %p16038_p2 = scmp.lt.s32.totalorder %s16032_s11, %s16032_s11 }
   0x6   :  { %p16039_p3 = por %p16038_p2, %p16037_p1 }
   0x8   :  { %p16040_p4 = pnand %p16039_p3, %p16033_p0 }
   0xa   :  { %16043 = shalt.err (!%p16040_p4)
}
   0xb   :  { %s16069_s12 = smov 1152   ;;  %s16070_s13 = smov 72  }
   0xc   :  { %27 = dma.hbm_to_vmem [thread:$0]  %s22088_s0, 18432, %s22_s10, [#allocation6], %s16069_s12, %s16069_s12, %s16070_s13  }
   0xd   :  { %16064 = dma.done.wait [#allocation6], 18432  }
   0xe   :  { %16065 = vsyncadd [#allocation6], 4294948864  ;;  %v14606_v0 = vld [vmem:[%s22089_s1 + $0xac] ss:$12 sps:$4 sm:$0xff]   ;;  %v14610_v2 = vld [vmem:[%s22089_s1 + $0xa8] ss:$12 sps:$4 sm:$0xff]  }
   0xf   :  { %v14608_v1 = vld [vmem:[%s22089_s1 + $0x22c] ss:$12 sps:$4 sm:$0xff]   ;;  %1666 = vmatprep.subr.bf16.mxu0 %v14606_v0  ;;  %v14611_v3 = vld [vmem:[%s22089_s1 + $0x228] ss:$12 sps:$4 sm:$0xff]   ;;  %v14616_v6 = vld [vmem:[%s22089_s1 + $0x90] ss:$12 sps:$4 sm:$0xff]  }
  0x10   :  { %1779 = vmatprep.subr.bf16.mxu1 %v14608_v1  ;;  %v14612_v4 = vld [vmem:[%s22089_s1 + $0x94] ss:$12 sps:$4 sm:$0xff]   ;;  %1667 = vmatpush1.bf16.msra.mxu0 %v14610_v2  ;;  %v14617_v7 = vld [vmem:[%s22089_s1 + $0x210] ss:$12 sps:$4 sm:$0xff]   ;;  %v14622_v10 = vld [vmem:[%s22089_s1 + $0x78] ss:$12 sps:$4 sm:$0xff]  }
  0x11   :  { %1780 = vmatpush1.bf16.msra.mxu1 %v14611_v3  ;;  %v14614_v5 = vld [vmem:[%s22089_s1 + $0x214] ss:$12 sps:$4 sm:$0xff]   ;;  %1668 = vmatprep.subr.bf16.mxu0 %v14612_v4  ;;  %v14618_v8 = vld [vmem:[%s22089_s1 + $0x7c] ss:$12 sps:$4 sm:$0xff]   ;;  %v14623_v11 = vld [vmem:[%s22089_s1 + $0x1f8] ss:$12 sps:$4 sm:$0xff]  }
  0x12   :  { %1781 = vmatprep.subr.bf16.mxu1 %v14614_v5  ;;  %v14620_v9 = vld [vmem:[%s22089_s1 + $0x1fc] ss:$12 sps:$4 sm:$0xff]   ;;  %v14624_v12 = vld [vmem:[%s22089_s1 + $0x64] ss:$12 sps:$4 sm:$0xff]   ;;  %v14628_v14 = vld [vmem:[%s22089_s1 + $0x60] ss:$12 sps:$4 sm:$0xff]  }
  0x13   :  { %v14626_v13 = vld [vmem:[%s22089_s1 + $0x1e4] ss:$12 sps:$4 sm:$0xff]   ;;  %v14629_v15 = vld [vmem:[%s22089_s1 + $0x1e0] ss:$12 sps:$4 sm:$0xff]   ;;  %v14634_v18 = vld [vmem:[%s22089_s1 + $0x48] ss:$12 sps:$4 sm:$0xff]  }
  0x14   :  { %1669 = vmatpush1.bf16.msra.mxu0 %v14616_v6  ;;  %v14630_v16 = vld [vmem:[%s22089_s1 + $0x4c] ss:$12 sps:$4 sm:$0xff]   ;;  %v14635_v19 = vld [vmem:[%s22089_s1 + $0x1c8] ss:$12 sps:$4 sm:$0xff]   ;;  %v14640_v22 = vld [vmem:[%s22089_s1 + $0x30] ss:$12 sps:$4 sm:$0xff]  }
  0x15   :  { %1782 = vmatpush1.bf16.msra.mxu1 %v14617_v7  ;;  %1670 = vmatprep.subr.bf16.mxu0 %v14618_v8  ;;  %v14632_v17 = vld [vmem:[%s22089_s1 + $0x1cc] ss:$12 sps:$4 sm:$0xff]   ;;  %v14636_v20 = vld [vmem:[%s22089_s1 + $0x34] ss:$12 sps:$4 sm:$0xff]   ;;  %v14641_v23 = vld [vmem:[%s22089_s1 + $0x1b0] ss:$12 sps:$4 sm:$0xff]  }
  0x16   :  { %1783 = vmatprep.subr.bf16.mxu1 %v14620_v9  ;;  %v14638_v21 = vld [vmem:[%s22089_s1 + $0x1b4] ss:$12 sps:$4 sm:$0xff]   ;;  %v14642_v24 = vld [vmem:[%s22089_s1 + $0x1c] ss:$12 sps:$4 sm:$0xff]   ;;  %v14646_v26 = vld [vmem:[%s22089_s1 + $0x18] ss:$12 sps:$4 sm:$0xff]  }
  0x17   :  { %v14644_v25 = vld [vmem:[%s22089_s1 + $0x19c] ss:$12 sps:$4 sm:$0xff]   ;;  %v14647_v27 = vld [vmem:[%s22089_s1 + $0x198] ss:$12 sps:$4 sm:$0xff]   ;;  %v14652_v30 = vld [vmem:[%s22089_s1] ss:$12 sps:$4 sm:$0xff]  }
  0x18   :  { %1671 = vmatpush1.bf16.msra.mxu0 %v14622_v10  ;;  %v14648_v28 = vld [vmem:[%s22089_s1 + $0x4] ss:$12 sps:$4 sm:$0xff]   ;;  %v14653_v31 = vld [vmem:[%s22089_s1 + $0x180] ss:$12 sps:$4 sm:$0xff]   ;;  %v14658_v34 = vld [vmem:[%s22089_s1 + $0x168] ss:$12 sps:$4 sm:$0xff]  }
  0x19   :  { %1784 = vmatpush1.bf16.msra.mxu1 %v14623_v11  ;;  %1672 = vmatprep.subr.bf16.mxu0 %v14624_v12  ;;  %v14650_v29 = vld [vmem:[%s22089_s1 + $0x184] ss:$12 sps:$4 sm:$0xff]   ;;  %v14654_v32 = vld [vmem:[%s22089_s1 + $0x16c] ss:$12 sps:$4 sm:$0xff]   ;;  %v14659_v35 = vld [vmem:[%s22089_s1 + $0x2e8] ss:$12 sps:$4 sm:$0xff]  }
  0x1a   :  { %1785 = vmatprep.subr.bf16.mxu1 %v14626_v13  ;;  %v14656_v33 = vld [vmem:[%s22089_s1 + $0x2ec] ss:$12 sps:$4 sm:$0xff]   ;;  %v14660_v36 = vld [vmem:[%s22089_s1 + $0x154] ss:$12 sps:$4 sm:$0xff]   ;;  %v14664_v38 = vld [vmem:[%s22089_s1 + $0x150] ss:$12 sps:$4 sm:$0xff]  }
  0x1b   :  { %v14662_v37 = vld [vmem:[%s22089_s1 + $0x2d4] ss:$12 sps:$4 sm:$0xff]   ;;  %v14665_v39 = vld [vmem:[%s22089_s1 + $0x2d0] ss:$12 sps:$4 sm:$0xff]   ;;  %v14670_v42 = vld [vmem:[%s22089_s1 + $0x138] ss:$12 sps:$4 sm:$0xff]  }
  0x1c   :  { %1673 = vmatpush1.bf16.msra.mxu0 %v14628_v14  ;;  %v14666_v40 = vld [vmem:[%s22089_s1 + $0x13c] ss:$12 sps:$4 sm:$0xff]   ;;  %v14671_v43 = vld [vmem:[%s22089_s1 + $0x2b8] ss:$12 sps:$4 sm:$0xff]   ;;  %v58_v47 = vld [vmem:[#allocation5 + $0x50] sm:$0xff]  ;;  %vm1641_vm0 = vcmask 523264  }
  0x1d   :  { %1786 = vmatpush1.bf16.msra.mxu1 %v14629_v15  ;;  %1674 = vmatprep.subr.bf16.mxu0 %v14630_v16  ;;  %v14668_v41 = vld [vmem:[%s22089_s1 + $0x2bc] ss:$12 sps:$4 sm:$0xff]   ;;  %v14672_v44 = vld [vmem:[%s22089_s1 + $0x124] ss:$12 sps:$4 sm:$0xff]   ;;  %v14676_v50 = vld [vmem:[%s22089_s1 + $0x120] ss:$12 sps:$4 sm:$0xff]  }
  0x1e   :  { %1787 = vmatprep.subr.bf16.mxu1 %v14632_v17  ;;  %v14674_v45 = vld [vmem:[%s22089_s1 + $0x2a4] ss:$12 sps:$4 sm:$0xff]   ;;  %v49_v46 = vld [vmem:[#allocation5 + $0x8] sm:$0xff]  ;;  %v51_v48 = vld [vmem:[#allocation5 + $0x18] sm:$0xff]  ;;  %vm2788_vm1 = vcmask 1041408   ;;  %vm2839_vm4 = vcmask 1042433  }
  0x1f   :  { %v60_v49 = vld [vmem:[#allocation5 + $0x60] sm:$0xff]  ;;  %v14678_v52 = vld [vmem:[%s22089_s1 + $0x10c] ss:$12 sps:$4 sm:$0xff]   ;;  %v16276_v53 = vpack.c.bf16 %v58_v47, %v49_v46  ;;  %v14682_v56 = vld [vmem:[%s22089_s1 + $0x108] ss:$12 sps:$4 sm:$0xff]   ;;  %vm3106_vm7 = vcmask 1043457  }
  0x20   :  { %1675 = vmatpush1.bf16.msra.mxu0 %v14634_v18  ;;  %v14677_v51 = vld [vmem:[%s22089_s1 + $0x2a0] ss:$12 sps:$4 sm:$0xff]   ;;  %v16278_v54 = vpack.c.bf16 %v60_v49, %v51_v48  ;;  %v14683_v57 = vld [vmem:[%s22089_s1 + $0x288] ss:$12 sps:$4 sm:$0xff]   ;;  %v14688_v60 = vld [vmem:[%s22089_s1 + $0xf0] ss:$12 sps:$4 sm:$0xff]  }
  0x21   :  { %1788 = vmatpush1.bf16.msra.mxu1 %v14635_v19  ;;  %1676 = vmatprep.subr.bf16.mxu0 %v14636_v20  ;;  %v14680_v55 = vld [vmem:[%s22089_s1 + $0x28c] ss:$12 sps:$4 sm:$0xff]   ;;  %v14684_v58 = vld [vmem:[%s22089_s1 + $0xf4] ss:$12 sps:$4 sm:$0xff]   ;;  %v14689_v61 = vld [vmem:[%s22089_s1 + $0x270] ss:$12 sps:$4 sm:$0xff]  }
  0x22   :  { %1789 = vmatprep.subr.bf16.mxu1 %v14638_v21  ;;  %1698 = vmatprep.mubr.bf16.mxu0 %v16276_v53  ;;  %v14686_v59 = vld [vmem:[%s22089_s1 + $0x274] ss:$12 sps:$4 sm:$0xff]   ;;  %v14690_v62 = vld [vmem:[%s22089_s1 + $0xdc] ss:$12 sps:$4 sm:$0xff]   ;;  %v14694_v0 = vld [vmem:[%s22089_s1 + $0xd8] ss:$12 sps:$4 sm:$0xff]  }
  0x23   :  { %1811 = vmatprep.mubr.bf16.mxu1 %v16278_v54  ;;  %v14692_v63 = vld [vmem:[%s22089_s1 + $0x25c] ss:$12 sps:$4 sm:$0xff]   ;;  %v14695_v1 = vld [vmem:[%s22089_s1 + $0x258] ss:$12 sps:$4 sm:$0xff]   ;;  %v14700_v4 = vld [vmem:[%s22089_s1 + $0xc0] ss:$12 sps:$4 sm:$0xff]  }
  0x24   :  { %1677 = vmatpush1.bf16.msra.mxu0 %v14640_v22  ;;  %v14696_v2 = vld [vmem:[%s22089_s1 + $0xc4] ss:$12 sps:$4 sm:$0xff]   ;;  %v14701_v5 = vld [vmem:[%s22089_s1 + $0x240] ss:$12 sps:$4 sm:$0xff]   ;;  %v59_v9 = vld [vmem:[#allocation5 + $0x58] sm:$0xff]  ;;  %vm3591_vm9 = vcmask 1042432  }
  0x25   :  { %1790 = vmatpush1.bf16.msra.mxu1 %v14641_v23  ;;  %1678 = vmatprep.subr.bf16.mxu0 %v14642_v24  ;;  %v14698_v3 = vld [vmem:[%s22089_s1 + $0x244] ss:$12 sps:$4 sm:$0xff]   ;;  %v57_v7 = vld [vmem:[#allocation5 + $0x48] sm:$0xff]  ;;  %v67_v14 = vld [vmem:[#allocation5 + $0x98] sm:$0xff]  ;;  %vm2789_vm2 = vsmask.f32 1280 }
  0x26   :  { %1791 = vmatprep.subr.bf16.mxu1 %v14644_v25  ;;  %v48_v6 = vld [vmem:[#allocation5] sm:$0xff]  ;;  %v50_v8 = vld [vmem:[#allocation5 + $0x10] sm:$0xff]  ;;  %v14704_v10 = vld [vmem:[%s22089_s1 + $0x3ac] ss:$12 sps:$4 sm:$0xff]   ;;  %vm2840_vm5 = vsmask.f32 7942 }
  0x27   :  { %v14707_v11 = vld [vmem:[%s22089_s1 + $0x52c] ss:$12 sps:$4 sm:$0xff]   ;;  %v14702_v12 = vld [vmem:[%s22089_s1 + $0x3a8] ss:$12 sps:$4 sm:$0xff]   ;;  %v76_v15 = vld [vmem:[#allocation5 + $0xe0] sm:$0xff]  ;;  %v16339_v16 = vpack.c.bf16 %v57_v7, %v48_v6  ;;  %v16341_v17 = vpack.c.bf16 %v59_v9, %v50_v8  ;;  %vm3592_vm10 = vcmask 1046532  }
  0x28   :  { %1679 = vmatpush1.bf16.msra.mxu0 %v14646_v26  ;;  %v14705_v13 = vld [vmem:[%s22089_s1 + $0x528] ss:$12 sps:$4 sm:$0xff]   ;;  %v14708_v22 = vld [vmem:[%s22089_s1 + $0x390] ss:$12 sps:$4 sm:$0xff]   ;;  %v16352_v23 = vpack.c.bf16 %v76_v15, %v67_v14  ;;  %v84_v46 = vld [vmem:[#allocation5 + $0x120] sm:$0xff] }
  0x29   :  { %1792 = vmatpush1.bf16.msra.mxu1 %v14647_v27  ;;  %1680 = vmatprep.subr.bf16.mxu0 %v14648_v28  ;;  %v69_v18 = vld [vmem:[#allocation5 + $0xa8] sm:$0xff]  ;;  %v78_v19 = vld [vmem:[#allocation5 + $0xf0] sm:$0xff]  ;;  %v75_v27 = vld [vmem:[#allocation5 + $0xd8] sm:$0xff]  ;;  %vm3268_vm11 = vsmask.f32 3328 }
  0x2a   :  { %1793 = vmatprep.subr.bf16.mxu1 %v14650_v29  ;;  %v14710_v20 = vld [vmem:[%s22089_s1 + $0x394] ss:$12 sps:$4 sm:$0xff]   ;;  %v16354_v24 = vpack.c.bf16 %v78_v19, %v69_v18  ;;  %v14711_v25 = vld [vmem:[%s22089_s1 + $0x510] ss:$12 sps:$4 sm:$0xff]   ;;  %v77_v29 = vld [vmem:[#allocation5 + $0xe8] sm:$0xff] }
  0x2b   :  { %v14713_v21 = vld [vmem:[%s22089_s1 + $0x514] ss:$12 sps:$4 sm:$0xff]   ;;  %v93_v47 = vld [vmem:[#allocation5 + $0x168] sm:$0xff]  ;;  %v95_v49 = vld [vmem:[#allocation5 + $0x178] sm:$0xff]  ;;  %vm3269_vm12 = vsmask.f32 7440 }
  0x2c   :  { %1681 = vmatpush1.bf16.msra.mxu0 %v14652_v30  ;;  %v66_v26 = vld [vmem:[#allocation5 + $0x90] sm:$0xff]  ;;  %v68_v28 = vld [vmem:[#allocation5 + $0xa0] sm:$0xff]  ;;  %v14716_v30 = vld [vmem:[%s22089_s1 + $0x37c] ss:$12 sps:$4 sm:$0xff]   ;;  %vm3722_vm13 = vsmask.f32 2304 }
  0x2d   :  { %1794 = vmatpush1.bf16.msra.mxu1 %v14653_v31  ;;  %1682 = vmatprep.subr.bf16.mxu0 %v14654_v32  ;;  %v14719_v31 = vld [vmem:[%s22089_s1 + $0x4fc] ss:$12 sps:$4 sm:$0xff]   ;;  %v14714_v32 = vld [vmem:[%s22089_s1 + $0x378] ss:$12 sps:$4 sm:$0xff]   ;;  %v86_v48 = vld [vmem:[#allocation5 + $0x130] sm:$0xff] }
  0x2e   :  { %1795 = vmatprep.subr.bf16.mxu1 %v14656_v33  ;;  %v14717_v33 = vld [vmem:[%s22089_s1 + $0x4f8] ss:$12 sps:$4 sm:$0xff]   ;;  %v113_v7 = vld [vmem:[#allocation5 + $0x208] sm:$0xff]  ;;  %vm17015_vm3 = vmand %vm2788_vm1, %vm2789_vm2  ;;  %vm3723_vm14 = vsmask.f32 6416 }
  0x2f   :  { %v104_v6 = vld [vmem:[#allocation5 + $0x1c0] sm:$0xff]  ;;  %v14740_v8 = vld [vmem:[%s22089_s1 + $0x31c] ss:$12 sps:$4 sm:$0xff]   ;;  %vm17022_vm6 = vmand %vm2839_vm4, %vm2840_vm5 }
  0x30   :  { %1683 = vmatpush2.bf16.msra.mxu0 %v14658_v34  ;;  %v85_v34 = vld [vmem:[#allocation5 + $0x128] sm:$0xff]  ;;  %v16449_v15 = vpack.c.bf16 %v113_v7, %v104_v6  ;;  %v123_v18 = vld [vmem:[#allocation5 + $0x258] sm:$0xff]  ;;  %v132_v19 = vld [vmem:[#allocation5 + $0x2a0] sm:$0xff] }
  0x31   :  { %1796 = vmatpush2.bf16.msra.mxu1 %v14659_v35  ;;  %1684 = vmatprep.subr.bf16.mxu0 %v14660_v36  ;;  %v94_v35 = vld [vmem:[#allocation5 + $0x170] sm:$0xff]  ;;  %v16375_v36 = vpack.c.bf16 %v75_v27, %v66_v26  ;;  %v14743_v9 = vld [vmem:[%s22089_s1 + $0x49c] ss:$12 sps:$4 sm:$0xff]   ;;  %v16462_v26 = vpack.c.bf16 %v132_v19, %v123_v18  ;;  %v14747_v27 = vld [vmem:[%s22089_s1 + $0x480] ss:$12 sps:$4 sm:$0xff]  }
  0x32   :  { %1797 = vmatprep.subr.bf16.mxu1 %v14662_v37  ;;  %v16377_v37 = vpack.c.bf16 %v77_v29, %v68_v28  ;;  %v120_v28 = vld [vmem:[#allocation5 + $0x240] sm:$0xff]  ;;  %v129_v29 = vld [vmem:[#allocation5 + $0x288] sm:$0xff]  ;;  %v159_v6 = vld [vmem:[#allocation5 + $0x378] sm:$0xff] }
  0x33   :  { %v168_v7 = vld [vmem:[#allocation5 + $0x3c0] sm:$0xff]  ;;  %v165_v19 = vld [vmem:[#allocation5 + $0x3a8] sm:$0xff]  ;;  %vm17572_vm8 = vmand %vm3106_vm7, %vm2840_vm5  ;;  %vm4109_vm5 = vcmask 1045508   ;;  %vm4239_vm7 = vsmask.f32 5392 }
  0x34   :  { %1685 = vmatpush2.bf16.msra.mxu0 %v14664_v38  ;;  %v87_v38 = vld [vmem:[#allocation5 + $0x138] sm:$0xff]  ;;  %v156_v18 = vld [vmem:[#allocation5 + $0x360] sm:$0xff]  ;;  %vm17871_vm15 = vmor %vm3591_vm9, %vm3592_vm10  ;;  %vm4626_vm9 = vcmask 1044484  }
  0x35   :  { %1798 = vmatpush2.bf16.msra.mxu1 %v14665_v39  ;;  %1686 = vmatprep.subr.bf16.mxu0 %v14666_v40  ;;  %v96_v39 = vld [vmem:[#allocation5 + $0x180] sm:$0xff]  ;;  %vm17909_vm4 = vmor %vm3722_vm13, %vm3723_vm14 }
  0x36   :  { %1799 = vmatprep.subr.bf16.mxu1 %v14668_v41  ;;  %v14722_v40 = vld [vmem:[%s22089_s1 + $0x364] ss:$12 sps:$4 sm:$0xff]  }
  0x37   :  { %v14725_v41 = vld [vmem:[%s22089_s1 + $0x4e4] ss:$12 sps:$4 sm:$0xff]  }
  0x38   :  { %1687 = vmatpush2.bf16.msra.mxu0 %v14670_v42  ;;  %v14720_v42 = vld [vmem:[%s22089_s1 + $0x360] ss:$12 sps:$4 sm:$0xff]  }
  0x39   :  { %1800 = vmatpush2.bf16.msra.mxu1 %v14671_v43  ;;  %1688 = vmatprep.subr.bf16.mxu0 %v14672_v44  ;;  %v16388_v43 = vpack.c.bf16 %v94_v35, %v85_v34  ;;  %v16390_v44 = vpack.c.bf16 %v96_v39, %v87_v38  ;;  %v14750_v34 = vld [vmem:[%s22089_s1 + $0x468] ss:$12 sps:$4 sm:$0xff]   ;;  %v139_v38 = vld [vmem:[#allocation5 + $0x2d8] sm:$0xff]  ;;  %v148_v39 = vld [vmem:[#allocation5 + $0x320] sm:$0xff] }
  0x3a   :  { %1801 = vmatprep.subr.bf16.mxu1 %v14674_v45  ;;  %v14723_v45 = vld [vmem:[%s22089_s1 + $0x4e0] ss:$12 sps:$4 sm:$0xff]   ;;  %v14753_v35 = vld [vmem:[%s22089_s1 + $0x5e8] ss:$12 sps:$4 sm:$0xff]  }
  0x3c   :  { %1689 = vmatpush2.bf16.msra.mxu0 %v14676_v50  ;;  %v14728_v50 = vld [vmem:[%s22089_s1 + $0x34c] ss:$12 sps:$4 sm:$0xff]  }
  0x3d   :  { %1802 = vmatpush2.bf16.msra.mxu1 %v14677_v51  ;;  %1690 = vmatprep.subr.bf16.mxu0 %v14678_v52  ;;  %v14731_v51 = vld [vmem:[%s22089_s1 + $0x4cc] ss:$12 sps:$4 sm:$0xff]   ;;  %v14726_v52 = vld [vmem:[%s22089_s1 + $0x348] ss:$12 sps:$4 sm:$0xff]  }
  0x3e   :  { %1803 = vmatprep.subr.bf16.mxu1 %v14680_v55  ;;  %v14729_v55 = vld [vmem:[%s22089_s1 + $0x4c8] ss:$12 sps:$4 sm:$0xff]  }
  0x40   :  { %1691 = vmatpush2.bf16.msra.mxu0 %v14682_v56  ;;  %v103_v56 = vld [vmem:[#allocation5 + $0x1b8] sm:$0xff] }
  0x41   :  { %1804 = vmatpush2.bf16.msra.mxu1 %v14683_v57  ;;  %1692 = vmatprep.subr.bf16.mxu0 %v14684_v58  ;;  %v112_v57 = vld [vmem:[#allocation5 + $0x200] sm:$0xff]  ;;  %v16411_v58 = vpack.c.bf16 %v93_v47, %v84_v46 }
  0x42   :  { %1805 = vmatprep.subr.bf16.mxu1 %v14686_v59  ;;  %v16413_v59 = vpack.c.bf16 %v95_v49, %v86_v48  ;;  %v14758_v46 = vld [vmem:[%s22089_s1 + $0x454] ss:$12 sps:$4 sm:$0xff]   ;;  %v14756_v48 = vld [vmem:[%s22089_s1 + $0x450] ss:$12 sps:$4 sm:$0xff]   ;;  %v16496_v49 = vpack.c.bf16 %v148_v39, %v139_v38 }
  0x43   :  { %v14761_v47 = vld [vmem:[%s22089_s1 + $0x5d4] ss:$12 sps:$4 sm:$0xff]  }
  0x44   :  { %1693 = vmatpush2.bf16.msra.mxu0 %v14688_v60  ;;  %v105_v60 = vld [vmem:[#allocation5 + $0x1c8] sm:$0xff]  ;;  %v14782_v38 = vld [vmem:[%s22089_s1 + $0x3f4] ss:$12 sps:$4 sm:$0xff]  }
  0x45   :  { %1806 = vmatpush2.bf16.msra.mxu1 %v14689_v61  ;;  %1694 = vmatprep.subr.bf16.mxu0 %v14690_v62  ;;  %v114_v61 = vld [vmem:[#allocation5 + $0x210] sm:$0xff] }
  0x46   :  { %1807 = vmatprep.subr.bf16.mxu1 %v14692_v63  ;;  %v14734_v62 = vld [vmem:[%s22089_s1 + $0x334] ss:$12 sps:$4 sm:$0xff]  }
  0x47   :  { %v14737_v63 = vld [vmem:[%s22089_s1 + $0x4b4] ss:$12 sps:$4 sm:$0xff]  }
  0x48   :  { %1695 = vmatpush2.bf16.msra.mxu0 %v14694_v0  ;;  %v14732_v0 = vld [vmem:[%s22089_s1 + $0x330] ss:$12 sps:$4 sm:$0xff]   ;;  %v14785_v39 = vld [vmem:[%s22089_s1 + $0x574] ss:$12 sps:$4 sm:$0xff]  }
  0x49   :  { %1808 = vmatpush2.bf16.msra.mxu1 %v14695_v1  ;;  %1696 = vmatprep.subr.bf16.mxu0 %v14696_v2  ;;  %v16424_v1 = vpack.c.bf16 %v112_v57, %v103_v56  ;;  %v16426_v2 = vpack.c.bf16 %v114_v61, %v105_v60  ;;  %v140_v56 = vld [vmem:[#allocation5 + $0x2e0] sm:$0xff]  ;;  %v149_v57 = vld [vmem:[#allocation5 + $0x328] sm:$0xff] }
  0x4a   :  { %1809 = vmatprep.subr.bf16.mxu1 %v14698_v3  ;;  %v14735_v3 = vld [vmem:[%s22089_s1 + $0x4b0] ss:$12 sps:$4 sm:$0xff]  }
  0x4b   :  { %v14764_v60 = vld [vmem:[%s22089_s1 + $0x43c] ss:$12 sps:$4 sm:$0xff]  }
  0x4c   :  { %1697 = vmatpush2.bf16.msra.mxu0 %v14700_v4  ;;  %v102_v4 = vld [vmem:[#allocation5 + $0x1b0] sm:$0xff]  ;;  %v14767_v61 = vld [vmem:[%s22089_s1 + $0x5bc] ss:$12 sps:$4 sm:$0xff]  }
  0x4d   :  { %1810 = vmatpush2.bf16.msra.mxu1 %v14701_v5  ;;  %1892 = vmatprep.subr.bf16.mxu0 %v14704_v10  ;;  %v111_v5 = vld [vmem:[#allocation5 + $0x1f8] sm:$0xff] }
  0x4e   :  { %2005 = vmatprep.subr.bf16.mxu1 %v14707_v11  ;;  %v14738_v10 = vld [vmem:[%s22089_s1 + $0x318] ss:$12 sps:$4 sm:$0xff]   ;;  %v16447_v14 = vpack.c.bf16 %v111_v5, %v102_v4  ;;  %v16521_v5 = vpack.c.bf16 %v149_v57, %v140_v56  ;;  %v14788_v56 = vld [vmem:[%s22089_s1 + $0x3dc] ss:$12 sps:$4 sm:$0xff]  }
  0x4f   :  { %1699 = vmatmul.mubr.bf16.vlgmr.msra.gmra.mxu0 %v16339_v16  ;;  %v14741_v11 = vld [vmem:[%s22089_s1 + $0x498] ss:$12 sps:$4 sm:$0xff]   ;;  %v14791_v57 = vld [vmem:[%s22089_s1 + $0x55c] ss:$12 sps:$4 sm:$0xff]  }
  0x50   :  { %1812 = vmatmul.mubr.bf16.vlgmr.msra.gmra.mxu1 %v16341_v17  ;;  %1893 = vmatpush1.bf16.msra.mxu0 %v14702_v12  ;;  %v121_v12 = vld [vmem:[#allocation5 + $0x248] sm:$0xff] }
  0x51   :  { %2006 = vmatpush1.bf16.msra.mxu1 %v14705_v13  ;;  %1894 = vmatprep.subr.bf16.mxu0 %v14710_v20  ;;  %v130_v13 = vld [vmem:[#allocation5 + $0x290] sm:$0xff] }
  0x52   :  { %2007 = vmatprep.subr.bf16.mxu1 %v14713_v21  ;;  %1708 = vmatprep.mubr.bf16.mxu0 %v16352_v23  ;;  %v14746_v20 = vld [vmem:[%s22089_s1 + $0x304] ss:$12 sps:$4 sm:$0xff]  }
  0x53   :  { %1821 = vmatprep.mubr.bf16.mxu1 %v16354_v24  ;;  %v14749_v21 = vld [vmem:[%s22089_s1 + $0x484] ss:$12 sps:$4 sm:$0xff]  }
  0x54   :  { %1895 = vmatpush1.bf16.msra.mxu0 %v14708_v22  ;;  %v14744_v22 = vld [vmem:[%s22089_s1 + $0x300] ss:$12 sps:$4 sm:$0xff]  }
  0x55   :  { %2008 = vmatpush1.bf16.msra.mxu1 %v14711_v25  ;;  %1896 = vmatprep.subr.bf16.mxu0 %v14716_v30  ;;  %v16460_v25 = vpack.c.bf16 %v130_v13, %v121_v12  ;;  %v122_v30 = vld [vmem:[#allocation5 + $0x250] sm:$0xff]  ;;  %v16534_v12 = vpack.c.bf16 %v168_v7, %v159_v6  ;;  %v14771_v13 = vld [vmem:[%s22089_s1 + $0x5a0] ss:$12 sps:$4 sm:$0xff]   ;;  %v14786_v6 = vld [vmem:[%s22089_s1 + $0x3d8] ss:$12 sps:$4 sm:$0xff]  }
  0x56   :  { %2009 = vmatprep.subr.bf16.mxu1 %v14719_v31  ;;  %v131_v31 = vld [vmem:[#allocation5 + $0x298] sm:$0xff] }
  0x57   :  { %1709 = vmatmul.mubr.bf16.gmra.mxu0 %v16375_v36  ;;  %v14789_v7 = vld [vmem:[%s22089_s1 + $0x558] ss:$12 sps:$4 sm:$0xff]  }
  0x58   :  { %1822 = vmatmul.mubr.bf16.gmra.mxu1 %v16377_v37  ;;  %1897 = vmatpush1.bf16.msra.mxu0 %v14714_v32  ;;  %v14752_v32 = vld [vmem:[%s22089_s1 + $0x46c] ss:$12 sps:$4 sm:$0xff]  }
  0x59   :  { %2010 = vmatpush1.bf16.msra.mxu1 %v14717_v33  ;;  %1898 = vmatprep.subr.bf16.mxu0 %v14722_v40  ;;  %v14755_v33 = vld [vmem:[%s22089_s1 + $0x5ec] ss:$12 sps:$4 sm:$0xff]   ;;  %v16483_v40 = vpack.c.bf16 %v129_v29, %v120_v28  ;;  %v16549_v29 = vpack.c.bf16 %v165_v19, %v156_v18 }
  0x5a   :  { %2011 = vmatprep.subr.bf16.mxu1 %v14725_v41  ;;  %1718 = vmatprep.mubr.bf16.mxu0 %v16388_v43  ;;  %v16485_v41 = vpack.c.bf16 %v131_v31, %v122_v30  ;;  %v175_v28 = vld [vmem:[#allocation5 + $0x3f8] sm:$0xff]  ;;  %v184_v31 = vld [vmem:[#allocation5 + $0x440] sm:$0xff] }
  0x5b   :  { %1831 = vmatprep.mubr.bf16.mxu1 %v16390_v44  ;;  %v14795_v19 = vld [vmem:[%s22089_s1 + $0x540] ss:$12 sps:$4 sm:$0xff]  }
  0x5c   :  { %1899 = vmatpush1.bf16.msra.mxu0 %v14720_v42  ;;  %v141_v42 = vld [vmem:[#allocation5 + $0x2e8] sm:$0xff] }
  0x5d   :  { %2012 = vmatpush1.bf16.msra.mxu1 %v14723_v45  ;;  %1900 = vmatprep.subr.bf16.mxu0 %v14728_v50  ;;  %v150_v45 = vld [vmem:[#allocation5 + $0x330] sm:$0xff] }
  0x5e   :  { %2013 = vmatprep.subr.bf16.mxu1 %v14731_v51  ;;  %v16498_v50 = vpack.c.bf16 %v150_v45, %v141_v42  ;;  %v14759_v51 = vld [vmem:[%s22089_s1 + $0x5d0] ss:$12 sps:$4 sm:$0xff]  }
  0x5f   :  { %1719 = vmatmul.mubr.bf16.gmra.mxu0 %v16411_v58  ;;  %v14780_v42 = vld [vmem:[%s22089_s1 + $0x3f0] ss:$12 sps:$4 sm:$0xff]  }
  0x60   :  { %1832 = vmatmul.mubr.bf16.gmra.mxu1 %v16413_v59  ;;  %1901 = vmatpush1.bf16.msra.mxu0 %v14726_v52  ;;  %v138_v52 = vld [vmem:[#allocation5 + $0x2d0] sm:$0xff] }
  0x61   :  { %2014 = vmatpush1.bf16.msra.mxu1 %v14729_v55  ;;  %1902 = vmatprep.subr.bf16.mxu0 %v14734_v62  ;;  %v147_v55 = vld [vmem:[#allocation5 + $0x318] sm:$0xff] }
  0x62   :  { %2015 = vmatprep.subr.bf16.mxu1 %v14737_v63  ;;  %1728 = vmatprep.mubr.bf16.mxu0 %v16424_v1  ;;  %v14762_v62 = vld [vmem:[%s22089_s1 + $0x438] ss:$12 sps:$4 sm:$0xff]   ;;  %v16519_v4 = vpack.c.bf16 %v147_v55, %v138_v52  ;;  %v14783_v45 = vld [vmem:[%s22089_s1 + $0x570] ss:$12 sps:$4 sm:$0xff]   ;;  %v185_v55 = vld [vmem:[#allocation5 + $0x448] sm:$0xff] }
  0x63   :  { %1841 = vmatprep.mubr.bf16.mxu1 %v16426_v2  ;;  %v14765_v63 = vld [vmem:[%s22089_s1 + $0x5b8] ss:$12 sps:$4 sm:$0xff]  }
  0x64   :  { %1903 = vmatpush1.bf16.msra.mxu0 %v14732_v0  ;;  %v157_v0 = vld [vmem:[#allocation5 + $0x368] sm:$0xff]  ;;  %v176_v52 = vld [vmem:[#allocation5 + $0x400] sm:$0xff] }
  0x65   :  { %2016 = vmatpush1.bf16.msra.mxu1 %v14735_v3  ;;  %1904 = vmatprep.subr.bf16.mxu0 %v14740_v8  ;;  %v166_v3 = vld [vmem:[#allocation5 + $0x3b0] sm:$0xff] }
  0x66   :  { %2017 = vmatprep.subr.bf16.mxu1 %v14743_v9  ;;  %v14770_v8 = vld [vmem:[%s22089_s1 + $0x424] ss:$12 sps:$4 sm:$0xff]  }
  0x67   :  { %1729 = vmatmul.mubr.bf16.gmra.mxu0 %v16447_v14  ;;  %v14773_v9 = vld [vmem:[%s22089_s1 + $0x5a4] ss:$12 sps:$4 sm:$0xff]  }
  0x68   :  { %1842 = vmatmul.mubr.bf16.gmra.mxu1 %v16449_v15  ;;  %1905 = vmatpush1.bf16.msra.mxu0 %v14738_v10  ;;  %v14768_v10 = vld [vmem:[%s22089_s1 + $0x420] ss:$12 sps:$4 sm:$0xff]  }
  0x69   :  { %2018 = vmatpush1.bf16.msra.mxu1 %v14741_v11  ;;  %1906 = vmatprep.subr.bf16.mxu0 %v14746_v20  ;;  %v16532_v11 = vpack.c.bf16 %v166_v3, %v157_v0  ;;  %v158_v20 = vld [vmem:[#allocation5 + $0x370] sm:$0xff]  ;;  %v55_v0 = vld [vmem:[#allocation5 + $0x38] sm:$0xff]  ;;  %v64_v3 = vld [vmem:[#allocation5 + $0x80] sm:$0xff] }
  0x6a   :  { %2019 = vmatprep.subr.bf16.mxu1 %v14749_v21  ;;  %1738 = vmatprep.mubr.bf16.mxu0 %v16460_v25  ;;  %v167_v21 = vld [vmem:[#allocation5 + $0x3b8] sm:$0xff]  ;;  %v16606_v18 = vpack.c.bf16 %v64_v3, %v55_v0  ;;  %v100_v3 = vld [vmem:[#allocation5 + $0x1a0] sm:$0xff] }
  0x6b   :  { %1851 = vmatprep.mubr.bf16.mxu1 %v16462_v26  ;;  %v16551_v30 = vpack.c.bf16 %v167_v21, %v158_v20  ;;  %v52_v20 = vld [vmem:[#allocation5 + $0x20] sm:$0xff]  ;;  %v61_v21 = vld [vmem:[#allocation5 + $0x68] sm:$0xff]  ;;  %v91_v0 = vld [vmem:[#allocation5 + $0x158] sm:$0xff] }
  0x6c   :  { %1907 = vmatpush1.bf16.msra.mxu0 %v14744_v22  ;;  %v14776_v22 = vld [vmem:[%s22089_s1 + $0x40c] ss:$12 sps:$4 sm:$0xff]  }
  0x6d   :  { %2020 = vmatpush1.bf16.msra.mxu1 %v14747_v27  ;;  %1908 = vmatprep.subr.bf16.mxu0 %v14752_v32  ;;  %v14779_v27 = vld [vmem:[%s22089_s1 + $0x58c] ss:$12 sps:$4 sm:$0xff]  }
  0x6e   :  { %2021 = vmatprep.subr.bf16.mxu1 %v14755_v33  ;;  %v177_v32 = vld [vmem:[#allocation5 + $0x408] sm:$0xff]  ;;  %v186_v33 = vld [vmem:[#allocation5 + $0x450] sm:$0xff] }
  0x6f   :  { %1739 = vmatmul.mubr.bf16.gmra.mxu0 %v16483_v40 }
  0x70   :  { %1852 = vmatmul.mubr.bf16.gmra.mxu1 %v16485_v41  ;;  %1909 = vmatpush2.bf16.msra.mxu0 %v14750_v34  ;;  %v14774_v34 = vld [vmem:[%s22089_s1 + $0x408] ss:$12 sps:$4 sm:$0xff]  }
  0x71   :  { %2022 = vmatpush2.bf16.msra.mxu1 %v14753_v35  ;;  %1910 = vmatprep.subr.bf16.mxu0 %v14758_v46  ;;  %v14777_v35 = vld [vmem:[%s22089_s1 + $0x588] ss:$12 sps:$4 sm:$0xff]   ;;  %v16571_v46 = vpack.c.bf16 %v184_v31, %v175_v28  ;;  %v14800_v28 = vld [vmem:[%s22089_s1 + $0x64c] ss:$12 sps:$4 sm:$0xff]  }
  0x72   :  { %2023 = vmatprep.subr.bf16.mxu1 %v14761_v47  ;;  %1748 = vmatprep.mubr.bf16.mxu0 %v16496_v49  ;;  %v16573_v47 = vpack.c.bf16 %v186_v33, %v177_v32  ;;  %v71_v31 = vld [vmem:[#allocation5 + $0xb8] sm:$0xff]  ;;  %v80_v32 = vld [vmem:[#allocation5 + $0x100] sm:$0xff]  ;;  %v73_v33 = vld [vmem:[#allocation5 + $0xc8] sm:$0xff] }
  0x73   :  { %1861 = vmatprep.mubr.bf16.mxu1 %v16498_v50 }
  0x74   :  { %1911 = vmatpush2.bf16.msra.mxu0 %v14756_v48  ;;  %v174_v48 = vld [vmem:[#allocation5 + $0x3f0] sm:$0xff] }
  0x75   :  { %2024 = vmatpush2.bf16.msra.mxu1 %v14759_v51  ;;  %1912 = vmatprep.subr.bf16.mxu0 %v14764_v60  ;;  %v183_v51 = vld [vmem:[#allocation5 + $0x438] sm:$0xff]  ;;  %v53_v60 = vld [vmem:[#allocation5 + $0x28] sm:$0xff] }
  0x76   :  { %2025 = vmatprep.subr.bf16.mxu1 %v14767_v61  ;;  %v16585_v61 = vpack.c.bf16 %v183_v51, %v174_v48  ;;  %v14803_v48 = vld [vmem:[%s22089_s1 + $0x634] ss:$12 sps:$4 sm:$0xff]  }
  0x77   :  { %1749 = vmatmul.mubr.bf16.gmra.mxu0 %v16519_v4  ;;  %v70_v51 = vld [vmem:[#allocation5 + $0xb0] sm:$0xff] }
  0x78   :  { %1862 = vmatmul.mubr.bf16.gmra.mxu1 %v16521_v5  ;;  %1913 = vmatpush2.bf16.msra.mxu0 %v14762_v62  ;;  %v16587_v62 = vpack.c.bf16 %v185_v55, %v176_v52  ;;  %v79_v52 = vld [vmem:[#allocation5 + $0xf8] sm:$0xff]  ;;  %v72_v55 = vld [vmem:[#allocation5 + $0xc0] sm:$0xff] }
  0x79   :  { %2026 = vmatpush2.bf16.msra.mxu1 %v14765_v63  ;;  %1914 = vmatprep.subr.bf16.mxu0 %v14770_v8  ;;  %v62_v63 = vld [vmem:[#allocation5 + $0x70] sm:$0xff] }
  0x7a   :  { %2027 = vmatprep.subr.bf16.mxu1 %v14773_v9  ;;  %1758 = vmatprep.mubr.bf16.mxu0 %v16532_v11  ;;  %v14794_v8 = vld [vmem:[%s22089_s1 + $0x3c4] ss:$12 sps:$4 sm:$0xff]  }
  0x7b   :  { %1871 = vmatprep.mubr.bf16.mxu1 %v16534_v12  ;;  %v14797_v9 = vld [vmem:[%s22089_s1 + $0x544] ss:$12 sps:$4 sm:$0xff]  }
  0x7c   :  { %1915 = vmatpush2.bf16.msra.mxu0 %v14768_v10  ;;  %v14792_v10 = vld [vmem:[%s22089_s1 + $0x3c0] ss:$12 sps:$4 sm:$0xff]  }
  0x7d   :  { %2028 = vmatpush2.bf16.msra.mxu1 %v14771_v13  ;;  %1916 = vmatprep.subr.bf16.mxu0 %v14776_v22  ;;  %v16604_v13 = vpack.c.bf16 %v62_v63, %v53_v60  ;;  %v54_v22 = vld [vmem:[#allocation5 + $0x30] sm:$0xff] }
  0x7e   :  { %2029 = vmatprep.subr.bf16.mxu1 %v14779_v27  ;;  %v63_v27 = vld [vmem:[#allocation5 + $0x78] sm:$0xff]  ;;  %v98_v60 = vld [vmem:[#allocation5 + $0x190] sm:$0xff] }
  0x7f   :  { %1759 = vmatmul.mubr.bf16.gmra.mxu0 %v16549_v29  ;;  %v14801_v63 = vld [vmem:[%s22089_s1 + $0x630] ss:$12 sps:$4 sm:$0xff]  }
  0x80   :  { %1872 = vmatmul.mubr.bf16.gmra.mxu1 %v16551_v30  ;;  %1917 = vmatpush2.bf16.msra.mxu0 %v14774_v34  ;;  %v82_v34 = vld [vmem:[#allocation5 + $0x110] sm:$0xff] }
  0x81   :  { %2030 = vmatpush2.bf16.msra.mxu1 %v14777_v35  ;;  %1918 = vmatprep.subr.bf16.mxu0 %v14782_v38  ;;  %v16618_v35 = vpack.c.bf16 %v61_v21, %v52_v20  ;;  %v16620_v38 = vpack.c.bf16 %v63_v27, %v54_v22  ;;  %v88_v20 = vld [vmem:[#allocation5 + $0x140] sm:$0xff]  ;;  %v97_v21 = vld [vmem:[#allocation5 + $0x188] sm:$0xff]  ;;  %v90_v22 = vld [vmem:[#allocation5 + $0x150] sm:$0xff] }
  0x82   :  { %2031 = vmatprep.subr.bf16.mxu1 %v14785_v39  ;;  %1768 = vmatprep.mubr.bf16.mxu0 %v16571_v46  ;;  %v14798_v39 = vld [vmem:[%s22089_s1 + $0x648] ss:$12 sps:$4 sm:$0xff]   ;;  %v99_v27 = vld [vmem:[#allocation5 + $0x198] sm:$0xff] }
  0x83   :  { %1881 = vmatprep.mubr.bf16.mxu1 %v16573_v47 }
  0x84   :  { %1919 = vmatpush2.bf16.msra.mxu0 %v14780_v42  ;;  %v16625_v42 = vpack.c.bf16 %v80_v32, %v71_v31  ;;  %v107_v31 = vld [vmem:[#allocation5 + $0x1d8] sm:$0xff]  ;;  %v116_v32 = vld [vmem:[#allocation5 + $0x220] sm:$0xff] }
  0x85   :  { %2032 = vmatpush2.bf16.msra.mxu1 %v14783_v45  ;;  %1920 = vmatprep.subr.bf16.mxu0 %v14788_v56  ;;  %v16627_v45 = vpack.c.bf16 %v82_v34, %v73_v33  ;;  %v81_v56 = vld [vmem:[#allocation5 + $0x108] sm:$0xff]  ;;  %v118_v34 = vld [vmem:[#allocation5 + $0x230] sm:$0xff] }
  0x86   :  { %2033 = vmatprep.subr.bf16.mxu1 %v14791_v57  ;;  %v89_v57 = vld [vmem:[#allocation5 + $0x148] sm:$0xff] }
  0x87   :  { %1769 = vmatmul.mubr.bf16.gmra.mxu0 %v16585_v61  ;;  %v109_v33 = vld [vmem:[#allocation5 + $0x1e8] sm:$0xff] }
  0x88   :  { %1882 = vmatmul.mubr.bf16.gmra.mxu1 %v16587_v62  ;;  %1921 = vmatpush2.bf16.msra.mxu0 %v14786_v6  ;;  %v14806_v6 = vld [vmem:[%s22089_s1 + $0x61c] ss:$12 sps:$4 sm:$0xff]  }
  0x89   :  { %2034 = vmatpush2.bf16.msra.mxu1 %v14789_v7  ;;  %1922 = vmatprep.subr.bf16.mxu0 %v14794_v8  ;;  %v16642_v7 = vpack.c.bf16 %v79_v52, %v70_v51  ;;  %v16644_v8 = vpack.c.bf16 %v81_v56, %v72_v55  ;;  %v16666_v51 = vpack.c.bf16 %v97_v21, %v88_v20  ;;  %v127_v20 = vld [vmem:[#allocation5 + $0x278] sm:$0xff]  ;;  %v136_v21 = vld [vmem:[#allocation5 + $0x2c0] sm:$0xff] }
  0x8a   :  { %2035 = vmatprep.subr.bf16.mxu1 %v14797_v9  ;;  %1924 = vmatprep.mubr.bf16.mxu0 %v16604_v13  ;;  %v16646_v9 = vpack.c.bf16 %v98_v60, %v89_v57  ;;  %v16668_v52 = vpack.c.bf16 %v99_v27, %v90_v22  ;;  %v16670_v55 = vpack.c.bf16 %v116_v32, %v107_v31  ;;  %v14810_v57 = vld [vmem:[%s22089_s1 + $0x170] ss:$12 sps:$4 sm:$0xff]   ;;  %v124_v32 = vld [vmem:[#allocation5 + $0x260] sm:$0xff] }
  0x8b   :  { %2037 = vmatprep.mubr.bf16.mxu1 %v16606_v18  ;;  %v16672_v56 = vpack.c.bf16 %v118_v34, %v109_v33  ;;  %v106_v60 = vld [vmem:[#allocation5 + $0x1d0] sm:$0xff]  ;;  %v16687_v31 = vpack.c.bf16 %v136_v21, %v127_v20  ;;  %v133_v33 = vld [vmem:[#allocation5 + $0x2a8] sm:$0xff]  ;;  %v151_v20 = vld [vmem:[#allocation5 + $0x338] sm:$0xff] }
  0x8c   :  { %1923 = vmatpush2.bf16.msra.mxu0 %v14792_v10  ;;  %v16648_v10 = vpack.c.bf16 %v100_v3, %v91_v0  ;;  %v108_v0 = vld [vmem:[#allocation5 + $0x1e0] sm:$0xff]  ;;  %v117_v3 = vld [vmem:[#allocation5 + $0x228] sm:$0xff]  ;;  %v126_v34 = vld [vmem:[#allocation5 + $0x270] sm:$0xff] }
  0x8d   :  { %2036 = vmatpush2.bf16.msra.mxu1 %v14795_v19  ;;  %2126 = vmatprep.subr.bf16.mxu0 %v14800_v28  ;;  %v14804_v19 = vld [vmem:[%s22089_s1 + $0x618] ss:$12 sps:$4 sm:$0xff]   ;;  %22162 = vst [vmem:[#allocation11_spill] sm:$0xff] %v16672_v56  ;;  %v16683_v27 = vpack.c.bf16 %v117_v3, %v108_v0  ;;  %22165 = vst [vmem:[#allocation14_spill] sm:$0xff] %v16687_v31 }
  0x8e   :  { %14593 = vmatprep.subr.bf16.mxu1 %v14800_v28  ;;  %v14809_v28 = vld [vmem:[%s22089_s1 + $0x604] ss:$12 sps:$4 sm:$0xff]  }
  0x8f   :  { %1925 = vmatmul.mubr.bf16.vlgmr.msra.gmra.mxu0 %v16618_v35  ;;  %22163 = vst [vmem:[#allocation12_spill] sm:$0xff] %v16683_v27  ;;  %v144_v21 = vld [vmem:[#allocation5 + $0x300] sm:$0xff] }
  0x90   :  { %2038 = vmatmul.mubr.bf16.vlgmr.msra.gmra.mxu1 %v16620_v38  ;;  %2127 = vmatpush1.bf16.msra.mxu0 %v14798_v39 }
  0x91   :  { %1934 = vmatprep.mubr.bf16.mxu0 %v16625_v42  ;;  %2047 = vmatprep.mubr.bf16.mxu1 %v16627_v45 }
  0x92   :  { %2128 = vmatprep.subr.bf16.mxu0 %v14803_v48  ;;  %14597 = vmatpush1.bf16.msra.mxu1 %v14798_v39  ;;  %v14807_v39 = vld [vmem:[%s22089_s1 + $0x600] ss:$12 sps:$4 sm:$0xff]  }
  0x93   :  { %14594 = vmatprep.subr.bf16.mxu1 %v14803_v48  ;;  %v14812_v48 = vld [vmem:[%s22089_s1 + $0x2f0] ss:$12 sps:$4 sm:$0xff]  }
  0x94   :  { %2129 = vmatpush1.bf16.msra.mxu0 %v14801_v63 }
  0x95   :  { %2130 = vmatprep.subr.bf16.mxu0 %v14806_v6 }
  0x96   :  { %14598 = vmatpush1.bf16.msra.mxu1 %v14801_v63  ;;  %v115_v63 = vld [vmem:[#allocation5 + $0x218] sm:$0xff] }
  0x97   :  { %1935 = vmatmul.mubr.bf16.gmra.mxu0 %v16642_v7  ;;  %14595 = vmatprep.subr.bf16.mxu1 %v14806_v6  ;;  %v125_v6 = vld [vmem:[#allocation5 + $0x268] sm:$0xff]  ;;  %v16681_v22 = vpack.c.bf16 %v115_v63, %v106_v60  ;;  %v154_v60 = vld [vmem:[#allocation5 + $0x350] sm:$0xff]  ;;  %v16693_v63 = vpack.c.bf16 %v133_v33, %v124_v32  ;;  %v163_v32 = vld [vmem:[#allocation5 + $0x398] sm:$0xff] }
  0x98   :  { %2048 = vmatmul.mubr.bf16.gmra.mxu1 %v16644_v8  ;;  %1944 = vmatprep.mubr.bf16.mxu0 %v16646_v9  ;;  %v172_v33 = vld [vmem:[#allocation5 + $0x3e0] sm:$0xff] }
  0x99   :  { %2057 = vmatprep.mubr.bf16.mxu1 %v16648_v10  ;;  %2131 = vmatpush1.bf16.msra.mxu0 %v14804_v19  ;;  %22166 = vst [vmem:[#allocation15_spill] sm:$0xff] %v16693_v63 }
  0x9a   :  { %2132 = vmatprep.subr.bf16.mxu0 %v14809_v28  ;;  %14599 = vmatpush1.bf16.msra.mxu1 %v14804_v19  ;;  %v134_v19 = vld [vmem:[#allocation5 + $0x2b0] sm:$0xff] }
  0x9b   :  { %14596 = vmatprep.subr.bf16.mxu1 %v14809_v28  ;;  %v16685_v28 = vpack.c.bf16 %v134_v19, %v125_v6  ;;  %v142_v19 = vld [vmem:[#allocation5 + $0x2f0] sm:$0xff] }
  0x9d   :  { %2133 = vmatpush1.bf16.msra.mxu0 %v14807_v39  ;;  %22164 = vst [vmem:[#allocation13_spill] sm:$0xff] %v16685_v28 }
  0x9e   :  { %14600 = vmatpush1.bf16.msra.mxu1 %v14807_v39  ;;  %14237 = vmatprep.subr.bf16.mxu0 %v14812_v48  ;;  %v135_v39 = vld [vmem:[#allocation5 + $0x2b8] sm:$0xff] }
  0x9f   :  { %1945 = vmatmul.mubr.bf16.gmra.mxu0 %v16666_v51  ;;  %14173 = vmatprep.subr.bf16.mxu1 %v14810_v57  ;;  %v143_v48 = vld [vmem:[#allocation5 + $0x2f8] sm:$0xff]  ;;  %v145_v57 = vld [vmem:[#allocation5 + $0x308] sm:$0xff]  ;;  %v16695_v0 = vpack.c.bf16 %v135_v39, %v126_v34 }
  0xa0   :  { %2058 = vmatmul.mubr.bf16.gmra.mxu1 %v16668_v52  ;;  %1954 = vmatprep.mubr.bf16.mxu0 %v16670_v55  ;;  %v16699_v6 = vpack.c.bf16 %v154_v60, %v145_v57  ;;  %v160_v57 = vld [vmem:[#allocation5 + $0x380] sm:$0xff]  ;;  %v169_v60 = vld [vmem:[#allocation5 + $0x3c8] sm:$0xff] }
  0xa1   :  { %2067 = vmatprep.mubr.bf16.mxu1 %v16672_v56  ;;  %v152_v56 = vld [vmem:[#allocation5 + $0x340] sm:$0xff]  ;;  %22167 = vst [vmem:[#allocation16_spill] sm:$0xff] %v16695_v0 }
  0xa2   :  { %v16697_v3 = vpack.c.bf16 %v152_v56, %v143_v48  ;;  %22169 = vst [vmem:[#allocation18_spill] sm:$0xff] %v16699_v6  ;;  %v16705_v56 = vpack.c.bf16 %v151_v20, %v142_v19  ;;  %v16711_v48 = vpack.c.bf16 %v172_v33, %v163_v32  ;;  %v190_v19 = vld [vmem:[#allocation5 + $0x470] sm:$0xff]  ;;  %v187_v33 = vld [vmem:[#allocation5 + $0x458] sm:$0xff] }
  0xa3   :  { %v178_v32 = vld [vmem:[#allocation5 + $0x410] sm:$0xff] }
  0xa4   :  { %22168 = vst [vmem:[#allocation17_spill] sm:$0xff] %v16697_v3  ;;  %22172 = vst [vmem:[#allocation21_spill] sm:$0xff] %v16711_v48 }
  0xa7   :  { %1955 = vmatmul.mubr.bf16.gmra.mxu0 %v16681_v22 }
  0xa8   :  { %2068 = vmatmul.mubr.bf16.gmra.mxu1 %v16683_v27  ;;  %1964 = vmatprep.mubr.bf16.mxu0 %v16685_v28  ;;  %v153_v27 = vld [vmem:[#allocation5 + $0x348] sm:$0xff] }
  0xa9   :  { %2077 = vmatprep.mubr.bf16.mxu1 %v16687_v31  ;;  %v161_v28 = vld [vmem:[#allocation5 + $0x388] sm:$0xff]  ;;  %v170_v31 = vld [vmem:[#allocation5 + $0x3d0] sm:$0xff]  ;;  %v16707_v34 = vpack.c.bf16 %v153_v27, %v144_v21 }
  0xaa   :  { %v16709_v39 = vpack.c.bf16 %v170_v31, %v161_v28  ;;  %v181_v27 = vld [vmem:[#allocation5 + $0x428] sm:$0xff]  ;;  %v16717_v28 = vpack.c.bf16 %v169_v60, %v160_v57  ;;  %v16729_v57 = vpack.c.bf16 %v187_v33, %v178_v32  ;;  %v22108_v60 = vmov 0   ;;  %v14813_v32 = vld [vmem:[%s22089_s1 + $0x230] ss:$12 sps:$4 sm:$0xff]   ;;  %v14814_v33 = vld [vmem:[%s22089_s1 + $0x158] ss:$12 sps:$4 sm:$0xff]  }
  0xab   :  { %22170 = vst [vmem:[#allocation19_spill] sm:$0xff] %v16707_v34  ;;  %v16723_v21 = vpack.c.bf16 %v190_v19, %v181_v27  ;;  %v137_v27 = vld [vmem:[#allocation5 + $0x2c8] sm:$0xff]  ;;  %v14811_v19 = vld [vmem:[%s22089_s1 + $0xb0] ss:$12 sps:$4 sm:$0xff]  }
  0xac   :  { %22171 = vst [vmem:[#allocation20_spill] sm:$0xff] %v16709_v39  ;;  %22173 = vst [vmem:[#allocation22_spill] sm:$0xff] %v16717_v28 }
  0xad   :  { %22176 = vst [vmem:[#allocation25_spill] sm:$0xff] %v16723_v21  ;;  %22177 = vst [vmem:[#allocation26_spill] sm:$0xff] %v16729_v57 }
  0xaf   :  { %1965 = vmatmul.mubr.bf16.gmra.mxu0 %v16693_v63  ;;  %v162_v63 = vld [vmem:[#allocation5 + $0x390] sm:$0xff] }
  0xb0   :  { %2078 = vmatmul.mubr.bf16.gmra.mxu1 %v16695_v0  ;;  %1974 = vmatprep.mubr.bf16.mxu0 %v16697_v3  ;;  %v171_v0 = vld [vmem:[#allocation5 + $0x3d8] sm:$0xff] }
  0xb1   :  { %2087 = vmatprep.mubr.bf16.mxu1 %v16699_v6  ;;  %v179_v3 = vld [vmem:[#allocation5 + $0x418] sm:$0xff]  ;;  %v188_v6 = vld [vmem:[#allocation5 + $0x460] sm:$0xff]  ;;  %v16719_v31 = vpack.c.bf16 %v171_v0, %v162_v63 }
  0xb2   :  { %v16721_v20 = vpack.c.bf16 %v188_v6, %v179_v3  ;;  %v56_v0 = vld [vmem:[#allocation5 + $0x40] sm:$0xff]  ;;  %v65_v3 = vld [vmem:[#allocation5 + $0x88] sm:$0xff] }
  0xb3   :  { %22174 = vst [vmem:[#allocation23_spill] sm:$0xff] %v16719_v31  ;;  %v128_v6 = vld [vmem:[#allocation5 + $0x280] sm:$0xff] }
  0xb4   :  { %22175 = vst [vmem:[#allocation24_spill] sm:$0xff] %v16721_v20 }
  0xb7   :  { %1975 = vmatmul.mubr.bf16.gmra.mxu0 %v16705_v56 }
  0xb8   :  { %2088 = vmatmul.mubr.bf16.gmra.mxu1 %v16707_v34  ;;  %1984 = vmatprep.mubr.bf16.mxu0 %v16709_v39  ;;  %v180_v34 = vld [vmem:[#allocation5 + $0x420] sm:$0xff]  ;;  %v191_v39 = vld [vmem:[#allocation5 + $0x478] sm:$0xff] }
  0xb9   :  { %2097 = vmatprep.mubr.bf16.mxu1 %v16711_v48  ;;  %v189_v48 = vld [vmem:[#allocation5 + $0x468] sm:$0xff] }
  0xba   :  { %v16731_v63 = vpack.c.bf16 %v189_v48, %v180_v34  ;;  %v16740_v34 = vpack.c.bf16 %v65_v3, %v56_v0  ;;  %v16742_v48 = vpack.c.bf16 %v137_v27, %v128_v6  ;;  %v14817_v0 = vld [vmem:[%s22089_s1 + $0x218] ss:$12 sps:$4 sm:$0xff]   ;;  %v74_v3 = vld [vmem:[#allocation5 + $0xd0] sm:$0xff] }
  0xbb   :  { %v83_v6 = vld [vmem:[#allocation5 + $0x118] sm:$0xff]  ;;  %v146_v27 = vld [vmem:[#allocation5 + $0x310] sm:$0xff] }
  0xbc   :  { %22178 = vst [vmem:[#allocation27_spill] sm:$0xff] %v16731_v63  ;;  %22179 = vst [vmem:[#allocation28_spill] sm:$0xff] %v16740_v34 }
  0xbd   :  { %22180 = vst [vmem:[#allocation29_spill] sm:$0xff] %v16742_v48 }
  0xbf   :  { %1985 = vmatmul.mubr.bf16.gmra.mxu0 %v16717_v28  ;;  %v14831_v28 = vld [vmem:[%s22089_s1 + $0x38] ss:$12 sps:$4 sm:$0xff]  }
  0xc0   :  { %2098 = vmatmul.mubr.bf16.gmra.mxu1 %v16719_v31  ;;  %1994 = vmatprep.mubr.bf16.mxu0 %v16721_v20  ;;  %v14820_v20 = vld [vmem:[%s22089_s1 + $0x2c0] ss:$12 sps:$4 sm:$0xff]   ;;  %v22181_v31 = vmov 0  }
  0xc1   :  { %2107 = vmatprep.mubr.bf16.mxu1 %v16723_v21  ;;  %v14818_v21 = vld [vmem:[%s22089_s1 + $0x140] ss:$12 sps:$4 sm:$0xff]  }
  0xc7   :  { %1995 = vmatmul.mubr.bf16.gmra.mxu0 %v16729_v57  ;;  %v155_v57 = vld [vmem:[#allocation5 + $0x358] sm:$0xff] }
  0xc8   :  { %2108 = vmatmul.mubr.bf16.gmra.mxu1 %v16731_v63  ;;  %2150 = vmatprep.mubr.bf16.mxu0 %v22108_v60  ;;  %v14815_v63 = vld [vmem:[%s22089_s1 + $0x98] ss:$12 sps:$4 sm:$0xff]  }
  0xc9   :  { %2190 = vmatprep.mubr.bf16.mxu1 %v22108_v60  ;;  %v14816_v60 = vld [vmem:[%s22089_s1 + $0x2d8] ss:$12 sps:$4 sm:$0xff]  }
  0xcf   :  { %13032 = vmatmul.mubr.msk.bf16.vlgmr.msra.gmra.mxu0 %vm1641_vm0, %v16740_v34  ;;  %v14824_v34 = vld [vmem:[%s22089_s1 + $0x2a8] ss:$12 sps:$4 sm:$0xff]  }
  0xd0   :  { %13036 = vmatmul.mubr.msk.bf16.vlgmr.msra.gmra.mxu1 %vm1641_vm0, %v16742_v48  ;;  %14238 = vmatpush3.bf16.msra.mxu0 %v14813_v32  ;;  %v14819_v48 = vld [vmem:[%s22089_s1 + $0x80] ss:$12 sps:$4 sm:$0xff]   ;;  %v16776_v32 = vpack.c.bf16 %v155_v57, %v146_v27  ;;  %v14823_v57 = vld [vmem:[%s22089_s1 + $0x68] ss:$12 sps:$4 sm:$0xff]  }
  0xd1   :  { %14174 = vmatpush3.bf16.msra.mxu1 %v14811_v19  ;;  %14239 = vmatprep.subr.bf16.mxu0 %v14816_v60  ;;  %v16774_v19 = vpack.c.bf16 %v83_v6, %v74_v3  ;;  %v14821_v60 = vld [vmem:[%s22089_s1 + $0x200] ss:$12 sps:$4 sm:$0xff]   ;;  %v14825_v3 = vld [vmem:[%s22089_s1 + $0x1e8] ss:$12 sps:$4 sm:$0xff]  }
  0xd2   :  { %14175 = vmatprep.subr.bf16.mxu1 %v14814_v33  ;;  %2160 = vmatprep.mubr.bf16.mxu0 %v22181_v31  ;;  %22183 = vst [vmem:[#allocation31_spill] sm:$0xff] %v16776_v32  ;;  %v14822_v33 = vld [vmem:[%s22089_s1 + $0x128] ss:$12 sps:$4 sm:$0xff]   ;;  %v164_v6 = vld [vmem:[#allocation5 + $0x3a0] sm:$0xff] }
  0xd3   :  { %2200 = vmatprep.mubr.bf16.mxu1 %v22181_v31  ;;  %22182 = vst [vmem:[#allocation30_spill] sm:$0xff] %v16774_v19  ;;  %v173_v27 = vld [vmem:[#allocation5 + $0x3e8] sm:$0xff] }
  0xd4   :  { %14240 = vmatpush3.bf16.msra.mxu0 %v14817_v0  ;;  %v101_v0 = vld [vmem:[#allocation5 + $0x1a8] sm:$0xff] }
  0xd5   :  { %14176 = vmatpush3.bf16.msra.mxu1 %v14815_v63  ;;  %14241 = vmatprep.subr.bf16.mxu0 %v14820_v20  ;;  %v92_v63 = vld [vmem:[#allocation5 + $0x160] sm:$0xff]  ;;  %v14826_v20 = vld [vmem:[%s22089_s1 + $0x110] ss:$12 sps:$4 sm:$0xff]  }
  0xd6   :  { %14177 = vmatprep.subr.bf16.mxu1 %v14818_v21  ;;  %v14828_v21 = vld [vmem:[%s22089_s1 + $0x290] ss:$12 sps:$4 sm:$0xff]  }
  0xd7   :  { %13033 = vmatmul.mubr.msk.bf16.gmra.mxu0 %vm1641_vm0, %v16774_v19  ;;  %v14829_v19 = vld [vmem:[%s22089_s1 + $0x1d0] ss:$12 sps:$4 sm:$0xff]  }
  0xd8   :  { %13037 = vmatmul.mubr.msk.bf16.gmra.mxu1 %vm1641_vm0, %v16776_v32  ;;  %14242 = vmatpush3.bf16.msra.mxu0 %v14821_v60  ;;  %v14827_v32 = vld [vmem:[%s22089_s1 + $0x50] ss:$12 sps:$4 sm:$0xff]   ;;  %v16813_v60 = vpack.c.bf16 %v173_v27, %v164_v6 }
  0xd9   :  { %14178 = vmatpush3.bf16.msra.mxu1 %v14819_v48  ;;  %14243 = vmatprep.subr.bf16.mxu0 %v14824_v34  ;;  %v16811_v48 = vpack.c.bf16 %v101_v0, %v92_v63  ;;  %v14830_v34 = vld [vmem:[%s22089_s1 + $0xf8] ss:$12 sps:$4 sm:$0xff]   ;;  %v110_v0 = vld [vmem:[#allocation5 + $0x1f0] sm:$0xff] }
  0xda   :  { %14179 = vmatprep.subr.bf16.mxu1 %v14822_v33  ;;  %2170 = vmatprep.mubr.bf16.mxu0 %v22181_v31  ;;  %22185 = vst [vmem:[#allocation33_spill] sm:$0xff] %v16813_v60  ;;  %v14832_v33 = vld [vmem:[%s22089_s1 + $0x278] ss:$12 sps:$4 sm:$0xff]   ;;  %v182_v27 = vld [vmem:[#allocation5 + $0x430] sm:$0xff] }
  0xdb   :  { %2210 = vmatprep.mubr.bf16.mxu1 %v22181_v31  ;;  %22184 = vst [vmem:[#allocation32_spill] sm:$0xff] %v16811_v48  ;;  %v14833_v63 = vld [vmem:[%s22089_s1 + $0x1b8] ss:$12 sps:$4 sm:$0xff]  }
  0xdc   :  { %14244 = vmatpush3.bf16.msra.mxu0 %v14825_v3  ;;  %v119_v6 = vld [vmem:[#allocation5 + $0x238] sm:$0xff]  ;;  %v14836_v3 = vld [vmem:[%s22089_s1 + $0x260] ss:$12 sps:$4 sm:$0xff]  }
  0xdd   :  { %14180 = vmatpush3.bf16.msra.mxu1 %v14823_v57  ;;  %14245 = vmatprep.subr.bf16.mxu0 %v14828_v21  ;;  %v14834_v57 = vld [vmem:[%s22089_s1 + $0xe0] ss:$12 sps:$4 sm:$0xff]  }
  0xde   :  { %14181 = vmatprep.subr.bf16.mxu1 %v14826_v20  ;;  %v14835_v20 = vld [vmem:[%s22089_s1 + $0x20] ss:$12 sps:$4 sm:$0xff]  }
  0xdf   :  { %13034 = vmatmul.mubr.msk.bf16.gmra.mxu0 %vm1641_vm0, %v16811_v48  ;;  %v14837_v21 = vld [vmem:[%s22089_s1 + $0x1a0] ss:$12 sps:$4 sm:$0xff]   ;;  %v16847_v48 = vpack.c.bf16 %v191_v39, %v182_v27  ;;  %v14841_v39 = vld [vmem:[%s22089_s1 + $0x188] ss:$12 sps:$4 sm:$0xff]   ;;  %v14851_v27 = vld [vmem:[%s22089_s1 + $0x518] ss:$12 sps:$4 sm:$0xff]  }
  0xe0   :  { %13038 = vmatmul.mubr.msk.bf16.gmra.mxu1 %vm1641_vm0, %v16813_v60  ;;  %14246 = vmatpush3.bf16.msra.mxu0 %v14829_v19  ;;  %v16845_v60 = vpack.c.bf16 %v119_v6, %v110_v0  ;;  %v14838_v19 = vld [vmem:[%s22089_s1 + $0xc8] ss:$12 sps:$4 sm:$0xff]   ;;  %v14849_v0 = vld [vmem:[%s22089_s1 + $0x530] ss:$12 sps:$4 sm:$0xff]   ;;  %v14844_v6 = vld [vmem:[%s22089_s1 + $0x458] ss:$12 sps:$4 sm:$0xff]  }
  0xe1   :  { %14182 = vmatpush3.bf16.msra.mxu1 %v14827_v32  ;;  %14247 = vmatprep.subr.bf16.mxu0 %v14832_v33  ;;  %v14840_v32 = vld [vmem:[%s22089_s1 + $0x248] ss:$12 sps:$4 sm:$0xff]   ;;  %v14848_v33 = vld [vmem:[%s22089_s1 + $0x5f0] ss:$12 sps:$4 sm:$0xff]  }
  0xe2   :  { %14183 = vmatprep.subr.bf16.mxu1 %v14830_v34  ;;  %2180 = vmatprep.mubr.bf16.mxu0 %v22181_v31  ;;  %v14839_v34 = vld [vmem:[%s22089_s1 + $0x8] ss:$12 sps:$4 sm:$0xff]  }
  0xe3   :  { %2220 = vmatprep.mubr.bf16.mxu1 %v22181_v31 }
  0xe4   :  { %14248 = vmatpush3.bf16.msra.mxu0 %v14833_v63  ;;  %v14843_v63 = vld [vmem:[%s22089_s1 + $0x3b0] ss:$12 sps:$4 sm:$0xff]  }
  0xe5   :  { %14184 = vmatpush3.bf16.msra.mxu1 %v14831_v28  ;;  %14249 = vmatprep.subr.bf16.mxu0 %v14836_v3  ;;  %v14842_v28 = vld [vmem:[%s22089_s1 + $0x470] ss:$12 sps:$4 sm:$0xff]   ;;  %v14856_v3 = vld [vmem:[%s22089_s1 + $0x5a8] ss:$12 sps:$4 sm:$0xff]  }
  0xe6   :  { %14185 = vmatprep.subr.bf16.mxu1 %v14834_v57  ;;  %v14846_v57 = vld [vmem:[%s22089_s1 + $0x440] ss:$12 sps:$4 sm:$0xff]  }
  0xe7   :  { %13035 = vmatmul.mubr.msk.bf16.gmra.mxu0 %vm1641_vm0, %v16845_v60 }
  0xe8   :  { %13039 = vmatmul.mubr.msk.bf16.gmra.mxu1 %vm1641_vm0, %v16847_v48  ;;  %14250 = vmatpush3.bf16.msra.mxu0 %v14837_v21  ;;  %v14857_v21 = vld [vmem:[%s22089_s1 + $0x4e8] ss:$12 sps:$4 sm:$0xff]  }
  0xe9   :  { %14186 = vmatpush3.bf16.msra.mxu1 %v14835_v20  ;;  %14251 = vmatprep.subr.bf16.mxu0 %v14840_v32  ;;  %v14853_v20 = vld [vmem:[%s22089_s1 + $0x368] ss:$12 sps:$4 sm:$0xff]   ;;  %v14864_v32 = vld [vmem:[%s22089_s1 + $0x578] ss:$12 sps:$4 sm:$0xff]  }
  0xea   :  { %14187 = vmatprep.subr.bf16.mxu1 %v14838_v19  ;;  %2263 = vmatprep.mubr.bf16.mxu1 %v16276_v53  ;;  %v14850_v53 = vld [vmem:[%s22089_s1 + $0x5d8] ss:$12 sps:$4 sm:$0xff]   ;;  %v14859_v19 = vld [vmem:[%s22089_s1 + $0x350] ss:$12 sps:$4 sm:$0xff]  }
  0xeb   :  { %2360 = vmatprep.mubr.bf16.mxu0 %v16278_v54  ;;  %v14845_v54 = vld [vmem:[%s22089_s1 + $0x398] ss:$12 sps:$4 sm:$0xff]  }
  0xec   :  { %14252 = vmatpush3.bf16.msra.mxu0 %v14841_v39  ;;  %v14865_v39 = vld [vmem:[%s22089_s1 + $0x4b8] ss:$12 sps:$4 sm:$0xff]  }
  0xed   :  { %14188 = vmatpush3.bf16.msra.mxu1 %v14839_v34  ;;  %14365 = vmatprep.subr.bf16.mxu0 %v14848_v33  ;;  %v14863_v34 = vld [vmem:[%s22089_s1 + $0x338] ss:$12 sps:$4 sm:$0xff]   ;;  %v14867_v33 = vld [vmem:[%s22089_s1 + $0x320] ss:$12 sps:$4 sm:$0xff]  }
  0xee   :  { %14301 = vmatprep.subr.bf16.mxu1 %v14842_v28  ;;  %v538_v28 = vlaneseq }
  0xef   :  { %2361 = vmatmul.mubr.bf16.vlgmr.msra.gmra.mxu0 %v16341_v17  ;;  %v14847_v17 = vld [vmem:[%s22089_s1 + $0x380] ss:$12 sps:$4 sm:$0xff]  }
  0xf0   :  { %2264 = vmatmul.mubr.bf16.vlgmr.msra.gmra.mxu1 %v16339_v16  ;;  %2368 = vmatprep.mubr.bf16.mxu0 %v16354_v24  ;;  %v14854_v16 = vld [vmem:[%s22089_s1 + $0x5c0] ss:$12 sps:$4 sm:$0xff]   ;;  %v14852_v24 = vld [vmem:[%s22089_s1 + $0x428] ss:$12 sps:$4 sm:$0xff]  }
  0xf1   :  { %2271 = vmatprep.mubr.bf16.mxu1 %v16352_v23  ;;  %14302 = vmatpush3.bf16.msra.mxu1 %v14843_v63  ;;  %v14855_v23 = vld [vmem:[%s22089_s1 + $0x500] ss:$12 sps:$4 sm:$0xff]   ;;  %v14870_v63 = vld [vmem:[%s22089_s1 + $0x3c8] ss:$12 sps:$4 sm:$0xff]  }
  0xf2   :  { %14366 = vmatpush3.bf16.msra.mxu0 %v14849_v0  ;;  %14303 = vmatprep.subr.bf16.mxu1 %v14844_v6  ;;  %v14872_v0 = vld [vmem:[%s22089_s1 + $0x548] ss:$12 sps:$4 sm:$0xff]   ;;  %v536_v6 = vld [vmem:[%s22090_s2] sm:$0x7] }
  0xf3   :  { %14367 = vmatprep.subr.bf16.mxu0 %v14850_v53  ;;  %v14871_v53 = vld [vmem:[%s22089_s1 + $0x308] ss:$12 sps:$4 sm:$0xff]  }
  0xf5   :  { %14304 = vmatpush3.bf16.msra.mxu1 %v14845_v54  ;;  %v14873_v54 = vld [vmem:[%s22089_s1 + $0x488] ss:$12 sps:$4 sm:$0xff]  }
  0xf6   :  { %14368 = vmatpush3.bf16.msra.mxu0 %v14851_v27  ;;  %14305 = vmatprep.subr.bf16.mxu1 %v14846_v57 }
  0xf7   :  { %14369 = vmatprep.subr.bf16.mxu0 %v14854_v16  ;;  %2369 = vmatmul.mubr.bf16.gmra.mxu0 %v16377_v37  ;;  %v14860_v37 = vld [vmem:[%s22089_s1 + $0x590] ss:$12 sps:$4 sm:$0xff]  }
  0xf8   :  { %2272 = vmatmul.mubr.bf16.gmra.mxu1 %v16375_v36  ;;  %2376 = vmatprep.mubr.bf16.mxu0 %v16390_v44  ;;  %v14858_v36 = vld [vmem:[%s22089_s1 + $0x410] ss:$12 sps:$4 sm:$0xff]   ;;  %v14862_v44 = vld [vmem:[%s22089_s1 + $0x3f8] ss:$12 sps:$4 sm:$0xff]  }
  0xf9   :  { %2279 = vmatprep.mubr.bf16.mxu1 %v16388_v43  ;;  %14306 = vmatpush3.bf16.msra.mxu1 %v14847_v17  ;;  %v14861_v43 = vld [vmem:[%s22089_s1 + $0x4d0] ss:$12 sps:$4 sm:$0xff]  }
  0xfa   :  { %14370 = vmatpush3.bf16.msra.mxu0 %v14855_v23  ;;  %14307 = vmatprep.subr.bf16.mxu1 %v14852_v24 }
  0xfb   :  { %14371 = vmatprep.subr.bf16.mxu0 %v14856_v3 }
  0xfd   :  { %14308 = vmatpush3.bf16.msra.mxu1 %v14853_v20 }
  0xfe   :  { %14372 = vmatpush3.bf16.msra.mxu0 %v14857_v21  ;;  %14309 = vmatprep.subr.bf16.mxu1 %v14858_v36 }
  0xff   :  { %14373 = vmatprep.subr.bf16.mxu0 %v14860_v37  ;;  %2377 = vmatmul.mubr.bf16.gmra.mxu0 %v16413_v59  ;;  %v14868_v59 = vld [vmem:[%s22089_s1 + $0x560] ss:$12 sps:$4 sm:$0xff]  }
 0x100   :  { %2280 = vmatmul.mubr.bf16.gmra.mxu1 %v16411_v58  ;;  %2384 = vmatprep.mubr.bf16.mxu0 %v16426_v2  ;;  %v14866_v58 = vld [vmem:[%s22089_s1 + $0x3e0] ss:$12 sps:$4 sm:$0xff]   ;;  %v16963_v2 = vshrl.u32 %v538_v28, 7  ;;  %v2866_v28 = vld [vmem:[#allocation2 + $0x44] sm:$0x6] }
 0x101   :  { %2287 = vmatprep.mubr.bf16.mxu1 %v16424_v1  ;;  %14310 = vmatpush3.bf16.msra.mxu1 %v14859_v19  ;;  %v14869_v1 = vld [vmem:[%s22089_s1 + $0x4a0] ss:$12 sps:$4 sm:$0xff]   ;;  %v2842_v19 = vld [vmem:[#allocation2 + $0x4] sm:$0x6] }
 0x102   :  { %14374 = vmatpush3.bf16.msra.mxu0 %v14861_v43  ;;  %14311 = vmatprep.subr.bf16.mxu1 %v14862_v44  ;;  %22186 = vst [vmem:[#allocation34_spill] sm:$0xff] %v16963_v2  ;;  %v16984_v27 = vsub.s32 0, %v16963_v2  ;;  %v2815_v43 = vld [vmem:[#allocation2 + $0x40] sm:$0x3] }
 0x103   :  { %14375 = vmatprep.subr.bf16.mxu0 %v14864_v32 }
 0x104   :  { %22187 = vst [vmem:[#allocation35_spill] sm:$0xff] %v16984_v27  ;;  %v16999_v57 = vrot.slane %v536_v6, %v16984_v27 }
 0x105   :  { %14312 = vmatpush3.bf16.msra.mxu1 %v14863_v34  ;;  %v2843_v34 = vsel %vm17022_vm6, 0, %v2842_v19 }
 0x106   :  { %14376 = vmatpush3.bf16.msra.mxu0 %v14865_v39  ;;  %14313 = vmatprep.subr.bf16.mxu1 %v14866_v58  ;;  %v2816_v39 = vsel %vm17015_vm3, 0, %v2815_v43  ;;  %2844 = vst [vmem:[#allocation2 + $0x4] sm:$0x6] %v2843_v34 }
 0x107   :  { %14377 = vmatprep.subr.bf16.mxu0 %v14868_v59  ;;  %2385 = vmatmul.mubr.bf16.gmra.mxu0 %v16449_v15  ;;  %v16993_v15 = vld [vmem:[%s22089_s1 + $0x650] ss:$12 sps:$4 sm:$0xff]   ;;  %2817 = vst [vmem:[#allocation2 + $0x40] sm:$0x3] %v2816_v39 }
 0x108   :  { %2288 = vmatmul.mubr.bf16.gmra.mxu1 %v16447_v14  ;;  %2392 = vmatprep.mubr.bf16.mxu0 %v16462_v26  ;;  %v16988_v14 = vsub.s32 1, %v16963_v2 }
 0x109   :  { %2295 = vmatprep.mubr.bf16.mxu1 %v16460_v25  ;;  %14314 = vmatpush3.bf16.msra.mxu1 %v14867_v33  ;;  %v14880_v25 = vld [vmem:[%s22091_s3 + $0x74] ss:$8 sps:$4 sm:$0xff]   ;;  %v2867_v33 = vsel %vm17022_vm6, 0, %v2866_v28 }
 0x10a   :  { %14378 = vmatpush3.bf16.msra.mxu0 %v14869_v1  ;;  %22188 = vst [vmem:[#allocation36_spill] sm:$0xff] %v16988_v14  ;;  %14315 = vmatprep.subr.bf16.mxu1 %v14870_v63  ;;  %v17002_v26 = vrot.slane %v536_v6, %v16988_v14  ;;  %2868 = vst [vmem:[#allocation2 + $0x44] sm:$0x6] %v2867_v33 }
 0x10b   :  { %14379 = vmatprep.subr.bf16.mxu0 %v14872_v0 }
 0x10d   :  { %14316 = vmatpush3.bf16.msra.mxu1 %v14871_v53  ;;  %v2794_v53 = vld [vmem:[#allocation2 + $0x8] sm:$0x3] }
 0x10e   :  { %14380 = vmatpush3.bf16.msra.mxu0 %v14873_v54  ;;  %14569 = vmatprep.subr.bf16.mxu1 %v16993_v15  ;;  %v2818_v54 = vld [vmem:[#allocation2 + $0x48] sm:$0x3] }
 0x10f   :  { %5760 = vmatprep.subr.bf16.mxu0 %v14880_v25  ;;  %v1700_v16 = vpop.f32.mrf.mxu0  ;;  %2393 = vmatmul.mubr.bf16.gmra.mxu0 %v16485_v41  ;;  %v2791_v41 = vld [vmem:[#allocation2] sm:$0x3] }
 0x110   :  { %v1813_v17 = vpop.f32.mrf.mxu1  ;;  %2296 = vmatmul.mubr.bf16.gmra.mxu1 %v16483_v40  ;;  %v1701_v23 = vadd.f32 %v1700_v16, %v16999_v57  ;;  %2400 = vmatprep.mubr.bf16.mxu0 %v16498_v50  ;;  %v2792_v50 = vsel %vm17015_vm3, 0, %v2791_v41 }
 0x111   :  { %2303 = vmatprep.mubr.bf16.mxu1 %v16496_v49  ;;  %v1702_v24 = vpop.f32.mrf.mxu0  ;;  %2793 = vst [vmem:[#allocation2] sm:$0x3] %v2792_v50 }
 0x112   :  { %v1815_v3 = vpop.f32.mrf.mxu1  ;;  %v17010_v20 = vadd.f32 %v1813_v17, %v1701_v23  ;;  %v1703_v21 = vadd.f32 %v1702_v24, %v17002_v26  ;;  %v2795_v17 = vsel %vm17015_vm3, 0, %v2794_v53  ;;  %v2819_v23 = vsel %vm17015_vm3, 0, %v2818_v54  ;;  %v2848_v54 = vld [vmem:[#allocation2 + $0x14] sm:$0x6] }
 0x113   :  { %v1704_v49 = vpop.f32.mrf.mxu0  ;;  %2796 = vst [vmem:[#allocation2 + $0x8] sm:$0x3] %v2795_v17  ;;  %2820 = vst [vmem:[#allocation2 + $0x48] sm:$0x3] %v2819_v23  ;;  %v2849_v17 = vsel %vm17022_vm6, 0, %v2848_v54 }
 0x114   :  { %v1817_v36 = vpop.f32.mrf.mxu1  ;;  %v17026_v44 = vadd.f32 %v1815_v3, %v1703_v21  ;;  %v1705_v32 = vadd.f32 %v1704_v49, %v16999_v57  ;;  %v2869_v3 = vld [vmem:[#allocation2 + $0x4c] sm:$0x6]  ;;  %v2872_v23 = vld [vmem:[#allocation2 + $0x54] sm:$0x6]  ;;  %2850 = vst [vmem:[#allocation2 + $0x14] sm:$0x6] %v2849_v17 }
 0x115   :  { %v1706_v58 = vpop.f32.mrf.mxu0 }
 0x116   :  { %v1819_v59 = vpop.f32.mrf.mxu1  ;;  %v17035_v1 = vadd.f32 %v1817_v36, %v1705_v32  ;;  %v1707_v63 = vadd.f32 %v1706_v58, %v17002_v26  ;;  %v2870_v36 = vsel %vm17022_vm6, 0, %v2869_v3 }
 0x117   :  { %v1710_v0 = vpop.f32.mrf.mxu0  ;;  %2401 = vmatmul.mubr.bf16.gmra.mxu0 %v16521_v5  ;;  %v2845_v5 = vld [vmem:[#allocation2 + $0xc] sm:$0x6]  ;;  %2871 = vst [vmem:[#allocation2 + $0x4c] sm:$0x6] %v2870_v36 }
 0x118   :  { %v1823_v6 = vpop.f32.mrf.mxu1  ;;  %2304 = vmatmul.mubr.bf16.gmra.mxu1 %v16519_v4  ;;  %v17040_v25 = vadd.f32 %v1819_v59, %v1707_v63  ;;  %v1711_v16 = vadd.f32 %v1710_v0, %v16999_v57  ;;  %2408 = vmatprep.mubr.bf16.mxu0 %v16534_v12  ;;  %v2797_v59 = vld [vmem:[#allocation2 + $0x10] sm:$0x3] }
 0x119   :  { %2311 = vmatprep.mubr.bf16.mxu1 %v16532_v11  ;;  %v1712_v24 = vpop.f32.mrf.mxu0  ;;  %v2846_v11 = vsel %vm17022_vm6, 0, %v2845_v5  ;;  %v2798_v0 = vsel %vm17015_vm3, 0, %v2797_v59  ;;  %v2875_v59 = vld [vmem:[#allocation2 + $0x5c] sm:$0x6] }
 0x11a   :  { %v1825_v4 = vpop.f32.mrf.mxu1  ;;  %v17049_v21 = vadd.f32 %v1823_v6, %v1711_v16  ;;  %v1713_v41 = vadd.f32 %v1712_v24, %v17002_v26  ;;  %2847 = vst [vmem:[#allocation2 + $0xc] sm:$0x6] %v2846_v11  ;;  %2799 = vst [vmem:[#allocation2 + $0x10] sm:$0x3] %v2798_v0  ;;  %v2821_v16 = vld [vmem:[#allocation2 + $0x50] sm:$0x3] }
 0x11b   :  { %v1714_v12 = vpop.f32.mrf.mxu0 }
 0x11c   :  { %v1827_v49 = vpop.f32.mrf.mxu1  ;;  %v17056_v50 = vadd.f32 %v1825_v4, %v1713_v41  ;;  %v1715_v19 = vadd.f32 %v1714_v12, %v16999_v57  ;;  %v2873_v4 = vsel %vm17022_vm6, 0, %v2872_v23  ;;  %v2800_v12 = vld [vmem:[#allocation2 + $0x18] sm:$0x3] }
 0x11d   :  { %v1716_v43 = vpop.f32.mrf.mxu0  ;;  %2874 = vst [vmem:[#allocation2 + $0x54] sm:$0x6] %v2873_v4 }
 0x11e   :  { %v1829_v32 = vpop.f32.mrf.mxu1  ;;  %v17059_v34 = vadd.f32 %v1827_v49, %v1715_v19  ;;  %v1717_v39 = vadd.f32 %v1716_v43, %v17002_v26  ;;  %v2824_v49 = vld [vmem:[#allocation2 + $0x58] sm:$0x3]  ;;  %v2801_v43 = vsel %vm17015_vm3, 0, %v2800_v12 }
 0x11f   :  { %v1720_v28 = vpop.f32.mrf.mxu0  ;;  %2409 = vmatmul.mubr.bf16.gmra.mxu0 %v16551_v30  ;;  %2802 = vst [vmem:[#allocation2 + $0x18] sm:$0x3] %v2801_v43 }
 0x120   :  { %v1833_v58 = vpop.f32.mrf.mxu1  ;;  %2312 = vmatmul.mubr.bf16.gmra.mxu1 %v16549_v29  ;;  %v17064_v33 = vadd.f32 %v1829_v32, %v1717_v39  ;;  %v1721_v63 = vadd.f32 %v1720_v28, %v16999_v57  ;;  %2416 = vmatprep.mubr.bf16.mxu0 %v16573_v47  ;;  %v2825_v32 = vsel %vm17015_vm3, 0, %v2824_v49  ;;  %v2803_v49 = vld [vmem:[#allocation2 + $0x20] sm:$0x3] }
 0x121   :  { %2319 = vmatprep.mubr.bf16.mxu1 %v16571_v46  ;;  %v1722_v6 = vpop.f32.mrf.mxu0  ;;  %v2822_v46 = vsel %vm17015_vm3, 0, %v2821_v16  ;;  %2826 = vst [vmem:[#allocation2 + $0x58] sm:$0x3] %v2825_v32  ;;  %v14876_v32 = vld [vmem:[%s22089_s1 + $0x620] ss:$12 sps:$4 sm:$0xff]  }
 0x122   :  { %v1835_v53 = vpop.f32.mrf.mxu1  ;;  %v17071_v29 = vadd.f32 %v1833_v58, %v1721_v63  ;;  %v1723_v30 = vadd.f32 %v1722_v6, %v17002_v26  ;;  %2823 = vst [vmem:[#allocation2 + $0x50] sm:$0x3] %v2822_v46  ;;  %v2851_v58 = vld [vmem:[#allocation2 + $0x1c] sm:$0x6] }
 0x123   :  { %v1724_v47 = vpop.f32.mrf.mxu0  ;;  %v2852_v6 = vsel %vm17022_vm6, 0, %v2851_v58  ;;  %v2827_v58 = vld [vmem:[#allocation2 + $0x60] sm:$0x3] }
 0x124   :  { %v1837_v24 = vpop.f32.mrf.mxu1  ;;  %v17080_v5 = vadd.f32 %v1835_v53, %v1723_v30  ;;  %v1725_v3 = vadd.f32 %v1724_v47, %v16999_v57  ;;  %2853 = vst [vmem:[#allocation2 + $0x1c] sm:$0x6] %v2852_v6  ;;  %v14878_v47 = vld [vmem:[%s22091_s3 + $0x70] ss:$8 sps:$4 sm:$0xff]   ;;  %v2828_v6 = vsel %vm17015_vm3, 0, %v2827_v58 }
 0x125   :  { %v1726_v41 = vpop.f32.mrf.mxu0  ;;  %2829 = vst [vmem:[#allocation2 + $0x60] sm:$0x3] %v2828_v6 }
 0x126   :  { %v1839_v11 = vpop.f32.mrf.mxu1  ;;  %v17083_v36 = vadd.f32 %v1837_v24, %v1725_v3  ;;  %v1727_v19 = vadd.f32 %v1726_v41, %v17002_v26  ;;  %v14875_v3 = vld [vmem:[%s22089_s1 + $0x638] ss:$12 sps:$4 sm:$0xff]  }
 0x127   :  { %v1730_v39 = vpop.f32.mrf.mxu0  ;;  %2417 = vmatmul.mubr.bf16.gmra.mxu0 %v16587_v62  ;;  %v14886_v41 = vld [vmem:[%s22091_s3 + $0x64] ss:$8 sps:$4 sm:$0xff]  }
 0x128   :  { %v1843_v28 = vpop.f32.mrf.mxu1  ;;  %2320 = vmatmul.mubr.bf16.gmra.mxu1 %v16585_v61  ;;  %v17092_v63 = vadd.f32 %v1839_v11, %v1727_v19  ;;  %v1731_v0 = vadd.f32 %v1730_v39, %v16999_v57  ;;  %2554 = vmatprep.mubr.bf16.mxu0 %v16606_v18  ;;  %v2876_v61 = vsel %vm17022_vm6, 0, %v2875_v59  ;;  %v2804_v39 = vsel %vm17015_vm3, 0, %v2803_v49 }
 0x129   :  { %2457 = vmatprep.mubr.bf16.mxu1 %v16604_v13  ;;  %v1732_v53 = vpop.f32.mrf.mxu0  ;;  %2877 = vst [vmem:[#allocation2 + $0x5c] sm:$0x6] %v2876_v61  ;;  %2805 = vst [vmem:[#allocation2 + $0x20] sm:$0x3] %v2804_v39  ;;  %v2878_v61 = vld [vmem:[#allocation2 + $0x64] sm:$0x6] }
 0x12a   :  { %v1845_v62 = vpop.f32.mrf.mxu1  ;;  %v17101_v54 = vadd.f32 %v1843_v28, %v1731_v0  ;;  %v1733_v16 = vadd.f32 %v1732_v53, %v17002_v26  ;;  %v14892_v0 = vld [vmem:[%s22091_s3 + $0x54] ss:$8 sps:$4 sm:$0xff]  }
 0x12b   :  { %v1734_v30 = vpop.f32.mrf.mxu0 }
 0x12c   :  { %v1847_v17 = vpop.f32.mrf.mxu1  ;;  %v17104_v46 = vadd.f32 %v1845_v62, %v1733_v16  ;;  %v1735_v13 = vadd.f32 %v1734_v30, %v16999_v57  ;;  %v14890_v16 = vld [vmem:[%s22091_s3 + $0x50] ss:$8 sps:$4 sm:$0xff]   ;;  %v2879_v30 = vsel %vm17022_vm6, 0, %v2878_v61 }
 0x12d   :  { %v1736_v18 = vpop.f32.mrf.mxu0  ;;  %2880 = vst [vmem:[#allocation2 + $0x64] sm:$0x6] %v2879_v30 }
 0x12e   :  { %v1849_v23 = vpop.f32.mrf.mxu1  ;;  %v17110_v24 = vadd.f32 %v1847_v17, %v1735_v13  ;;  %v1737_v4 = vadd.f32 %v1736_v18, %v17002_v26  ;;  %v14877_v18 = vld [vmem:[%s22089_s1 + $0x608] ss:$12 sps:$4 sm:$0xff]  }
 0x12f   :  { %v1740_v11 = vpop.f32.mrf.mxu0  ;;  %2555 = vmatmul.mubr.bf16.vlgmr.msra.gmra.mxu0 %v16620_v38  ;;  %v14884_v38 = vld [vmem:[%s22091_s3 + $0x60] ss:$8 sps:$4 sm:$0xff]  }
 0x130   :  { %v1853_v12 = vpop.f32.mrf.mxu1  ;;  %2458 = vmatmul.mubr.bf16.vlgmr.msra.gmra.mxu1 %v16618_v35  ;;  %v17121_v19 = vadd.f32 %v1849_v23, %v1737_v4  ;;  %v1741_v43 = vadd.f32 %v1740_v11, %v16999_v57  ;;  %2562 = vmatprep.mubr.bf16.mxu0 %v16627_v45  ;;  %v14898_v23 = vld [vmem:[%s22091_s3 + $0x44] ss:$8 sps:$4 sm:$0xff]   ;;  %v2830_v4 = vld [vmem:[#allocation2 + $0x68] sm:$0x3] }
 0x131   :  { %2465 = vmatprep.mubr.bf16.mxu1 %v16625_v42  ;;  %v1742_v28 = vpop.f32.mrf.mxu0  ;;  %14570 = vmatpush3.bf16.msra.mxu1 %v16993_v15  ;;  %v2854_v42 = vld [vmem:[#allocation2 + $0x24] sm:$0x6]  ;;  %v2831_v49 = vsel %vm17015_vm3, 0, %v2830_v4 }
 0x132   :  { %v1855_v35 = vpop.f32.mrf.mxu1  ;;  %5761 = vmatpush1.bf16.msra.mxu0 %v14878_v47  ;;  %v17135_v45 = vadd.f32 %v1853_v12, %v1741_v43  ;;  %v1743_v59 = vadd.f32 %v1742_v28, %v17002_v26  ;;  %14571 = vmatprep.subr.bf16.mxu1 %v14875_v3  ;;  %v2855_v15 = vsel %vm17022_vm6, 0, %v2854_v42  ;;  %v2806_v47 = vld [vmem:[#allocation2 + $0x28] sm:$0x3]  ;;  %v2857_v28 = vld [vmem:[#allocation2 + $0x2c] sm:$0x6] }
 0x133   :  { %5762 = vmatprep.subr.bf16.mxu0 %v14886_v41  ;;  %v1744_v53 = vpop.f32.mrf.mxu0  ;;  %2856 = vst [vmem:[#allocation2 + $0x24] sm:$0x6] %v2855_v15  ;;  %v2807_v12 = vsel %vm17015_vm3, 0, %v2806_v47  ;;  %2832 = vst [vmem:[#allocation2 + $0x68] sm:$0x3] %v2831_v49 }
 0x134   :  { %v1857_v62 = vpop.f32.mrf.mxu1  ;;  %v17150_v17 = vadd.f32 %v1855_v35, %v1743_v59  ;;  %v1745_v13 = vadd.f32 %v1744_v53, %v16999_v57  ;;  %2808 = vst [vmem:[#allocation2 + $0x28] sm:$0x3] %v2807_v12  ;;  %v2881_v35 = vld [vmem:[#allocation2 + $0x6c] sm:$0x6]  ;;  %v2833_v12 = vld [vmem:[#allocation2 + $0x70] sm:$0x3] }
 0x135   :  { %v1746_v41 = vpop.f32.mrf.mxu0  ;;  %14572 = vmatpush3.bf16.msra.mxu1 %v14875_v3  ;;  %v2858_v3 = vsel %vm17022_vm6, 0, %v2857_v28  ;;  %v14910_v28 = vld [vmem:[%s22091_s3 + $0x24] ss:$8 sps:$4 sm:$0xff]  }
 0x136   :  { %v1859_v11 = vpop.f32.mrf.mxu1  ;;  %5763 = vmatpush1.bf16.msra.mxu0 %v14884_v38  ;;  %v17163_v43 = vadd.f32 %v1857_v62, %v1745_v13  ;;  %v1747_v39 = vadd.f32 %v1746_v41, %v17002_v26  ;;  %14573 = vmatprep.subr.bf16.mxu1 %v14876_v32  ;;  %v2882_v38 = vsel %vm17022_vm6, 0, %v2881_v35  ;;  %2859 = vst [vmem:[#allocation2 + $0x2c] sm:$0x6] %v2858_v3  ;;  %v14904_v62 = vld [vmem:[%s22091_s3 + $0x34] ss:$8 sps:$4 sm:$0xff]   ;;  %v2834_v35 = vsel %vm17015_vm3, 0, %v2833_v12 }
 0x137   :  { %5764 = vmatprep.subr.bf16.mxu0 %v14892_v0  ;;  %v1750_v42 = vpop.f32.mrf.mxu0  ;;  %2563 = vmatmul.mubr.bf16.gmra.mxu0 %v16644_v8  ;;  %2883 = vst [vmem:[#allocation2 + $0x6c] sm:$0x6] %v2882_v38  ;;  %v2809_v8 = vld [vmem:[#allocation2 + $0x30] sm:$0x3]  ;;  %2835 = vst [vmem:[#allocation2 + $0x70] sm:$0x3] %v2834_v35 }
 0x138   :  { %v1863_v58 = vpop.f32.mrf.mxu1  ;;  %2466 = vmatmul.mubr.bf16.gmra.mxu1 %v16642_v7  ;;  %v17172_v59 = vadd.f32 %v1859_v11, %v1747_v39  ;;  %v1751_v0 = vadd.f32 %v1750_v42, %v16999_v57  ;;  %2570 = vmatprep.mubr.bf16.mxu0 %v16648_v10  ;;  %v14896_v7 = vld [vmem:[%s22091_s3 + $0x40] ss:$8 sps:$4 sm:$0xff]   ;;  %v2810_v61 = vsel %vm17015_vm3, 0, %v2809_v8  ;;  %v14883_v10 = vld [vmem:[%s22091_s3 + $0x174] ss:$8 sps:$4 sm:$0xff]  }
 0x139   :  { %2473 = vmatprep.mubr.bf16.mxu1 %v16646_v9  ;;  %v1752_v15 = vpop.f32.mrf.mxu0  ;;  %14574 = vmatpush3.bf16.msra.mxu1 %v14876_v32  ;;  %2811 = vst [vmem:[#allocation2 + $0x30] sm:$0x3] %v2810_v61  ;;  %v2860_v32 = vld [vmem:[#allocation2 + $0x34] sm:$0x6]  ;;  %v2812_v61 = vld [vmem:[#allocation2 + $0x38] sm:$0x3] }
 0x13a   :  { %v1865_v6 = vpop.f32.mrf.mxu1  ;;  %5765 = vmatpush1.bf16.msra.mxu0 %v14890_v16  ;;  %v17182_v53 = vadd.f32 %v1863_v58, %v1751_v0  ;;  %v1753_v9 = vadd.f32 %v1752_v15, %v17002_v26  ;;  %14575 = vmatprep.subr.bf16.mxu1 %v14877_v18  ;;  %v2861_v13 = vsel %vm17022_vm6, 0, %v2860_v32  ;;  %v2884_v58 = vld [vmem:[#allocation2 + $0x74] sm:$0x6]  ;;  %v22193_v0 = vld [vmem:[#allocation11_spill] sm:$0xff]  ;;  %v2813_v32 = vsel %vm17015_vm3, 0, %v2812_v61 }
 0x13b   :  { %5766 = vmatprep.subr.bf16.mxu0 %v14898_v23  ;;  %v1754_v16 = vpop.f32.mrf.mxu0  ;;  %2862 = vst [vmem:[#allocation2 + $0x34] sm:$0x6] %v2861_v13  ;;  %v14902_v23 = vld [vmem:[%s22091_s3 + $0x30] ss:$8 sps:$4 sm:$0xff]   ;;  %2814 = vst [vmem:[#allocation2 + $0x38] sm:$0x3] %v2813_v32 }
 0x13c   :  { %v1867_v30 = vpop.f32.mrf.mxu1  ;;  %v17193_v47 = vadd.f32 %v1865_v6, %v1753_v9  ;;  %v1755_v4 = vadd.f32 %v1754_v16, %v16999_v57  ;;  %v2836_v9 = vld [vmem:[#allocation2 + $0x78] sm:$0x3] }
 0x13d   :  { %v1756_v41 = vpop.f32.mrf.mxu0  ;;  %14576 = vmatpush3.bf16.msra.mxu1 %v14877_v18  ;;  %v2837_v16 = vsel %vm17015_vm3, 0, %v2836_v9  ;;  %v14914_v12 = vld [vmem:[%s22091_s3 + $0x10] ss:$8 sps:$4 sm:$0xff]   ;;  %v14928_v9 = vld [vmem:[%s22091_s3 + $0xf4] ss:$8 sps:$4 sm:$0xff]  }
 0x13e   :  { %v1869_v11 = vpop.f32.mrf.mxu1  ;;  %5767 = vmatpush1.bf16.msra.mxu0 %v14896_v7  ;;  %v17199_v49 = vadd.f32 %v1867_v30, %v1755_v4  ;;  %v1757_v39 = vadd.f32 %v1756_v41, %v17002_v26  ;;  %5873 = vmatprep.subr.bf16.mxu1 %v14883_v10  ;;  %v2885_v7 = vsel %vm17022_vm6, 0, %v2884_v58  ;;  %v2863_v4 = vld [vmem:[#allocation2 + $0x3c] sm:$0x6]  ;;  %2838 = vst [vmem:[#allocation2 + $0x78] sm:$0x3] %v2837_v16 }
 0x13f   :  { %5768 = vmatprep.subr.bf16.mxu0 %v14904_v62  ;;  %v1760_v18 = vpop.f32.mrf.mxu0  ;;  %2571 = vmatmul.mubr.bf16.gmra.mxu0 %v16668_v52  ;;  %2886 = vst [vmem:[#allocation2 + $0x74] sm:$0x6] %v2885_v7  ;;  %v2887_v41 = vld [vmem:[#allocation2 + $0x7c] sm:$0x6] }
 0x140   :  { %v1873_v42 = vpop.f32.mrf.mxu1  ;;  %2474 = vmatmul.mubr.bf16.gmra.mxu1 %v16666_v51  ;;  %v17209_v3 = vadd.f32 %v1869_v11, %v1757_v39  ;;  %v1761_v38 = vadd.f32 %v1760_v18, %v16999_v57  ;;  %2578 = vmatprep.mubr.bf16.mxu0 %v22193_v0  ;;  %v14908_v51 = vld [vmem:[%s22091_s3 + $0x20] ss:$8 sps:$4 sm:$0xff]   ;;  %v2864_v39 = vsel %vm17022_vm6, 0, %v2863_v4 }
 0x141   :  { %2481 = vmatprep.mubr.bf16.mxu1 %v16670_v55  ;;  %v1762_v8 = vpop.f32.mrf.mxu0  ;;  %v14916_v55 = vld [vmem:[%s22091_s3 + $0x14] ss:$8 sps:$4 sm:$0xff]   ;;  %2865 = vst [vmem:[#allocation2 + $0x3c] sm:$0x6] %v2864_v39  ;;  %v22194_v0 = vld [vmem:[#allocation12_spill] sm:$0xff] }
 0x142   :  { %v1875_v15 = vpop.f32.mrf.mxu1  ;;  %5769 = vmatpush1.bf16.msra.mxu0 %v14902_v23  ;;  %v17219_v52 = vadd.f32 %v1873_v42, %v1761_v38  ;;  %v1763_v6 = vadd.f32 %v1762_v8, %v17002_v26  ;;  %v14922_v42 = vld [vmem:[%s22091_s3 + $0x4] ss:$8 sps:$4 sm:$0xff]   ;;  %v22195_v8 = vld [vmem:[#allocation13_spill] sm:$0xff] }
 0x143   :  { %5770 = vmatprep.subr.bf16.mxu0 %v14910_v28  ;;  %v1764_v10 = vpop.f32.mrf.mxu0  ;;  %v2888_v28 = vsel %vm17022_vm6, 0, %v2887_v41  ;;  %v14926_v41 = vld [vmem:[%s22091_s3 + $0xf0] ss:$8 sps:$4 sm:$0xff]   ;;  %vm18403_vm6 = vmor %vm2788_vm1, %vm4109_vm5 }
 0x144   :  { %v1877_v62 = vpop.f32.mrf.mxu1  ;;  %v17229_v30 = vadd.f32 %v1875_v15, %v1763_v6  ;;  %v1765_v13 = vadd.f32 %v1764_v10, %v16999_v57  ;;  %2889 = vst [vmem:[#allocation2 + $0x7c] sm:$0x6] %v2888_v28  ;;  %v22196_v15 = vld [vmem:[#allocation14_spill] sm:$0xff]  ;;  %vm18432_vm1 = vmor %vm2789_vm2, %vm4239_vm7 }
 0x145   :  { %v1766_v11 = vpop.f32.mrf.mxu0 }
 0x146   :  { %v1879_v23 = vpop.f32.mrf.mxu1  ;;  %5771 = vmatpush1.bf16.msra.mxu0 %v14908_v51  ;;  %v17239_v35 = vadd.f32 %v1877_v62, %v1765_v13  ;;  %v1767_v18 = vadd.f32 %v1766_v11, %v17002_v26  ;;  %v14920_v51 = vld [vmem:[%s22091_s3] ss:$8 sps:$4 sm:$0xff]  }
 0x147   :  { %5772 = vmatprep.subr.bf16.mxu0 %v14916_v55  ;;  %v1770_v58 = vpop.f32.mrf.mxu0  ;;  %2579 = vmatmul.mubr.bf16.gmra.mxu0 %v22194_v0  ;;  %v14940_v0 = vld [vmem:[%s22091_s3 + $0xd4] ss:$8 sps:$4 sm:$0xff]  }
 0x148   :  { %v1883_v38 = vpop.f32.mrf.mxu1  ;;  %2482 = vmatmul.mubr.bf16.gmra.mxu1 %v16681_v22  ;;  %v17247_v7 = vadd.f32 %v1879_v23, %v1767_v18  ;;  %v1771_v37 = vadd.f32 %v1770_v58, %v16999_v57  ;;  %2586 = vmatprep.mubr.bf16.mxu0 %v22196_v15  ;;  %v22198_v18 = vld [vmem:[#allocation16_spill] sm:$0xff] }
 0x149   :  { %2489 = vmatprep.mubr.bf16.mxu1 %v22195_v8  ;;  %v1772_v6 = vpop.f32.mrf.mxu0 }
 0x14a   :  { %v1885_v55 = vpop.f32.mrf.mxu1  ;;  %5773 = vmatpush1.bf16.msra.mxu0 %v14914_v12  ;;  %v17255_v61 = vadd.f32 %v1883_v38, %v1771_v37  ;;  %v1773_v22 = vadd.f32 %v1772_v6, %v17002_v26  ;;  %v14934_v12 = vld [vmem:[%s22091_s3 + $0xe4] ss:$8 sps:$4 sm:$0xff]   ;;  %v22200_v38 = vld [vmem:[#allocation18_spill] sm:$0xff] }
 0x14b   :  { %5774 = vmatprep.subr.bf16.mxu0 %v14922_v42  ;;  %v1774_v10 = vpop.f32.mrf.mxu0  ;;  %v14932_v42 = vld [vmem:[%s22091_s3 + $0xe0] ss:$8 sps:$4 sm:$0xff]  }
 0x14c   :  { %v1887_v62 = vpop.f32.mrf.mxu1  ;;  %v17261_v32 = vadd.f32 %v1885_v55, %v1773_v22  ;;  %v1775_v16 = vadd.f32 %v1774_v10, %v16999_v57  ;;  %v22197_v57 = vld [vmem:[#allocation15_spill] sm:$0xff]  ;;  %v14938_v10 = vld [vmem:[%s22091_s3 + $0xd0] ss:$8 sps:$4 sm:$0xff]  }
 0x14d   :  { %v1776_v13 = vpop.f32.mrf.mxu0 }
 0x14e   :  { %v1889_v4 = vpop.f32.mrf.mxu1  ;;  %5775 = vmatpush1.bf16.msra.mxu0 %v14920_v51  ;;  %v17267_v11 = vadd.f32 %v1887_v62, %v1775_v16  ;;  %v1777_v23 = vadd.f32 %v1776_v13, %v17002_v26  ;;  %v22199_v26 = vld [vmem:[#allocation17_spill] sm:$0xff] }
 0x14f   :  { %5776 = vmatprep.subr.bf16.mxu0 %v14928_v9  ;;  %v17273_v39 = vpop.f32.mrf.mxu0  ;;  %2587 = vmatmul.mubr.bf16.gmra.mxu0 %v22198_v18  ;;  %v14952_v18 = vld [vmem:[%s22091_s3 + $0xb4] ss:$8 sps:$4 sm:$0xff]  }
 0x150   :  { %v17275_v28 = vpop.f32.mrf.mxu1  ;;  %2490 = vmatmul.mubr.bf16.gmra.mxu1 %v22197_v57  ;;  %v17282_v58 = vadd.f32 %v1889_v4, %v1777_v23  ;;  %2594 = vmatprep.mubr.bf16.mxu0 %v22200_v38  ;;  %v22201_v4 = vld [vmem:[#allocation19_spill] sm:$0xff]  ;;  %v22203_v57 = vld [vmem:[#allocation21_spill] sm:$0xff] }
 0x151   :  { %2497 = vmatprep.mubr.bf16.mxu1 %v22199_v26  ;;  %v1928_v37 = vpop.f32.mrf.mxu0 }
 0x152   :  { %v2041_v8 = vpop.f32.mrf.mxu1  ;;  %5777 = vmatpush2.bf16.msra.mxu0 %v14926_v41  ;;  %v1929_v15 = vadd.f32 %v1928_v37, %v17026_v44  ;;  %v14946_v44 = vld [vmem:[%s22091_s3 + $0xc4] ss:$8 sps:$4 sm:$0xff]   ;;  %v14944_v41 = vld [vmem:[%s22091_s3 + $0xc0] ss:$8 sps:$4 sm:$0xff]  }
 0x153   :  { %5778 = vmatprep.subr.bf16.mxu0 %v14934_v12  ;;  %v17290_v51 = vpop.f32.mrf.mxu0 }
 0x154   :  { %v17292_v6 = vpop.f32.mrf.mxu1  ;;  %v17294_v55 = vadd.f32 %v2041_v8, %v1929_v15 }
 0x155   :  { %v1932_v22 = vpop.f32.mrf.mxu0 }
 0x156   :  { %v2045_v9 = vpop.f32.mrf.mxu1  ;;  %5779 = vmatpush2.bf16.msra.mxu0 %v14932_v42  ;;  %v1933_v62 = vadd.f32 %v1932_v22, %v17040_v25  ;;  %v22202_v25 = vld [vmem:[#allocation20_spill] sm:$0xff] }
 0x157   :  { %5780 = vmatprep.subr.bf16.mxu0 %v14940_v0  ;;  %v1936_v16 = vpop.f32.mrf.mxu0  ;;  %2595 = vmatmul.mubr.bf16.gmra.mxu0 %v22201_v4  ;;  %v14958_v22 = vld [vmem:[%s22091_s3 + $0xa4] ss:$8 sps:$4 sm:$0xff]  }
 0x158   :  { %v2049_v13 = vpop.f32.mrf.mxu1  ;;  %2498 = vmatmul.mubr.bf16.gmra.mxu1 %v16705_v56  ;;  %v17308_v23 = vadd.f32 %v2045_v9, %v1933_v62  ;;  %v1937_v12 = vadd.f32 %v1936_v16, %v17049_v21  ;;  %2602 = vmatprep.mubr.bf16.mxu0 %v22203_v57  ;;  %v14950_v21 = vld [vmem:[%s22091_s3 + $0xb0] ss:$8 sps:$4 sm:$0xff]   ;;  %v22205_v4 = vld [vmem:[#allocation23_spill] sm:$0xff] }
 0x159   :  { %2505 = vmatprep.mubr.bf16.mxu1 %v22202_v25  ;;  %v1938_v42 = vpop.f32.mrf.mxu0  ;;  %v22207_v57 = vld [vmem:[#allocation25_spill] sm:$0xff] }
 0x15a   :  { %v2051_v56 = vpop.f32.mrf.mxu1  ;;  %5781 = vmatpush2.bf16.msra.mxu0 %v14938_v10  ;;  %v17316_v26 = vadd.f32 %v2049_v13, %v1937_v12  ;;  %v1939_v38 = vadd.f32 %v1938_v42, %v17056_v50  ;;  %v22204_v13 = vld [vmem:[#allocation22_spill] sm:$0xff] }
 0x15b   :  { %5782 = vmatprep.subr.bf16.mxu0 %v14946_v44  ;;  %v1940_v0 = vpop.f32.mrf.mxu0 }
 0x15c   :  { %v2053_v37 = vpop.f32.mrf.mxu1  ;;  %v17322_v8 = vadd.f32 %v2051_v56, %v1939_v38  ;;  %v1941_v15 = vadd.f32 %v1940_v0, %v17059_v34  ;;  %v14956_v34 = vld [vmem:[%s22091_s3 + $0xa0] ss:$8 sps:$4 sm:$0xff]  }
 0x15d   :  { %v1942_v9 = vpop.f32.mrf.mxu0 }
 0x15e   :  { %v2055_v10 = vpop.f32.mrf.mxu1  ;;  %5783 = vmatpush2.bf16.msra.mxu0 %v14944_v41  ;;  %v17328_v62 = vadd.f32 %v2053_v37, %v1941_v15  ;;  %v1943_v50 = vadd.f32 %v1942_v9, %v17064_v33  ;;  %v22206_v41 = vld [vmem:[#allocation24_spill] sm:$0xff]  ;;  %v14964_v33 = vld [vmem:[%s22091_s3 + $0x94] ss:$8 sps:$4 sm:$0xff]  }
 0x15f   :  { %5784 = vmatprep.subr.bf16.mxu0 %v14952_v18  ;;  %v1946_v44 = vpop.f32.mrf.mxu0  ;;  %2603 = vmatmul.mubr.bf16.gmra.mxu0 %v22205_v4  ;;  %v22210_v4 = vld [vmem:[#allocation27_spill] sm:$0xff] }
 0x160   :  { %v2059_v16 = vpop.f32.mrf.mxu1  ;;  %2506 = vmatmul.mubr.bf16.gmra.mxu1 %v22204_v13  ;;  %v17336_v12 = vadd.f32 %v2055_v10, %v1943_v50  ;;  %v1947_v25 = vadd.f32 %v1946_v44, %v17071_v29  ;;  %2610 = vmatprep.mubr.bf16.mxu0 %v22207_v57  ;;  %v14962_v29 = vld [vmem:[%s22091_s3 + $0x90] ss:$8 sps:$4 sm:$0xff]   ;;  %v14970_v10 = vld [vmem:[%s22091_s3 + $0x84] ss:$8 sps:$4 sm:$0xff]  }
 0x161   :  { %2513 = vmatprep.mubr.bf16.mxu1 %v22206_v41  ;;  %v1948_v18 = vpop.f32.mrf.mxu0  ;;  %v22209_v13 = vld [vmem:[#allocation26_spill] sm:$0xff]  ;;  %v22212_v41 = vld [vmem:[#allocation28_spill] sm:$0xff] }
 0x162   :  { %v2061_v42 = vpop.f32.mrf.mxu1  ;;  %5785 = vmatpush2.bf16.msra.mxu0 %v14950_v21  ;;  %v17344_v56 = vadd.f32 %v2059_v16, %v1947_v25  ;;  %v1949_v38 = vadd.f32 %v1948_v18, %v17080_v5 }
 0x163   :  { %5786 = vmatprep.subr.bf16.mxu0 %v14958_v22  ;;  %v1950_v0 = vpop.f32.mrf.mxu0 }
 0x164   :  { %v2063_v37 = vpop.f32.mrf.mxu1  ;;  %v17350_v15 = vadd.f32 %v2061_v42, %v1949_v38  ;;  %v1951_v9 = vadd.f32 %v1950_v0, %v17083_v36 }
 0x165   :  { %v1952_v21 = vpop.f32.mrf.mxu0 }
 0x166   :  { %v2065_v50 = vpop.f32.mrf.mxu1  ;;  %5787 = vmatpush2.bf16.msra.mxu0 %v14956_v34  ;;  %v17356_v44 = vadd.f32 %v2063_v37, %v1951_v9  ;;  %v1953_v5 = vadd.f32 %v1952_v21, %v17092_v63  ;;  %v14968_v34 = vld [vmem:[%s22091_s3 + $0x80] ss:$8 sps:$4 sm:$0xff]   ;;  %v14982_v63 = vld [vmem:[%s22091_s3 + $0x274] ss:$8 sps:$4 sm:$0xff]   ;;  %v14889_v37 = vld [vmem:[%s22091_s3 + $0x164] ss:$8 sps:$4 sm:$0xff]  }
 0x167   :  { %5788 = vmatprep.subr.bf16.mxu0 %v14964_v33  ;;  %v1956_v22 = vpop.f32.mrf.mxu0  ;;  %2611 = vmatmul.mubr.bf16.gmra.mxu0 %v22210_v4 }
 0x168   :  { %22208 = vst [vmem:[#allocation11_spill] sm:$0xff] %v17356_v44  ;;  %v2069_v16 = vpop.f32.mrf.mxu1  ;;  %2514 = vmatmul.mubr.bf16.gmra.mxu1 %v22209_v13  ;;  %v17361_v25 = vadd.f32 %v2065_v50, %v1953_v5  ;;  %v1957_v36 = vadd.f32 %v1956_v22, %v17101_v54  ;;  %v14881_v54 = vld [vmem:[%s22091_s3 + $0x170] ss:$8 sps:$4 sm:$0xff]  }
 0x169   :  { %14577 = vmatprep.mubr.msk.bf16.mxu1 %vm1641_vm0, %v22212_v41  ;;  %v1958_v57 = vpop.f32.mrf.mxu0  ;;  %v22216_v13 = vld [vmem:[#allocation30_spill] sm:$0xff] }
 0x16a   :  { %22211 = vst [vmem:[#allocation12_spill] sm:$0xff] %v17361_v25  ;;  %v2071_v33 = vpop.f32.mrf.mxu1  ;;  %5789 = vmatpush2.bf16.msra.mxu0 %v14962_v29  ;;  %v17372_v18 = vadd.f32 %v2069_v16, %v1957_v36  ;;  %v1959_v42 = vadd.f32 %v1958_v57, %v17104_v46  ;;  %v22218_v36 = vld [vmem:[#allocation32_spill] sm:$0xff] }
 0x16b   :  { %5790 = vmatprep.subr.bf16.mxu0 %v14970_v10  ;;  %v1960_v38 = vpop.f32.mrf.mxu0  ;;  %v14887_v10 = vld [vmem:[%s22091_s3 + $0x160] ss:$8 sps:$4 sm:$0xff]  }
 0x16c   :  { %22213 = vst [vmem:[#allocation13_spill] sm:$0xff] %v17372_v18  ;;  %v2073_v0 = vpop.f32.mrf.mxu1  ;;  %v17381_v9 = vadd.f32 %v2071_v33, %v1959_v42  ;;  %v1961_v21 = vadd.f32 %v1960_v38, %v17110_v24  ;;  %v14895_v24 = vld [vmem:[%s22091_s3 + $0x154] ss:$8 sps:$4 sm:$0xff]   ;;  %v1931_v18 = vadd.f32 %v17290_v51, %v17035_v1  ;;  %v15878_v1 = vld [vmem:[%s22090_s2] sm:$0x7] }
 0x16d   :  { %v1962_v29 = vpop.f32.mrf.mxu0 }
 0x16e   :  { %22214 = vst [vmem:[#allocation14_spill] sm:$0xff] %v17381_v9  ;;  %v2075_v50 = vpop.f32.mrf.mxu1  ;;  %5791 = vmatpush2.bf16.msra.mxu0 %v14968_v34  ;;  %v17384_v5 = vadd.f32 %v2073_v0, %v1961_v21  ;;  %v1963_v46 = vadd.f32 %v1962_v29, %v17121_v19  ;;  %v14899_v21 = vld [vmem:[%s22091_s3 + $0x140] ss:$8 sps:$4 sm:$0xff]   ;;  %v14907_v29 = vld [vmem:[%s22091_s3 + $0x134] ss:$8 sps:$4 sm:$0xff]  }
 0x16f   :  { %5986 = vmatprep.subr.bf16.mxu0 %v14982_v63  ;;  %v17390_v22 = vpop.f32.mrf.mxu0  ;;  %v14893_v63 = vld [vmem:[%s22091_s3 + $0x150] ss:$8 sps:$4 sm:$0xff]  }
 0x170   :  { %22215 = vst [vmem:[#allocation15_spill] sm:$0xff] %v17384_v5  ;;  %v17392_v16 = vpop.f32.mrf.mxu1  ;;  %14578 = vmatmul.mubr.msk.bf16.vlgmr.msra.gmra.mxu1 %vm1641_vm0, %v22216_v13  ;;  %v17399_v4 = vadd.f32 %v2075_v50, %v1963_v46  ;;  %v22219_v50 = vld [vmem:[#allocation29_spill] sm:$0xff]  ;;  %v1967_v25 = vadd.f32 %v17390_v22, %v17135_v45  ;;  %v22223_v45 = vsub.s32 2, %v16963_v2 }
 0x171   :  { %14581 = vmatprep.mubr.msk.bf16.mxu1 %vm1641_vm0, %v22218_v36  ;;  %5874 = vmatpush1.bf16.msra.mxu1 %v14881_v54  ;;  %v1968_v19 = vpop.f32.mrf.mxu0  ;;  %v14901_v54 = vld [vmem:[%s22091_s3 + $0x144] ss:$8 sps:$4 sm:$0xff]  }
 0x172   :  { %22217 = vst [vmem:[#allocation16_spill] sm:$0xff] %v17399_v4  ;;  %v2081_v41 = vpop.f32.mrf.mxu1  ;;  %5875 = vmatprep.subr.bf16.mxu1 %v14889_v37  ;;  %v1969_v34 = vadd.f32 %v1968_v19, %v17150_v17  ;;  %v14913_v19 = vld [vmem:[%s22091_s3 + $0x124] ss:$8 sps:$4 sm:$0xff]  }
 0x173   :  { %v1970_v57 = vpop.f32.mrf.mxu0 }
 0x174   :  { %v17407_v33 = vpop.f32.mrf.mxu1  ;;  %v17409_v42 = vadd.f32 %v2081_v41, %v1969_v34 }
 0x175   :  { %5876 = vmatpush1.bf16.msra.mxu1 %v14887_v10  ;;  %v17411_v38 = vpop.f32.mrf.mxu0 }
 0x176   :  { %v17413_v0 = vpop.f32.mrf.mxu1  ;;  %5877 = vmatprep.subr.bf16.mxu1 %v14895_v24 }
 0x177   :  { %v17418_v17 = vpop.f32.mrf.mxu0 }
 0x178   :  { %v17420_v37 = vpop.f32.mrf.mxu1  ;;  %14582 = vmatmul.mubr.msk.bf16.gmra.mxu1 %vm1641_vm0, %v16845_v60  ;;  %v14905_v60 = vld [vmem:[%s22091_s3 + $0x130] ss:$8 sps:$4 sm:$0xff]   ;;  %v1977_v51 = vadd.f32 %v17418_v17, %v17182_v53 }
 0x179   :  { %14585 = vmatprep.mubr.msk.bf16.mxu1 %vm1641_vm0, %v22219_v50  ;;  %5878 = vmatpush1.bf16.msra.mxu1 %v14893_v63  ;;  %v1978_v46 = vpop.f32.mrf.mxu0 }
 0x17a   :  { %v2091_v10 = vpop.f32.mrf.mxu1  ;;  %5879 = vmatprep.subr.bf16.mxu1 %v14901_v54  ;;  %v1979_v13 = vadd.f32 %v1978_v46, %v17193_v47  ;;  %v14911_v47 = vld [vmem:[%s22091_s3 + $0x120] ss:$8 sps:$4 sm:$0xff]  }
 0x17b   :  { %v1980_v24 = vpop.f32.mrf.mxu0  ;;  %v22220_v46 = vld [vmem:[#allocation31_spill] sm:$0xff] }
 0x17c   :  { %v17436_v36 = vpop.f32.mrf.mxu1  ;;  %v17441_v41 = vadd.f32 %v2091_v10, %v1979_v13  ;;  %v14919_v10 = vld [vmem:[%s22091_s3 + $0x114] ss:$8 sps:$4 sm:$0xff]   ;;  %v1981_v22 = vadd.f32 %v1980_v24, %v17199_v49  ;;  %v17523_v24 = vadd.f32 %v17420_v37, %v1977_v51  ;;  %v14941_v37 = vld [vmem:[%s22091_s3 + $0x1d0] ss:$8 sps:$4 sm:$0xff]  }
 0x17d   :  { %5880 = vmatpush1.bf16.msra.mxu1 %v14899_v21  ;;  %v1982_v34 = vpop.f32.mrf.mxu0  ;;  %v22221_v13 = vld [vmem:[#allocation33_spill] sm:$0xff] }
 0x17e   :  { %v17443_v63 = vpop.f32.mrf.mxu1  ;;  %5881 = vmatprep.subr.bf16.mxu1 %v14907_v29 }
 0x17f   :  { %v1986_v54 = vpop.f32.mrf.mxu0 }
 0x180   :  { %v17448_v50 = vpop.f32.mrf.mxu1  ;;  %14586 = vmatmul.mubr.msk.bf16.gmra.mxu1 %vm1641_vm0, %v22220_v46  ;;  %v14917_v46 = vld [vmem:[%s22091_s3 + $0x110] ss:$8 sps:$4 sm:$0xff]   ;;  %v1987_v53 = vadd.f32 %v1986_v54, %v17219_v52 }
 0x181   :  { %14589 = vmatprep.mubr.msk.bf16.mxu1 %vm1641_vm0, %v22221_v13  ;;  %5882 = vmatpush1.bf16.msra.mxu1 %v14905_v60  ;;  %v1988_v21 = vpop.f32.mrf.mxu0  ;;  %v14925_v60 = vld [vmem:[%s22091_s3 + $0x104] ss:$8 sps:$4 sm:$0xff]   ;;  %v1927_v13 = vadd.f32 %v17273_v39, %v17010_v20 }
 0x182   :  { %v2101_v29 = vpop.f32.mrf.mxu1  ;;  %5883 = vmatprep.subr.bf16.mxu1 %v14913_v19  ;;  %v1989_v14 = vadd.f32 %v1988_v21, %v17229_v30  ;;  %v14923_v30 = vld [vmem:[%s22091_s3 + $0x100] ss:$8 sps:$4 sm:$0xff]   ;;  %v14937_v20 = vld [vmem:[%s22091_s3 + $0x1e4] ss:$8 sps:$4 sm:$0xff]  }
 0x183   :  { %v1990_v27 = vpop.f32.mrf.mxu0 }
 0x184   :  { %v17458_v31 = vpop.f32.mrf.mxu1  ;;  %v17460_v4 = vadd.f32 %v2101_v29, %v1989_v14  ;;  %v1991_v49 = vadd.f32 %v1990_v27, %v17239_v35  ;;  %v17526_v27 = vadd.f32 %v17436_v36, %v1981_v22  ;;  %v17544_v36 = vadd.f32 %v17448_v50, %v1987_v53  ;;  %v14955_v53 = vld [vmem:[%s22091_s3 + $0x1b4] ss:$8 sps:$4 sm:$0xff]  }
 0x185   :  { %5884 = vmatpush1.bf16.msra.mxu1 %v14911_v47  ;;  %v1992_v5 = vpop.f32.mrf.mxu0  ;;  %v14931_v47 = vld [vmem:[%s22091_s3 + $0x1f4] ss:$8 sps:$4 sm:$0xff]  }
 0x186   :  { %22222 = vst [vmem:[#allocation17_spill] sm:$0xff] %v17460_v4  ;;  %v17465_v9 = vpop.f32.mrf.mxu1  ;;  %5885 = vmatprep.subr.bf16.mxu1 %v14919_v10 }
 0x187   :  { %v1996_v19 = vpop.f32.mrf.mxu0 }
 0x188   :  { %v2109_v14 = vpop.f32.mrf.mxu1  ;;  %14590 = vmatmul.mubr.msk.bf16.gmra.mxu1 %vm1641_vm0, %v16847_v48  ;;  %v1971_v48 = vadd.f32 %v1970_v57, %v17163_v43  ;;  %v17500_v43 = vrot.slane %v15878_v1, %v22223_v45 }
 0x189   :  { %5886 = vmatpush1.bf16.msra.mxu1 %v14917_v46  ;;  %v1998_v21 = vpop.f32.mrf.mxu0  ;;  %v14929_v46 = vld [vmem:[%s22091_s3 + $0x1f0] ss:$8 sps:$4 sm:$0xff]  }
 0x18a   :  { %v2111_v29 = vpop.f32.mrf.mxu1  ;;  %5887 = vmatprep.subr.bf16.mxu1 %v14925_v60  ;;  %v1999_v44 = vadd.f32 %v1998_v21, %v17261_v32  ;;  %v1973_v32 = vadd.f32 %v17411_v38, %v17172_v59  ;;  %v2044_v21 = vadd.f32 %v17292_v6, %v1931_v18  ;;  %v2084_v1 = vadd.f32 %v17407_v33, %v1971_v48  ;;  %v14935_v59 = vld [vmem:[%s22091_s3 + $0x1e0] ss:$8 sps:$4 sm:$0xff]  }
 0x18b   :  { %v2000_v10 = vpop.f32.mrf.mxu0  ;;  %v1997_v38 = vadd.f32 %v1996_v19, %v17255_v61  ;;  %v14943_v61 = vld [vmem:[%s22091_s3 + $0x1d4] ss:$8 sps:$4 sm:$0xff]  }
 0x18c   :  { %v2113_v4 = vpop.f32.mrf.mxu1  ;;  %v17493_v39 = vadd.f32 %v2111_v29, %v1999_v44  ;;  %v1983_v44 = vadd.f32 %v1982_v34, %v17209_v3  ;;  %v2080_v29 = vadd.f32 %v17392_v16, %v1967_v25  ;;  %v1993_v3 = vadd.f32 %v1992_v5, %v17247_v7 }
 0x18d   :  { %5888 = vmatpush1.bf16.msra.mxu1 %v14923_v30  ;;  %v2002_v57 = vpop.f32.mrf.mxu0  ;;  %v2040_v30 = vadd.f32 %v17275_v28, %v1927_v13  ;;  %v2001_v6 = vadd.f32 %v2000_v10, %v17267_v11  ;;  %v2086_v33 = vadd.f32 %v17413_v0, %v1973_v32  ;;  %v17547_v34 = vadd.f32 %v17458_v31, %v1991_v49 }
 0x18e   :  { %v2115_v60 = vpop.f32.mrf.mxu1  ;;  %5889 = vmatprep.subr.bf16.mxu1 %v14931_v47  ;;  %v2003_v25 = vadd.f32 %v2002_v57, %v17282_v58  ;;  %v17529_v52 = vadd.f32 %v17443_v63, %v1983_v44  ;;  %v17550_v63 = vadd.f32 %v17465_v9, %v1993_v3  ;;  %v17552_v54 = vadd.f32 %v2109_v14, %v1997_v38  ;;  %v3108_v44 = vld [vmem:[#allocation2] sm:$0xe] }
 0x18f   :  { %v2152_v17 = vpop.f32.mrf.mxu0  ;;  %v17557_v47 = vadd.f32 %v2113_v4, %v2001_v6  ;;  %v14947_v4 = vld [vmem:[%s22091_s3 + $0x1c0] ss:$8 sps:$4 sm:$0xff]   ;;  %v3111_v6 = vld [vmem:[#allocation2 + $0x4] sm:$0x3] }
 0x190   :  { %v2192_v28 = vpop.f32.mrf.mxu1  ;;  %v2153_v18 = vadd.f32 %v2152_v17, %v2040_v30  ;;  %v17559_v10 = vadd.f32 %v2115_v60, %v2003_v25  ;;  %v3156_v57 = vld [vmem:[#allocation2 + $0x40] sm:$0xe] }
 0x191   :  { %v2193_v16 = vadd.f32 %v2192_v28, %v2080_v29  ;;  %5890 = vmatpush2.bf16.msra.mxu1 %v14929_v46  ;;  %v2154_v35 = vpop.f32.mrf.mxu0 }
 0x192   :  { %v2194_v7 = vpop.f32.mrf.mxu1  ;;  %5891 = vmatprep.subr.bf16.mxu1 %v14937_v20  ;;  %v2716_v11 = vmax.f32 %v2153_v18, 0.0  ;;  %v17535_v5 = vadd.f32 %v2154_v35, %v17294_v55 }
 0x193   :  { %v2740_v58 = vmax.f32 %v2193_v16, 0.0  ;;  %v17538_v0 = vadd.f32 %v2194_v7, %v17409_v42  ;;  %v2156_v55 = vpop.f32.mrf.mxu0  ;;  %v14949_v42 = vld [vmem:[%s22091_s3 + $0x1c4] ss:$8 sps:$4 sm:$0xff]  }
 0x194   :  { %v2196_v19 = vpop.f32.mrf.mxu1  ;;  %v14113_v50 = vpack.c.bf16 %v2716_v11, %v2716_v11  ;;  %v2717_v31 = vmax.f32 %v17535_v5, 0.0  ;;  %v2157_v48 = vadd.f32 %v2156_v55, %v2044_v21  ;;  %v14959_v5 = vld [vmem:[%s22091_s3 + $0x1a0] ss:$8 sps:$4 sm:$0xff]  }
 0x195   :  { %v14121_v13 = vpack.c.bf16 %v2740_v58, %v2740_v58  ;;  %5892 = vmatpush2.bf16.msra.mxu1 %v14935_v59  ;;  %v2741_v9 = vmax.f32 %v17538_v0, 0.0  ;;  %v2197_v14 = vadd.f32 %v2196_v19, %v2084_v1  ;;  %v2158_v46 = vpop.f32.mrf.mxu0  ;;  %v14953_v19 = vld [vmem:[%s22091_s3 + $0x1b0] ss:$8 sps:$4 sm:$0xff]  }
 0x196   :  { %v2198_v20 = vpop.f32.mrf.mxu1  ;;  %5893 = vmatprep.subr.bf16.mxu1 %v14943_v61  ;;  %v2931_v45 = vshrl.u32 %v14113_v50, 16  ;;  %v2934_v32 = vshll.u32 %v14113_v50, 16  ;;  %v2719_v60 = vmax.f32 %v2157_v48, 0.0  ;;  %v2159_v29 = vadd.f32 %v2158_v46, %v17308_v23  ;;  %v3159_v23 = vld [vmem:[#allocation2 + $0x44] sm:$0x3] }
 0x197   :  { %v3003_v51 = vshrl.u32 %v14121_v13, 16  ;;  %v3006_v22 = vshll.u32 %v14121_v13, 16  ;;  %v2743_v30 = vmax.f32 %v2197_v14, 0.0  ;;  %v2199_v59 = vadd.f32 %v2198_v20, %v2086_v33  ;;  %v2162_v21 = vpop.f32.mrf.mxu0 }
 0x198   :  { %v2202_v1 = vpop.f32.mrf.mxu1  ;;  %v2933_v49 = vrot.slane %v2931_v45, 6  ;;  %v2936_v3 = vrot.slane %v2934_v32, 7  ;;  %v14114_v25 = vpack.c.bf16 %v2719_v60, %v2719_v60  ;;  %v2720_v16 = vmax.f32 %v2159_v29, 0.0 }
 0x199   :  { %v3005_v17 = vrot.slane %v3003_v51, 6  ;;  %v3008_v28 = vrot.slane %v3006_v22, 7  ;;  %5894 = vmatpush2.bf16.msra.mxu1 %v14941_v37  ;;  %v14122_v18 = vpack.c.bf16 %v2743_v30, %v2743_v30  ;;  %v2744_v33 = vmax.f32 %v2199_v59, 0.0  ;;  %v2164_v35 = vpop.f32.mrf.mxu0 }
 0x19a   :  { %v2204_v7 = vpop.f32.mrf.mxu1  ;;  %5895 = vmatprep.subr.bf16.mxu1 %v14949_v42  ;;  %v2937_v61 = vor.u32 %v2936_v3, %v2933_v49  ;;  %v2163_v58 = vadd.f32 %v2162_v21, %v17316_v26  ;;  %v2203_v55 = vadd.f32 %v2202_v1, %v17523_v24  ;;  %v2940_v37 = vshrl.u32 %v14114_v25, 16  ;;  %v14961_v42 = vld [vmem:[%s22091_s3 + $0x1a4] ss:$8 sps:$4 sm:$0xff]   ;;  %v3114_v21 = vld [vmem:[#allocation2 + $0x8] sm:$0xe] }
 0x19b   :  { %v3009_v11 = vor.u32 %v3008_v28, %v3005_v17  ;;  %v2943_v50 = vshll.u32 %v14114_v25, 16  ;;  %v3012_v13 = vshrl.u32 %v14122_v18, 16  ;;  %v3015_v48 = vshll.u32 %v14122_v18, 16  ;;  %v2166_v14 = vpop.f32.mrf.mxu0  ;;  %v3117_v1 = vld [vmem:[#allocation2 + $0xc] sm:$0x3] }
 0x19c   :  { %v2206_v46 = vpop.f32.mrf.mxu1  ;;  %v2938_v20 = vrot.slane %v2937_v61, 4  ;;  %v3109_v26 = vsel %vm17572_vm8, %v2937_v61, %v3108_v44  ;;  %v2942_v32 = vrot.slane %v2940_v37, 6  ;;  %v17600_v49 = vpack.c.bf16 %v2744_v33, %v2741_v9  ;;  %v3165_v17 = vld [vmem:[#allocation2 + $0x4c] sm:$0x3] }
 0x19d   :  { %v3010_v45 = vrot.slane %v3009_v11, 4  ;;  %v3157_v24 = vsel %vm17572_vm8, %v3009_v11, %v3156_v57  ;;  %5896 = vmatpush2.bf16.msra.mxu1 %v14947_v4  ;;  %3110 = vst [vmem:[#allocation2] sm:$0xe] %v3109_v26  ;;  %v2945_v51 = vrot.slane %v2943_v50, 7  ;;  %v3014_v22 = vrot.slane %v3012_v13, 6  ;;  %v2168_v30 = vpop.f32.mrf.mxu0 }
 0x19e   :  { %3158 = vst [vmem:[#allocation2 + $0x40] sm:$0xe] %v3157_v24  ;;  %v3017_v60 = vrot.slane %v3015_v48, 7  ;;  %v17588_v29 = vpop.f32.mrf.mxu1  ;;  %5897 = vmatprep.subr.bf16.mxu1 %v14955_v53  ;;  %v3112_v59 = vsel %vm17015_vm3, %v2938_v20, %v3111_v6  ;;  %v3162_v57 = vld [vmem:[#allocation2 + $0x48] sm:$0xe]  ;;  %v17596_v4 = vpack.c.bf16 %v2720_v16, %v2717_v31  ;;  %22227 = vst [vmem:[#allocation19_spill] sm:$0xff] %v17600_v49 }
 0x19f   :  { %v3160_v44 = vsel %vm17015_vm3, %v3010_v45, %v3159_v23  ;;  %3113 = vst [vmem:[#allocation2 + $0x4] sm:$0x3] %v3112_v59  ;;  %v2946_v53 = vor.u32 %v2945_v51, %v2942_v32  ;;  %v2722_v28 = vmax.f32 %v2163_v58, 0.0  ;;  %v2746_v6 = vmax.f32 %v2203_v55, 0.0  ;;  %v17602_v25 = vpop.f32.mrf.mxu0  ;;  %v14967_v16 = vld [vmem:[%s22091_s3 + $0x194] ss:$8 sps:$4 sm:$0xff]  }
 0x1a0   :  { %22226 = vst [vmem:[#allocation18_spill] sm:$0xff] %v17596_v4  ;;  %3161 = vst [vmem:[#allocation2 + $0x44] sm:$0x3] %v3160_v44  ;;  %v3018_v3 = vor.u32 %v3017_v60, %v3014_v22  ;;  %v17604_v23 = vpop.f32.mrf.mxu1  ;;  %v17610_v31 = vadd.f32 %v2164_v35, %v17322_v8  ;;  %v17613_v0 = vadd.f32 %v2204_v7, %v17441_v41  ;;  %v14965_v55 = vld [vmem:[%s22091_s3 + $0x190] ss:$8 sps:$4 sm:$0xff]  }
 0x1a1   :  { %v2167_v9 = vadd.f32 %v2166_v14, %v17328_v62  ;;  %v2207_v18 = vadd.f32 %v2206_v46, %v17526_v27  ;;  %5898 = vmatpush2.bf16.msra.mxu1 %v14953_v19  ;;  %v2947_v33 = vrot.slane %v2946_v53, 4  ;;  %v3115_v61 = vsel %vm17572_vm8, %v2946_v53, %v3114_v21  ;;  %v17624_v35 = vpop.f32.mrf.mxu0  ;;  %v3120_v32 = vld [vmem:[#allocation2 + $0x10] sm:$0xe]  ;;  %v14973_v21 = vld [vmem:[%s22091_s3 + $0x184] ss:$8 sps:$4 sm:$0xff]  }
 0x1a2   :  { %v3019_v11 = vrot.slane %v3018_v3, 4  ;;  %v3163_v8 = vsel %vm17572_vm8, %v3018_v3, %v3162_v57  ;;  %v17626_v41 = vpop.f32.mrf.mxu1  ;;  %5899 = vmatprep.subr.bf16.mxu1 %v14961_v42  ;;  %3116 = vst [vmem:[#allocation2 + $0x8] sm:$0xe] %v3115_v61  ;;  %v14115_v62 = vpack.c.bf16 %v2722_v28, %v2722_v28  ;;  %v14123_v27 = vpack.c.bf16 %v2746_v6, %v2746_v6  ;;  %v3168_v6 = vld [vmem:[#allocation2 + $0x50] sm:$0xe] }
 0x1a3   :  { %3164 = vst [vmem:[#allocation2 + $0x48] sm:$0xe] %v3163_v8  ;;  %v2723_v7 = vmax.f32 %v17610_v31, 0.0  ;;  %v2747_v58 = vmax.f32 %v17613_v0, 0.0  ;;  %v3118_v19 = vsel %vm17015_vm3, %v2947_v33, %v3117_v1  ;;  %v2725_v50 = vmax.f32 %v2167_v9, 0.0  ;;  %v17637_v48 = vpop.f32.mrf.mxu0 }
 0x1a4   :  { %v3166_v37 = vsel %vm17015_vm3, %v3019_v11, %v3165_v17  ;;  %v2749_v13 = vmax.f32 %v2207_v18, 0.0  ;;  %v17639_v14 = vpop.f32.mrf.mxu1  ;;  %v17641_v46 = vld [vmem:[#allocation2] sm:$0x8]  ;;  %3119 = vst [vmem:[#allocation2 + $0xc] sm:$0x3] %v3118_v19  ;;  %v2949_v42 = vshrl.u32 %v14115_v62, 16  ;;  %v2169_v60 = vadd.f32 %v2168_v30, %v17336_v12 }
 0x1a5   :  { %22228 = vst [vmem:[#allocation20_spill] sm:$0xff] %v17641_v46  ;;  %3167 = vst [vmem:[#allocation2 + $0x4c] sm:$0x3] %v3166_v37  ;;  %v2952_v20 = vshll.u32 %v14115_v62, 16  ;;  %v3021_v26 = vshrl.u32 %v14123_v27, 16  ;;  %v3024_v45 = vshll.u32 %v14123_v27, 16  ;;  %5900 = vmatpush2.bf16.msra.mxu1 %v14959_v5  ;;  %v14116_v51 = vpack.c.bf16 %v2725_v50, %v2725_v50  ;;  %v17645_v59 = vpop.f32.mrf.mxu0 }
 0x1a6   :  { %v14124_v22 = vpack.c.bf16 %v2749_v13, %v2749_v13  ;;  %v17647_v44 = vpop.f32.mrf.mxu1  ;;  %5901 = vmatprep.subr.bf16.mxu1 %v14967_v16  ;;  %v3204_v1 = vld [vmem:[#allocation2] sm:$0xf]  ;;  %v17652_v57 = vld [vmem:[#allocation2 + $0x4] sm:$0x7]  ;;  %v2951_v53 = vrot.slane %v2949_v42, 6  ;;  %v2726_v19 = vmax.f32 %v2169_v60, 0.0 }
 0x1a7   :  { %22229 = vst [vmem:[#allocation21_spill] sm:$0xff] %v17652_v57  ;;  %v2954_v3 = vrot.slane %v2952_v20, 7  ;;  %v3023_v17 = vrot.slane %v3021_v26, 6  ;;  %v3026_v28 = vrot.slane %v3024_v45, 7  ;;  %3220 = vst [vmem:[#allocation3] sm:$0xf] %v3204_v1  ;;  %v17655_v33 = vpop.f32.mrf.mxu0  ;;  %v2209_v45 = vadd.f32 %v17588_v29, %v17529_v52 }
 0x1a8   :  { %v3123_v30 = vld [vmem:[#allocation2 + $0x14] sm:$0x3]  ;;  %v2958_v9 = vshrl.u32 %v14116_v51, 16  ;;  %v2961_v18 = vshll.u32 %v14116_v51, 16  ;;  %v3030_v16 = vshrl.u32 %v14124_v22, 16  ;;  %v17657_v61 = vpop.f32.mrf.mxu1  ;;  %v3033_v27 = vshll.u32 %v14124_v22, 16 }
 0x1a9   :  { %v3171_v5 = vld [vmem:[#allocation2 + $0x54] sm:$0x3]  ;;  %v2955_v11 = vor.u32 %v2954_v3, %v2951_v53  ;;  %v3027_v8 = vor.u32 %v3026_v28, %v3023_v17  ;;  %v3126_v62 = vld [vmem:[#allocation2 + $0x18] sm:$0xe]  ;;  %5902 = vmatpush2.bf16.msra.mxu1 %v14965_v55  ;;  %v14971_v37 = vld [vmem:[%s22091_s3 + $0x180] ss:$8 sps:$4 sm:$0xff]   ;;  %v17669_v51 = vpop.f32.mrf.mxu0 }
 0x1aa   :  { %v14985_v50 = vld [vmem:[%s22091_s3 + $0x374] ss:$8 sps:$4 sm:$0xff]   ;;  %v17665_v13 = vld [vmem:[#allocation2 + $0x8] sm:$0x8]  ;;  %v2960_v42 = vrot.slane %v2958_v9, 6  ;;  %v2963_v20 = vrot.slane %v2961_v18, 7  ;;  %v17671_v22 = vpop.f32.mrf.mxu1  ;;  %5903 = vmatprep.subr.bf16.mxu1 %v14973_v21  ;;  %v17682_v9 = vpack.c.bf16 %v2726_v19, %v2723_v7 }
 0x1ab   :  { %22230 = vst [vmem:[#allocation22_spill] sm:$0xff] %v17665_v13  ;;  %v3032_v26 = vrot.slane %v3030_v16, 6  ;;  %v2956_v60 = vrot.slane %v2955_v11, 4  ;;  %v3121_v1 = vsel %vm17572_vm8, %v2955_v11, %v3120_v32  ;;  %v3028_v53 = vrot.slane %v3027_v8, 4  ;;  %v3205_v3 = vld [vmem:[#allocation2 + $0x8] sm:$0xf]  ;;  %v17684_v21 = vpop.f32.mrf.mxu0 }
 0x1ac   :  { %v17676_v17 = vld [vmem:[#allocation2 + $0xc] sm:$0x7]  ;;  %3122 = vst [vmem:[#allocation2 + $0x10] sm:$0xe] %v3121_v1  ;;  %v3169_v28 = vsel %vm17572_vm8, %v3027_v8, %v3168_v6  ;;  %v2964_v52 = vor.u32 %v2963_v20, %v2960_v42  ;;  %v3035_v29 = vrot.slane %v3033_v27, 7  ;;  %22232 = vst [vmem:[#allocation24_spill] sm:$0xff] %v17682_v9  ;;  %v17686_v18 = vpop.f32.mrf.mxu1  ;;  %v2173_v42 = vadd.f32 %v17602_v25, %v17344_v56 }
 0x1ad   :  { %22231 = vst [vmem:[#allocation23_spill] sm:$0xff] %v17676_v17  ;;  %3221 = vst [vmem:[#allocation3 + $0x1c] sm:$0xf] %v3205_v3  ;;  %v3124_v16 = vsel %vm17015_vm3, %v2956_v60, %v3123_v30  ;;  %v3172_v6 = vsel %vm17015_vm3, %v3028_v53, %v3171_v5  ;;  %v3129_v11 = vld [vmem:[#allocation2 + $0x1c] sm:$0x3]  ;;  %v2750_v27 = vmax.f32 %v2209_v45, 0.0  ;;  %5904 = vmatpush2.bf16.msra.mxu1 %v14971_v37  ;;  %v17697_v20 = vpop.f32.mrf.mxu0 }
 0x1ae   :  { %3170 = vst [vmem:[#allocation2 + $0x50] sm:$0xe] %v3169_v28  ;;  %v3174_v8 = vld [vmem:[#allocation2 + $0x58] sm:$0xe]  ;;  %3125 = vst [vmem:[#allocation2 + $0x14] sm:$0x3] %v3124_v16  ;;  %v3127_v7 = vsel %vm17572_vm8, %v2964_v52, %v3126_v62  ;;  %v3036_v19 = vor.u32 %v3035_v29, %v3032_v26  ;;  %v17699_v30 = vpop.f32.mrf.mxu1  ;;  %6099 = vmatprep.subr.bf16.mxu1 %v14985_v50  ;;  %v2213_v45 = vadd.f32 %v17604_v23, %v17544_v36 }
 0x1af   :  { %3173 = vst [vmem:[#allocation2 + $0x54] sm:$0x3] %v3172_v6  ;;  %v2965_v31 = vrot.slane %v2964_v52, 4  ;;  %3128 = vst [vmem:[#allocation2 + $0x18] sm:$0xe] %v3127_v7  ;;  %v17703_v37 = vpack.c.bf16 %v2750_v27, %v2747_v58  ;;  %v2175_v62 = vadd.f32 %v17624_v35, %v17350_v15  ;;  %v22234_v26 = vld [vmem:[#allocation17_spill] sm:$0xff]  ;;  %v17717_v58 = vpop.f32.mrf.mxu0  ;;  %v2217_v29 = vadd.f32 %v17639_v14, %v17547_v34 }
 0x1b0   :  { %v3177_v5 = vld [vmem:[#allocation2 + $0x5c] sm:$0x3]  ;;  %v2215_v56 = vadd.f32 %v17626_v41, %v22234_v26  ;;  %v3037_v60 = vrot.slane %v3036_v19, 4  ;;  %v3175_v50 = vsel %vm17572_vm8, %v3036_v19, %v3174_v8  ;;  %v2728_v1 = vmax.f32 %v2173_v42, 0.0  ;;  %v17715_v0 = vpop.f32.mrf.mxu1  ;;  %v3212_v53 = vld [vmem:[#allocation2 + $0x40] sm:$0xf] }
 0x1b1   :  { %22233 = vst [vmem:[#allocation25_spill] sm:$0xff] %v17703_v37  ;;  %v3130_v25 = vsel %vm17015_vm3, %v2965_v31, %v3129_v11  ;;  %v3213_v36 = vld [vmem:[#allocation2 + $0x48] sm:$0xf]  ;;  %3176 = vst [vmem:[#allocation2 + $0x58] sm:$0xe] %v3175_v50  ;;  %v2752_v15 = vmax.f32 %v2213_v45, 0.0  ;;  %v17729_v8 = vpop.f32.mrf.mxu0 }
 0x1b2   :  { %3131 = vst [vmem:[#allocation2 + $0x1c] sm:$0x3] %v3130_v25  ;;  %v2729_v23 = vmax.f32 %v2175_v62, 0.0  ;;  %v2753_v35 = vmax.f32 %v2215_v56, 0.0  ;;  %v22235_v41 = vld [vmem:[#allocation11_spill] sm:$0xff]  ;;  %v3178_v28 = vsel %vm17015_vm3, %v3037_v60, %v3177_v5  ;;  %v14117_v52 = vpack.c.bf16 %v2728_v1, %v2728_v1  ;;  %v22236_v16 = vld [vmem:[#allocation12_spill] sm:$0xff]  ;;  %v17727_v11 = vpop.f32.mrf.mxu1 }
 0x1b3   :  { %v2177_v3 = vadd.f32 %v17637_v48, %v22235_v41  ;;  %3228 = vst [vmem:[#allocation3 + $0xe0] sm:$0xf] %v3212_v53  ;;  %3229 = vst [vmem:[#allocation3 + $0xfc] sm:$0xf] %v3213_v36  ;;  %v2179_v6 = vadd.f32 %v17645_v59, %v22236_v16  ;;  %v14125_v27 = vpack.c.bf16 %v2752_v15, %v2752_v15  ;;  %v22237_v7 = vld [vmem:[#allocation13_spill] sm:$0xff]  ;;  %v2755_v34 = vmax.f32 %v2217_v29, 0.0  ;;  %v17737_v59 = vpop.f32.mrf.mxu0 }
 0x1b4   :  { %3179 = vst [vmem:[#allocation2 + $0x5c] sm:$0x3] %v3178_v28  ;;  %v2219_v48 = vadd.f32 %v17647_v44, %v17550_v63  ;;  %v2183_v19 = vadd.f32 %v17655_v33, %v22237_v7  ;;  %v3206_v42 = vld [vmem:[#allocation2 + $0x10] sm:$0xf]  ;;  %v2967_v5 = vshrl.u32 %v14117_v52, 16  ;;  %v2970_v45 = vshll.u32 %v14117_v52, 16  ;;  %v17735_v62 = vpop.f32.mrf.mxu1 }
 0x1b5   :  { %v2731_v31 = vmax.f32 %v2177_v3, 0.0  ;;  %v2732_v14 = vmax.f32 %v2179_v6, 0.0  ;;  %3222 = vst [vmem:[#allocation3 + $0x38] sm:$0xf] %v3206_v42  ;;  %v3039_v26 = vshrl.u32 %v14125_v27, 16  ;;  %v3042_v56 = vshll.u32 %v14125_v27, 16  ;;  %v17743_v53 = vpop.f32.mrf.mxu0 }
 0x1b6   :  { %v2756_v60 = vmax.f32 %v2219_v48, 0.0  ;;  %v2969_v50 = vrot.slane %v2967_v5, 6  ;;  %v2972_v1 = vrot.slane %v2970_v45, 7  ;;  %v14126_v63 = vpack.c.bf16 %v2755_v34, %v2755_v34  ;;  %v17741_v33 = vpop.f32.mrf.mxu1  ;;  %v3207_v36 = vld [vmem:[#allocation2 + $0x18] sm:$0xf] }
 0x1b7   :  { %v14118_v25 = vpack.c.bf16 %v2731_v31, %v2731_v31  ;;  %v17739_v44 = vpack.c.bf16 %v2732_v14, %v2729_v23  ;;  %v3132_v15 = vld [vmem:[#allocation2 + $0x20] sm:$0xe]  ;;  %v3041_v41 = vrot.slane %v3039_v26, 6  ;;  %v3044_v3 = vrot.slane %v3042_v56, 7  ;;  %3223 = vst [vmem:[#allocation3 + $0x54] sm:$0xf] %v3207_v36  ;;  %v17749_v7 = vpop.f32.mrf.mxu0 }
 0x1b8   :  { %v2973_v29 = vor.u32 %v2972_v1, %v2969_v50  ;;  %v3135_v16 = vld [vmem:[#allocation2 + $0x24] sm:$0x3]  ;;  %v3180_v6 = vld [vmem:[#allocation2 + $0x60] sm:$0xe]  ;;  %v3048_v27 = vshrl.u32 %v14126_v63, 16  ;;  %v3051_v31 = vshll.u32 %v14126_v63, 16  ;;  %v17745_v48 = vpack.c.bf16 %v2756_v60, %v2753_v35  ;;  %v17747_v23 = vpop.f32.mrf.mxu1 }
 0x1b9   :  { %22238 = vst [vmem:[#allocation26_spill] sm:$0xff] %v17739_v44  ;;  %v2976_v28 = vshrl.u32 %v14118_v25, 16  ;;  %v2979_v52 = vshll.u32 %v14118_v25, 16  ;;  %v3045_v42 = vor.u32 %v3044_v3, %v3041_v41  ;;  %v3183_v5 = vld [vmem:[#allocation2 + $0x64] sm:$0x3]  ;;  %v2734_v14 = vmax.f32 %v2183_v19, 0.0  ;;  %v17755_v35 = vpop.f32.mrf.mxu0 }
 0x1ba   :  { %22239 = vst [vmem:[#allocation27_spill] sm:$0xff] %v17745_v48  ;;  %v2974_v26 = vrot.slane %v2973_v29, 4  ;;  %v3133_v56 = vsel %vm17572_vm8, %v2973_v29, %v3132_v15  ;;  %v3138_v25 = vld [vmem:[#allocation2 + $0x28] sm:$0xe]  ;;  %v3050_v50 = vrot.slane %v3048_v27, 6  ;;  %v3053_v1 = vrot.slane %v3051_v31, 7  ;;  %v17753_v36 = vpop.f32.mrf.mxu1 }
 0x1bb   :  { %v2978_v45 = vrot.slane %v2976_v28, 6  ;;  %v2981_v34 = vrot.slane %v2979_v52, 7  ;;  %3134 = vst [vmem:[#allocation2 + $0x20] sm:$0xe] %v3133_v56  ;;  %v3046_v60 = vrot.slane %v3045_v42, 4  ;;  %v3181_v63 = vsel %vm17572_vm8, %v3045_v42, %v3180_v6  ;;  %v22240_v27 = vld [vmem:[#allocation14_spill] sm:$0xff]  ;;  %v17769_v55 = vpop.f32.mrf.mxu0 }
 0x1bc   :  { %v3186_v3 = vld [vmem:[#allocation2 + $0x68] sm:$0xe]  ;;  %v14119_v28 = vpack.c.bf16 %v2734_v14, %v2734_v14  ;;  %v3136_v19 = vsel %vm17015_vm3, %v2974_v26, %v3135_v16  ;;  %3182 = vst [vmem:[#allocation2 + $0x60] sm:$0xe] %v3181_v63  ;;  %v3141_v15 = vld [vmem:[#allocation2 + $0x2c] sm:$0x3]  ;;  %v3054_v52 = vor.u32 %v3053_v1, %v3050_v50  ;;  %v2223_v29 = vadd.f32 %v17657_v61, %v17552_v54  ;;  %v17767_v56 = vpop.f32.mrf.mxu1 }
 0x1bd   :  { %v2982_v41 = vor.u32 %v2981_v34, %v2978_v45  ;;  %v17765_v31 = vadd.f32 %v17669_v51, %v22240_v27  ;;  %3137 = vst [vmem:[#allocation2 + $0x24] sm:$0x3] %v3136_v19  ;;  %v3184_v6 = vsel %vm17015_vm3, %v3046_v60, %v3183_v5  ;;  %v3189_v45 = vld [vmem:[#allocation2 + $0x6c] sm:$0x3]  ;;  %v17779_v50 = vpop.f32.mrf.mxu0  ;;  %v2225_v60 = vadd.f32 %v17671_v22, %v17493_v39  ;;  %v3144_v27 = vld [vmem:[#allocation2 + $0x30] sm:$0xe] }
 0x1be   :  { %v2985_v34 = vshrl.u32 %v14119_v28, 16  ;;  %3185 = vst [vmem:[#allocation2 + $0x64] sm:$0x3] %v3184_v6  ;;  %v3055_v54 = vrot.slane %v3054_v52, 4  ;;  %v3187_v61 = vsel %vm17572_vm8, %v3054_v52, %v3186_v3  ;;  %v2988_v51 = vshll.u32 %v14119_v28, 16  ;;  %v17777_v26 = vpop.f32.mrf.mxu1  ;;  %v22241_v28 = vld [vmem:[#allocation15_spill] sm:$0xff] }
 0x1bf   :  { %v2983_v42 = vrot.slane %v2982_v41, 4  ;;  %v3139_v16 = vsel %vm17572_vm8, %v2982_v41, %v3138_v25  ;;  %v2758_v14 = vmax.f32 %v2223_v29, 0.0  ;;  %3188 = vst [vmem:[#allocation2 + $0x68] sm:$0xe] %v3187_v61  ;;  %v2735_v25 = vmax.f32 %v17765_v31, 0.0  ;;  %v17792_v29 = vpop.f32.mrf.mxu0  ;;  %v22242_v22 = vld [vmem:[#allocation16_spill] sm:$0xff] }
 0x1c0   :  { %3140 = vst [vmem:[#allocation2 + $0x28] sm:$0xe] %v3139_v16  ;;  %v2987_v1 = vrot.slane %v2985_v34, 6  ;;  %v3190_v63 = vsel %vm17015_vm3, %v3055_v54, %v3189_v45  ;;  %v2990_v41 = vrot.slane %v2988_v51, 7  ;;  %v2187_v19 = vadd.f32 %v17684_v21, %v22241_v28  ;;  %v17790_v52 = vpop.f32.mrf.mxu1  ;;  %v3215_v16 = vld [vmem:[#allocation2 + $0x58] sm:$0xf] }
 0x1c1   :  { %v3142_v5 = vsel %vm17015_vm3, %v2983_v42, %v3141_v15  ;;  %v14127_v3 = vpack.c.bf16 %v2758_v14, %v2758_v14  ;;  %v3214_v15 = vld [vmem:[#allocation2 + $0x50] sm:$0xf]  ;;  %3191 = vst [vmem:[#allocation2 + $0x6c] sm:$0x3] %v3190_v63  ;;  %v2759_v31 = vmax.f32 %v2225_v60, 0.0  ;;  %v2227_v39 = vadd.f32 %v17686_v18, %v17557_v47  ;;  %v17802_v51 = vpop.f32.mrf.mxu0 }
 0x1c2   :  { %3143 = vst [vmem:[#allocation2 + $0x2c] sm:$0x3] %v3142_v5  ;;  %v2189_v6 = vadd.f32 %v17697_v20, %v22242_v22  ;;  %v2229_v42 = vadd.f32 %v17699_v30, %v17559_v10  ;;  %3230 = vst [vmem:[#allocation3 + $0x118] sm:$0xf] %v3214_v15  ;;  %v2991_v21 = vor.u32 %v2990_v41, %v2987_v1  ;;  %v2737_v54 = vmax.f32 %v2187_v19, 0.0  ;;  %v17800_v61 = vpop.f32.mrf.mxu1 }
 0x1c3   :  { %v3057_v45 = vshrl.u32 %v14127_v3, 16  ;;  %v3060_v34 = vshll.u32 %v14127_v3, 16  ;;  %v3208_v14 = vld [vmem:[#allocation2 + $0x20] sm:$0xf]  ;;  %3231 = vst [vmem:[#allocation3 + $0x134] sm:$0xf] %v3215_v16  ;;  %v14191_v20 = vadd.f32 %v17727_v11, %v17715_v0  ;;  %v17810_v3 = vpop.f32.mrf.mxu0 }
 0x1c4   :  { %v3147_v5 = vld [vmem:[#allocation2 + $0x34] sm:$0x3]  ;;  %v2761_v47 = vmax.f32 %v2227_v39, 0.0  ;;  %v2738_v18 = vmax.f32 %v2189_v6, 0.0  ;;  %v2762_v60 = vmax.f32 %v2229_v42, 0.0  ;;  %v2992_v10 = vrot.slane %v2991_v21, 4  ;;  %v17808_v41 = vpop.f32.mrf.mxu1 }
 0x1c5   :  { %3224 = vst [vmem:[#allocation3 + $0x70] sm:$0xf] %v3208_v14  ;;  %v3145_v30 = vsel %vm17572_vm8, %v2991_v21, %v3144_v27  ;;  %v3059_v1 = vrot.slane %v3057_v45, 6  ;;  %v3062_v63 = vrot.slane %v3060_v34, 7  ;;  %v3192_v28 = vld [vmem:[#allocation2 + $0x70] sm:$0xe]  ;;  %v14120_v19 = vpack.c.bf16 %v2737_v54, %v2737_v54  ;;  %v17823_v21 = vpop.f32.mrf.mxu0 }
 0x1c6   :  { %3146 = vst [vmem:[#allocation2 + $0x30] sm:$0xe] %v3145_v30  ;;  %v14128_v15 = vpack.c.bf16 %v2761_v47, %v2761_v47  ;;  %v17812_v39 = vpack.c.bf16 %v2738_v18, %v2735_v25  ;;  %v17814_v0 = vpack.c.bf16 %v2762_v60, %v2759_v31  ;;  %v3148_v27 = vsel %vm17015_vm3, %v2992_v10, %v3147_v5  ;;  %v17821_v16 = vpop.f32.mrf.mxu1  ;;  %v3195_v25 = vld [vmem:[#allocation2 + $0x74] sm:$0x3]  ;;  %v3150_v47 = vld [vmem:[#allocation2 + $0x38] sm:$0xe] }
 0x1c7   :  { %v3209_v11 = vld [vmem:[#allocation2 + $0x28] sm:$0xf]  ;;  %v3063_v22 = vor.u32 %v3062_v63, %v3059_v1  ;;  %v2266_v6 = vadd.f32 %v14191_v20, %v17500_v43  ;;  %v14255_v42 = vadd.f32 %v17729_v8, %v17717_v58  ;;  %3149 = vst [vmem:[#allocation2 + $0x34] sm:$0x3] %v3148_v27  ;;  %v2994_v31 = vshrl.u32 %v14120_v19, 16  ;;  %v17833_v20 = vpop.f32.mrf.mxu0 }
 0x1c8   :  { %22243 = vst [vmem:[#allocation28_spill] sm:$0xff] %v17812_v39  ;;  %22244 = vst [vmem:[#allocation30_spill] sm:$0xff] %v17814_v0  ;;  %v2997_v45 = vshll.u32 %v14120_v19, 16  ;;  %v3066_v34 = vshrl.u32 %v14128_v15, 16  ;;  %v3069_v54 = vshll.u32 %v14128_v15, 16  ;;  %v14194_v58 = vadd.f32 %v17741_v33, %v17735_v62  ;;  %v17831_v60 = vpop.f32.mrf.mxu1 }
 0x1c9   :  { %3225 = vst [vmem:[#allocation3 + $0x8c] sm:$0xf] %v3209_v11  ;;  %v3064_v14 = vrot.slane %v3063_v22, 4  ;;  %v3193_v5 = vsel %vm17572_vm8, %v3063_v22, %v3192_v28  ;;  %v17827_v18 = vadd.f32 %v14255_v42, %v2266_v6  ;;  %v3236_v8 = vld [vmem:[#allocation2] sm:$0xf]  ;;  %v2996_v10 = vrot.slane %v2994_v31, 6  ;;  %v17844_v42 = vpop.f32.mrf.mxu0 }
 0x1ca   :  { %3194 = vst [vmem:[#allocation2 + $0x70] sm:$0xe] %v3193_v5  ;;  %v2999_v30 = vrot.slane %v2997_v45, 7  ;;  %v3068_v1 = vrot.slane %v3066_v34, 6  ;;  %v3071_v63 = vrot.slane %v3069_v54, 7  ;;  %v2269_v22 = vadd.f32 %v14194_v58, %v17500_v43  ;;  %v17842_v6 = vpop.f32.mrf.mxu1 }
 0x1cb   :  { %22245 = vst [vmem:[#allocation32_spill] sm:$0xff] %v17827_v18  ;;  %v3237_v19 = vld [vmem:[#allocation2 + $0x4] sm:$0x1]  ;;  %v3196_v28 = vsel %vm17015_vm3, %v3064_v14, %v3195_v25  ;;  %v3153_v15 = vld [vmem:[#allocation2 + $0x3c] sm:$0x3]  ;;  %v14258_v62 = vadd.f32 %v17743_v53, %v17737_v59  ;;  %v14197_v33 = vadd.f32 %v17753_v36, %v17747_v23  ;;  %v14261_v25 = vadd.f32 %v17755_v35, %v17749_v7  ;;  %v17853_v32 = vpop.f32.mrf.mxu0 }
 0x1cc   :  { %v3198_v11 = vld [vmem:[#allocation2 + $0x78] sm:$0xe]  ;;  %v3201_v27 = vld [vmem:[#allocation2 + $0x7c] sm:$0x3]  ;;  %3197 = vst [vmem:[#allocation2 + $0x74] sm:$0x3] %v3196_v28  ;;  %v3000_v31 = vor.u32 %v2999_v30, %v2996_v10  ;;  %v3072_v45 = vor.u32 %v3071_v63, %v3068_v1  ;;  %v17851_v36 = vpop.f32.mrf.mxu1 }
 0x1cd   :  { %v3272_v34 = vshrl.u32 %v3236_v8, 16  ;;  %v3527_v54 = vld [vmem:[#allocation2] sm:$0xe]  ;;  %v3528_v14 = vld [vmem:[#allocation2 + $0x4] sm:$0x1]  ;;  %v17848_v5 = vadd.f32 %v14258_v62, %v2269_v22  ;;  %v2274_v59 = vadd.f32 %v14197_v33, %v17500_v43  ;;  %v3275_v58 = vshll.u32 %v3236_v8, 16 }
 0x1ce   :  { %v3238_v53 = vld [vmem:[#allocation2 + $0x8] sm:$0xf]  ;;  %v3281_v23 = vshll.u32 %v3237_v19, 16  ;;  %v3210_v28 = vld [vmem:[#allocation2 + $0x30] sm:$0xf]  ;;  %v3001_v10 = vrot.slane %v3000_v31, 4  ;;  %v3151_v30 = vsel %vm17572_vm8, %v3000_v31, %v3150_v47  ;;  %v3199_v35 = vsel %vm17572_vm8, %v3072_v45, %v3198_v11  ;;  %v17861_v24 = vpop.f32.mrf.mxu1  ;;  %v17863_v47 = vpop.f32.mrf.mxu0 }
 0x1cf   :  { %22246 = vst [vmem:[#allocation29_spill] sm:$0xff] %v17848_v5  ;;  %v3073_v7 = vrot.slane %v3072_v45, 4  ;;  %v3239_v1 = vld [vmem:[#allocation2 + $0xc] sm:$0x1]  ;;  %v3529_v63 = vld [vmem:[#allocation2 + $0x8] sm:$0xe]  ;;  %v17859_v8 = vadd.f32 %v14261_v25, %v2274_v59 }
 0x1d0   :  { %3226 = vst [vmem:[#allocation3 + $0xa8] sm:$0xf] %v3210_v28  ;;  %3152 = vst [vmem:[#allocation2 + $0x38] sm:$0xe] %v3151_v30  ;;  %v3274_v19 = vrot.slane %v3272_v34, 4  ;;  %v3277_v22 = vrot.slane %v3275_v58, 5  ;;  %v3154_v38 = vsel %vm17015_vm3, %v3001_v10, %v3153_v15  ;;  %v17875_v15 = vpop.f32.mrf.mxu1  ;;  %v17877_v40 = vpop.f32.mrf.mxu0 }
 0x1d1   :  { %3200 = vst [vmem:[#allocation2 + $0x78] sm:$0xe] %v3199_v35  ;;  %22247 = vst [vmem:[#allocation31_spill] sm:$0xff] %v17859_v8  ;;  %v3283_v62 = vrot.slane %v3281_v23, 5  ;;  %v3530_v33 = vld [vmem:[#allocation2 + $0xc] sm:$0x1]  ;;  %v3202_v11 = vsel %vm17015_vm3, %v3073_v7, %v3201_v27 }
 0x1d2   :  { %v3286_v31 = vshrl.u32 %v3238_v53, 16  ;;  %v3289_v45 = vshll.u32 %v3238_v53, 16  ;;  %v3690_v34 = vld [vmem:[#allocation2] sm:$0xe]  ;;  %3155 = vst [vmem:[#allocation2 + $0x3c] sm:$0x3] %v3154_v38  ;;  %v3278_v59 = vor.u32 %v3277_v22, %v3274_v19  ;;  %vm17881_vm3 = vmor %vm3268_vm11, %vm3269_vm12  ;;  %v17887_v22 = vpop.f32.mrf.mxu1 }
 0x1d3   :  { %3203 = vst [vmem:[#allocation2 + $0x7c] sm:$0x3] %v3202_v11  ;;  %v3295_v58 = vshll.u32 %v3239_v1, 16  ;;  %v13064_v23 = vrot.slane %v3527_v54, 9  ;;  %v3596_v28 = vrot.slane %v3528_v14, 5  ;;  %v13065_v7 = vrot.slane %v3529_v63, 9  ;;  %v17889_v11 = vpop.f32.mrf.mxu0 }
 0x1d4   :  { %v3691_v30 = vld [vmem:[#allocation2 + $0x4] sm:$0x3]  ;;  %v3288_v53 = vrot.slane %v3286_v31, 4  ;;  %v3291_v10 = vrot.slane %v3289_v45, 5  ;;  %v3600_v35 = vrot.slane %v3530_v33, 5  ;;  %v3279_v19 = vrot.slane %v3278_v59, 4 }
 0x1d5   :  { %v3692_v38 = vld [vmem:[#allocation2 + $0x8] sm:$0xe]  ;;  %v3297_v1 = vrot.slane %v3295_v58, 5  ;;  %v3597_v54 = vsel %vm17871_vm15, %v13064_v23, %v3596_v28  ;;  %v3726_v14 = vshrl.u32 %v3690_v34, 16  ;;  %v3693_v31 = vld [vmem:[#allocation2 + $0xc] sm:$0x3]  ;;  %v17895_v28 = vpop.f32.mrf.mxu1  ;;  %v17897_v0 = vpop.f32.mrf.mxu0 }
 0x1d6   :  { %v3292_v12 = vor.u32 %v3291_v10, %v3288_v53  ;;  %v3601_v2 = vsel %vm17871_vm15, %v13065_v7, %v3600_v35  ;;  %3674 = vst [vmem:[#allocation3 + $0x8] sm:$0xf] %v3597_v54  ;;  %v3729_v45 = vshll.u32 %v3690_v34, 16  ;;  %v3735_v63 = vshrl.u32 %v3691_v30, 16  ;;  %v3216_v4 = vld [vmem:[#allocation2 + $0x60] sm:$0xf] }
 0x1d7   :  { %v3284_v33 = vsel %vm17881_vm3, %v3279_v19, %v3283_v62  ;;  %3675 = vst [vmem:[#allocation3 + $0x24] sm:$0xf] %v3601_v2  ;;  %v3728_v59 = vrot.slane %v3726_v14, 5  ;;  %v3738_v58 = vshll.u32 %v3691_v30, 16  ;;  %v3744_v23 = vshrl.u32 %v3692_v38, 16  ;;  %v17899_v62 = vpop.f32.mrf.mxu1  ;;  %v17901_v2 = vpop.f32.mrf.mxu0 }
 0x1d8   :  { %v3293_v48 = vrot.slane %v3292_v12, 4  ;;  %3511 = vst [vmem:[#allocation3 + $0x4] sm:$0xf] %v3284_v33  ;;  %v3731_v53 = vrot.slane %v3729_v45, 6  ;;  %v3737_v10 = vrot.slane %v3735_v63, 5  ;;  %v3747_v7 = vshll.u32 %v3692_v38, 16 }
 0x1d9   :  { %v3211_v35 = vld [vmem:[#allocation2 + $0x38] sm:$0xf]  ;;  %v3740_v54 = vrot.slane %v3738_v58, 6  ;;  %v3746_v34 = vrot.slane %v3744_v23, 5  ;;  %v3753_v37 = vshrl.u32 %v3693_v31, 16  ;;  %v3756_v49 = vshll.u32 %v3693_v31, 16 }
 0x1da   :  { %3227 = vst [vmem:[#allocation3 + $0xc4] sm:$0xf] %v3211_v35  ;;  %v3298_v30 = vsel %vm17881_vm3, %v3293_v48, %v3297_v1  ;;  %v3732_v19 = vor.u32 %v3731_v53, %v3728_v59  ;;  %v3749_v14 = vrot.slane %v3747_v7, 6  ;;  %v14200_v12 = vadd.f32 %v17777_v26, %v17767_v56  ;;  %v3240_v45 = vld [vmem:[#allocation2 + $0x10] sm:$0xf]  ;;  %v17915_v48 = vpop.f32.mrf.mxu1  ;;  %v17917_v1 = vpop.f32.mrf.mxu0 }
 0x1db   :  { %3512 = vst [vmem:[#allocation3 + $0x20] sm:$0xf] %v3298_v30  ;;  %v3741_v31 = vor.u32 %v3740_v54, %v3737_v10  ;;  %v3755_v63 = vrot.slane %v3753_v37, 5  ;;  %v3758_v33 = vrot.slane %v3756_v49, 6  ;;  %v14264_v58 = vadd.f32 %v17779_v50, %v17769_v55  ;;  %v3241_v53 = vld [vmem:[#allocation2 + $0x14] sm:$0x1] }
 0x1dc   :  { %v3733_v59 = vrot.slane %v3732_v19, 4  ;;  %v3750_v56 = vor.u32 %v3749_v14, %v3746_v34  ;;  %v2277_v26 = vadd.f32 %v14200_v12, %v17500_v43  ;;  %v14203_v23 = vadd.f32 %v17800_v61, %v17790_v52  ;;  %v3242_v7 = vld [vmem:[#allocation2 + $0x18] sm:$0xf]  ;;  %v3243_v37 = vld [vmem:[#allocation2 + $0x1c] sm:$0x1]  ;;  %v17924_v54 = vpop.f32.mrf.mxu1  ;;  %v17926_v30 = vpop.f32.mrf.mxu0 }
 0x1dd   :  { %v3759_v35 = vor.u32 %v3758_v33, %v3755_v63  ;;  %v14267_v49 = vadd.f32 %v17802_v51, %v17792_v29  ;;  %v3300_v10 = vshrl.u32 %v3240_v45, 16  ;;  %v3303_v55 = vshll.u32 %v3240_v45, 16  ;;  %v3531_v50 = vld [vmem:[#allocation2 + $0x10] sm:$0xe]  ;;  %v3532_v61 = vld [vmem:[#allocation2 + $0x14] sm:$0x1] }
 0x1de   :  { %v3742_v34 = vsel %vm17909_vm4, %v3733_v59, %v3741_v31  ;;  %v3751_v19 = vrot.slane %v3750_v56, 4  ;;  %v17930_v14 = vadd.f32 %v14264_v58, %v2277_v26  ;;  %v2282_v52 = vadd.f32 %v14203_v23, %v17500_v43  ;;  %v3533_v12 = vld [vmem:[#allocation2 + $0x18] sm:$0xe]  ;;  %v3534_v33 = vld [vmem:[#allocation2 + $0x1c] sm:$0x1]  ;;  %v17933_v39 = vpop.f32.mrf.mxu1 }
 0x1df   :  { %4029 = vst [vmem:[#allocation3 + $0xc] sm:$0xf] %v3742_v34  ;;  %v3302_v29 = vrot.slane %v3300_v10, 4  ;;  %v3305_v51 = vrot.slane %v3303_v55, 5  ;;  %v3309_v63 = vshll.u32 %v3241_v53, 16  ;;  %v3314_v45 = vshrl.u32 %v3242_v7, 16  ;;  %v17942_v10 = vpop.f32.mrf.mxu0 }
 0x1e0   :  { %22254 = vst [vmem:[#allocation33_spill] sm:$0xff] %v17930_v14  ;;  %v3760_v44 = vsel %vm17909_vm4, %v3751_v19, %v3759_v35  ;;  %v14980_v31 = vld [vmem:[%s22091_s3 + $0x270] ss:$8 sps:$4 sm:$0xff]   ;;  %v17940_v58 = vadd.f32 %v14267_v49, %v2282_v52  ;;  %v3317_v59 = vshll.u32 %v3242_v7, 16  ;;  %v3323_v56 = vshll.u32 %v3243_v37, 16  ;;  %v17947_v9 = vpop.f32.mrf.mxu1 }
 0x1e1   :  { %v3694_v26 = vld [vmem:[#allocation2 + $0x10] sm:$0xe]  ;;  %v3695_v23 = vld [vmem:[#allocation2 + $0x14] sm:$0x3]  ;;  %4030 = vst [vmem:[#allocation3 + $0x28] sm:$0xf] %v3760_v44  ;;  %v3306_v55 = vor.u32 %v3305_v51, %v3302_v29  ;;  %v14206_v37 = vadd.f32 %v17821_v16, %v17808_v41  ;;  %v17953_v44 = vadd.f32 %v17823_v21, %v17810_v3 }
 0x1e2   :  { %22255 = vst [vmem:[#allocation17_spill] sm:$0xff] %v17940_v58  ;;  %v14988_v53 = vld [vmem:[%s22091_s3 + $0x264] ss:$8 sps:$4 sm:$0xff]   ;;  %v3311_v34 = vrot.slane %v3309_v63, 5  ;;  %v3316_v35 = vrot.slane %v3314_v45, 4  ;;  %v13066_v19 = vrot.slane %v3531_v50, 9  ;;  %v17957_v58 = vadd.f32 %v17842_v6, %v17831_v60  ;;  %v17959_v45 = vpop.f32.mrf.mxu1  ;;  %v17964_v60 = vpop.f32.mrf.mxu0 }
 0x1e3   :  { %v14974_v49 = vld [vmem:[#allocation3] ss:$28 sps:$4 sm:$0xff]   ;;  %v3319_v7 = vrot.slane %v3317_v59, 5  ;;  %3232 = vst [vmem:[#allocation3 + $0x150] sm:$0xf] %v3216_v4  ;;  %v3307_v29 = vrot.slane %v3306_v55, 4 }
 0x1e4   :  { %v14976_v52 = vld [vmem:[#allocation3 + $0x4] ss:$28 sps:$4 sm:$0xff]   ;;  %v3325_v50 = vrot.slane %v3323_v56, 5  ;;  %v3604_v51 = vrot.slane %v3532_v61, 5  ;;  %v13067_v63 = vrot.slane %v3533_v12, 9  ;;  %v3608_v3 = vrot.slane %v3534_v33, 5  ;;  %v17973_v55 = vpop.f32.mrf.mxu1 }
 0x1e5   :  { %v3217_v13 = vld [vmem:[#allocation2 + $0x68] sm:$0xf]  ;;  %5792 = vmatprep.mubr.bf16.mxu0 %v14976_v52  ;;  %v3320_v16 = vor.u32 %v3319_v7, %v3316_v35  ;;  %v3696_v21 = vld [vmem:[#allocation2 + $0x18] sm:$0xe]  ;;  %v3762_v59 = vshrl.u32 %v3694_v26, 16  ;;  %v3765_v17 = vshll.u32 %v3694_v26, 16  ;;  %v3312_v4 = vsel %vm17881_vm3, %v3307_v29, %v3311_v34 }
 0x1e6   :  { %v14986_v41 = vld [vmem:[%s22091_s3 + $0x260] ss:$8 sps:$4 sm:$0xff]   ;;  %3233 = vst [vmem:[#allocation3 + $0x16c] sm:$0xf] %v3217_v13  ;;  %5793 = vmatmul.mubr.bf16.vlgmr.msra.gmra.mxu0 %v14974_v49  ;;  %v3605_v6 = vsel %vm17871_vm15, %v13066_v19, %v3604_v51  ;;  %v3697_v61 = vld [vmem:[#allocation2 + $0x1c] sm:$0x3]  ;;  %v3609_v34 = vsel %vm17871_vm15, %v13067_v63, %v3608_v3 }
 0x1e7   :  { %v3771_v12 = vshrl.u32 %v3695_v23, 16  ;;  %v3774_v56 = vshll.u32 %v3695_v23, 16  ;;  %v14997_v33 = vld [vmem:[%s22091_s3 + $0x254] ss:$8 sps:$4 sm:$0xff]   ;;  %5987 = vmatpush1.bf16.msra.mxu0 %v14980_v31  ;;  %v14983_v13 = vld [vmem:[%s22091_s3 + $0x370] ss:$8 sps:$4 sm:$0xff]  }
 0x1e8   :  { %v3321_v26 = vrot.slane %v3320_v16, 4  ;;  %3513 = vst [vmem:[#allocation3 + $0x3c] sm:$0xf] %v3312_v4  ;;  %3676 = vst [vmem:[#allocation3 + $0x40] sm:$0xf] %v3605_v6  ;;  %v3764_v35 = vrot.slane %v3762_v59, 5  ;;  %5988 = vmatprep.subr.bf16.mxu0 %v14988_v53  ;;  %v17985_v16 = vpop.f32.mrf.mxu1  ;;  %v2285_v53 = vadd.f32 %v14206_v37, %v17500_v43  ;;  %v17993_v6 = vpop.f32.mrf.mxu0 }
 0x1e9   :  { %v3767_v19 = vrot.slane %v3765_v17, 6  ;;  %v17980_v23 = vld [vmem:[#allocation2 + $0x20] sm:$0xf]  ;;  %3677 = vst [vmem:[#allocation3 + $0x5c] sm:$0xf] %v3609_v34  ;;  %v3773_v49 = vrot.slane %v3771_v12, 5 }
 0x1ea   :  { %v3776_v52 = vrot.slane %v3774_v56, 6  ;;  %v3780_v7 = vshrl.u32 %v3696_v21, 16  ;;  %v3783_v31 = vshll.u32 %v3696_v21, 16  ;;  %v15000_v29 = vld [vmem:[%s22091_s3 + $0x364] ss:$8 sps:$4 sm:$0xff]   ;;  %v3326_v17 = vsel %vm17881_vm3, %v3321_v26, %v3325_v50  ;;  %v17995_v14 = vpop.f32.mrf.mxu1 }
 0x1eb   :  { %v3245_v51 = vld [vmem:[#allocation2 + $0x24] sm:$0x1]  ;;  %v14979_v63 = vld [vmem:[#allocation3 + $0xc] ss:$28 sps:$4 sm:$0xff]   ;;  %v3768_v3 = vor.u32 %v3767_v19, %v3764_v35  ;;  %v3789_v59 = vshrl.u32 %v3697_v61, 16  ;;  %v3792_v46 = vshll.u32 %v3697_v61, 16  ;;  %5989 = vmatpush1.bf16.msra.mxu0 %v14986_v41  ;;  %v17998_v37 = vadd.f32 %v17953_v44, %v2285_v53 }
 0x1ec   :  { %v14977_v4 = vld [vmem:[#allocation3 + $0x8] ss:$28 sps:$4 sm:$0xff]   ;;  %v14995_v21 = vld [vmem:[%s22091_s3 + $0x250] ss:$8 sps:$4 sm:$0xff]   ;;  %3514 = vst [vmem:[#allocation3 + $0x58] sm:$0xf] %v3326_v17  ;;  %v3777_v12 = vor.u32 %v3776_v52, %v3773_v49  ;;  %5905 = vmatprep.mubr.bf16.mxu1 %v14979_v63  ;;  %v2290_v19 = vadd.f32 %v17957_v58, %v17500_v43  ;;  %5990 = vmatprep.subr.bf16.mxu0 %v14997_v33  ;;  %v18014_v58 = vpop.f32.mrf.mxu1 }
 0x1ed   :  { %v3782_v56 = vrot.slane %v3780_v7, 5  ;;  %v3785_v34 = vrot.slane %v3783_v31, 6  ;;  %v3246_v57 = vld [vmem:[#allocation2 + $0x28] sm:$0xf]  ;;  %v3769_v50 = vrot.slane %v3768_v3, 4  ;;  %v3791_v26 = vrot.slane %v3789_v59, 5  ;;  %5906 = vmatmul.mubr.bf16.vlgmr.msra.gmra.mxu1 %v14977_v4  ;;  %v18022_v59 = vpop.f32.mrf.mxu0 }
 0x1ee   :  { %22256 = vst [vmem:[#allocation11_spill] sm:$0xff] %v17998_v37  ;;  %v14998_v35 = vld [vmem:[%s22091_s3 + $0x360] ss:$8 sps:$4 sm:$0xff]   ;;  %v15003_v61 = vld [vmem:[%s22091_s3 + $0x244] ss:$8 sps:$4 sm:$0xff]   ;;  %v3794_v52 = vrot.slane %v3792_v46, 6  ;;  %v14273_v41 = vadd.f32 %v17844_v42, %v17833_v20  ;;  %6100 = vmatpush1.bf16.msra.mxu1 %v14983_v13  ;;  %v18029_v8 = vpop.f32.mrf.mxu1 }
 0x1ef   :  { %v3786_v49 = vor.u32 %v3785_v34, %v3782_v56  ;;  %v3328_v44 = vshrl.u32 %v17980_v23, 16  ;;  %v3535_v7 = vld [vmem:[#allocation2 + $0x20] sm:$0xe]  ;;  %v3536_v31 = vld [vmem:[#allocation2 + $0x24] sm:$0x1]  ;;  %v3778_v4 = vsel %vm17909_vm4, %v3769_v50, %v3777_v12  ;;  %v3331_v20 = vshll.u32 %v17980_v23, 16  ;;  %6101 = vmatprep.subr.bf16.mxu1 %v15000_v29  ;;  %5991 = vmatpush1.bf16.msra.mxu0 %v14995_v21 }
 0x1f0   :  { %v15015_v63 = vld [vmem:[%s22091_s3 + $0x354] ss:$8 sps:$4 sm:$0xff]   ;;  %v15001_v46 = vld [vmem:[%s22091_s3 + $0x240] ss:$8 sps:$4 sm:$0xff]   ;;  %v3247_v33 = vld [vmem:[#allocation2 + $0x2c] sm:$0x1]  ;;  %v3795_v56 = vor.u32 %v3794_v52, %v3791_v26  ;;  %v18024_v13 = vadd.f32 %v14273_v41, %v2290_v19  ;;  %5992 = vmatprep.subr.bf16.mxu0 %v15003_v61 }
 0x1f1   :  { %v3337_v42 = vshll.u32 %v3245_v51, 16  ;;  %v3342_v17 = vshrl.u32 %v3246_v57, 16  ;;  %v3537_v3 = vld [vmem:[#allocation2 + $0x28] sm:$0xe]  ;;  %v3787_v53 = vrot.slane %v3786_v49, 4  ;;  %v3330_v34 = vrot.slane %v3328_v44, 4 }
 0x1f2   :  { %4031 = vst [vmem:[#allocation3 + $0x44] sm:$0xf] %v3778_v4  ;;  %22257 = vst [vmem:[#allocation12_spill] sm:$0xff] %v18024_v13  ;;  %v3538_v12 = vld [vmem:[#allocation2 + $0x2c] sm:$0x1]  ;;  %v3333_v23 = vrot.slane %v3331_v20, 5  ;;  %v18038_v4 = vpop.f32.mrf.mxu1  ;;  %6102 = vmatpush1.bf16.msra.mxu1 %v14998_v35 }
 0x1f3   :  { %v3698_v50 = vld [vmem:[#allocation2 + $0x20] sm:$0xe]  ;;  %v15012_v37 = vld [vmem:[%s22091_s3 + $0x234] ss:$8 sps:$4 sm:$0xff]   ;;  %v3339_v51 = vrot.slane %v3337_v42, 5  ;;  %v3344_v5 = vrot.slane %v3342_v17, 4  ;;  %v3796_v26 = vsel %vm17909_vm4, %v3787_v53, %v3795_v56  ;;  %v14212_v17 = vadd.f32 %v17861_v24, %v17851_v36  ;;  %6103 = vmatprep.subr.bf16.mxu1 %v15015_v63  ;;  %5993 = vmatpush1.bf16.msra.mxu0 %v15001_v46 }
 0x1f4   :  { %v3345_v18 = vshll.u32 %v3246_v57, 16  ;;  %v3699_v49 = vld [vmem:[#allocation2 + $0x24] sm:$0x3]  ;;  %v15013_v29 = vld [vmem:[%s22091_s3 + $0x350] ss:$8 sps:$4 sm:$0xff]   ;;  %v3351_v19 = vshll.u32 %v3247_v33, 16  ;;  %v3334_v57 = vor.u32 %v3333_v23, %v3330_v34  ;;  %v18059_v36 = vpop.f32.mrf.mxu1  ;;  %5994 = vmatprep.subr.bf16.mxu0 %v15012_v37 }
 0x1f5   :  { %v13068_v52 = vrot.slane %v3535_v7, 9  ;;  %v3612_v41 = vrot.slane %v3536_v31, 5  ;;  %v18036_v44 = vld [vmem:[#allocation2 + $0x28] sm:$0xe]  ;;  %v14989_v21 = vld [vmem:[#allocation3 + $0x38] ss:$28 sps:$4 sm:$0xff]   ;;  %v18047_v7 = vadd.f32 %v17863_v47, %v17853_v32  ;;  %v18049_v31 = vpop.f32.mrf.mxu0 }
 0x1f6   :  { %v14991_v20 = vld [vmem:[#allocation3 + $0x3c] ss:$28 sps:$4 sm:$0xff]   ;;  %4032 = vst [vmem:[#allocation3 + $0x60] sm:$0xf] %v3796_v26  ;;  %v3347_v42 = vrot.slane %v3345_v18, 5  ;;  %v3353_v33 = vrot.slane %v3351_v19, 5  ;;  %v18067_v46 = vpop.f32.mrf.mxu1  ;;  %6104 = vmatpush1.bf16.msra.mxu1 %v15013_v29 }
 0x1f7   :  { %v15010_v61 = vld [vmem:[%s22091_s3 + $0x230] ss:$8 sps:$4 sm:$0xff]   ;;  %v3613_v53 = vsel %vm17871_vm15, %v13068_v52, %v3612_v41  ;;  %v13069_v35 = vrot.slane %v3537_v3, 9  ;;  %v3616_v56 = vrot.slane %v3538_v12, 5  ;;  %v15018_v24 = vld [vmem:[%s22091_s3 + $0x224] ss:$8 sps:$4 sm:$0xff]   ;;  %5802 = vmatprep.mubr.bf16.mxu0 %v14991_v20 }
 0x1f8   :  { %v15036_v18 = vld [vmem:[%s22091_s3 + $0x344] ss:$8 sps:$4 sm:$0xff]   ;;  %v3335_v32 = vrot.slane %v3334_v57, 4  ;;  %v3348_v47 = vor.u32 %v3347_v42, %v3344_v5  ;;  %3678 = vst [vmem:[#allocation3 + $0x78] sm:$0xf] %v3613_v53  ;;  %v3798_v34 = vshrl.u32 %v3698_v50, 16  ;;  %5803 = vmatmul.mubr.bf16.gmra.mxu0 %v14989_v21 }
 0x1f9   :  { %v3801_v23 = vshll.u32 %v3698_v50, 16  ;;  %v15034_v63 = vld [vmem:[%s22091_s3 + $0x340] ss:$8 sps:$4 sm:$0xff]   ;;  %v3617_v3 = vsel %vm17871_vm15, %v13069_v35, %v3616_v56  ;;  %v3701_v12 = vld [vmem:[#allocation2 + $0x2c] sm:$0x3]  ;;  %v3807_v26 = vshrl.u32 %v3699_v49, 16  ;;  %6105 = vmatprep.subr.bf16.mxu1 %v15036_v18  ;;  %5995 = vmatpush1.bf16.msra.mxu0 %v15010_v61  ;;  %v2293_v18 = vadd.f32 %v14212_v17, %v17500_v43 }
 0x1fa   :  { %v3810_v19 = vshll.u32 %v3699_v49, 16  ;;  %v3816_v52 = vshrl.u32 %v18036_v44, 16  ;;  %22258 = vst [vmem:[#allocation13_spill] sm:$0xff] %v18067_v46  ;;  %v3340_v5 = vsel %vm17881_vm3, %v3335_v32, %v3339_v51  ;;  %v3349_v50 = vrot.slane %v3348_v47, 4  ;;  %3679 = vst [vmem:[#allocation3 + $0x94] sm:$0xf] %v3617_v3  ;;  %v18079_v49 = vpop.f32.mrf.mxu0  ;;  %v18085_v47 = vpop.f32.mrf.mxu1  ;;  %5996 = vmatprep.subr.bf16.mxu0 %v15018_v24  ;;  %6106 = vmatpush1.bf16.msra.mxu1 %v15034_v63 }
 0x1fb   :  { %v3800_v41 = vrot.slane %v3798_v34, 5  ;;  %v3803_v20 = vrot.slane %v3801_v23, 6  ;;  %v15016_v21 = vld [vmem:[%s22091_s3 + $0x220] ss:$8 sps:$4 sm:$0xff]   ;;  %v18074_v57 = vld [vmem:[#allocation2 + $0x30] sm:$0xf]  ;;  %v18107_v24 = vadd.f32 %v18047_v7, %v2293_v18 }
 0x1fc   :  { %v15051_v37 = vld [vmem:[%s22091_s3 + $0x334] ss:$8 sps:$4 sm:$0xff]   ;;  %3515 = vst [vmem:[#allocation3 + $0x74] sm:$0xf] %v3340_v5  ;;  %v3809_v42 = vrot.slane %v3807_v26, 5  ;;  %v3812_v51 = vrot.slane %v3810_v19, 6  ;;  %v3354_v34 = vsel %vm17881_vm3, %v3349_v50, %v3353_v33  ;;  %v18094_v33 = vpop.f32.mrf.mxu1 }
 0x1fd   :  { %v3818_v53 = vrot.slane %v3816_v52, 5  ;;  %v3819_v35 = vshll.u32 %v18036_v44, 16  ;;  %v3249_v56 = vld [vmem:[#allocation2 + $0x34] sm:$0x1]  ;;  %v3218_v32 = vld [vmem:[#allocation2 + $0x70] sm:$0xf]  ;;  %v3804_v23 = vor.u32 %v3803_v20, %v3800_v41  ;;  %v14279_v41 = vadd.f32 %v17889_v11, %v17877_v40  ;;  %6107 = vmatprep.subr.bf16.mxu1 %v15051_v37  ;;  %5997 = vmatpush1.bf16.msra.mxu0 %v15016_v21 }
 0x1fe   :  { %v15027_v29 = vld [vmem:[%s22091_s3 + $0x214] ss:$8 sps:$4 sm:$0xff]   ;;  %22259 = vst [vmem:[#allocation14_spill] sm:$0xff] %v18085_v47  ;;  %v3825_v3 = vshrl.u32 %v3701_v12, 16  ;;  %v3828_v5 = vshll.u32 %v3701_v12, 16  ;;  %v3813_v13 = vor.u32 %v3812_v51, %v3809_v42  ;;  %v14215_v47 = vadd.f32 %v17887_v22, %v17875_v15  ;;  %v18104_v22 = vpop.f32.mrf.mxu0  ;;  %22260 = vst [vmem:[#allocation15_spill] sm:$0xff] %v18107_v24 }
 0x1ff   :  { %v18089_v26 = vld [vmem:[#allocation2 + $0x38] sm:$0xf]  ;;  %3234 = vst [vmem:[#allocation3 + $0x188] sm:$0xf] %v3218_v32  ;;  %v14992_v44 = vld [vmem:[#allocation3 + $0x40] ss:$28 sps:$4 sm:$0xff]   ;;  %5998 = vmatprep.subr.bf16.mxu0 %v15027_v29  ;;  %v18144_v24 = vadd.f32 %v17901_v2, %v17897_v0 }
 0x200   :  { %v3219_v19 = vld [vmem:[#allocation2 + $0x78] sm:$0xf]  ;;  %v14994_v52 = vld [vmem:[#allocation3 + $0x44] ss:$28 sps:$4 sm:$0xff]   ;;  %3516 = vst [vmem:[#allocation3 + $0x90] sm:$0xf] %v3354_v34  ;;  %v2298_v40 = vadd.f32 %v14215_v47, %v17500_v43  ;;  %v18117_v34 = vpop.f32.mrf.mxu1 }
 0x201   :  { %v3821_v46 = vrot.slane %v3819_v35, 6  ;;  %3235 = vst [vmem:[#allocation3 + $0x1a4] sm:$0xf] %v3219_v19  ;;  %v3805_v12 = vrot.slane %v3804_v23, 4  ;;  %v3827_v61 = vrot.slane %v3825_v3, 5  ;;  %v3830_v50 = vrot.slane %v3828_v5, 6  ;;  %5915 = vmatprep.mubr.bf16.mxu1 %v14994_v52 }
 0x202   :  { %v3539_v20 = vld [vmem:[#allocation2 + $0x30] sm:$0xe]  ;;  %v3540_v32 = vld [vmem:[#allocation2 + $0x34] sm:$0x1]  ;;  %v3251_v11 = vld [vmem:[#allocation2 + $0x3c] sm:$0x1]  ;;  %5916 = vmatmul.mubr.bf16.gmra.mxu1 %v14992_v44  ;;  %v18122_v37 = vadd.f32 %v14279_v41, %v2298_v40  ;;  %v18128_v44 = vpop.f32.mrf.mxu1  ;;  %v18134_v41 = vpop.f32.mrf.mxu0 }
 0x203   :  { %v15025_v42 = vld [vmem:[%s22091_s3 + $0x210] ss:$8 sps:$4 sm:$0xff]   ;;  %v3822_v17 = vor.u32 %v3821_v46, %v3818_v53  ;;  %v3356_v51 = vshrl.u32 %v18074_v57, 16  ;;  %v15039_v63 = vld [vmem:[%s22091_s3 + $0x204] ss:$8 sps:$4 sm:$0xff]   ;;  %v3814_v7 = vsel %vm17909_vm4, %v3805_v12, %v3813_v13  ;;  %v3831_v46 = vor.u32 %v3830_v50, %v3827_v61 }
 0x204   :  { %v15049_v15 = vld [vmem:[%s22091_s3 + $0x330] ss:$8 sps:$4 sm:$0xff]   ;;  %v15066_v35 = vld [vmem:[%s22091_s3 + $0x324] ss:$8 sps:$4 sm:$0xff]   ;;  %v3359_v53 = vshll.u32 %v18074_v57, 16  ;;  %v3365_v47 = vshll.u32 %v3249_v56, 16  ;;  %5999 = vmatpush1.bf16.msra.mxu0 %v15025_v42 }
 0x205   :  { %v3541_v23 = vld [vmem:[#allocation2 + $0x38] sm:$0xe]  ;;  %v3542_v3 = vld [vmem:[#allocation2 + $0x3c] sm:$0x1]  ;;  %v3823_v5 = vrot.slane %v3822_v17, 4  ;;  %22261 = vst [vmem:[#allocation16_spill] sm:$0xff] %v18122_v37  ;;  %6108 = vmatpush1.bf16.msra.mxu1 %v15049_v15  ;;  %v14218_v15 = vadd.f32 %v17899_v62, %v17895_v28  ;;  %6000 = vmatprep.subr.bf16.mxu0 %v15039_v63 }
 0x206   :  { %4033 = vst [vmem:[#allocation3 + $0x7c] sm:$0xf] %v3814_v7  ;;  %v3358_v19 = vrot.slane %v3356_v51, 4  ;;  %v3370_v52 = vshrl.u32 %v18089_v26, 16  ;;  %v3702_v18 = vld [vmem:[#allocation2 + $0x30] sm:$0xe]  ;;  %6109 = vmatprep.subr.bf16.mxu1 %v15066_v35 }
 0x207   :  { %v15064_v13 = vld [vmem:[%s22091_s3 + $0x320] ss:$8 sps:$4 sm:$0xff]   ;;  %v3361_v21 = vrot.slane %v3359_v53, 5  ;;  %v3367_v57 = vrot.slane %v3365_v47, 5  ;;  %v3373_v56 = vshll.u32 %v18089_v26, 16  ;;  %v3379_v12 = vshll.u32 %v3251_v11, 16  ;;  %v18138_v53 = vpop.f32.mrf.mxu1 }
 0x208   :  { %v3703_v61 = vld [vmem:[#allocation2 + $0x34] sm:$0x3]  ;;  %v15037_v50 = vld [vmem:[%s22091_s3 + $0x200] ss:$8 sps:$4 sm:$0xff]   ;;  %v3832_v29 = vsel %vm17909_vm4, %v3823_v5, %v3831_v46  ;;  %v3372_v17 = vrot.slane %v3370_v52, 4  ;;  %v13070_v40 = vrot.slane %v3539_v20, 9 }
 0x209   :  { %v3620_v51 = vrot.slane %v3540_v32, 5  ;;  %v3704_v7 = vld [vmem:[#allocation2 + $0x38] sm:$0xe]  ;;  %v15004_v26 = vld [vmem:[#allocation3 + $0x70] ss:$28 sps:$4 sm:$0xff]   ;;  %v3362_v47 = vor.u32 %v3361_v21, %v3358_v19  ;;  %v3375_v37 = vrot.slane %v3373_v56, 5  ;;  %v18151_v19 = vpop.f32.mrf.mxu1  ;;  %6110 = vmatpush1.bf16.msra.mxu1 %v15064_v13  ;;  %6001 = vmatpush1.bf16.msra.mxu0 %v15037_v50 }
 0x20a   :  { %v15006_v11 = vld [vmem:[#allocation3 + $0x74] ss:$28 sps:$4 sm:$0xff]   ;;  %4034 = vst [vmem:[#allocation3 + $0x98] sm:$0xf] %v3832_v29  ;;  %v3381_v46 = vrot.slane %v3379_v12, 5  ;;  %v13071_v32 = vrot.slane %v3541_v23, 9  ;;  %v18156_v23 = vpop.f32.mrf.mxu0 }
 0x20b   :  { %v3621_v20 = vsel %vm17871_vm15, %v13070_v40, %v3620_v51  ;;  %v3624_v35 = vrot.slane %v3542_v3, 5  ;;  %v15042_v5 = vld [vmem:[%s22091_s3 + $0x2f4] ss:$8 sps:$4 sm:$0xff]   ;;  %22262 = vst [vmem:[#allocation37_spill] sm:$0xff] %v18151_v19  ;;  %5812 = vmatprep.mubr.bf16.mxu0 %v15006_v11  ;;  %v3363_v28 = vrot.slane %v3362_v47, 4  ;;  %v3376_v62 = vor.u32 %v3375_v37, %v3372_v17  ;;  %v18160_v37 = vpop.f32.mrf.mxu1 }
 0x20c   :  { %3680 = vst [vmem:[#allocation3 + $0xb0] sm:$0xf] %v3621_v20  ;;  %v3834_v42 = vshrl.u32 %v3702_v18, 16  ;;  %v3837_v0 = vshll.u32 %v3702_v18, 16  ;;  %v15040_v2 = vld [vmem:[%s22091_s3 + $0x2f0] ss:$8 sps:$4 sm:$0xff]   ;;  %5813 = vmatmul.mubr.bf16.gmra.mxu0 %v15004_v26  ;;  %6002 = vmatprep.subr.bf16.mxu0 %v15042_v5 }
 0x20d   :  { %v3625_v63 = vsel %vm17871_vm15, %v13071_v32, %v3624_v35  ;;  %v3705_v3 = vld [vmem:[#allocation2 + $0x3c] sm:$0x3]  ;;  %v3843_v52 = vshrl.u32 %v3703_v61, 16  ;;  %v3846_v21 = vshll.u32 %v3703_v61, 16  ;;  %v3852_v56 = vshrl.u32 %v3704_v7, 16  ;;  %22263 = vst [vmem:[#allocation38_spill] sm:$0xff] %v18160_v37  ;;  %v18167_v32 = vpop.f32.mrf.mxu1  ;;  %6003 = vmatpush2.bf16.msra.mxu0 %v15040_v2 }
 0x20e   :  { %v3252_v12 = vld [vmem:[#allocation2 + $0x40] sm:$0xf]  ;;  %v3368_v18 = vsel %vm17881_vm3, %v3363_v28, %v3367_v57  ;;  %v3377_v29 = vrot.slane %v3376_v62, 4  ;;  %3681 = vst [vmem:[#allocation3 + $0xcc] sm:$0xf] %v3625_v63  ;;  %v3836_v17 = vrot.slane %v3834_v42, 5  ;;  %v18171_v42 = vpop.f32.mrf.mxu0 }
 0x20f   :  { %v3839_v13 = vrot.slane %v3837_v0, 6  ;;  %v3253_v40 = vld [vmem:[#allocation2 + $0x44] sm:$0x1]  ;;  %v3254_v51 = vld [vmem:[#allocation2 + $0x48] sm:$0xf]  ;;  %v3845_v26 = vrot.slane %v3843_v52, 5 }
 0x210   :  { %3517 = vst [vmem:[#allocation3 + $0xac] sm:$0xf] %v3368_v18  ;;  %v3848_v11 = vrot.slane %v3846_v21, 6  ;;  %v3854_v47 = vrot.slane %v3852_v56, 5  ;;  %v3855_v20 = vshll.u32 %v3704_v7, 16  ;;  %22264 = vst [vmem:[#allocation39_spill] sm:$0xff] %v18167_v32  ;;  %v3382_v57 = vsel %vm17881_vm3, %v3377_v29, %v3381_v46  ;;  %v18184_v29 = vpop.f32.mrf.mxu1 }
 0x211   :  { %v15054_v61 = vld [vmem:[%s22091_s3 + $0x2e4] ss:$8 sps:$4 sm:$0xff]   ;;  %v3840_v35 = vor.u32 %v3839_v13, %v3836_v17  ;;  %v3861_v28 = vshrl.u32 %v3705_v3, 16  ;;  %v3864_v62 = vshll.u32 %v3705_v3, 16  ;;  %v15079_v50 = vld [vmem:[%s22091_s3 + $0x310] ss:$8 sps:$4 sm:$0xff]   ;;  %v2301_v46 = vadd.f32 %v14218_v15, %v17500_v43 }
 0x212   :  { %v15081_v7 = vld [vmem:[%s22091_s3 + $0x314] ss:$8 sps:$4 sm:$0xff]   ;;  %3518 = vst [vmem:[#allocation3 + $0xc8] sm:$0xf] %v3382_v57  ;;  %v3849_v63 = vor.u32 %v3848_v11, %v3845_v26  ;;  %v3857_v52 = vrot.slane %v3855_v20, 6  ;;  %v18182_v18 = vadd.f32 %v17924_v54, %v17915_v48  ;;  %22265 = vst [vmem:[#allocation40_spill] sm:$0xff] %v18184_v29  ;;  %6004 = vmatprep.subr.bf16.mxu0 %v15054_v61 }
 0x213   :  { %v15007_v5 = vld [vmem:[#allocation3 + $0x78] ss:$28 sps:$4 sm:$0xff]   ;;  %v3255_v21 = vld [vmem:[#allocation2 + $0x4c] sm:$0x1]  ;;  %v3543_v56 = vld [vmem:[#allocation2 + $0x40] sm:$0xe]  ;;  %6111 = vmatprep.subr.bf16.mxu1 %v15081_v7  ;;  %v18194_v7 = vpop.f32.mrf.mxu0 }
 0x214   :  { %v15009_v0 = vld [vmem:[#allocation3 + $0x7c] ss:$28 sps:$4 sm:$0xff]   ;;  %v3544_v3 = vld [vmem:[#allocation2 + $0x44] sm:$0x1]  ;;  %v3841_v17 = vrot.slane %v3840_v35, 4  ;;  %v3863_v13 = vrot.slane %v3861_v28, 5  ;;  %v3858_v15 = vor.u32 %v3857_v52, %v3854_v47  ;;  %v18196_v47 = vpop.f32.mrf.mxu1  ;;  %6112 = vmatpush1.bf16.msra.mxu1 %v15079_v50 }
 0x215   :  { %v3866_v32 = vrot.slane %v3864_v62, 6  ;;  %v3384_v37 = vshrl.u32 %v3252_v12, 16  ;;  %v3545_v19 = vld [vmem:[#allocation2 + $0x48] sm:$0xe]  ;;  %5925 = vmatprep.mubr.bf16.mxu1 %v15009_v0  ;;  %v3387_v11 = vshll.u32 %v3252_v12, 16  ;;  %v3393_v20 = vshll.u32 %v3253_v40, 16 }
 0x216   :  { %v15052_v26 = vld [vmem:[%s22091_s3 + $0x2e0] ss:$8 sps:$4 sm:$0xff]   ;;  %v3398_v57 = vshrl.u32 %v3254_v51, 16  ;;  %v15057_v48 = vld [vmem:[%s22091_s3 + $0x2d4] ss:$8 sps:$4 sm:$0xff]   ;;  %5926 = vmatmul.mubr.bf16.gmra.mxu1 %v15007_v5  ;;  %v3850_v54 = vsel %vm17909_vm4, %v3841_v17, %v3849_v63  ;;  %v3401_v28 = vshll.u32 %v3254_v51, 16 }
 0x217   :  { %v3867_v2 = vor.u32 %v3866_v32, %v3863_v13  ;;  %v3386_v35 = vrot.slane %v3384_v37, 4  ;;  %v3546_v62 = vld [vmem:[#allocation2 + $0x4c] sm:$0x1]  ;;  %v3706_v29 = vld [vmem:[#allocation2 + $0x40] sm:$0xe]  ;;  %22266 = vst [vmem:[#allocation41_spill] sm:$0xff] %v18196_v47  ;;  %6005 = vmatpush2.bf16.msra.mxu0 %v15052_v26  ;;  %v18211_v26 = vpop.f32.mrf.mxu0 }
 0x218   :  { %v3859_v12 = vrot.slane %v3858_v15, 4  ;;  %4035 = vst [vmem:[#allocation3 + $0xb4] sm:$0xf] %v3850_v54  ;;  %v3389_v40 = vrot.slane %v3387_v11, 5  ;;  %v3395_v61 = vrot.slane %v3393_v20, 5  ;;  %v3400_v0 = vrot.slane %v3398_v57, 4  ;;  %6006 = vmatprep.subr.bf16.mxu0 %v15057_v48 }
 0x219   :  { %v3707_v52 = vld [vmem:[#allocation2 + $0x44] sm:$0x3]  ;;  %v15055_v5 = vld [vmem:[%s22091_s3 + $0x2d0] ss:$8 sps:$4 sm:$0xff]   ;;  %v3403_v32 = vrot.slane %v3401_v28, 5  ;;  %v3407_v37 = vshll.u32 %v3255_v21, 16 }
 0x21a   :  { %v13072_v51 = vrot.slane %v3543_v56, 9  ;;  %v3628_v63 = vrot.slane %v3544_v3, 5  ;;  %v3868_v17 = vsel %vm17909_vm4, %v3859_v12, %v3867_v2  ;;  %v3390_v13 = vor.u32 %v3389_v40, %v3386_v35  ;;  %v3708_v11 = vld [vmem:[#allocation2 + $0x48] sm:$0xe]  ;;  %v15069_v20 = vld [vmem:[%s22091_s3 + $0x2c4] ss:$8 sps:$4 sm:$0xff]  }
 0x21b   :  { %v13073_v15 = vrot.slane %v3545_v19, 9  ;;  %v3632_v54 = vrot.slane %v3546_v62, 5  ;;  %v15019_v57 = vld [vmem:[#allocation3 + $0xa8] ss:$28 sps:$4 sm:$0xff]   ;;  %4036 = vst [vmem:[#allocation3 + $0xd0] sm:$0xf] %v3868_v17  ;;  %v3404_v50 = vor.u32 %v3403_v32, %v3400_v0  ;;  %v18209_v3 = vadd.f32 %v18144_v24, %v2301_v46  ;;  %v18213_v19 = vpop.f32.mrf.mxu1  ;;  %6007 = vmatpush2.bf16.msra.mxu0 %v15055_v5 }
 0x21c   :  { %v15021_v47 = vld [vmem:[#allocation3 + $0xac] ss:$28 sps:$4 sm:$0xff]   ;;  %v3409_v21 = vrot.slane %v3407_v37, 5  ;;  %v3629_v56 = vsel %vm17871_vm15, %v13072_v51, %v3628_v63  ;;  %v3391_v48 = vrot.slane %v3390_v13, 4  ;;  %v3870_v28 = vshrl.u32 %v3706_v29, 16  ;;  %6008 = vmatprep.subr.bf16.mxu0 %v15069_v20 }
 0x21d   :  { %v3633_v2 = vsel %vm17871_vm15, %v13073_v15, %v3632_v54  ;;  %3682 = vst [vmem:[#allocation3 + $0xe8] sm:$0xf] %v3629_v56  ;;  %v3709_v35 = vld [vmem:[#allocation2 + $0x4c] sm:$0x3]  ;;  %v3873_v62 = vshll.u32 %v3706_v29, 16  ;;  %5822 = vmatprep.mubr.bf16.mxu0 %v15021_v47  ;;  %v3405_v12 = vrot.slane %v3404_v50, 4  ;;  %v18227_v15 = vpop.f32.mrf.mxu0  ;;  %v18229_v54 = vpop.f32.mrf.mxu1 }
 0x21e   :  { %3683 = vst [vmem:[#allocation3 + $0x104] sm:$0xf] %v3633_v2  ;;  %v3879_v40 = vshrl.u32 %v3707_v52, 16  ;;  %v3882_v0 = vshll.u32 %v3707_v52, 16  ;;  %v3888_v32 = vshrl.u32 %v3708_v11, 16  ;;  %5823 = vmatmul.mubr.bf16.gmra.mxu0 %v15019_v57  ;;  %v3396_v46 = vsel %vm17881_vm3, %v3391_v48, %v3395_v61 }
 0x21f   :  { %v15067_v24 = vld [vmem:[%s22091_s3 + $0x2c0] ss:$8 sps:$4 sm:$0xff]   ;;  %v3872_v37 = vrot.slane %v3870_v28, 5  ;;  %v3875_v51 = vrot.slane %v3873_v62, 6  ;;  %v3891_v63 = vshll.u32 %v3708_v11, 16  ;;  %v3410_v47 = vsel %vm17881_vm3, %v3405_v12, %v3409_v21 }
 0x220   :  { %v15072_v29 = vld [vmem:[%s22091_s3 + $0x2b4] ss:$8 sps:$4 sm:$0xff]   ;;  %3519 = vst [vmem:[#allocation3 + $0xe4] sm:$0xf] %v3396_v46  ;;  %v3881_v52 = vrot.slane %v3879_v40, 5  ;;  %v3884_v5 = vrot.slane %v3882_v0, 6  ;;  %v2306_v2 = vadd.f32 %v18182_v18, %v17500_v43  ;;  %v14285_v28 = vadd.f32 %v17926_v30, %v17917_v1  ;;  %6009 = vmatpush2.bf16.msra.mxu0 %v15067_v24 }
 0x221   :  { %v3890_v17 = vrot.slane %v3888_v32, 5  ;;  %v3256_v13 = vld [vmem:[#allocation2 + $0x50] sm:$0xf]  ;;  %3520 = vst [vmem:[#allocation3 + $0x100] sm:$0xf] %v3410_v47  ;;  %v3876_v61 = vor.u32 %v3875_v51, %v3872_v37  ;;  %v3893_v11 = vrot.slane %v3891_v63, 6  ;;  %v14224_v62 = vadd.f32 %v17947_v9, %v17933_v39  ;;  %6010 = vmatprep.subr.bf16.mxu0 %v15072_v29  ;;  %v18256_v47 = vpop.f32.mrf.mxu0 }
 0x222   :  { %v3897_v20 = vshrl.u32 %v3709_v35, 16  ;;  %v3900_v57 = vshll.u32 %v3709_v35, 16  ;;  %v3257_v50 = vld [vmem:[#allocation2 + $0x54] sm:$0x1]  ;;  %v3258_v56 = vld [vmem:[#allocation2 + $0x58] sm:$0xf]  ;;  %v3885_v48 = vor.u32 %v3884_v5, %v3881_v52  ;;  %v14288_v9 = vadd.f32 %v17964_v60, %v17942_v10  ;;  %v18258_v52 = vpop.f32.mrf.mxu1 }
 0x223   :  { %v15091_v21 = vld [vmem:[%s22091_s3 + $0x300] ss:$8 sps:$4 sm:$0xff]   ;;  %v15070_v35 = vld [vmem:[%s22091_s3 + $0x2b0] ss:$8 sps:$4 sm:$0xff]   ;;  %v15084_v12 = vld [vmem:[%s22091_s3 + $0x2a4] ss:$8 sps:$4 sm:$0xff]   ;;  %v3894_v1 = vor.u32 %v3893_v11, %v3890_v17  ;;  %v14227_v39 = vadd.f32 %v17973_v55, %v17959_v45  ;;  %v18253_v46 = vadd.f32 %v14285_v28, %v2306_v2  ;;  %v2309_v37 = vadd.f32 %v14224_v62, %v17500_v43 }
 0x224   :  { %v15093_v40 = vld [vmem:[%s22091_s3 + $0x304] ss:$8 sps:$4 sm:$0xff]   ;;  %v15024_v0 = vld [vmem:[#allocation3 + $0xb4] ss:$28 sps:$4 sm:$0xff]   ;;  %v3877_v32 = vrot.slane %v3876_v61, 4  ;;  %v3899_v30 = vrot.slane %v3897_v20, 5  ;;  %6011 = vmatpush2.bf16.msra.mxu0 %v15070_v35  ;;  %v18277_v35 = vpop.f32.mrf.mxu1 }
 0x225   :  { %v15022_v18 = vld [vmem:[#allocation3 + $0xb0] ss:$28 sps:$4 sm:$0xff]   ;;  %v3902_v24 = vrot.slane %v3900_v57, 6  ;;  %v3259_v51 = vld [vmem:[#allocation2 + $0x5c] sm:$0x1]  ;;  %6113 = vmatprep.subr.bf16.mxu1 %v15093_v40  ;;  %5935 = vmatprep.mubr.bf16.mxu1 %v15024_v0  ;;  %v3895_v60 = vrot.slane %v3894_v1, 4 }
 0x226   :  { %v3547_v63 = vld [vmem:[#allocation2 + $0x50] sm:$0xe]  ;;  %v3886_v10 = vsel %vm17909_vm4, %v3877_v32, %v3885_v48  ;;  %v3412_v45 = vshrl.u32 %v3256_v13, 16  ;;  %v3415_v55 = vshll.u32 %v3256_v13, 16  ;;  %v3548_v29 = vld [vmem:[#allocation2 + $0x54] sm:$0x1]  ;;  %6114 = vmatpush1.bf16.msra.mxu1 %v15091_v21  ;;  %6012 = vmatprep.subr.bf16.mxu0 %v15084_v12 }
 0x227   :  { %v3549_v5 = vld [vmem:[#allocation2 + $0x58] sm:$0xe]  ;;  %v3550_v17 = vld [vmem:[#allocation2 + $0x5c] sm:$0x1]  ;;  %v3710_v61 = vld [vmem:[#allocation2 + $0x50] sm:$0xe]  ;;  %5936 = vmatmul.mubr.bf16.gmra.mxu1 %v15022_v18  ;;  %v3903_v20 = vor.u32 %v3902_v24, %v3899_v30  ;;  %v18270_v30 = vadd.f32 %v14288_v9, %v2309_v37 }
 0x228   :  { %v15082_v11 = vld [vmem:[%s22091_s3 + $0x2a0] ss:$8 sps:$4 sm:$0xff]   ;;  %4037 = vst [vmem:[#allocation3 + $0xec] sm:$0xf] %v3886_v10  ;;  %v3421_v57 = vshll.u32 %v3257_v50, 16  ;;  %v3426_v2 = vshrl.u32 %v3258_v56, 16  ;;  %v18273_v50 = vadd.f32 %v14227_v39, %v17500_v43 }
 0x229   :  { %v3429_v28 = vshll.u32 %v3258_v56, 16  ;;  %v15087_v13 = vld [vmem:[%s22091_s3 + $0x294] ss:$8 sps:$4 sm:$0xff]   ;;  %v3414_v48 = vrot.slane %v3412_v45, 4  ;;  %v3417_v62 = vrot.slane %v3415_v55, 5  ;;  %v3435_v40 = vshll.u32 %v3259_v51, 16  ;;  %v18275_v56 = vpop.f32.mrf.mxu0  ;;  %6013 = vmatpush2.bf16.msra.mxu0 %v15082_v11 }
 0x22a   :  { %v13074_v0 = vrot.slane %v3547_v63, 9  ;;  %v15030_v32 = vld [vmem:[#allocation3 + $0xe4] ss:$28 sps:$4 sm:$0xff]   ;;  %v3904_v21 = vsel %vm17909_vm4, %v3895_v60, %v3903_v20  ;;  %v3423_v18 = vrot.slane %v3421_v57, 5  ;;  %v3711_v1 = vld [vmem:[#allocation2 + $0x54] sm:$0x3]  ;;  %6014 = vmatprep.subr.bf16.mxu0 %v15087_v13 }
 0x22b   :  { %22267 = vst [vmem:[#allocation42_spill] sm:$0xff] %v18270_v30  ;;  %v15028_v24 = vld [vmem:[#allocation3 + $0xe0] ss:$28 sps:$4 sm:$0xff]   ;;  %4038 = vst [vmem:[#allocation3 + $0x108] sm:$0xf] %v3904_v21  ;;  %v3418_v51 = vor.u32 %v3417_v62, %v3414_v48  ;;  %v3428_v63 = vrot.slane %v3426_v2, 4  ;;  %5832 = vmatprep.mubr.bf16.mxu0 %v15030_v32  ;;  %v18291_v62 = vpop.f32.mrf.mxu1 }
 0x22c   :  { %v3431_v12 = vrot.slane %v3429_v28, 5  ;;  %v3437_v10 = vrot.slane %v3435_v40, 5  ;;  %v3712_v45 = vld [vmem:[#allocation2 + $0x58] sm:$0xe]  ;;  %v3713_v55 = vld [vmem:[#allocation2 + $0x5c] sm:$0x3]  ;;  %5833 = vmatmul.mubr.bf16.gmra.mxu0 %v15028_v24  ;;  %v18289_v28 = vpop.f32.mrf.mxu0 }
 0x22d   :  { %v3636_v60 = vrot.slane %v3548_v29, 5  ;;  %v13075_v20 = vrot.slane %v3549_v5, 9  ;;  %v3640_v9 = vrot.slane %v3550_v17, 5  ;;  %v3906_v37 = vshrl.u32 %v3710_v61, 16  ;;  %v15085_v39 = vld [vmem:[%s22091_s3 + $0x290] ss:$8 sps:$4 sm:$0xff]  }
 0x22e   :  { %v3419_v57 = vrot.slane %v3418_v51, 4  ;;  %v3432_v30 = vor.u32 %v3431_v12, %v3428_v63  ;;  %v3909_v21 = vshll.u32 %v3710_v61, 16  ;;  %v3915_v48 = vshrl.u32 %v3711_v1, 16  ;;  %v15096_v2 = vld [vmem:[%s22091_s3 + $0x284] ss:$8 sps:$4 sm:$0xff]   ;;  %6015 = vmatpush2.bf16.msra.mxu0 %v15085_v39 }
 0x22f   :  { %v3637_v29 = vsel %vm17871_vm15, %v13074_v0, %v3636_v60  ;;  %v3641_v5 = vsel %vm17871_vm15, %v13075_v20, %v3640_v9  ;;  %v3908_v17 = vrot.slane %v3906_v37, 5  ;;  %v3918_v11 = vshll.u32 %v3711_v1, 16  ;;  %v15094_v1 = vld [vmem:[%s22091_s3 + $0x280] ss:$8 sps:$4 sm:$0xff]   ;;  %v3261_v9 = vld [vmem:[#allocation2 + $0x64] sm:$0x1]  ;;  %6016 = vmatprep.subr.bf16.mxu0 %v15096_v2 }
 0x230   :  { %v3424_v61 = vsel %vm17881_vm3, %v3419_v57, %v3423_v18  ;;  %v3433_v13 = vrot.slane %v3432_v30, 4  ;;  %3684 = vst [vmem:[#allocation3 + $0x120] sm:$0xf] %v3637_v29  ;;  %3685 = vst [vmem:[#allocation3 + $0x13c] sm:$0xf] %v3641_v5  ;;  %v3911_v40 = vrot.slane %v3909_v21, 6  ;;  %v14291_v30 = vadd.f32 %v18022_v59, %v17993_v6 }
 0x231   :  { %v3917_v32 = vrot.slane %v3915_v48, 5  ;;  %3521 = vst [vmem:[#allocation3 + $0x11c] sm:$0xf] %v3424_v61  ;;  %v3920_v24 = vrot.slane %v3918_v11, 6  ;;  %v3924_v0 = vshrl.u32 %v3712_v45, 16  ;;  %v3927_v51 = vshll.u32 %v3712_v45, 16 }
 0x232   :  { %v3933_v63 = vshrl.u32 %v3713_v55, 16  ;;  %v3438_v12 = vsel %vm17881_vm3, %v3433_v13, %v3437_v10  ;;  %v3912_v60 = vor.u32 %v3911_v40, %v3908_v17  ;;  %v3936_v18 = vshll.u32 %v3713_v55, 16  ;;  %v3260_v20 = vld [vmem:[#allocation2 + $0x60] sm:$0xf]  ;;  %v15033_v37 = vld [vmem:[#allocation3 + $0xec] ss:$28 sps:$4 sm:$0xff]   ;;  %v18306_v10 = vpop.f32.mrf.mxu0  ;;  %v18308_v55 = vpop.f32.mrf.mxu1  ;;  %6017 = vmatpush2.bf16.msra.mxu0 %v15094_v1 }
 0x233   :  { %3522 = vst [vmem:[#allocation3 + $0x138] sm:$0xf] %v3438_v12  ;;  %v3921_v45 = vor.u32 %v3920_v24, %v3917_v32  ;;  %v3926_v57 = vrot.slane %v3924_v0, 5  ;;  %v14230_v39 = vadd.f32 %v17995_v14, %v17985_v16  ;;  %v3262_v21 = vld [vmem:[#allocation2 + $0x68] sm:$0xf]  ;;  %v14294_v48 = vadd.f32 %v18079_v49, %v18049_v31  ;;  %5945 = vmatprep.mubr.bf16.mxu1 %v15033_v37 }
 0x234   :  { %v15031_v29 = vld [vmem:[#allocation3 + $0xe8] ss:$28 sps:$4 sm:$0xff]   ;;  %v3913_v6 = vrot.slane %v3912_v60, 4  ;;  %v3929_v59 = vrot.slane %v3927_v51, 6  ;;  %v3935_v5 = vrot.slane %v3933_v63, 5  ;;  %v3938_v2 = vrot.slane %v3936_v18, 6 }
 0x235   :  { %v18311_v17 = vadd.f32 %v14291_v30, %v18273_v50  ;;  %v2317_v11 = vadd.f32 %v14230_v39, %v17500_v43  ;;  %v3263_v14 = vld [vmem:[#allocation2 + $0x6c] sm:$0x1]  ;;  %v3440_v16 = vshrl.u32 %v3260_v20, 16  ;;  %v3443_v61 = vshll.u32 %v3260_v20, 16  ;;  %v3551_v13 = vld [vmem:[#allocation2 + $0x60] sm:$0xe]  ;;  %5946 = vmatmul.mubr.bf16.gmra.mxu1 %v15031_v29  ;;  %v18316_v30 = vpop.f32.mrf.mxu0  ;;  %v18318_v20 = vpop.f32.mrf.mxu1 }
 0x236   :  { %v3922_v31 = vsel %vm17909_vm4, %v3913_v6, %v3921_v45  ;;  %v3930_v49 = vor.u32 %v3929_v59, %v3926_v57  ;;  %v3939_v40 = vor.u32 %v3938_v2, %v3935_v5  ;;  %v3449_v32 = vshll.u32 %v3261_v9, 16  ;;  %v3552_v24 = vld [vmem:[#allocation2 + $0x64] sm:$0x1]  ;;  %v3553_v0 = vld [vmem:[#allocation2 + $0x68] sm:$0xe] }
 0x237   :  { %4039 = vst [vmem:[#allocation3 + $0x124] sm:$0xf] %v3922_v31  ;;  %v3442_v51 = vrot.slane %v3440_v16, 4  ;;  %v3445_v50 = vrot.slane %v3443_v61, 5  ;;  %v3454_v63 = vshrl.u32 %v3262_v21, 16  ;;  %v3457_v12 = vshll.u32 %v3262_v21, 16 }
 0x238   :  { %v3554_v60 = vld [vmem:[#allocation2 + $0x6c] sm:$0x1]  ;;  %v3714_v18 = vld [vmem:[#allocation2 + $0x60] sm:$0xe]  ;;  %v3931_v1 = vrot.slane %v3930_v49, 4  ;;  %v3451_v37 = vrot.slane %v3449_v32, 5  ;;  %v18322_v61 = vadd.f32 %v14294_v48, %v2317_v11  ;;  %v14233_v31 = vadd.f32 %v18029_v8, %v18014_v58 }
 0x239   :  { %v3463_v39 = vshll.u32 %v3263_v14, 16  ;;  %v13076_v45 = vrot.slane %v3551_v13, 9  ;;  %v3446_v57 = vor.u32 %v3445_v50, %v3442_v51  ;;  %v3456_v29 = vrot.slane %v3454_v63, 4  ;;  %v3715_v59 = vld [vmem:[#allocation2 + $0x64] sm:$0x3]  ;;  %v18328_v51 = vpop.f32.mrf.mxu0  ;;  %v18330_v50 = vpop.f32.mrf.mxu1 }
 0x23a   :  { %v3459_v9 = vrot.slane %v3457_v12, 5  ;;  %v3644_v6 = vrot.slane %v3552_v24, 5  ;;  %v15045_v5 = vld [vmem:[#allocation3 + $0x11c] ss:$28 sps:$4 sm:$0xff]   ;;  %v3940_v2 = vsel %vm17909_vm4, %v3931_v1, %v3939_v40  ;;  %v3716_v16 = vld [vmem:[#allocation2 + $0x68] sm:$0xe] }
 0x23b   :  { %v3465_v21 = vrot.slane %v3463_v39, 5  ;;  %v15043_v49 = vld [vmem:[#allocation3 + $0x118] ss:$28 sps:$4 sm:$0xff]   ;;  %4040 = vst [vmem:[#allocation3 + $0x140] sm:$0xf] %v3940_v2  ;;  %v3447_v14 = vrot.slane %v3446_v57, 4  ;;  %5842 = vmatprep.mubr.bf16.mxu0 %v15045_v5  ;;  %v18338_v5 = vpop.f32.mrf.mxu0 }
 0x23c   :  { %v3460_v13 = vor.u32 %v3459_v9, %v3456_v29  ;;  %v3645_v32 = vsel %vm17871_vm15, %v13076_v45, %v3644_v6  ;;  %v13077_v24 = vrot.slane %v3553_v0, 9  ;;  %v3648_v40 = vrot.slane %v3554_v60, 5  ;;  %5843 = vmatmul.mubr.bf16.gmra.mxu0 %v15043_v49  ;;  %v3717_v12 = vld [vmem:[#allocation2 + $0x6c] sm:$0x3] }
 0x23d   :  { %3686 = vst [vmem:[#allocation3 + $0x158] sm:$0xf] %v3645_v32  ;;  %v3942_v48 = vshrl.u32 %v3714_v18, 16  ;;  %v3945_v11 = vshll.u32 %v3714_v18, 16  ;;  %v3951_v63 = vshrl.u32 %v3715_v59, 16  ;;  %v3452_v8 = vsel %vm17881_vm3, %v3447_v14, %v3451_v37  ;;  %v18340_v37 = vpop.f32.mrf.mxu1 }
 0x23e   :  { %v3461_v58 = vrot.slane %v3460_v13, 4  ;;  %v3954_v1 = vshll.u32 %v3715_v59, 16  ;;  %v3960_v39 = vshrl.u32 %v3716_v16, 16  ;;  %3523 = vst [vmem:[#allocation3 + $0x154] sm:$0xf] %v3452_v8  ;;  %v3649_v0 = vsel %vm17871_vm15, %v13077_v24, %v3648_v40 }
 0x23f   :  { %v3944_v45 = vrot.slane %v3942_v48, 5  ;;  %v3947_v57 = vrot.slane %v3945_v11, 6  ;;  %v3953_v29 = vrot.slane %v3951_v63, 5  ;;  %3687 = vst [vmem:[#allocation3 + $0x174] sm:$0xf] %v3649_v0  ;;  %v3963_v6 = vshll.u32 %v3716_v16, 16 }
 0x240   :  { %v3466_v60 = vsel %vm17881_vm3, %v3461_v58, %v3465_v21  ;;  %v3956_v18 = vrot.slane %v3954_v1, 6  ;;  %v3962_v9 = vrot.slane %v3960_v39, 5  ;;  %v3969_v2 = vshrl.u32 %v3717_v12, 16  ;;  %v3264_v40 = vld [vmem:[#allocation2 + $0x70] sm:$0xf] }
 0x241   :  { %3524 = vst [vmem:[#allocation3 + $0x170] sm:$0xf] %v3466_v60  ;;  %v3948_v59 = vor.u32 %v3947_v57, %v3944_v45  ;;  %v3972_v49 = vshll.u32 %v3717_v12, 16  ;;  %v2322_v14 = vadd.f32 %v14233_v31, %v17500_v43  ;;  %v3965_v32 = vrot.slane %v3963_v6, 6  ;;  %v3265_v16 = vld [vmem:[#allocation2 + $0x74] sm:$0x1]  ;;  %v18357_v45 = vpop.f32.mrf.mxu0  ;;  %v18359_v57 = vpop.f32.mrf.mxu1 }
 0x242   :  { %v3957_v13 = vor.u32 %v3956_v18, %v3953_v29  ;;  %v14297_v24 = vadd.f32 %v18134_v41, %v18104_v22  ;;  %v14236_v21 = vadd.f32 %v18059_v36, %v18038_v4  ;;  %v15048_v48 = vld [vmem:[#allocation3 + $0x124] ss:$28 sps:$4 sm:$0xff]   ;;  %v3266_v63 = vld [vmem:[#allocation2 + $0x78] sm:$0xf]  ;;  %v14300_v8 = vadd.f32 %v18171_v42, %v18156_v23  ;;  %v22268_v58 = vld [vmem:[#allocation13_spill] sm:$0xff] }
 0x243   :  { %v3949_v11 = vrot.slane %v3948_v59, 4  ;;  %v22269_v12 = vld [vmem:[#allocation14_spill] sm:$0xff]  ;;  %v18353_v31 = vadd.f32 %v18211_v26, %v18194_v7  ;;  %v3966_v22 = vor.u32 %v3965_v32, %v3962_v9  ;;  %v3971_v41 = vrot.slane %v3969_v2, 5  ;;  %5955 = vmatprep.mubr.bf16.mxu1 %v15048_v48  ;;  %v3555_v26 = vld [vmem:[#allocation2 + $0x70] sm:$0xe] }
 0x244   :  { %v14319_v1 = vadd.f32 %v22269_v12, %v22268_v58  ;;  %v15046_v39 = vld [vmem:[#allocation3 + $0x120] ss:$28 sps:$4 sm:$0xff]   ;;  %v3974_v0 = vrot.slane %v3972_v49, 6  ;;  %v18355_v4 = vadd.f32 %v14297_v24, %v2322_v14  ;;  %v2325_v42 = vadd.f32 %v14236_v21, %v17500_v43  ;;  %v3556_v60 = vld [vmem:[#allocation2 + $0x74] sm:$0x1]  ;;  %v22272_v12 = vld [vmem:[#allocation32_spill] sm:$0xff] }
 0x245   :  { %22270 = vst [vmem:[#allocation13_spill] sm:$0xff] %v18353_v31  ;;  %v3267_v36 = vld [vmem:[#allocation2 + $0x7c] sm:$0x1]  ;;  %v3958_v23 = vsel %vm17909_vm4, %v3949_v11, %v3957_v13  ;;  %v3468_v29 = vshrl.u32 %v3264_v40, 16  ;;  %v3471_v7 = vshll.u32 %v3264_v40, 16  ;;  %5956 = vmatmul.mubr.bf16.gmra.mxu1 %v15046_v39  ;;  %v3967_v9 = vrot.slane %v3966_v22, 4  ;;  %v18371_v22 = vpop.f32.mrf.mxu0 }
 0x246   :  { %v3557_v18 = vld [vmem:[#allocation2 + $0x78] sm:$0xe]  ;;  %v3975_v6 = vor.u32 %v3974_v0, %v3971_v41  ;;  %4041 = vst [vmem:[#allocation3 + $0x15c] sm:$0xf] %v3958_v23  ;;  %v3477_v59 = vshll.u32 %v3265_v16, 16  ;;  %v3482_v2 = vshrl.u32 %v3266_v63, 16  ;;  %v18366_v11 = vadd.f32 %v14300_v8, %v2325_v42  ;;  %v18373_v16 = vpop.f32.mrf.mxu1 }
 0x247   :  { %v3558_v49 = vld [vmem:[#allocation2 + $0x7c] sm:$0x1]  ;;  %v3470_v14 = vrot.slane %v3468_v29, 4  ;;  %v3473_v32 = vrot.slane %v3471_v7, 5  ;;  %v3485_v24 = vshll.u32 %v3266_v63, 16  ;;  %v3491_v48 = vshll.u32 %v3267_v36, 16 }
 0x248   :  { %v3718_v58 = vld [vmem:[#allocation2 + $0x70] sm:$0xe]  ;;  %v3976_v43 = vsel %vm17909_vm4, %v3967_v9, %v3975_v6  ;;  %v3479_v21 = vrot.slane %v3477_v59, 5  ;;  %v3719_v40 = vld [vmem:[#allocation2 + $0x74] sm:$0x3]  ;;  %22271 = vst [vmem:[#allocation14_spill] sm:$0xff] %v18366_v11  ;;  %v18369_v39 = vadd.f32 %v14319_v1, %v22272_v12 }
 0x249   :  { %v15060_v13 = vld [vmem:[#allocation3 + $0x154] ss:$28 sps:$4 sm:$0xff]   ;;  %4042 = vst [vmem:[#allocation3 + $0x178] sm:$0xf] %v3976_v43  ;;  %v3474_v63 = vor.u32 %v3473_v32, %v3470_v14  ;;  %v3484_v0 = vrot.slane %v3482_v2, 4  ;;  %v3487_v36 = vrot.slane %v3485_v24, 5 }
 0x24a   :  { %22273 = vst [vmem:[#allocation32_spill] sm:$0xff] %v18369_v39  ;;  %v15058_v41 = vld [vmem:[#allocation3 + $0x150] ss:$28 sps:$4 sm:$0xff]   ;;  %v3493_v23 = vrot.slane %v3491_v48, 5  ;;  %5852 = vmatprep.mubr.bf16.mxu0 %v15060_v13  ;;  %v13078_v29 = vrot.slane %v3555_v26, 9  ;;  %v3652_v7 = vrot.slane %v3556_v60, 5  ;;  %v18379_v48 = vpop.f32.mrf.mxu0  ;;  %v18381_v26 = vpop.f32.mrf.mxu1 }
 0x24b   :  { %v13079_v9 = vrot.slane %v3557_v18, 9  ;;  %v3656_v6 = vrot.slane %v3558_v49, 5  ;;  %5853 = vmatmul.mubr.bf16.gmra.mxu0 %v15058_v41  ;;  %v3475_v8 = vrot.slane %v3474_v63, 4  ;;  %v3488_v42 = vor.u32 %v3487_v36, %v3484_v0  ;;  %v3720_v1 = vld [vmem:[#allocation2 + $0x78] sm:$0xe] }
 0x24c   :  { %v3978_v59 = vshrl.u32 %v3718_v58, 16  ;;  %v3981_v12 = vshll.u32 %v3718_v58, 16  ;;  %v3653_v31 = vsel %vm17871_vm15, %v13078_v29, %v3652_v7  ;;  %v3721_v2 = vld [vmem:[#allocation2 + $0x7c] sm:$0x3]  ;;  %v3987_v32 = vshrl.u32 %v3719_v40, 16  ;;  %v18395_v27 = vpop.f32.mrf.mxu1 }
 0x24d   :  { %v3657_v14 = vsel %vm17871_vm15, %v13079_v9, %v3656_v6  ;;  %v3990_v24 = vshll.u32 %v3719_v40, 16  ;;  %v3480_v60 = vsel %vm17881_vm3, %v3475_v8, %v3479_v21  ;;  %v3489_v18 = vrot.slane %v3488_v42, 4  ;;  %3688 = vst [vmem:[#allocation3 + $0x190] sm:$0xf] %v3653_v31  ;;  %v4045_v13 = vld [vmem:[#allocation2] sm:$0xc] }
 0x24e   :  { %3689 = vst [vmem:[#allocation3 + $0x1ac] sm:$0xf] %v3657_v14  ;;  %v3980_v49 = vrot.slane %v3978_v59, 5  ;;  %v3983_v58 = vrot.slane %v3981_v12, 6  ;;  %3525 = vst [vmem:[#allocation3 + $0x18c] sm:$0xf] %v3480_v60  ;;  %v14322_v42 = vadd.f32 %v18117_v34, %v18094_v33  ;;  %v18393_v12 = vpop.f32.mrf.mxu0 }
 0x24f   :  { %v3989_v43 = vrot.slane %v3987_v32, 5  ;;  %v3992_v25 = vrot.slane %v3990_v24, 6  ;;  %v3996_v41 = vshrl.u32 %v3720_v1, 16  ;;  %v3999_v63 = vshll.u32 %v3720_v1, 16  ;;  %v4046_v0 = vld [vmem:[#allocation2 + $0x4] sm:$0x3] }
 0x250   :  { %v3494_v40 = vsel %vm17881_vm3, %v3489_v18, %v3493_v23  ;;  %v3984_v36 = vor.u32 %v3983_v58, %v3980_v49  ;;  %v4005_v29 = vshrl.u32 %v3721_v2, 16  ;;  %v4008_v7 = vshll.u32 %v3721_v2, 16  ;;  %v4047_v9 = vld [vmem:[#allocation2 + $0x8] sm:$0xc]  ;;  %v4048_v21 = vld [vmem:[#allocation2 + $0xc] sm:$0x3] }
 0x251   :  { %v15063_v6 = vld [vmem:[#allocation3 + $0x15c] ss:$28 sps:$4 sm:$0xff]   ;;  %3526 = vst [vmem:[#allocation3 + $0x1a8] sm:$0xf] %v3494_v40  ;;  %v3993_v31 = vor.u32 %v3992_v25, %v3989_v43  ;;  %v3998_v8 = vrot.slane %v3996_v41, 5  ;;  %v18391_v1 = vadd.f32 %v18256_v47, %v18227_v15  ;;  %v4001_v2 = vrot.slane %v3999_v63, 6  ;;  %v18409_v40 = vpop.f32.mrf.mxu0 }
 0x252   :  { %v4207_v59 = vld [vmem:[#allocation2] sm:$0xc]  ;;  %v15061_v23 = vld [vmem:[#allocation3 + $0x158] ss:$28 sps:$4 sm:$0xff]   ;;  %v3985_v14 = vrot.slane %v3984_v36, 4  ;;  %v4007_v32 = vrot.slane %v4005_v29, 5  ;;  %5965 = vmatprep.mubr.bf16.mxu1 %v15063_v6  ;;  %v18411_v36 = vpop.f32.mrf.mxu1 }
 0x253   :  { %22274 = vst [vmem:[#allocation43_spill] sm:$0xff] %v18391_v1  ;;  %v4010_v24 = vrot.slane %v4008_v7, 6  ;;  %v22275_v60 = vld [vmem:[#allocation29_spill] sm:$0xff]  ;;  %v13080_v33 = vrot.slane %v4045_v13, 10  ;;  %v4113_v34 = vrot.slane %v4046_v0, 6  ;;  %5966 = vmatmul.mubr.bf16.gmra.mxu1 %v15061_v23  ;;  %v4002_v47 = vor.u32 %v4001_v2, %v3998_v8 }
 0x254   :  { %v18398_v18 = vadd.f32 %v14322_v42, %v22275_v60  ;;  %v4208_v49 = vld [vmem:[#allocation2 + $0x4] sm:$0x7]  ;;  %v3994_v15 = vsel %vm17909_vm4, %v3985_v14, %v3993_v31  ;;  %v13081_v25 = vrot.slane %v4047_v9, 10  ;;  %v4209_v41 = vld [vmem:[#allocation2 + $0x8] sm:$0xc]  ;;  %v4117_v13 = vrot.slane %v4048_v21, 6  ;;  %v18425_v38 = vpop.f32.mrf.mxu1 }
 0x255   :  { %v4011_v58 = vor.u32 %v4010_v24, %v4007_v32  ;;  %4043 = vst [vmem:[#allocation3 + $0x194] sm:$0xf] %v3994_v15  ;;  %v4114_v63 = vsel %vm18403_vm6, %v13080_v33, %v4113_v34  ;;  %v4242_v0 = vshrl.u32 %v4207_v59, 16  ;;  %v4003_v29 = vrot.slane %v4002_v47, 4  ;;  %v4210_v8 = vld [vmem:[#allocation2 + $0xc] sm:$0x7] }
 0x256   :  { %22276 = vst [vmem:[#allocation29_spill] sm:$0xff] %v18398_v18  ;;  %4191 = vst [vmem:[#allocation3 + $0x10] sm:$0xf] %v4114_v63  ;;  %v4245_v7 = vshll.u32 %v4207_v59, 16  ;;  %v4251_v6 = vshrl.u32 %v4208_v49, 16  ;;  %v4254_v31 = vshll.u32 %v4208_v49, 16  ;;  %v4118_v9 = vsel %vm18403_vm6, %v13081_v25, %v4117_v13 }
 0x257   :  { %v4244_v42 = vrot.slane %v4242_v0, 6  ;;  %v4260_v23 = vshrl.u32 %v4209_v41, 16  ;;  %v4263_v14 = vshll.u32 %v4209_v41, 16  ;;  %v4012_v21 = vsel %vm17909_vm4, %v4003_v29, %v4011_v58  ;;  %4192 = vst [vmem:[#allocation3 + $0x2c] sm:$0xf] %v4118_v9  ;;  %v18423_v41 = vpop.f32.mrf.mxu0 }
 0x258   :  { %v15075_v2 = vld [vmem:[#allocation3 + $0x18c] ss:$28 sps:$4 sm:$0xff]   ;;  %v4247_v32 = vrot.slane %v4245_v7, 7  ;;  %v14325_v24 = vadd.f32 %v18138_v53, %v18128_v44  ;;  %v18421_v59 = vadd.f32 %v18289_v28, %v18275_v56  ;;  %v4049_v60 = vld [vmem:[#allocation2 + $0x10] sm:$0xc]  ;;  %v4253_v49 = vrot.slane %v4251_v6, 6 }
 0x259   :  { %v4050_v33 = vld [vmem:[#allocation2 + $0x14] sm:$0x3]  ;;  %v15073_v34 = vld [vmem:[#allocation3 + $0x188] ss:$28 sps:$4 sm:$0xff]   ;;  %4044 = vst [vmem:[#allocation3 + $0x1b0] sm:$0xf] %v4012_v21  ;;  %5862 = vmatprep.mubr.bf16.mxu0 %v15075_v2 }
 0x25a   :  { %22279 = vst [vmem:[#allocation44_spill] sm:$0xff] %v18421_v59  ;;  %v4256_v15 = vrot.slane %v4254_v31, 7  ;;  %v4262_v47 = vrot.slane %v4260_v23, 6  ;;  %v4265_v25 = vrot.slane %v4263_v14, 7  ;;  %v4248_v58 = vor.u32 %v4247_v32, %v4244_v42  ;;  %v22280_v53 = vld [vmem:[#allocation31_spill] sm:$0xff]  ;;  %5863 = vmatmul.mubr.bf16.gmra.mxu0 %v15073_v34  ;;  %v22284_v6 = vld [vmem:[#allocation37_spill] sm:$0xff] }
 0x25b   :  { %v4269_v63 = vshrl.u32 %v4210_v8, 16  ;;  %v4272_v44 = vshll.u32 %v4210_v8, 16  ;;  %v18428_v13 = vadd.f32 %v14325_v24, %v22280_v53  ;;  %v4051_v56 = vld [vmem:[#allocation2 + $0x18] sm:$0xc]  ;;  %v4052_v28 = vld [vmem:[#allocation2 + $0x1c] sm:$0x3] }
 0x25c   :  { %v4257_v29 = vor.u32 %v4256_v15, %v4253_v49  ;;  %v4266_v7 = vor.u32 %v4265_v25, %v4262_v47  ;;  %v22285_v31 = vld [vmem:[#allocation38_spill] sm:$0xff]  ;;  %vm4625_vm8 = vcmask 1040384   ;;  %v4211_v42 = vld [vmem:[#allocation2 + $0x10] sm:$0xc]  ;;  %v4249_v8 = vrot.slane %v4248_v58, 4  ;;  %v18445_v15 = vpop.f32.mrf.mxu0  ;;  %v18447_v47 = vpop.f32.mrf.mxu1  ;;  %v22292_v53 = vld [vmem:[#allocation20_spill] sm:$0xff] }
 0x25d   :  { %22281 = vst [vmem:[#allocation31_spill] sm:$0xff] %v18428_v13  ;;  %v14328_v9 = vadd.f32 %v22285_v31, %v22284_v6  ;;  %v4271_v23 = vrot.slane %v4269_v63, 6  ;;  %v4274_v14 = vrot.slane %v4272_v44, 7  ;;  %v22286_v21 = vld [vmem:[#allocation33_spill] sm:$0xff]  ;;  %vm18441_vm10 = vmor %vm4625_vm8, %vm4626_vm9  ;;  %v13082_v34 = vrot.slane %v4049_v60, 10  ;;  %v22294_v31 = vld [vmem:[#allocation23_spill] sm:$0xff] }
 0x25e   :  { %v4267_v2 = vrot.slane %v4266_v7, 4  ;;  %v4121_v49 = vrot.slane %v4050_v33, 6  ;;  %v4258_v25 = vsel %vm18432_vm1, %v4249_v8, %v4257_v29  ;;  %v22290_v63 = vld [vmem:[#allocation21_spill] sm:$0xff]  ;;  %v22293_v7 = vrot.slane %v22292_v53, 11  ;;  %v4213_v18 = vld [vmem:[#allocation2 + $0x18] sm:$0xc] }
 0x25f   :  { %v18439_v32 = vadd.f32 %v14328_v9, %v22286_v21  ;;  %v4275_v58 = vor.u32 %v4274_v14, %v4271_v23  ;;  %v22291_v44 = vrot.slane %v22290_v63, 7  ;;  %v22295_v9 = vrot.slane %v22294_v31, 7  ;;  %v22296_v21 = vld [vmem:[#allocation22_spill] sm:$0xff]  ;;  %v4212_v1 = vld [vmem:[#allocation2 + $0x14] sm:$0x7] }
 0x260   :  { %v22297_v60 = vrot.slane %v22296_v21, 11  ;;  %4545 = vst [vmem:[#allocation3 + $0x14] sm:$0xf] %v4258_v25  ;;  %v4122_v29 = vsel %vm18403_vm6, %v13082_v34, %v4121_v49  ;;  %v13083_v8 = vrot.slane %v4051_v56, 10  ;;  %v4125_v23 = vrot.slane %v4052_v28, 6  ;;  %v22299_v25 = vld [vmem:[#allocation39_spill] sm:$0xff] }
 0x261   :  { %22287 = vst [vmem:[#allocation37_spill] sm:$0xff] %v18439_v32  ;;  %v4631_v6 = vsel %vm18441_vm10, %v22293_v7, %v22291_v44  ;;  %v4214_v14 = vld [vmem:[#allocation2 + $0x1c] sm:$0x7]  ;;  %v4278_v63 = vshrl.u32 %v4211_v42, 16  ;;  %v15078_v44 = vld [vmem:[#allocation3 + $0x194] ss:$28 sps:$4 sm:$0xff]   ;;  %v4276_v53 = vsel %vm18432_vm1, %v4267_v2, %v4275_v58  ;;  %v18469_v31 = vadd.f32 %v18316_v30, %v18306_v10  ;;  %v18477_v2 = vpop.f32.mrf.mxu1 }
 0x262   :  { %v4635_v33 = vsel %vm18441_vm10, %v22297_v60, %v22295_v9  ;;  %4708 = vst [vmem:[#allocation3 + $0x18] sm:$0xf] %v4631_v6  ;;  %4193 = vst [vmem:[#allocation3 + $0x48] sm:$0xf] %v4122_v29  ;;  %v4281_v7 = vshll.u32 %v4211_v42, 16  ;;  %v22300_v6 = vld [vmem:[#allocation40_spill] sm:$0xff]  ;;  %v4126_v56 = vsel %vm18403_vm6, %v13083_v8, %v4125_v23  ;;  %v18475_v60 = vpop.f32.mrf.mxu0  ;;  %5975 = vmatprep.mubr.bf16.mxu1 %v15078_v44 }
 0x263   :  { %4709 = vst [vmem:[#allocation3 + $0x34] sm:$0xf] %v4635_v33  ;;  %22298 = vst [vmem:[#allocation38_spill] sm:$0xff] %v18469_v31  ;;  %v14331_v9 = vadd.f32 %v22300_v6, %v22299_v25  ;;  %v15076_v21 = vld [vmem:[#allocation3 + $0x190] ss:$28 sps:$4 sm:$0xff]   ;;  %v4280_v28 = vrot.slane %v4278_v63, 6 }
 0x264   :  { %4546 = vst [vmem:[#allocation3 + $0x30] sm:$0xf] %v4276_v53  ;;  %v4287_v34 = vshrl.u32 %v4212_v1, 16  ;;  %v4290_v49 = vshll.u32 %v4212_v1, 16  ;;  %4194 = vst [vmem:[#allocation3 + $0x64] sm:$0xf] %v4126_v56  ;;  %5976 = vmatmul.mubr.bf16.gmra.mxu1 %v15076_v21  ;;  %v18485_v21 = vadd.f32 %v18338_v5, %v18328_v51  ;;  %v14337_v51 = vadd.f32 %v18258_v52, %v18229_v54 }
 0x265   :  { %v4283_v42 = vrot.slane %v4281_v7, 7  ;;  %v4296_v10 = vshrl.u32 %v4213_v18, 16  ;;  %v4299_v30 = vshll.u32 %v4213_v18, 16  ;;  %v4305_v58 = vshrl.u32 %v4214_v14, 16  ;;  %v4565_v33 = vld [vmem:[#allocation2 + $0x10] sm:$0x8] }
 0x266   :  { %v4289_v29 = vrot.slane %v4287_v34, 6  ;;  %v4292_v53 = vrot.slane %v4290_v49, 7  ;;  %v4308_v25 = vshll.u32 %v4214_v14, 16  ;;  %v22301_v6 = vld [vmem:[#allocation17_spill] sm:$0xff]  ;;  %v22303_v1 = vmov 0   ;;  %22304 = vst [vmem:[#allocation21_spill] sm:$0xff] %v18485_v21 }
 0x267   :  { %v18480_v8 = vadd.f32 %v14331_v9, %v22301_v6  ;;  %v4566_v23 = vld [vmem:[#allocation2 + $0x14] sm:$0x7]  ;;  %6131 = vmatprep.mubr.bf16.mxu1 %v22303_v1  ;;  %v4284_v63 = vor.u32 %v4283_v42, %v4280_v28  ;;  %v4298_v31 = vrot.slane %v4296_v10, 6  ;;  %v4301_v32 = vrot.slane %v4299_v30, 7  ;;  %v4567_v56 = vld [vmem:[#allocation2 + $0x18] sm:$0x8]  ;;  %v18491_v28 = vpop.f32.mrf.mxu1 }
 0x268   :  { %v4307_v44 = vrot.slane %v4305_v58, 6  ;;  %v4568_v7 = vld [vmem:[#allocation2 + $0x1c] sm:$0x7]  ;;  %v4053_v39 = vld [vmem:[#allocation2 + $0x20] sm:$0xc]  ;;  %v4293_v18 = vor.u32 %v4292_v53, %v4289_v29  ;;  %v4310_v59 = vrot.slane %v4308_v25, 7  ;;  %v18495_v58 = vadd.f32 %v18371_v22, %v18357_v45 }
 0x269   :  { %22302 = vst [vmem:[#allocation33_spill] sm:$0xff] %v18480_v8  ;;  %v22305_v14 = vld [vmem:[#allocation41_spill] sm:$0xff]  ;;  %v4054_v34 = vld [vmem:[#allocation2 + $0x24] sm:$0x3]  ;;  %v4055_v49 = vld [vmem:[#allocation2 + $0x28] sm:$0xc]  ;;  %v18489_v8 = vpop.f32.mrf.mxu0  ;;  %v4302_v10 = vor.u32 %v4301_v32, %v4298_v31  ;;  %v18509_v54 = vadd.f32 %v18393_v12, %v18379_v48 }
 0x26a   :  { %v14334_v9 = vadd.f32 %v18213_v19, %v22305_v14  ;;  %v4056_v6 = vld [vmem:[#allocation2 + $0x2c] sm:$0x3]  ;;  %v4285_v42 = vrot.slane %v4284_v63, 4  ;;  %v4215_v30 = vld [vmem:[#allocation2 + $0x20] sm:$0xc]  ;;  %22306 = vst [vmem:[#allocation20_spill] sm:$0xff] %v18495_v58  ;;  %v4311_v5 = vor.u32 %v4310_v59, %v4307_v44 }
 0x26b   :  { %v22307_v29 = vld [vmem:[#allocation11_spill] sm:$0xff]  ;;  %v13098_v53 = vrot.slane %v4565_v33, 11  ;;  %v4638_v25 = vrot.slane %v4566_v23, 7  ;;  %v4217_v21 = vld [vmem:[#allocation2 + $0x28] sm:$0xc]  ;;  %v4303_v31 = vrot.slane %v4302_v10, 4  ;;  %v18513_v44 = vpop.f32.mrf.mxu0 }
 0x26c   :  { %v18500_v19 = vadd.f32 %v14334_v9, %v22307_v29  ;;  %v4216_v14 = vld [vmem:[#allocation2 + $0x24] sm:$0x7]  ;;  %v15090_v13 = vld [vmem:[#allocation3 + $0x14] ss:$28 sps:$4 sm:$0xff]   ;;  %v4294_v32 = vsel %vm18432_vm1, %v4285_v42, %v4293_v18  ;;  %v22309_v63 = vld [vmem:[#allocation12_spill] sm:$0xff]  ;;  %22311 = vst [vmem:[#allocation39_spill] sm:$0xff] %v18509_v54  ;;  %v18515_v9 = vpop.f32.mrf.mxu1 }
 0x26d   :  { %v15097_v11 = vld [vmem:[#allocation3 + $0x18] ss:$28 sps:$4 sm:$0xff]   ;;  %v18505_v45 = vadd.f32 %v14337_v51, %v22309_v63  ;;  %v15088_v52 = vld [vmem:[#allocation3 + $0x10] ss:$28 sps:$4 sm:$0xff]   ;;  %4547 = vst [vmem:[#allocation3 + $0x4c] sm:$0xf] %v4294_v32  ;;  %v4639_v22 = vsel %vm18441_vm10, %v13098_v53, %v4638_v25  ;;  %6018 = vmatprep.mubr.bf16.mxu0 %v15090_v13  ;;  %v4312_v18 = vsel %vm18432_vm1, %v4303_v31, %v4311_v5  ;;  %v18526_v63 = vpop.f32.mrf.mxu0 }
 0x26e   :  { %22308 = vst [vmem:[#allocation23_spill] sm:$0xff] %v18500_v19  ;;  %v13099_v59 = vrot.slane %v4567_v56, 11  ;;  %v4642_v33 = vrot.slane %v4568_v7, 7  ;;  %v13084_v23 = vrot.slane %v4053_v39, 10  ;;  %4710 = vst [vmem:[#allocation3 + $0x50] sm:$0xf] %v4639_v22  ;;  %6019 = vmatmul.mubr.bf16.vlgmr.msra.gmra.mxu0 %v15088_v52  ;;  %6132 = vmatmul.mubr.bf16.vlgmr.msra.gmra.mxu1 %v15097_v11  ;;  %v18528_v52 = vpop.f32.mrf.mxu1 }
 0x26f   :  { %22310 = vst [vmem:[#allocation22_spill] sm:$0xff] %v18505_v45  ;;  %v4129_v42 = vrot.slane %v4054_v34, 6  ;;  %v13085_v48 = vrot.slane %v4055_v49, 10  ;;  %v4133_v12 = vrot.slane %v4056_v6, 6  ;;  %v4218_v10 = vld [vmem:[#allocation2 + $0x2c] sm:$0x7]  ;;  %6141 = vmatprep.mubr.bf16.mxu1 %v22303_v1 }
 0x270   :  { %4548 = vst [vmem:[#allocation3 + $0x68] sm:$0xf] %v4312_v18  ;;  %v4643_v56 = vsel %vm18441_vm10, %v13099_v59, %v4642_v33  ;;  %v4314_v39 = vshrl.u32 %v4215_v30, 16  ;;  %v4317_v7 = vshll.u32 %v4215_v30, 16  ;;  %v4323_v51 = vshrl.u32 %v4216_v14, 16  ;;  %v22312_v54 = vld [vmem:[#allocation15_spill] sm:$0xff] }
 0x271   :  { %v4569_v29 = vld [vmem:[#allocation2 + $0x20] sm:$0x8]  ;;  %4711 = vst [vmem:[#allocation3 + $0x6c] sm:$0xf] %v4643_v56  ;;  %v4130_v13 = vsel %vm18403_vm6, %v13084_v23, %v4129_v42  ;;  %v4134_v34 = vsel %vm18403_vm6, %v13085_v48, %v4133_v12  ;;  %v4326_v49 = vshll.u32 %v4216_v14, 16  ;;  %v4332_v6 = vshrl.u32 %v4217_v21, 16 }
 0x272   :  { %v4570_v11 = vld [vmem:[#allocation2 + $0x24] sm:$0x7]  ;;  %v4571_v5 = vld [vmem:[#allocation2 + $0x28] sm:$0x8]  ;;  %4195 = vst [vmem:[#allocation3 + $0x80] sm:$0xf] %v4130_v13  ;;  %v14340_v48 = vadd.f32 %v18291_v62, %v18277_v35  ;;  %v18537_v35 = vpop.f32.mrf.mxu1 }
 0x273   :  { %4196 = vst [vmem:[#allocation3 + $0x9c] sm:$0xf] %v4134_v34  ;;  %v4316_v53 = vrot.slane %v4314_v39, 6  ;;  %v4319_v25 = vrot.slane %v4317_v7, 7  ;;  %v4325_v30 = vrot.slane %v4323_v51, 6  ;;  %v4335_v32 = vshll.u32 %v4217_v21, 16 }
 0x274   :  { %v4572_v31 = vld [vmem:[#allocation2 + $0x2c] sm:$0x7]  ;;  %v4328_v22 = vrot.slane %v4326_v49, 7  ;;  %v4334_v59 = vrot.slane %v4332_v6, 6  ;;  %v4341_v33 = vshrl.u32 %v4218_v10, 16  ;;  %v4344_v23 = vshll.u32 %v4218_v10, 16 }
 0x275   :  { %v4057_v18 = vld [vmem:[#allocation2 + $0x30] sm:$0xc]  ;;  %v4320_v14 = vor.u32 %v4319_v25, %v4316_v53  ;;  %v4337_v42 = vrot.slane %v4335_v32, 7  ;;  %v13100_v12 = vrot.slane %v4569_v29, 11  ;;  %v4058_v56 = vld [vmem:[#allocation2 + $0x34] sm:$0x3]  ;;  %v18533_v10 = vadd.f32 %v14340_v48, %v22312_v54  ;;  %v18535_v32 = vpop.f32.mrf.mxu0 }
 0x276   :  { %v4059_v39 = vld [vmem:[#allocation2 + $0x38] sm:$0xc]  ;;  %v4060_v7 = vld [vmem:[#allocation2 + $0x3c] sm:$0x3]  ;;  %v4329_v21 = vor.u32 %v4328_v22, %v4325_v30  ;;  %v4343_v51 = vrot.slane %v4341_v33, 6  ;;  %v4346_v13 = vrot.slane %v4344_v23, 7  ;;  %v18543_v22 = vadd.f32 %v18423_v41, %v18409_v40 }
 0x277   :  { %v4646_v34 = vrot.slane %v4570_v11, 7  ;;  %v4219_v58 = vld [vmem:[#allocation2 + $0x30] sm:$0xc]  ;;  %v4220_v19 = vld [vmem:[#allocation2 + $0x34] sm:$0x7]  ;;  %v4321_v49 = vrot.slane %v4320_v14, 4  ;;  %v4338_v6 = vor.u32 %v4337_v42, %v4334_v59  ;;  %v14343_v23 = vadd.f32 %v18318_v20, %v18308_v55  ;;  %v18555_v55 = vpop.f32.mrf.mxu1 }
 0x278   :  { %v13101_v53 = vrot.slane %v4571_v5, 11  ;;  %v4221_v25 = vld [vmem:[#allocation2 + $0x38] sm:$0xc]  ;;  %v15098_v62 = vld [vmem:[#allocation3 + $0x48] ss:$28 sps:$4 sm:$0xff]   ;;  %v4347_v45 = vor.u32 %v4346_v13, %v4343_v51  ;;  %v4650_v11 = vrot.slane %v4572_v31, 7  ;;  %v18553_v51 = vpop.f32.mrf.mxu0 }
 0x279   :  { %v15100_v29 = vld [vmem:[#allocation3 + $0x4c] ss:$28 sps:$4 sm:$0xff]   ;;  %v4647_v30 = vsel %vm18441_vm10, %v13100_v12, %v4646_v34  ;;  %v4330_v54 = vsel %vm18432_vm1, %v4321_v49, %v4329_v21  ;;  %v4339_v5 = vrot.slane %v4338_v6, 4  ;;  %v13086_v33 = vrot.slane %v4057_v18, 10  ;;  %v4222_v41 = vld [vmem:[#allocation2 + $0x3c] sm:$0x7] }
 0x27a   :  { %v15101_v59 = vld [vmem:[#allocation3 + $0x50] ss:$28 sps:$4 sm:$0xff]   ;;  %4712 = vst [vmem:[#allocation3 + $0x88] sm:$0xf] %v4647_v30  ;;  %6028 = vmatprep.mubr.bf16.mxu0 %v15100_v29  ;;  %4549 = vst [vmem:[#allocation3 + $0x84] sm:$0xf] %v4330_v54  ;;  %v4651_v14 = vsel %vm18441_vm10, %v13101_v53, %v4650_v11 }
 0x27b   :  { %v4137_v31 = vrot.slane %v4058_v56, 6  ;;  %v13087_v42 = vrot.slane %v4059_v39, 10  ;;  %v4141_v48 = vrot.slane %v4060_v7, 6  ;;  %6029 = vmatmul.mubr.bf16.gmra.mxu0 %v15098_v62  ;;  %6142 = vmatmul.mubr.bf16.gmra.mxu1 %v15101_v59  ;;  %v4348_v40 = vsel %vm18432_vm1, %v4339_v5, %v4347_v45  ;;  %4713 = vst [vmem:[#allocation3 + $0xa4] sm:$0xf] %v4651_v14 }
 0x27c   :  { %v4350_v12 = vshrl.u32 %v4219_v58, 16  ;;  %v4353_v18 = vshll.u32 %v4219_v58, 16  ;;  %v4359_v21 = vshrl.u32 %v4220_v19, 16  ;;  %4550 = vst [vmem:[#allocation3 + $0xa0] sm:$0xf] %v4348_v40  ;;  %6151 = vmatprep.mubr.bf16.mxu1 %v22303_v1  ;;  %v4362_v39 = vshll.u32 %v4220_v19, 16  ;;  %v18569_v40 = vpop.f32.mrf.mxu0 }
 0x27d   :  { %v4138_v20 = vsel %vm18403_vm6, %v13086_v33, %v4137_v31  ;;  %v4142_v56 = vsel %vm18403_vm6, %v13087_v42, %v4141_v48  ;;  %v4368_v45 = vshrl.u32 %v4221_v25, 16  ;;  %v4573_v7 = vld [vmem:[#allocation2 + $0x30] sm:$0x8]  ;;  %v4574_v13 = vld [vmem:[#allocation2 + $0x34] sm:$0x7]  ;;  %v4371_v6 = vshll.u32 %v4221_v25, 16  ;;  %v18571_v25 = vpop.f32.mrf.mxu1 }
 0x27e   :  { %4197 = vst [vmem:[#allocation3 + $0xb8] sm:$0xf] %v4138_v20  ;;  %4198 = vst [vmem:[#allocation3 + $0xd4] sm:$0xf] %v4142_v56  ;;  %v4352_v58 = vrot.slane %v4350_v12, 6  ;;  %v4355_v34 = vrot.slane %v4353_v18, 7  ;;  %v18567_v19 = vadd.f32 %v18475_v60, %v18445_v15  ;;  %v14346_v15 = vadd.f32 %v18340_v37, %v18330_v50 }
 0x27f   :  { %v4361_v49 = vrot.slane %v4359_v21, 6  ;;  %v4575_v53 = vld [vmem:[#allocation2 + $0x38] sm:$0x8]  ;;  %v4364_v62 = vrot.slane %v4362_v39, 7  ;;  %v4370_v29 = vrot.slane %v4368_v45, 6  ;;  %v4377_v30 = vshrl.u32 %v4222_v41, 16 }
 0x280   :  { %v4380_v11 = vshll.u32 %v4222_v41, 16  ;;  %v4576_v59 = vld [vmem:[#allocation2 + $0x3c] sm:$0x7]  ;;  %v4356_v54 = vor.u32 %v4355_v34, %v4352_v58  ;;  %v4373_v5 = vrot.slane %v4371_v6, 7  ;;  %v22313_v33 = vld [vmem:[#allocation16_spill] sm:$0xff]  ;;  %22314 = vst [vmem:[#allocation40_spill] sm:$0xff] %v18567_v19  ;;  %v18588_v50 = vadd.f32 %v14346_v15, %v18209_v3  ;;  %v18600_v3 = vpop.f32.mrf.mxu0 }
 0x281   :  { %v18563_v14 = vadd.f32 %v14343_v23, %v22313_v33  ;;  %v4061_v31 = vld [vmem:[#allocation2 + $0x40] sm:$0xc]  ;;  %v4062_v42 = vld [vmem:[#allocation2 + $0x44] sm:$0x3]  ;;  %v4063_v48 = vld [vmem:[#allocation2 + $0x48] sm:$0xc]  ;;  %v4365_v12 = vor.u32 %v4364_v62, %v4361_v49 }
 0x282   :  { %v15126_v41 = vld [vmem:[%s22093_s5 + $0x70] ss:$8 sps:$4 sm:$0xff]   ;;  %v15128_v23 = vld [vmem:[%s22093_s5 + $0x74] ss:$8 sps:$4 sm:$0xff]   ;;  %v4379_v18 = vrot.slane %v4377_v30, 6  ;;  %v4382_v21 = vrot.slane %v4380_v11, 7  ;;  %v4374_v45 = vor.u32 %v4373_v5, %v4370_v29 }
 0x283   :  { %v4064_v60 = vld [vmem:[#allocation2 + $0x4c] sm:$0x3]  ;;  %v4223_v20 = vld [vmem:[#allocation2 + $0x40] sm:$0xc]  ;;  %v15129_v56 = vld [vmem:[%s22093_s5 + $0x170] ss:$8 sps:$4 sm:$0xff]   ;;  %6670 = vmatprep.subr.bf16.mxu0 %v15128_v23  ;;  %v18598_v23 = vadd.f32 %v18513_v44, %v18489_v8 }
 0x284   :  { %v4357_v39 = vrot.slane %v4356_v54, 4  ;;  %v13102_v58 = vrot.slane %v4573_v7, 11  ;;  %v4654_v34 = vrot.slane %v4574_v13, 7  ;;  %v4224_v6 = vld [vmem:[#allocation2 + $0x44] sm:$0x7]  ;;  %v4383_v30 = vor.u32 %v4382_v21, %v4379_v18  ;;  %6671 = vmatpush1.bf16.msra.mxu0 %v15126_v41 }
 0x285   :  { %v4225_v33 = vld [vmem:[#allocation2 + $0x48] sm:$0xc]  ;;  %v15131_v49 = vld [vmem:[%s22093_s5 + $0x174] ss:$8 sps:$4 sm:$0xff]   ;;  %v13103_v37 = vrot.slane %v4575_v53, 11  ;;  %v4658_v11 = vrot.slane %v4576_v59, 7  ;;  %v18602_v53 = vpop.f32.mrf.mxu1 }
 0x286   :  { %v15105_v62 = vld [vmem:[#allocation3 + $0x88] ss:$28 sps:$4 sm:$0xff]   ;;  %v15102_v19 = vld [vmem:[#allocation3 + $0x80] ss:$28 sps:$4 sm:$0xff]   ;;  %v4366_v7 = vsel %vm18432_vm1, %v4357_v39, %v4365_v12  ;;  %v4375_v13 = vrot.slane %v4374_v45, 4  ;;  %v4655_v29 = vsel %vm18441_vm10, %v13102_v58, %v4654_v34  ;;  %7073 = vmatprep.subr.bf16.mxu1 %v15131_v49  ;;  %v13088_v41 = vrot.slane %v4061_v31, 10 }
 0x287   :  { %v15104_v54 = vld [vmem:[#allocation3 + $0x84] ss:$28 sps:$4 sm:$0xff]   ;;  %v18594_v5 = vld [vmem:[#allocation2 + $0x4c] sm:$0x7]  ;;  %6152 = vmatmul.mubr.bf16.gmra.mxu1 %v15105_v62  ;;  %4551 = vst [vmem:[#allocation3 + $0xbc] sm:$0xf] %v4366_v7  ;;  %v4659_v59 = vsel %vm18441_vm10, %v13103_v37, %v4658_v11  ;;  %v18622_v37 = vpop.f32.mrf.mxu0  ;;  %v18624_v11 = vpop.f32.mrf.mxu1 }
 0x288   :  { %4714 = vst [vmem:[#allocation3 + $0xc0] sm:$0xf] %v4655_v29  ;;  %v4145_v12 = vrot.slane %v4062_v42, 6  ;;  %v13089_v18 = vrot.slane %v4063_v48, 10  ;;  %v15132_v21 = vld [vmem:[%s22093_s5 + $0x60] ss:$8 sps:$4 sm:$0xff]   ;;  %6038 = vmatprep.mubr.bf16.mxu0 %v15104_v54  ;;  %v4384_v8 = vsel %vm18432_vm1, %v4375_v13, %v4383_v30  ;;  %6161 = vmatprep.mubr.bf16.mxu1 %v22303_v1 }
 0x289   :  { %4715 = vst [vmem:[#allocation3 + $0xdc] sm:$0xf] %v4659_v59  ;;  %v4149_v44 = vrot.slane %v4064_v60, 6  ;;  %v4386_v15 = vshrl.u32 %v4223_v20, 16  ;;  %v4389_v39 = vshll.u32 %v4223_v20, 16  ;;  %6039 = vmatmul.mubr.bf16.gmra.mxu0 %v15102_v19  ;;  %v4395_v48 = vshrl.u32 %v4224_v6, 16  ;;  %7074 = vmatpush1.bf16.msra.mxu1 %v15129_v56 }
 0x28a   :  { %v15134_v31 = vld [vmem:[%s22093_s5 + $0x64] ss:$8 sps:$4 sm:$0xff]   ;;  %4552 = vst [vmem:[#allocation3 + $0xd8] sm:$0xf] %v4384_v8  ;;  %v4146_v42 = vsel %vm18403_vm6, %v13088_v41, %v4145_v12  ;;  %v4398_v45 = vshll.u32 %v4224_v6, 16  ;;  %v4404_v58 = vshrl.u32 %v4225_v33, 16  ;;  %v14349_v12 = vadd.f32 %v18373_v16, %v18359_v57 }
 0x28b   :  { %v15135_v34 = vld [vmem:[%s22093_s5 + $0x160] ss:$8 sps:$4 sm:$0xff]   ;;  %v4150_v60 = vsel %vm18403_vm6, %v13089_v18, %v4149_v44  ;;  %4199 = vst [vmem:[#allocation3 + $0xf0] sm:$0xf] %v4146_v42  ;;  %v4388_v20 = vrot.slane %v4386_v15, 6  ;;  %v4391_v49 = vrot.slane %v4389_v39, 7  ;;  %6672 = vmatprep.subr.bf16.mxu0 %v15134_v31  ;;  %v18643_v31 = vadd.f32 %v18535_v32, %v18526_v63 }
 0x28c   :  { %v4407_v62 = vshll.u32 %v4225_v33, 16  ;;  %v4577_v19 = vld [vmem:[#allocation2 + $0x40] sm:$0x8]  ;;  %v4578_v30 = vld [vmem:[#allocation2 + $0x44] sm:$0x7]  ;;  %v4397_v6 = vrot.slane %v4395_v48, 6  ;;  %6673 = vmatpush1.bf16.msra.mxu0 %v15132_v21  ;;  %v18654_v63 = vadd.f32 %v14349_v12, %v18253_v46  ;;  %v18669_v46 = vadd.f32 %v18569_v40, %v18553_v51 }
 0x28d   :  { %v15137_v56 = vld [vmem:[%s22093_s5 + $0x164] ss:$8 sps:$4 sm:$0xff]   ;;  %4200 = vst [vmem:[#allocation3 + $0x10c] sm:$0xf] %v4150_v60  ;;  %v4400_v54 = vrot.slane %v4398_v45, 7  ;;  %v4406_v7 = vrot.slane %v4404_v58, 6  ;;  %v4392_v29 = vor.u32 %v4391_v49, %v4388_v20 }
 0x28e   :  { %v4413_v13 = vshrl.u32 %v18594_v5, 16  ;;  %v15138_v33 = vld [vmem:[%s22093_s5 + $0x50] ss:$8 sps:$4 sm:$0xff]   ;;  %v4409_v59 = vrot.slane %v4407_v62, 7  ;;  %v4416_v41 = vshll.u32 %v18594_v5, 16  ;;  %7075 = vmatprep.subr.bf16.mxu1 %v15137_v56  ;;  %v14352_v5 = vadd.f32 %v18395_v27, %v18381_v26  ;;  %v18658_v27 = vpop.f32.mrf.mxu0 }
 0x28f   :  { %v4579_v18 = vld [vmem:[#allocation2 + $0x48] sm:$0x8]  ;;  %v4580_v8 = vld [vmem:[#allocation2 + $0x4c] sm:$0x7]  ;;  %v18636_v44 = vld [vmem:[#allocation2 + $0x50] sm:$0xc]  ;;  %v4401_v15 = vor.u32 %v4400_v54, %v4397_v6  ;;  %7076 = vmatpush1.bf16.msra.mxu1 %v15135_v34  ;;  %v18660_v34 = vpop.f32.mrf.mxu1  ;;  %v2597_v24 = vadd.f32 %v18643_v31, %v18654_v63 }
 0x290   :  { %v15140_v21 = vld [vmem:[%s22093_s5 + $0x54] ss:$8 sps:$4 sm:$0xff]   ;;  %v4415_v39 = vrot.slane %v4413_v13, 6  ;;  %v4067_v57 = vld [vmem:[#allocation2 + $0x58] sm:$0xc]  ;;  %v4393_v58 = vrot.slane %v4392_v29, 4  ;;  %v4410_v60 = vor.u32 %v4409_v59, %v4406_v7 }
 0x291   :  { %v4066_v42 = vld [vmem:[#allocation2 + $0x54] sm:$0x3]  ;;  %v4068_v16 = vld [vmem:[#allocation2 + $0x5c] sm:$0x3]  ;;  %v15141_v48 = vld [vmem:[%s22093_s5 + $0x150] ss:$8 sps:$4 sm:$0xff]   ;;  %6674 = vmatprep.subr.bf16.mxu0 %v15140_v21 }
 0x292   :  { %v15143_v45 = vld [vmem:[%s22093_s5 + $0x154] ss:$8 sps:$4 sm:$0xff]   ;;  %v4418_v20 = vrot.slane %v4416_v41, 7  ;;  %v4227_v32 = vld [vmem:[#allocation2 + $0x50] sm:$0xc]  ;;  %v13104_v6 = vrot.slane %v4577_v19, 11  ;;  %6675 = vmatpush1.bf16.msra.mxu0 %v15138_v33  ;;  %v4402_v41 = vsel %vm18432_vm1, %v4393_v58, %v4401_v15  ;;  %v18687_v58 = vpop.f32.mrf.mxu0 }
 0x293   :  { %v18656_v26 = vld [vmem:[#allocation2 + $0x54] sm:$0x7]  ;;  %v15109_v49 = vld [vmem:[#allocation3 + $0xc0] ss:$28 sps:$4 sm:$0xff]   ;;  %v4662_v54 = vrot.slane %v4578_v30, 7  ;;  %7077 = vmatprep.subr.bf16.mxu1 %v15143_v45  ;;  %v4411_v12 = vrot.slane %v4410_v60, 4  ;;  %v14355_v30 = vadd.f32 %v18425_v38, %v18411_v36 }
 0x294   :  { %v22315_v62 = vld [vmem:[#allocation42_spill] sm:$0xff]  ;;  %v15144_v7 = vld [vmem:[%s22093_s5 + $0x40] ss:$8 sps:$4 sm:$0xff]   ;;  %v4419_v19 = vor.u32 %v4418_v20, %v4415_v39  ;;  %6162 = vmatmul.mubr.bf16.gmra.mxu1 %v15109_v49  ;;  %4553 = vst [vmem:[#allocation3 + $0xf4] sm:$0xf] %v4402_v41  ;;  %v13105_v40 = vrot.slane %v4579_v18, 11  ;;  %v18689_v18 = vpop.f32.mrf.mxu1 }
 0x295   :  { %v18663_v56 = vadd.f32 %v14352_v5, %v22315_v62  ;;  %v18665_v13 = vld [vmem:[#allocation2 + $0x58] sm:$0xc]  ;;  %v4663_v51 = vsel %vm18441_vm10, %v13104_v6, %v4662_v54  ;;  %v4666_v33 = vrot.slane %v4580_v8, 7  ;;  %v13090_v21 = vrot.slane %v18636_v44, 10  ;;  %v4230_v5 = vld [vmem:[#allocation2 + $0x5c] sm:$0x7]  ;;  %6171 = vmatprep.mubr.bf16.mxu1 %v22303_v1  ;;  %7078 = vmatpush1.bf16.msra.mxu1 %v15141_v48 }
 0x296   :  { %v15106_v29 = vld [vmem:[#allocation3 + $0xb8] ss:$28 sps:$4 sm:$0xff]   ;;  %v15146_v45 = vld [vmem:[%s22093_s5 + $0x44] ss:$8 sps:$4 sm:$0xff]   ;;  %v4420_v15 = vsel %vm18432_vm1, %v4411_v12, %v4419_v19  ;;  %4716 = vst [vmem:[#allocation3 + $0xf8] sm:$0xf] %v4663_v51 }
 0x297   :  { %v15108_v59 = vld [vmem:[#allocation3 + $0xbc] ss:$28 sps:$4 sm:$0xff]   ;;  %v4153_v36 = vrot.slane %v4066_v42, 6  ;;  %v13091_v38 = vrot.slane %v4067_v57, 10  ;;  %v4157_v39 = vrot.slane %v4068_v16, 6  ;;  %v4667_v44 = vsel %vm18441_vm10, %v13105_v40, %v4666_v33  ;;  %6676 = vmatprep.subr.bf16.mxu0 %v15146_v45 }
 0x298   :  { %6048 = vmatprep.mubr.bf16.mxu0 %v15108_v59  ;;  %v15147_v8 = vld [vmem:[%s22093_s5 + $0x140] ss:$8 sps:$4 sm:$0xff]   ;;  %4554 = vst [vmem:[#allocation3 + $0x110] sm:$0xf] %v4420_v15  ;;  %v4422_v60 = vshrl.u32 %v4227_v32, 16  ;;  %v4425_v20 = vshll.u32 %v4227_v32, 16  ;;  %6677 = vmatpush1.bf16.msra.mxu0 %v15144_v7  ;;  %v18717_v15 = vpop.f32.mrf.mxu0 }
 0x299   :  { %6049 = vmatmul.mubr.bf16.gmra.mxu0 %v15106_v29  ;;  %v4431_v49 = vshrl.u32 %v18656_v26, 16  ;;  %v15149_v42 = vld [vmem:[%s22093_s5 + $0x144] ss:$8 sps:$4 sm:$0xff]   ;;  %4717 = vst [vmem:[#allocation3 + $0x114] sm:$0xf] %v4667_v44  ;;  %v4154_v57 = vsel %vm18403_vm6, %v13090_v21, %v4153_v36  ;;  %v4158_v16 = vsel %vm18403_vm6, %v13091_v38, %v4157_v39  ;;  %v4434_v62 = vshll.u32 %v18656_v26, 16  ;;  %v18719_v36 = vpop.f32.mrf.mxu1 }
 0x29a   :  { %v4440_v6 = vshrl.u32 %v18665_v13, 16  ;;  %v18706_v54 = vld [vmem:[#allocation2 + $0x50] sm:$0x8]  ;;  %v4582_v32 = vld [vmem:[#allocation2 + $0x54] sm:$0x7]  ;;  %v4424_v29 = vrot.slane %v4422_v60, 6  ;;  %7079 = vmatprep.subr.bf16.mxu1 %v15149_v42  ;;  %v18725_v39 = vadd.f32 %v14355_v30, %v18311_v17  ;;  %v18729_v44 = vadd.f32 %v18622_v37, %v18600_v3 }
 0x29b   :  { %v15152_v48 = vld [vmem:[%s22093_s5 + $0x34] ss:$8 sps:$4 sm:$0xff]   ;;  %4201 = vst [vmem:[#allocation3 + $0x128] sm:$0xf] %v4154_v57  ;;  %4202 = vst [vmem:[#allocation3 + $0x144] sm:$0xf] %v4158_v16  ;;  %7080 = vmatpush1.bf16.msra.mxu1 %v15147_v8  ;;  %v14358_v3 = vadd.f32 %v18477_v2, %v18447_v47 }
 0x29c   :  { %v4427_v59 = vrot.slane %v4425_v20, 7  ;;  %v4433_v41 = vrot.slane %v4431_v49, 6  ;;  %v4443_v12 = vshll.u32 %v18665_v13, 16  ;;  %v18712_v19 = vld [vmem:[#allocation2 + $0x58] sm:$0x8]  ;;  %v4436_v51 = vrot.slane %v4434_v62, 7  ;;  %6678 = vmatprep.subr.bf16.mxu0 %v15152_v48 }
 0x29d   :  { %v15150_v26 = vld [vmem:[%s22093_s5 + $0x30] ss:$8 sps:$4 sm:$0xff]   ;;  %v4442_v40 = vrot.slane %v4440_v6, 6  ;;  %v4449_v33 = vshrl.u32 %v4230_v5, 16  ;;  %v4452_v21 = vshll.u32 %v4230_v5, 16  ;;  %22316 = vst [vmem:[#allocation17_spill] sm:$0xff] %v18729_v44 }
 0x29e   :  { %v4584_v45 = vld [vmem:[#allocation2 + $0x5c] sm:$0x7]  ;;  %v4428_v7 = vor.u32 %v4427_v59, %v4424_v29  ;;  %v4445_v38 = vrot.slane %v4443_v12, 7  ;;  %v4069_v5 = vld [vmem:[#allocation2 + $0x60] sm:$0xc]  ;;  %v4437_v16 = vor.u32 %v4436_v51, %v4433_v41  ;;  %v13106_v48 = vrot.slane %v18706_v54, 11  ;;  %6679 = vmatpush1.bf16.msra.mxu0 %v15150_v26 }
 0x29f   :  { %v15155_v13 = vld [vmem:[%s22093_s5 + $0x134] ss:$8 sps:$4 sm:$0xff]   ;;  %v4070_v60 = vld [vmem:[#allocation2 + $0x64] sm:$0x3]  ;;  %v4071_v20 = vld [vmem:[#allocation2 + $0x68] sm:$0xc] }
 0x2a0   :  { %v4072_v49 = vld [vmem:[#allocation2 + $0x6c] sm:$0x3]  ;;  %v15153_v42 = vld [vmem:[%s22093_s5 + $0x130] ss:$8 sps:$4 sm:$0xff]   ;;  %v4451_v17 = vrot.slane %v4449_v33, 6  ;;  %v4454_v30 = vrot.slane %v4452_v21, 7  ;;  %7081 = vmatprep.subr.bf16.mxu1 %v15155_v13  ;;  %v4446_v6 = vor.u32 %v4445_v38, %v4442_v40  ;;  %v18744_v33 = vadd.f32 %v14358_v3, %v18322_v61  ;;  %v18751_v13 = vpop.f32.mrf.mxu0  ;;  %v18753_v40 = vpop.f32.mrf.mxu1 }
 0x2a1   :  { %v15158_v57 = vld [vmem:[%s22093_s5 + $0x24] ss:$8 sps:$4 sm:$0xff]   ;;  %v4231_v37 = vld [vmem:[#allocation2 + $0x60] sm:$0xc]  ;;  %v4429_v62 = vrot.slane %v4428_v7, 4  ;;  %v4670_v29 = vrot.slane %v4582_v32, 7  ;;  %v18749_v21 = vadd.f32 %v18687_v58, %v18658_v27  ;;  %7082 = vmatpush1.bf16.msra.mxu1 %v15153_v42 }
 0x2a2   :  { %v15156_v8 = vld [vmem:[%s22093_s5 + $0x20] ss:$8 sps:$4 sm:$0xff]   ;;  %v4232_v59 = vld [vmem:[#allocation2 + $0x64] sm:$0x7]  ;;  %v15110_v12 = vld [vmem:[#allocation3 + $0xf0] ss:$28 sps:$4 sm:$0xff]   ;;  %v4455_v51 = vor.u32 %v4454_v30, %v4451_v17  ;;  %6680 = vmatprep.subr.bf16.mxu0 %v15158_v57 }
 0x2a3   :  { %v15112_v41 = vld [vmem:[#allocation3 + $0xf4] ss:$28 sps:$4 sm:$0xff]   ;;  %22317 = vst [vmem:[#allocation41_spill] sm:$0xff] %v18744_v33  ;;  %v13107_v47 = vrot.slane %v18712_v19, 11  ;;  %v4233_v2 = vld [vmem:[#allocation2 + $0x68] sm:$0xc]  ;;  %v4438_v61 = vsel %vm18432_vm1, %v4429_v62, %v4437_v16  ;;  %v4671_v19 = vsel %vm18441_vm10, %v13106_v48, %v4670_v29  ;;  %v18779_v48 = vpop.f32.mrf.mxu1  ;;  %6681 = vmatpush1.bf16.msra.mxu0 %v15156_v8 }
 0x2a4   :  { %22318 = vst [vmem:[#allocation11_spill] sm:$0xff] %v18749_v21  ;;  %v15159_v54 = vld [vmem:[%s22093_s5 + $0x120] ss:$8 sps:$4 sm:$0xff]   ;;  %v15113_v32 = vld [vmem:[#allocation3 + $0xf8] ss:$28 sps:$4 sm:$0xff]   ;;  %v4447_v26 = vrot.slane %v4446_v6, 4  ;;  %6058 = vmatprep.mubr.bf16.mxu0 %v15112_v41  ;;  %v18777_v6 = vpop.f32.mrf.mxu0  ;;  %v2694_v63 = vadd.f32 %v18779_v48, %v2597_v24 }
 0x2a5   :  { %v4674_v7 = vrot.slane %v4584_v45, 7  ;;  %4555 = vst [vmem:[#allocation3 + $0x12c] sm:$0xf] %v4438_v61  ;;  %4718 = vst [vmem:[#allocation3 + $0x130] sm:$0xf] %v4671_v19  ;;  %v13092_v27 = vrot.slane %v4069_v5, 10  ;;  %6059 = vmatmul.mubr.bf16.gmra.mxu0 %v15110_v12  ;;  %6172 = vmatmul.mubr.bf16.gmra.mxu1 %v15113_v32 }
 0x2a6   :  { %v4161_v58 = vrot.slane %v4070_v60, 6  ;;  %v13093_v38 = vrot.slane %v4071_v20, 10  ;;  %v4165_v57 = vrot.slane %v4072_v49, 6  ;;  %v15161_v17 = vld [vmem:[%s22093_s5 + $0x124] ss:$8 sps:$4 sm:$0xff]   ;;  %v4456_v16 = vsel %vm18432_vm1, %v4447_v26, %v4455_v51  ;;  %6181 = vmatprep.mubr.bf16.mxu1 %v22303_v1 }
 0x2a7   :  { %v4675_v45 = vsel %vm18441_vm10, %v13107_v47, %v4674_v7  ;;  %v4234_v42 = vld [vmem:[#allocation2 + $0x6c] sm:$0x7]  ;;  %v4458_v30 = vshrl.u32 %v4231_v37, 16  ;;  %v4461_v3 = vshll.u32 %v4231_v37, 16  ;;  %v15164_v5 = vld [vmem:[%s22093_s5 + $0x14] ss:$8 sps:$4 sm:$0xff]   ;;  %7083 = vmatprep.subr.bf16.mxu1 %v15161_v17  ;;  %v14361_v17 = vadd.f32 %v18515_v9, %v18491_v28  ;;  %v18806_v28 = vpop.f32.mrf.mxu1 }
 0x2a8   :  { %4556 = vst [vmem:[#allocation3 + $0x148] sm:$0xf] %v4456_v16  ;;  %4719 = vst [vmem:[#allocation3 + $0x14c] sm:$0xf] %v4675_v45  ;;  %v4162_v60 = vsel %vm18403_vm6, %v13092_v27, %v4161_v58  ;;  %v4166_v20 = vsel %vm18403_vm6, %v13093_v38, %v4165_v57  ;;  %v4467_v49 = vshrl.u32 %v4232_v59, 16  ;;  %v4470_v62 = vshll.u32 %v4232_v59, 16  ;;  %6682 = vmatprep.subr.bf16.mxu0 %v15164_v5 }
 0x2a9   :  { %v15162_v37 = vld [vmem:[%s22093_s5 + $0x10] ss:$8 sps:$4 sm:$0xff]   ;;  %v15167_v29 = vld [vmem:[%s22093_s5 + $0x114] ss:$8 sps:$4 sm:$0xff]   ;;  %4203 = vst [vmem:[#allocation3 + $0x160] sm:$0xf] %v4162_v60  ;;  %7084 = vmatpush1.bf16.msra.mxu1 %v15159_v54  ;;  %v18804_v5 = vadd.f32 %v18751_v13, %v18717_v15  ;;  %v14364_v15 = vadd.f32 %v18537_v35, %v18528_v52 }
 0x2aa   :  { %4204 = vst [vmem:[#allocation3 + $0x17c] sm:$0xf] %v4166_v20  ;;  %v4460_v12 = vrot.slane %v4458_v30, 6  ;;  %v4463_v41 = vrot.slane %v4461_v3, 7  ;;  %v4476_v51 = vshrl.u32 %v4233_v2, 16  ;;  %v4479_v47 = vshll.u32 %v4233_v2, 16  ;;  %7085 = vmatprep.subr.bf16.mxu1 %v15167_v29  ;;  %6683 = vmatpush1.bf16.msra.mxu0 %v15162_v37 }
 0x2ab   :  { %v4585_v59 = vld [vmem:[#allocation2 + $0x60] sm:$0x8]  ;;  %v4586_v32 = vld [vmem:[#allocation2 + $0x64] sm:$0x7]  ;;  %v18787_v61 = vld [vmem:[#allocation2 + $0x68] sm:$0x8] }
 0x2ac   :  { %v15165_v8 = vld [vmem:[%s22093_s5 + $0x110] ss:$8 sps:$4 sm:$0xff]   ;;  %v4469_v26 = vrot.slane %v4467_v49, 6  ;;  %v4472_v19 = vrot.slane %v4470_v62, 7  ;;  %v4485_v7 = vshrl.u32 %v4234_v42, 16  ;;  %v4488_v27 = vshll.u32 %v4234_v42, 16  ;;  %v14427_v62 = vpop.f32.mrf.mxu0 }
 0x2ad   :  { %v15170_v58 = vld [vmem:[%s22093_s5 + $0x4] ss:$8 sps:$4 sm:$0xff]   ;;  %v4464_v2 = vor.u32 %v4463_v41, %v4460_v12  ;;  %v4478_v38 = vrot.slane %v4476_v51, 6  ;;  %v4481_v57 = vrot.slane %v4479_v47, 7  ;;  %v18797_v45 = vld [vmem:[#allocation2 + $0x70] sm:$0xc]  ;;  %v18812_v41 = vadd.f32 %v14361_v17, %v18355_v4  ;;  %7086 = vmatpush1.bf16.msra.mxu1 %v15165_v8 }
 0x2ae   :  { %v4588_v16 = vld [vmem:[#allocation2 + $0x6c] sm:$0x7]  ;;  %v4473_v42 = vor.u32 %v4472_v19, %v4469_v26  ;;  %v4487_v54 = vrot.slane %v4485_v7, 6  ;;  %v4490_v3 = vrot.slane %v4488_v27, 7  ;;  %v4074_v60 = vld [vmem:[#allocation2 + $0x74] sm:$0x3]  ;;  %6684 = vmatprep.subr.bf16.mxu0 %v15170_v58  ;;  %v19025_v24 = vpop.f32.mrf.mxu0 }
 0x2af   :  { %v15173_v30 = vld [vmem:[%s22093_s5 + $0x104] ss:$8 sps:$4 sm:$0xff]   ;;  %v4075_v20 = vld [vmem:[#allocation2 + $0x78] sm:$0xc]  ;;  %v4076_v49 = vld [vmem:[#allocation2 + $0x7c] sm:$0x3]  ;;  %v4482_v12 = vor.u32 %v4481_v57, %v4478_v38 }
 0x2b0   :  { %v15168_v9 = vld [vmem:[%s22093_s5] ss:$8 sps:$4 sm:$0xff]   ;;  %v4465_v29 = vrot.slane %v4464_v2, 4  ;;  %v4235_v13 = vld [vmem:[#allocation2 + $0x70] sm:$0xc]  ;;  %v4491_v26 = vor.u32 %v4490_v3, %v4487_v54  ;;  %v13108_v19 = vrot.slane %v4585_v59, 11  ;;  %7087 = vmatprep.subr.bf16.mxu1 %v15173_v30 }
 0x2b1   :  { %v18816_v51 = vld [vmem:[#allocation2 + $0x74] sm:$0x7]  ;;  %v15171_v37 = vld [vmem:[%s22093_s5 + $0x100] ss:$8 sps:$4 sm:$0xff]   ;;  %v4678_v7 = vrot.slane %v4586_v32, 7  ;;  %v13109_v4 = vrot.slane %v18787_v61, 11  ;;  %v18837_v61 = vadd.f32 %v14427_v62, %v18777_v6  ;;  %6685 = vmatpush1.bf16.msra.mxu0 %v15168_v9 }
 0x2b2   :  { %v15176_v47 = vld [vmem:[%s22093_s5 + $0xf4] ss:$8 sps:$4 sm:$0xff]   ;;  %v4237_v27 = vld [vmem:[#allocation2 + $0x78] sm:$0xc]  ;;  %v15114_v58 = vld [vmem:[#allocation3 + $0x128] ss:$28 sps:$4 sm:$0xff]   ;;  %v4474_v38 = vsel %vm18432_vm1, %v4465_v29, %v4473_v42  ;;  %v18844_v42 = vpop.f32.mrf.mxu1  ;;  %7088 = vmatpush1.bf16.msra.mxu1 %v15171_v37 }
 0x2b3   :  { %v15174_v52 = vld [vmem:[%s22093_s5 + $0xf0] ss:$8 sps:$4 sm:$0xff]   ;;  %v15179_v35 = vld [vmem:[%s22093_s5 + $0x1f4] ss:$8 sps:$4 sm:$0xff]   ;;  %v15116_v2 = vld [vmem:[#allocation3 + $0x12c] ss:$28 sps:$4 sm:$0xff]   ;;  %v4679_v17 = vsel %vm18441_vm10, %v13108_v19, %v4678_v7  ;;  %6686 = vmatprep.subr.bf16.mxu0 %v15176_v47 }
 0x2b4   :  { %v4483_v57 = vrot.slane %v4482_v12, 4  ;;  %v22319_v59 = vld [vmem:[#allocation14_spill] sm:$0xff]  ;;  %v15117_v8 = vld [vmem:[#allocation3 + $0x130] ss:$28 sps:$4 sm:$0xff]   ;;  %4557 = vst [vmem:[#allocation3 + $0x164] sm:$0xf] %v4474_v38  ;;  %6068 = vmatprep.mubr.bf16.mxu0 %v15116_v2  ;;  %7089 = vmatprep.subr.bf16.mxu1 %v15179_v35 }
 0x2b5   :  { %v18834_v32 = vadd.f32 %v14364_v15, %v22319_v59  ;;  %v4682_v54 = vrot.slane %v4588_v16, 7  ;;  %v13094_v3 = vrot.slane %v18797_v45, 10  ;;  %v22320_v21 = vld [vmem:[#allocation31_spill] sm:$0xff]  ;;  %v22321_v33 = vld [vmem:[#allocation44_spill] sm:$0xff]  ;;  %4720 = vst [vmem:[#allocation3 + $0x168] sm:$0xf] %v4679_v17  ;;  %6069 = vmatmul.mubr.bf16.gmra.mxu0 %v15114_v58  ;;  %6182 = vmatmul.mubr.bf16.gmra.mxu1 %v15117_v8  ;;  %v18868_v58 = vpop.f32.mrf.mxu1 }
 0x2b6   :  { %v2565_v44 = vadd.f32 %v22321_v33, %v22320_v21  ;;  %v4492_v6 = vsel %vm18432_vm1, %v4483_v57, %v4491_v26  ;;  %v4169_v30 = vrot.slane %v4074_v60, 6  ;;  %v13095_v62 = vrot.slane %v4075_v20, 10  ;;  %v4238_v12 = vld [vmem:[#allocation2 + $0x7c] sm:$0x7]  ;;  %v15182_v9 = vld [vmem:[%s22093_s5 + $0xe4] ss:$8 sps:$4 sm:$0xff]   ;;  %6191 = vmatprep.mubr.bf16.mxu1 %v22303_v1  ;;  %6687 = vmatpush2.bf16.msra.mxu0 %v15174_v52 }
 0x2b7   :  { %v4173_v29 = vrot.slane %v4076_v49, 6  ;;  %4558 = vst [vmem:[#allocation3 + $0x180] sm:$0xf] %v4492_v6  ;;  %v4683_v16 = vsel %vm18441_vm10, %v13109_v4, %v4682_v54  ;;  %v4494_v33 = vshrl.u32 %v4235_v13, 16  ;;  %v4497_v21 = vshll.u32 %v4235_v13, 16  ;;  %6688 = vmatprep.subr.bf16.mxu0 %v15182_v9  ;;  %v22322_v54 = vld [vmem:[#allocation32_spill] sm:$0xff] }
 0x2b8   :  { %v4503_v45 = vshrl.u32 %v18816_v51, 16  ;;  %4721 = vst [vmem:[#allocation3 + $0x184] sm:$0xf] %v4683_v16  ;;  %v4170_v60 = vsel %vm18403_vm6, %v13094_v3, %v4169_v30  ;;  %v4506_v49 = vshll.u32 %v18816_v51, 16  ;;  %v4512_v15 = vshrl.u32 %v4237_v27, 16  ;;  %v22323_v52 = vld [vmem:[#allocation13_spill] sm:$0xff] }
 0x2b9   :  { %v4174_v20 = vsel %vm18403_vm6, %v13095_v62, %v4173_v29  ;;  %v15177_v13 = vld [vmem:[%s22093_s5 + $0x1f0] ss:$8 sps:$4 sm:$0xff]   ;;  %v15180_v47 = vld [vmem:[%s22093_s5 + $0xe0] ss:$8 sps:$4 sm:$0xff]   ;;  %4205 = vst [vmem:[#allocation3 + $0x198] sm:$0xf] %v4170_v60  ;;  %v2662_v17 = vadd.f32 %v18555_v55, %v2565_v44  ;;  %v2557_v35 = vadd.f32 %v22323_v52, %v22322_v54 }
 0x2ba   :  { %4206 = vst [vmem:[#allocation3 + $0x1b4] sm:$0xf] %v4174_v20  ;;  %v4496_v26 = vrot.slane %v4494_v33, 6  ;;  %v4499_v19 = vrot.slane %v4497_v21, 7  ;;  %v4505_v7 = vrot.slane %v4503_v45, 6  ;;  %v4515_v4 = vshll.u32 %v4237_v27, 16  ;;  %7090 = vmatpush2.bf16.msra.mxu1 %v15177_v13  ;;  %6689 = vmatpush2.bf16.msra.mxu0 %v15180_v47 }
 0x2bb   :  { %v18866_v43 = vld [vmem:[#allocation2 + $0x70] sm:$0x8]  ;;  %v15185_v51 = vld [vmem:[%s22093_s5 + $0x1e4] ss:$8 sps:$4 sm:$0xff]   ;;  %v4508_v37 = vrot.slane %v4506_v49, 7  ;;  %v4514_v2 = vrot.slane %v4512_v15, 6  ;;  %v2654_v20 = vadd.f32 %v18571_v25, %v2557_v35  ;;  %v18888_v49 = vpop.f32.mrf.mxu1 }
 0x2bc   :  { %v4521_v38 = vshrl.u32 %v4238_v12, 16  ;;  %v4524_v57 = vshll.u32 %v4238_v12, 16  ;;  %v15188_v59 = vld [vmem:[%s22093_s5 + $0xd4] ss:$8 sps:$4 sm:$0xff]   ;;  %v4500_v27 = vor.u32 %v4499_v19, %v4496_v26  ;;  %v4517_v8 = vrot.slane %v4515_v4, 7  ;;  %7091 = vmatprep.subr.bf16.mxu1 %v15185_v51 }
 0x2bd   :  { %v4590_v3 = vld [vmem:[#allocation2 + $0x74] sm:$0x7]  ;;  %v4591_v6 = vld [vmem:[#allocation2 + $0x78] sm:$0x8]  ;;  %v15183_v30 = vld [vmem:[%s22093_s5 + $0x1e0] ss:$8 sps:$4 sm:$0xff]   ;;  %v4509_v62 = vor.u32 %v4508_v37, %v4505_v7  ;;  %6690 = vmatprep.subr.bf16.mxu0 %v15188_v59 }
 0x2be   :  { %v4523_v29 = vrot.slane %v4521_v38, 6  ;;  %v4526_v12 = vrot.slane %v4524_v57, 7  ;;  %v22324_v16 = vld [vmem:[#allocation37_spill] sm:$0xff]  ;;  %v22325_v33 = vld [vmem:[#allocation38_spill] sm:$0xff]  ;;  %v4501_v44 = vrot.slane %v4500_v27, 4  ;;  %v4518_v9 = vor.u32 %v4517_v8, %v4514_v2  ;;  %v22327_v2 = vld [vmem:[#allocation43_spill] sm:$0xff]  ;;  %7092 = vmatpush2.bf16.msra.mxu1 %v15183_v30 }
 0x2bf   :  { %v2568_v21 = vadd.f32 %v22325_v33, %v22324_v16  ;;  %v4592_v45 = vld [vmem:[#allocation2 + $0x7c] sm:$0x7]  ;;  %v15186_v55 = vld [vmem:[%s22093_s5 + $0xd0] ss:$8 sps:$4 sm:$0xff]   ;;  %v2724_v60 = vmax.f32 %v2662_v17, 0.0  ;;  %v13110_v38 = vrot.slane %v18866_v43, 11 }
 0x2c0   :  { %v15191_v15 = vld [vmem:[%s22093_s5 + $0x1d4] ss:$8 sps:$4 sm:$0xff]   ;;  %v15194_v13 = vld [vmem:[%s22093_s5 + $0xc4] ss:$8 sps:$4 sm:$0xff]   ;;  %v4527_v7 = vor.u32 %v4526_v12, %v4523_v29  ;;  %v4510_v51 = vsel %vm18432_vm1, %v4501_v44, %v4509_v62  ;;  %v4519_v57 = vrot.slane %v4518_v9, 4  ;;  %v2718_v27 = vmax.f32 %v2654_v20, 0.0  ;;  %v2701_v44 = vpop.f32.mrf.mxu1  ;;  %6691 = vmatpush2.bf16.msra.mxu0 %v15186_v55 }
 0x2c1   :  { %v15118_v26 = vld [vmem:[#allocation3 + $0x160] ss:$28 sps:$4 sm:$0xff]   ;;  %v2665_v4 = vadd.f32 %v18602_v53, %v2568_v21  ;;  %v22326_v37 = vld [vmem:[#allocation29_spill] sm:$0xff]  ;;  %v15121_v47 = vld [vmem:[#allocation3 + $0x168] ss:$28 sps:$4 sm:$0xff]   ;;  %v4686_v35 = vrot.slane %v4590_v3, 7  ;;  %7093 = vmatprep.subr.bf16.mxu1 %v15191_v15  ;;  %6692 = vmatprep.subr.bf16.mxu0 %v15194_v13 }
 0x2c2   :  { %v15120_v19 = vld [vmem:[#allocation3 + $0x164] ss:$28 sps:$4 sm:$0xff]   ;;  %v2560_v25 = vadd.f32 %v22327_v2, %v22326_v37  ;;  %v22328_v8 = vld [vmem:[#allocation22_spill] sm:$0xff]  ;;  %4559 = vst [vmem:[#allocation3 + $0x19c] sm:$0xf] %v4510_v51  ;;  %v13111_v29 = vrot.slane %v4591_v6, 11  ;;  %6192 = vmatmul.mubr.bf16.gmra.mxu1 %v15121_v47  ;;  %v4528_v59 = vsel %vm18432_vm1, %v4519_v57, %v4527_v7  ;;  %v14592_v37 = vpop.f32.mrf.mxu1 }
 0x2c3   :  { %v22329_v17 = vld [vmem:[#allocation39_spill] sm:$0xff]  ;;  %6078 = vmatprep.mubr.bf16.mxu0 %v15120_v19  ;;  %v2727_v52 = vmax.f32 %v2665_v4, 0.0  ;;  %v15189_v43 = vld [vmem:[%s22093_s5 + $0x1d0] ss:$8 sps:$4 sm:$0xff]   ;;  %v4690_v62 = vrot.slane %v4592_v45, 7  ;;  %6201 = vmatprep.mubr.bf16.mxu1 %v22303_v1  ;;  %v4687_v0 = vsel %vm18441_vm10, %v13110_v38, %v4686_v35  ;;  %v22334_v20 = vld [vmem:[#allocation20_spill] sm:$0xff]  ;;  %v2600_v4 = vadd.f32 %v18669_v46, %v18663_v56 }
 0x2c4   :  { %v2581_v54 = vadd.f32 %v22329_v17, %v22328_v8  ;;  %v2657_v53 = vadd.f32 %v18624_v11, %v2560_v25  ;;  %6079 = vmatmul.mubr.bf16.gmra.mxu0 %v15118_v26  ;;  %v22330_v16 = vld [vmem:[#allocation33_spill] sm:$0xff]  ;;  %v15197_v11 = vld [vmem:[%s22093_s5 + $0x1c4] ss:$8 sps:$4 sm:$0xff]   ;;  %4560 = vst [vmem:[#allocation3 + $0x1b8] sm:$0xf] %v4528_v59  ;;  %7094 = vmatpush2.bf16.msra.mxu1 %v15189_v43 }
 0x2c5   :  { %v22331_v33 = vld [vmem:[#allocation21_spill] sm:$0xff]  ;;  %v18916_v3 = vpack.c.bf16 %v2727_v52, %v2724_v60  ;;  %v15192_v30 = vld [vmem:[%s22093_s5 + $0xc0] ss:$8 sps:$4 sm:$0xff]   ;;  %v4691_v45 = vsel %vm18441_vm10, %v13111_v29, %v4690_v62  ;;  %4722 = vst [vmem:[#allocation3 + $0x1a0] sm:$0xf] %v4687_v0  ;;  %7095 = vmatprep.subr.bf16.mxu1 %v15197_v11  ;;  %v2697_v25 = vadd.f32 %v18844_v42, %v2600_v4 }
 0x2c6   :  { %v2678_v12 = vadd.f32 %v18660_v34, %v2581_v54  ;;  %v2573_v21 = vadd.f32 %v22331_v33, %v22330_v16  ;;  %v2721_v6 = vmax.f32 %v2657_v53, 0.0  ;;  %v2584_v34 = vadd.f32 %v18543_v22, %v18533_v10  ;;  %v22333_v60 = vld [vmem:[#allocation23_spill] sm:$0xff]  ;;  %v15200_v10 = vld [vmem:[%s22093_s5 + $0xb4] ss:$8 sps:$4 sm:$0xff]   ;;  %4723 = vst [vmem:[#allocation3 + $0x1bc] sm:$0xf] %v4691_v45  ;;  %6693 = vmatpush2.bf16.msra.mxu0 %v15192_v30  ;;  %v2704_v54 = vpop.f32.mrf.mxu1 }
 0x2c7   :  { %22332 = vst [vmem:[#allocation12_spill] sm:$0xff] %v18916_v3  ;;  %v2576_v26 = vadd.f32 %v22334_v20, %v22333_v60  ;;  %v22336_v19 = vld [vmem:[#allocation40_spill] sm:$0xff]  ;;  %v15198_v56 = vld [vmem:[%s22093_s5 + $0xb0] ss:$8 sps:$4 sm:$0xff]   ;;  %6694 = vmatprep.subr.bf16.mxu0 %v15200_v10  ;;  %v2751_v17 = vmax.f32 %v2697_v25, 0.0  ;;  %v22341_v43 = vld [vmem:[#allocation11_spill] sm:$0xff] }
 0x2c8   :  { %v2670_v9 = vadd.f32 %v18689_v18, %v2573_v21  ;;  %v18934_v22 = vpack.c.bf16 %v2721_v6, %v2718_v27  ;;  %v2681_v55 = vadd.f32 %v18719_v36, %v2584_v34  ;;  %v2589_v18 = vadd.f32 %v22336_v19, %v18563_v14  ;;  %v15195_v15 = vld [vmem:[%s22093_s5 + $0x1c0] ss:$8 sps:$4 sm:$0xff]   ;;  %v15203_v14 = vld [vmem:[%s22093_s5 + $0x1b4] ss:$8 sps:$4 sm:$0xff]   ;;  %v15210_v11 = vld [vmem:[%s22093_s5 + $0x90] ss:$8 sps:$4 sm:$0xff]   ;;  %v19027_v19 = vpop.f32.mrf.mxu0 }
 0x2c9   :  { %v2736_v13 = vmax.f32 %v2678_v12, 0.0  ;;  %v2673_v7 = vadd.f32 %v18753_v40, %v2576_v26  ;;  %v2592_v36 = vadd.f32 %v18598_v23, %v18588_v50  ;;  %v2613_v40 = vadd.f32 %v18804_v5, %v18812_v41  ;;  %v15201_v50 = vld [vmem:[%s22093_s5 + $0x1b0] ss:$8 sps:$4 sm:$0xff]   ;;  %v15206_v5 = vld [vmem:[%s22093_s5 + $0xa4] ss:$8 sps:$4 sm:$0xff]   ;;  %7096 = vmatpush2.bf16.msra.mxu1 %v15195_v15 }
 0x2ca   :  { %22335 = vst [vmem:[#allocation15_spill] sm:$0xff] %v18934_v22  ;;  %v2739_v31 = vmax.f32 %v2681_v55, 0.0  ;;  %v2686_v2 = vadd.f32 %v18806_v28, %v2589_v18  ;;  %v2730_v23 = vmax.f32 %v2670_v9, 0.0  ;;  %v2748_v41 = vmax.f32 %v2694_v63, 0.0  ;;  %v22338_v47 = vld [vmem:[#allocation17_spill] sm:$0xff]  ;;  %7097 = vmatprep.subr.bf16.mxu1 %v15203_v14  ;;  %6695 = vmatpush2.bf16.msra.mxu0 %v15198_v56 }
 0x2cb   :  { %v2733_v46 = vmax.f32 %v2673_v7, 0.0  ;;  %v2689_v48 = vadd.f32 %v18868_v58, %v2592_v36  ;;  %v2710_v38 = vadd.f32 %v18888_v49, %v2613_v40  ;;  %v2605_v51 = vadd.f32 %v22338_v47, %v18725_v39  ;;  %v15204_v42 = vld [vmem:[%s22093_s5 + $0xa0] ss:$8 sps:$4 sm:$0xff]   ;;  %v15209_v58 = vld [vmem:[%s22093_s5 + $0x1a4] ss:$8 sps:$4 sm:$0xff]   ;;  %v22340_v29 = vld [vmem:[#allocation41_spill] sm:$0xff]  ;;  %6696 = vmatprep.subr.bf16.mxu0 %v15206_v5  ;;  %v19045_v36 = vpop.f32.mrf.mxu1 }
 0x2cc   :  { %v18967_v28 = vpack.c.bf16 %v2739_v31, %v2736_v13  ;;  %v15122_v57 = vld [vmem:[#allocation3 + $0x198] ss:$28 sps:$4 sm:$0xff]   ;;  %v2616_v49 = vadd.f32 %v18837_v61, %v18834_v32  ;;  %v2742_v52 = vmax.f32 %v2686_v2, 0.0  ;;  %v2608_v59 = vadd.f32 %v22341_v43, %v22340_v29  ;;  %v15207_v62 = vld [vmem:[%s22093_s5 + $0x1a0] ss:$8 sps:$4 sm:$0xff]  }
 0x2cd   :  { %v15124_v27 = vld [vmem:[#allocation3 + $0x19c] ss:$28 sps:$4 sm:$0xff]   ;;  %v18978_v8 = vpack.c.bf16 %v2733_v46, %v2730_v23  ;;  %v2745_v53 = vmax.f32 %v2689_v48, 0.0  ;;  %v2702_v35 = vadd.f32 %v2701_v44, %v2605_v51  ;;  %v18990_v32 = vpack.c.bf16 %v2751_v17, %v2748_v41  ;;  %7098 = vmatpush2.bf16.msra.mxu1 %v15201_v50  ;;  %v15218_v9 = vld [vmem:[%s22093_s5 + $0x84] ss:$8 sps:$4 sm:$0xff]   ;;  %v19065_v56 = vpop.f32.mrf.mxu1 }
 0x2ce   :  { %22337 = vst [vmem:[#allocation16_spill] sm:$0xff] %v18967_v28  ;;  %v15212_v39 = vld [vmem:[%s22093_s5 + $0x94] ss:$8 sps:$4 sm:$0xff]   ;;  %6088 = vmatprep.mubr.bf16.mxu0 %v15124_v27  ;;  %v2760_v61 = vmax.f32 %v2710_v38, 0.0  ;;  %v2713_v16 = vadd.f32 %v14592_v37, %v2616_v49  ;;  %v2705_v44 = vadd.f32 %v2704_v54, %v2608_v59  ;;  %v19002_v6 = vcombine.high %v22303_v1, %v22303_v1  ;;  %v15213_v45 = vld [vmem:[%s22093_s5 + $0x190] ss:$8 sps:$4 sm:$0xff]   ;;  %v19047_v37 = vpop.f32.mrf.mxu0 }
 0x2cf   :  { %22339 = vst [vmem:[#allocation42_spill] sm:$0xff] %v18978_v8  ;;  %v15125_v12 = vld [vmem:[#allocation3 + $0x1a0] ss:$28 sps:$4 sm:$0xff]   ;;  %22342 = vst [vmem:[#allocation14_spill] sm:$0xff] %v18990_v32  ;;  %6089 = vmatmul.mubr.bf16.gmra.mxu0 %v15122_v57  ;;  %v18995_v21 = vpack.c.bf16 %v2745_v53, %v2742_v52  ;;  %7099 = vmatprep.subr.bf16.mxu1 %v15209_v58  ;;  %v2754_v34 = vmax.f32 %v2702_v35, 0.0  ;;  %v19037_v13 = vcombine.low %v22303_v1, %v22303_v1  ;;  %v19076_v25 = vpop.f32.mrf.mxu1 }
 0x2d0   :  { %v15215_v33 = vld [vmem:[%s22093_s5 + $0x194] ss:$8 sps:$4 sm:$0xff]   ;;  %6202 = vmatmul.mubr.bf16.gmra.mxu1 %v15125_v12  ;;  %v2763_v0 = vmax.f32 %v2713_v16, 0.0  ;;  %v2757_v30 = vmax.f32 %v2705_v44, 0.0  ;;  %6697 = vmatpush2.bf16.msra.mxu0 %v15204_v42  ;;  %v15221_v20 = vld [vmem:[%s22093_s5 + $0x184] ss:$8 sps:$4 sm:$0xff]   ;;  %v19068_v50 = vpop.f32.mrf.mxu0 }
 0x2d1   :  { %22343 = vst [vmem:[#allocation31_spill] sm:$0xff] %v18995_v21  ;;  %6702 = vmatprep.mubr.bf16.mxu0 %v19002_v6  ;;  %6698 = vmatprep.subr.bf16.mxu0 %v15212_v39  ;;  %v15216_v10 = vld [vmem:[%s22093_s5 + $0x80] ss:$8 sps:$4 sm:$0xff]   ;;  %v15224_v55 = vld [vmem:[%s22093_s5 + $0x274] ss:$8 sps:$4 sm:$0xff]   ;;  %v19095_v57 = vpop.f32.mrf.mxu1 }
 0x2d2   :  { %v19011_v60 = vpack.c.bf16 %v2763_v0, %v2760_v61  ;;  %7105 = vmatprep.mubr.bf16.mxu1 %v19002_v6  ;;  %v19017_v26 = vpack.c.bf16 %v2757_v30, %v2754_v34  ;;  %7100 = vmatpush2.bf16.msra.mxu1 %v15207_v62  ;;  %v15219_v18 = vld [vmem:[%s22093_s5 + $0x180] ss:$8 sps:$4 sm:$0xff]   ;;  %v15227_v15 = vld [vmem:[%s22093_s5 + $0x374] ss:$8 sps:$4 sm:$0xff]   ;;  %v15222_v7 = vld [vmem:[%s22093_s5 + $0x270] ss:$8 sps:$4 sm:$0xff]   ;;  %v5804_v41 = vpop.f32.mrf.mxu0 }
 0x2d3   :  { %7101 = vmatprep.subr.bf16.mxu1 %v15215_v33  ;;  %v15230_v4 = vld [vmem:[%s22093_s5 + $0x264] ss:$8 sps:$4 sm:$0xff]   ;;  %v15225_v14 = vld [vmem:[%s22093_s5 + $0x370] ss:$8 sps:$4 sm:$0xff]   ;;  %v15228_v31 = vld [vmem:[%s22093_s5 + $0x260] ss:$8 sps:$4 sm:$0xff]   ;;  %v5917_v53 = vpop.f32.mrf.mxu1 }
 0x2d4   :  { %22344 = vst [vmem:[#allocation44_spill] sm:$0xff] %v19011_v60  ;;  %22345 = vst [vmem:[#allocation32_spill] sm:$0xff] %v19017_v26  ;;  %6699 = vmatpush2.bf16.msra.mxu0 %v15210_v11  ;;  %v15233_v63 = vld [vmem:[%s22093_s5 + $0x364] ss:$8 sps:$4 sm:$0xff]   ;;  %v15236_v2 = vld [vmem:[%s22093_s5 + $0x254] ss:$8 sps:$4 sm:$0xff]   ;;  %v19093_v58 = vpop.f32.mrf.mxu0 }
 0x2d5   :  { %6700 = vmatprep.subr.bf16.mxu0 %v15218_v9  ;;  %v15231_v40 = vld [vmem:[%s22093_s5 + $0x360] ss:$8 sps:$4 sm:$0xff]   ;;  %v15234_v23 = vld [vmem:[%s22093_s5 + $0x250] ss:$8 sps:$4 sm:$0xff]   ;;  %v15239_v5 = vld [vmem:[%s22093_s5 + $0x354] ss:$8 sps:$4 sm:$0xff]   ;;  %v19113_v43 = vpop.f32.mrf.mxu1 }
 0x2d6   :  { %7102 = vmatpush2.bf16.msra.mxu1 %v15213_v45  ;;  %v4900_v46 = vld [vmem:[%s22092_s4] sm:$0x3]  ;;  %v15237_v48 = vld [vmem:[%s22093_s5 + $0x350] ss:$8 sps:$4 sm:$0xff]   ;;  %v15242_v47 = vld [vmem:[%s22093_s5 + $0x244] ss:$8 sps:$4 sm:$0xff]   ;;  %v5808_v52 = vpop.f32.mrf.mxu0 }
 0x2d7   :  { %7103 = vmatprep.subr.bf16.mxu1 %v15221_v20  ;;  %v15240_v38 = vld [vmem:[%s22093_s5 + $0x240] ss:$8 sps:$4 sm:$0xff]   ;;  %v15245_v17 = vld [vmem:[%s22093_s5 + $0x344] ss:$8 sps:$4 sm:$0xff]   ;;  %v15246_v54 = vld [vmem:[%s22093_s5 + $0x230] ss:$8 sps:$4 sm:$0xff]   ;;  %v5921_v61 = vpop.f32.mrf.mxu1 }
 0x2d8   :  { %6701 = vmatpush2.bf16.msra.mxu0 %v15216_v10  ;;  %v22346_v51 = vld [vmem:[#allocation35_spill] sm:$0xff]  ;;  %v15248_v39 = vld [vmem:[%s22093_s5 + $0x234] ss:$8 sps:$4 sm:$0xff]   ;;  %v15249_v59 = vld [vmem:[%s22093_s5 + $0x330] ss:$8 sps:$4 sm:$0xff]   ;;  %v19121_v12 = vpop.f32.mrf.mxu0 }
 0x2d9   :  { %7508 = vmatprep.subr.bf16.mxu0 %v15224_v55  ;;  %v19091_v42 = vrot.slane %v4900_v46, %v22346_v51  ;;  %v15243_v27 = vld [vmem:[%s22093_s5 + $0x340] ss:$8 sps:$4 sm:$0xff]   ;;  %v15251_v62 = vld [vmem:[%s22093_s5 + $0x334] ss:$8 sps:$4 sm:$0xff]   ;;  %v15254_v33 = vld [vmem:[%s22093_s5 + $0x224] ss:$8 sps:$4 sm:$0xff]   ;;  %v19137_v45 = vpop.f32.mrf.mxu1 }
 0x2da   :  { %7104 = vmatpush2.bf16.msra.mxu1 %v15219_v18  ;;  %v15252_v16 = vld [vmem:[%s22093_s5 + $0x220] ss:$8 sps:$4 sm:$0xff]   ;;  %v15257_v0 = vld [vmem:[%s22093_s5 + $0x324] ss:$8 sps:$4 sm:$0xff]   ;;  %v5814_v34 = vpop.f32.mrf.mxu0  ;;  %v15258_v9 = vld [vmem:[%s22093_s5 + $0x210] ss:$8 sps:$4 sm:$0xff]  }
 0x2db   :  { %6703 = vmatmul.mubr.bf16.vlgmr.msra.gmra.mxu0 %v19037_v13  ;;  %7942 = vmatprep.subr.bf16.mxu1 %v15227_v15  ;;  %v5805_v49 = vadd.f32 %v5804_v41, %v19091_v42  ;;  %v5809_v29 = vadd.f32 %v5808_v52, %v19091_v42  ;;  %v15255_v11 = vld [vmem:[%s22093_s5 + $0x320] ss:$8 sps:$4 sm:$0xff]   ;;  %v15260_v20 = vld [vmem:[%s22093_s5 + $0x214] ss:$8 sps:$4 sm:$0xff]   ;;  %v15261_v10 = vld [vmem:[%s22093_s5 + $0x310] ss:$8 sps:$4 sm:$0xff]   ;;  %v5815_v15 = vadd.f32 %v5814_v34, %v19091_v42 }
 0x2dc   :  { %7509 = vmatpush1.bf16.msra.mxu0 %v15222_v7  ;;  %v5816_v30 = vpop.f32.mrf.mxu0  ;;  %v22347_v55 = vld [vmem:[#allocation36_spill] sm:$0xff]  ;;  %v15263_v7 = vld [vmem:[%s22093_s5 + $0x314] ss:$8 sps:$4 sm:$0xff]   ;;  %v15273_v52 = vld [vmem:[%s22093_s5 + $0x3f0] ss:$8 sps:$4 sm:$0xff]  }
 0x2dd   :  { %7106 = vmatmul.mubr.bf16.vlgmr.msra.gmra.mxu1 %v19037_v13  ;;  %7510 = vmatprep.subr.bf16.mxu0 %v15230_v4  ;;  %v19110_v35 = vadd.f32 %v5917_v53, %v5805_v49  ;;  %v19129_v44 = vadd.f32 %v5921_v61, %v5809_v29  ;;  %v19149_v18 = vrot.slane %v4900_v46, %v22347_v55  ;;  %v15266_v46 = vld [vmem:[%s22093_s5 + $0x204] ss:$8 sps:$4 sm:$0xff]   ;;  %v15275_v53 = vld [vmem:[%s22093_s5 + $0x3f4] ss:$8 sps:$4 sm:$0xff]   ;;  %v15276_v61 = vld [vmem:[%s22093_s5 + $0x2e0] ss:$8 sps:$4 sm:$0xff]  }
 0x2de   :  { %7943 = vmatpush1.bf16.msra.mxu1 %v15225_v14  ;;  %v5818_v4 = vpop.f32.mrf.mxu0 }
 0x2df   :  { %7944 = vmatprep.subr.bf16.mxu1 %v15233_v63  ;;  %v5817_v14 = vadd.f32 %v5816_v30, %v19149_v18  ;;  %v15282_v30 = vld [vmem:[%s22093_s5 + $0x2d0] ss:$8 sps:$4 sm:$0xff]  }
 0x2e0   :  { %7511 = vmatpush1.bf16.msra.mxu0 %v15228_v31  ;;  %v5927_v31 = vpop.f32.mrf.mxu1  ;;  %v19170_v41 = vpop.f32.mrf.mxu0 }
 0x2e1   :  { %7512 = vmatprep.subr.bf16.mxu0 %v15236_v2  ;;  %v19156_v63 = vadd.f32 %v5927_v31, %v5815_v15  ;;  %v5819_v2 = vadd.f32 %v5818_v4, %v19091_v42 }
 0x2e2   :  { %7945 = vmatpush1.bf16.msra.mxu1 %v15231_v40  ;;  %v5929_v40 = vpop.f32.mrf.mxu1 }
 0x2e3   :  { %7946 = vmatprep.subr.bf16.mxu1 %v15239_v5  ;;  %v19168_v5 = vadd.f32 %v5929_v40, %v5817_v14  ;;  %v15285_v40 = vld [vmem:[%s22093_s5 + $0x3d0] ss:$8 sps:$4 sm:$0xff]  }
 0x2e4   :  { %7513 = vmatpush1.bf16.msra.mxu0 %v15234_v23  ;;  %v15264_v23 = vld [vmem:[%s22093_s5 + $0x200] ss:$8 sps:$4 sm:$0xff]  }
 0x2e5   :  { %7514 = vmatprep.subr.bf16.mxu0 %v15242_v47  ;;  %v15270_v47 = vld [vmem:[%s22093_s5 + $0x2f0] ss:$8 sps:$4 sm:$0xff]  }
 0x2e6   :  { %7947 = vmatpush1.bf16.msra.mxu1 %v15237_v48  ;;  %v15267_v48 = vld [vmem:[%s22093_s5 + $0x300] ss:$8 sps:$4 sm:$0xff]  }
 0x2e7   :  { %7948 = vmatprep.subr.bf16.mxu1 %v15245_v17  ;;  %v5931_v17 = vpop.f32.mrf.mxu1 }
 0x2e8   :  { %7515 = vmatpush1.bf16.msra.mxu0 %v15240_v38  ;;  %v15269_v38 = vld [vmem:[%s22093_s5 + $0x304] ss:$8 sps:$4 sm:$0xff]   ;;  %v19181_v49 = vadd.f32 %v5931_v17, %v5819_v2 }
 0x2e9   :  { %7516 = vmatprep.subr.bf16.mxu0 %v15248_v39  ;;  %v19189_v29 = vpop.f32.mrf.mxu1  ;;  %v15293_v17 = vld [vmem:[%s22093_s5 + $0x3c4] ss:$8 sps:$4 sm:$0xff]  }
 0x2ea   :  { %7949 = vmatpush1.bf16.msra.mxu1 %v15243_v27  ;;  %v15272_v27 = vld [vmem:[%s22093_s5 + $0x2f4] ss:$8 sps:$4 sm:$0xff]  }
 0x2eb   :  { %7950 = vmatprep.subr.bf16.mxu1 %v15251_v62  ;;  %v5937_v34 = vpop.f32.mrf.mxu1 }
 0x2ec   :  { %7517 = vmatpush1.bf16.msra.mxu0 %v15246_v54  ;;  %v5824_v54 = vpop.f32.mrf.mxu0 }
 0x2ed   :  { %7518 = vmatprep.subr.bf16.mxu0 %v15254_v33 }
 0x2ee   :  { %7951 = vmatpush1.bf16.msra.mxu1 %v15249_v59  ;;  %v5826_v39 = vpop.f32.mrf.mxu0  ;;  %v5825_v59 = vadd.f32 %v5824_v54, %v19091_v42 }
 0x2ef   :  { %7952 = vmatprep.subr.bf16.mxu1 %v15257_v0  ;;  %v5827_v33 = vadd.f32 %v5826_v39, %v19149_v18  ;;  %v15281_v0 = vld [vmem:[%s22093_s5 + $0x3e4] ss:$8 sps:$4 sm:$0xff]   ;;  %v15294_v39 = vld [vmem:[%s22093_s5 + $0x2b0] ss:$8 sps:$4 sm:$0xff]  }
 0x2f0   :  { %7519 = vmatpush1.bf16.msra.mxu0 %v15252_v16  ;;  %v5828_v62 = vpop.f32.mrf.mxu0  ;;  %v15278_v16 = vld [vmem:[%s22093_s5 + $0x2e4] ss:$8 sps:$4 sm:$0xff]  }
 0x2f1   :  { %7520 = vmatprep.subr.bf16.mxu0 %v15260_v20  ;;  %v19211_v20 = vadd.f32 %v5937_v34, %v5825_v59  ;;  %v15297_v34 = vld [vmem:[%s22093_s5 + $0x3b0] ss:$8 sps:$4 sm:$0xff]  }
 0x2f2   :  { %7953 = vmatpush1.bf16.msra.mxu1 %v15255_v11  ;;  %v15279_v11 = vld [vmem:[%s22093_s5 + $0x3e0] ss:$8 sps:$4 sm:$0xff]   ;;  %v19214_v15 = vpop.f32.mrf.mxu0 }
 0x2f3   :  { %7954 = vmatprep.subr.bf16.mxu1 %v15263_v7  ;;  %v5939_v7 = vpop.f32.mrf.mxu1 }
 0x2f4   :  { %7521 = vmatpush1.bf16.msra.mxu0 %v15258_v9  ;;  %v15284_v9 = vld [vmem:[%s22093_s5 + $0x2d4] ss:$8 sps:$4 sm:$0xff]   ;;  %v19216_v4 = vadd.f32 %v5939_v7, %v5827_v33  ;;  %v5834_v2 = vpop.f32.mrf.mxu0  ;;  %v15300_v7 = vld [vmem:[%s22093_s5 + $0x2a0] ss:$8 sps:$4 sm:$0xff]  }
 0x2f5   :  { %7522 = vmatprep.subr.bf16.mxu0 %v15266_v46  ;;  %v5941_v14 = vpop.f32.mrf.mxu1  ;;  %v5835_v54 = vadd.f32 %v5834_v2, %v19091_v42 }
 0x2f6   :  { %7955 = vmatpush1.bf16.msra.mxu1 %v15261_v10  ;;  %v5829_v10 = vadd.f32 %v5828_v62, %v19091_v42  ;;  %v5836_v46 = vpop.f32.mrf.mxu0 }
 0x2f7   :  { %7956 = vmatprep.subr.bf16.mxu1 %v15269_v38  ;;  %v15290_v38 = vld [vmem:[%s22093_s5 + $0x2c4] ss:$8 sps:$4 sm:$0xff]   ;;  %v5837_v59 = vadd.f32 %v5836_v46, %v19149_v18 }
 0x2f8   :  { %7523 = vmatpush1.bf16.msra.mxu0 %v15264_v23  ;;  %v19218_v31 = vadd.f32 %v5941_v14, %v5829_v10  ;;  %v15287_v23 = vld [vmem:[%s22093_s5 + $0x3d4] ss:$8 sps:$4 sm:$0xff]   ;;  %v15302_v14 = vld [vmem:[%s22093_s5 + $0x2a4] ss:$8 sps:$4 sm:$0xff]  }
 0x2f9   :  { %7524 = vmatprep.subr.bf16.mxu0 %v15272_v27  ;;  %v15291_v27 = vld [vmem:[%s22093_s5 + $0x3c0] ss:$8 sps:$4 sm:$0xff]  }
 0x2fa   :  { %7957 = vmatpush1.bf16.msra.mxu1 %v15267_v48  ;;  %v15288_v48 = vld [vmem:[%s22093_s5 + $0x2c0] ss:$8 sps:$4 sm:$0xff]  }
 0x2fb   :  { %7958 = vmatprep.subr.bf16.mxu1 %v15275_v53  ;;  %v5838_v53 = vpop.f32.mrf.mxu0 }
 0x2fc   :  { %7525 = vmatpush2.bf16.msra.mxu0 %v15270_v47  ;;  %v19232_v47 = vpop.f32.mrf.mxu1 }
 0x2fd   :  { %7526 = vmatprep.subr.bf16.mxu0 %v15278_v16  ;;  %22348 = vst [vmem:[#allocation13_spill] sm:$0xff] %v19232_v47  ;;  %v5839_v16 = vadd.f32 %v5838_v53, %v19091_v42  ;;  %v15314_v53 = vld [vmem:[%s22093_s5 + $0x284] ss:$8 sps:$4 sm:$0xff]  }
 0x2fe   :  { %7959 = vmatpush2.bf16.msra.mxu1 %v15273_v52  ;;  %v15296_v52 = vld [vmem:[%s22093_s5 + $0x2b4] ss:$8 sps:$4 sm:$0xff]   ;;  %v5947_v62 = vpop.f32.mrf.mxu1 }
 0x2ff   :  { %7960 = vmatprep.subr.bf16.mxu1 %v15281_v0  ;;  %v19253_v0 = vpop.f32.mrf.mxu0 }
 0x300   :  { %7527 = vmatpush2.bf16.msra.mxu0 %v15276_v61  ;;  %v19248_v61 = vadd.f32 %v5947_v62, %v5835_v54  ;;  %v5949_v33 = vpop.f32.mrf.mxu1 }
 0x301   :  { %7528 = vmatprep.subr.bf16.mxu0 %v15284_v9  ;;  %v5844_v2 = vpop.f32.mrf.mxu0 }
 0x302   :  { %7961 = vmatpush2.bf16.msra.mxu1 %v15279_v11  ;;  %v19251_v11 = vadd.f32 %v5949_v33, %v5837_v59  ;;  %v5951_v9 = vpop.f32.mrf.mxu1  ;;  %v5845_v54 = vadd.f32 %v5844_v2, %v19091_v42  ;;  %v15317_v59 = vld [vmem:[%s22093_s5 + $0x384] ss:$8 sps:$4 sm:$0xff]   ;;  %v15323_v2 = vld [vmem:[%s22093_s5 + $0x574] ss:$8 sps:$4 sm:$0xff]  }
 0x303   :  { %7962 = vmatprep.subr.bf16.mxu1 %v15287_v23  ;;  %v19261_v10 = vadd.f32 %v5951_v9, %v5839_v16  ;;  %v15305_v23 = vld [vmem:[%s22093_s5 + $0x3a4] ss:$8 sps:$4 sm:$0xff]   ;;  %v5846_v46 = vpop.f32.mrf.mxu0  ;;  %v15312_v16 = vld [vmem:[%s22093_s5 + $0x280] ss:$8 sps:$4 sm:$0xff]  }
 0x304   :  { %7529 = vmatpush2.bf16.msra.mxu0 %v15282_v30  ;;  %v15299_v30 = vld [vmem:[%s22093_s5 + $0x3b4] ss:$8 sps:$4 sm:$0xff]   ;;  %v5847_v62 = vadd.f32 %v5846_v46, %v19149_v18 }
 0x305   :  { %7530 = vmatprep.subr.bf16.mxu0 %v15290_v38  ;;  %v15306_v38 = vld [vmem:[%s22093_s5 + $0x290] ss:$8 sps:$4 sm:$0xff]  }
 0x306   :  { %7963 = vmatpush2.bf16.msra.mxu1 %v15285_v40  ;;  %v15303_v40 = vld [vmem:[%s22093_s5 + $0x3a0] ss:$8 sps:$4 sm:$0xff]  }
 0x307   :  { %7964 = vmatprep.subr.bf16.mxu1 %v15293_v17  ;;  %v15309_v17 = vld [vmem:[%s22093_s5 + $0x390] ss:$8 sps:$4 sm:$0xff]  }
 0x308   :  { %7531 = vmatpush2.bf16.msra.mxu0 %v15288_v48  ;;  %v19275_v48 = vpop.f32.mrf.mxu1 }
 0x309   :  { %7532 = vmatprep.subr.bf16.mxu0 %v15296_v52  ;;  %v15311_v52 = vld [vmem:[%s22093_s5 + $0x394] ss:$8 sps:$4 sm:$0xff]  }
 0x30a   :  { %7965 = vmatpush2.bf16.msra.mxu1 %v15291_v27  ;;  %v15308_v27 = vld [vmem:[%s22093_s5 + $0x294] ss:$8 sps:$4 sm:$0xff]   ;;  %v5957_v33 = vpop.f32.mrf.mxu1 }
 0x30b   :  { %7966 = vmatprep.subr.bf16.mxu1 %v15299_v30  ;;  %v15320_v30 = vld [vmem:[%s22093_s5 + $0x474] ss:$8 sps:$4 sm:$0xff]   ;;  %v19306_v9 = vadd.f32 %v5957_v33, %v5845_v54 }
 0x30c   :  { %7533 = vmatpush2.bf16.msra.mxu0 %v15294_v39  ;;  %v5848_v39 = vpop.f32.mrf.mxu0 }
 0x30d   :  { %7534 = vmatprep.subr.bf16.mxu0 %v15302_v14 }
 0x30e   :  { %7967 = vmatpush2.bf16.msra.mxu1 %v15297_v34  ;;  %v15315_v34 = vld [vmem:[%s22093_s5 + $0x380] ss:$8 sps:$4 sm:$0xff]   ;;  %v19309_v14 = vpop.f32.mrf.mxu0 }
 0x30f   :  { %7968 = vmatprep.subr.bf16.mxu1 %v15305_v23 }
 0x310   :  { %7535 = vmatpush2.bf16.msra.mxu0 %v15300_v7  ;;  %v5849_v7 = vadd.f32 %v5848_v39, %v19091_v42 }
 0x311   :  { %7536 = vmatprep.subr.bf16.mxu0 %v15308_v27  ;;  %v5854_v27 = vpop.f32.mrf.mxu0 }
 0x312   :  { %7969 = vmatpush2.bf16.msra.mxu1 %v15303_v40  ;;  %v5959_v40 = vpop.f32.mrf.mxu1  ;;  %v5855_v39 = vadd.f32 %v5854_v27, %v19091_v42 }
 0x313   :  { %7970 = vmatprep.subr.bf16.mxu1 %v15311_v52  ;;  %v19314_v23 = vadd.f32 %v5959_v40, %v5847_v62 }
 0x314   :  { %7537 = vmatpush2.bf16.msra.mxu0 %v15306_v38  ;;  %v5961_v46 = vpop.f32.mrf.mxu1 }
 0x315   :  { %7538 = vmatprep.subr.bf16.mxu0 %v15314_v53  ;;  %v19316_v38 = vadd.f32 %v5961_v46, %v5849_v7 }
 0x316   :  { %7971 = vmatpush2.bf16.msra.mxu1 %v15309_v17  ;;  %v5856_v17 = vpop.f32.mrf.mxu0  ;;  %v19318_v54 = vpop.f32.mrf.mxu1 }
 0x317   :  { %7972 = vmatprep.subr.bf16.mxu1 %v15317_v59  ;;  %v5857_v53 = vadd.f32 %v5856_v17, %v19149_v18 }
 0x318   :  { %7539 = vmatpush2.bf16.msra.mxu0 %v15312_v16  ;;  %v5858_v52 = vpop.f32.mrf.mxu0  ;;  %v5967_v59 = vpop.f32.mrf.mxu1 }
 0x319   :  { %8377 = vmatprep.subr.bf16.mxu0 %v15320_v30  ;;  %v19322_v33 = vadd.f32 %v5967_v59, %v5855_v39  ;;  %v5859_v62 = vadd.f32 %v5858_v52, %v19091_v42 }
 0x31a   :  { %7973 = vmatpush2.bf16.msra.mxu1 %v15315_v34  ;;  %v5969_v16 = vpop.f32.mrf.mxu1  ;;  %v19327_v30 = vpop.f32.mrf.mxu0 }
 0x31b   :  { %8812 = vmatprep.subr.bf16.mxu1 %v15323_v2  ;;  %v19325_v34 = vadd.f32 %v5969_v16, %v5857_v53  ;;  %v5795_v16 = vadd.f32 %v19025_v24, %v19091_v42 }
 0x31c   :  { %v5971_v7 = vpop.f32.mrf.mxu1  ;;  %v5864_v40 = vpop.f32.mrf.mxu0 }
 0x31d   :  { %v19329_v2 = vadd.f32 %v5971_v7, %v5859_v62  ;;  %v5865_v27 = vadd.f32 %v5864_v40, %v19091_v42  ;;  %v5797_v40 = vadd.f32 %v19027_v19, %v19149_v18 }
 0x31e   :  { %v5866_v46 = vpop.f32.mrf.mxu0  ;;  %v19331_v60 = vpop.f32.mrf.mxu1 }
 0x31f   :  { %v5867_v39 = vadd.f32 %v5866_v46, %v19149_v18  ;;  %v5910_v24 = vadd.f32 %v19065_v56, %v5797_v40 }
 0x320   :  { %v5868_v17 = vpop.f32.mrf.mxu0 }
 0x321   :  { %v5869_v52 = vadd.f32 %v5868_v17, %v19091_v42  ;;  %v5799_v17 = vadd.f32 %v19047_v37, %v19091_v42  ;;  %v5807_v42 = vadd.f32 %v19093_v58, %v19149_v18 }
 0x322   :  { %v19342_v32 = vpop.f32.mrf.mxu0 }
 0x323   :  { %22350 = vst [vmem:[#allocation38_spill] sm:$0xff] %v19342_v32  ;;  %v5912_v19 = vadd.f32 %v19076_v25, %v5799_v17 }
 0x324   :  { %v5977_v59 = vpop.f32.mrf.mxu1 }
 0x325   :  { %v19335_v26 = vadd.f32 %v5977_v59, %v5865_v27  ;;  %v5908_v27 = vadd.f32 %v19045_v36, %v5795_v16 }
 0x326   :  { %v5979_v53 = vpop.f32.mrf.mxu1 }
 0x327   :  { %v19340_v62 = vadd.f32 %v5979_v53, %v5867_v39  ;;  %v5801_v39 = vadd.f32 %v19068_v50, %v19149_v18 }
 0x328   :  { %v5981_v7 = vpop.f32.mrf.mxu1 }
 0x329   :  { %22349 = vst [vmem:[#allocation37_spill] sm:$0xff] %v19340_v62  ;;  %v19346_v21 = vadd.f32 %v5981_v7, %v5869_v52  ;;  %v5914_v36 = vadd.f32 %v19095_v57, %v5801_v39 }
 0x32a   :  { %v19348_v46 = vpop.f32.mrf.mxu1 }
 0x32b   :  { %22351 = vst [vmem:[#allocation29_spill] sm:$0xff] %v19348_v46 }
 0x32e   :  { %v6020_v59 = vpop.f32.mrf.mxu0  ;;  %v6133_v28 = vpop.f32.mrf.mxu1 }
 0x32f   :  { %v6021_v53 = vadd.f32 %v6020_v59, %v5908_v27 }
 0x330   :  { %v6022_v8 = vpop.f32.mrf.mxu0  ;;  %v6135_v3 = vpop.f32.mrf.mxu1 }
 0x331   :  { %v6134_v52 = vadd.f32 %v6133_v28, %v6021_v53  ;;  %v6023_v7 = vadd.f32 %v6022_v8, %v5910_v24  ;;  %v5811_v28 = vadd.f32 %v19121_v12, %v19149_v18 }
 0x332   :  { %v6024_v22 = vpop.f32.mrf.mxu0  ;;  %v6137_v46 = vpop.f32.mrf.mxu1 }
 0x333   :  { %v6136_v16 = vadd.f32 %v6135_v3, %v6023_v7  ;;  %v6025_v37 = vadd.f32 %v6024_v22, %v5912_v19  ;;  %v6212_v62 = vmax.f32 %v6134_v52, 0.0  ;;  %v5920_v3 = vadd.f32 %v19113_v43, %v5807_v42 }
 0x334   :  { %v6026_v56 = vpop.f32.mrf.mxu0  ;;  %v6139_v40 = vpop.f32.mrf.mxu1  ;;  %v5924_v43 = vadd.f32 %v19137_v45, %v5811_v28 }
 0x335   :  { %v6213_v50 = vmax.f32 %v6136_v16, 0.0  ;;  %v6138_v27 = vadd.f32 %v6137_v46, %v6025_v37  ;;  %v6027_v59 = vadd.f32 %v6026_v56, %v5914_v36 }
 0x337   :  { %v14129_v32 = vpack.c.bf16 %v6213_v50, %v6212_v62  ;;  %v6140_v47 = vadd.f32 %v6139_v40, %v6027_v59  ;;  %v6214_v8 = vmax.f32 %v6138_v27, 0.0 }
 0x339   :  { %v19364_v22 = vcombine.low %v22303_v1, %v14129_v32  ;;  %v6215_v58 = vmax.f32 %v6140_v47, 0.0  ;;  %v19368_v46 = vcombine.high %v22303_v1, %v14129_v32  ;;  %v19372_v12 = vpack.c.bf16 %v6214_v8, %v6212_v62 }
 0x33b   :  { %v6030_v25 = vpop.f32.mrf.mxu0  ;;  %v6143_v17 = vpop.f32.mrf.mxu1  ;;  %v19370_v52 = vpack.c.bf16 %v6215_v58, %v6213_v50  ;;  %6712 = vmatprep.mubr.bf16.mxu0 %v19368_v46 }
 0x33c   :  { %v6031_v57 = vadd.f32 %v6030_v25, %v19110_v35  ;;  %6713 = vmatmul.mubr.bf16.gmra.mxu0 %v19364_v22 }
 0x33d   :  { %v6032_v24 = vpop.f32.mrf.mxu0  ;;  %v6145_v39 = vpop.f32.mrf.mxu1  ;;  %7115 = vmatprep.mubr.bf16.mxu1 %v19370_v52 }
 0x33e   :  { %v6144_v53 = vadd.f32 %v6143_v17, %v6031_v57  ;;  %v6033_v19 = vadd.f32 %v6032_v24, %v5920_v3  ;;  %7116 = vmatmul.mubr.bf16.gmra.mxu1 %v19372_v12  ;;  %v5821_v3 = vadd.f32 %v19170_v41, %v19149_v18 }
 0x33f   :  { %v6034_v7 = vpop.f32.mrf.mxu0  ;;  %v6147_v36 = vpop.f32.mrf.mxu1 }
 0x340   :  { %v6146_v47 = vadd.f32 %v6145_v39, %v6033_v19  ;;  %v6035_v35 = vadd.f32 %v6034_v7, %v19129_v44  ;;  %v6216_v37 = vmax.f32 %v6144_v53, 0.0 }
 0x341   :  { %v6036_v32 = vpop.f32.mrf.mxu0  ;;  %v6149_v16 = vpop.f32.mrf.mxu1 }
 0x342   :  { %v6217_v62 = vmax.f32 %v6146_v47, 0.0  ;;  %v6148_v42 = vadd.f32 %v6147_v36, %v6035_v35  ;;  %v6037_v56 = vadd.f32 %v6036_v32, %v5924_v43  ;;  %v19382_v59 = vpack.c.bf16 %v6216_v37, %v6214_v8 }
 0x343   :  { %v5934_v36 = vadd.f32 %v19189_v29, %v5821_v3 }
 0x344   :  { %v19380_v40 = vpack.c.bf16 %v6217_v62, %v6215_v58  ;;  %v6218_v50 = vmax.f32 %v6148_v42, 0.0  ;;  %v6150_v27 = vadd.f32 %v6149_v16, %v6037_v56 }
 0x346   :  { %v19384_v44 = vpack.c.bf16 %v6218_v50, %v6216_v37  ;;  %v6219_v28 = vmax.f32 %v6150_v27, 0.0  ;;  %6722 = vmatprep.mubr.bf16.mxu0 %v19380_v40 }
 0x347   :  { %v6153_v45 = vpop.f32.mrf.mxu1  ;;  %6723 = vmatmul.mubr.bf16.gmra.mxu0 %v19382_v59 }
 0x348   :  { %v19391_v39 = vpack.c.bf16 %v6219_v28, %v6217_v62 }
 0x349   :  { %v6040_v25 = vpop.f32.mrf.mxu0  ;;  %v6155_v17 = vpop.f32.mrf.mxu1 }
 0x34a   :  { %v6041_v57 = vadd.f32 %v6040_v25, %v19156_v63  ;;  %7125 = vmatprep.mubr.bf16.mxu1 %v19391_v39 }
 0x34b   :  { %v6042_v24 = vpop.f32.mrf.mxu0  ;;  %v6157_v58 = vpop.f32.mrf.mxu1  ;;  %7126 = vmatmul.mubr.bf16.gmra.mxu1 %v19384_v44 }
 0x34c   :  { %v6154_v8 = vadd.f32 %v6153_v45, %v6041_v57  ;;  %v6043_v53 = vadd.f32 %v6042_v24, %v19168_v5 }
 0x34d   :  { %v6044_v19 = vpop.f32.mrf.mxu0  ;;  %v6159_v7 = vpop.f32.mrf.mxu1 }
 0x34e   :  { %v6220_v43 = vmax.f32 %v6154_v8, 0.0  ;;  %v6156_v47 = vadd.f32 %v6155_v17, %v6043_v53  ;;  %v6045_v41 = vadd.f32 %v6044_v19, %v19181_v49 }
 0x34f   :  { %v6046_v63 = vpop.f32.mrf.mxu0 }
 0x350   :  { %v19398_v35 = vpack.c.bf16 %v6220_v43, %v6218_v50  ;;  %v6221_v32 = vmax.f32 %v6156_v47, 0.0  ;;  %v6158_v16 = vadd.f32 %v6157_v58, %v6045_v41  ;;  %v6047_v37 = vadd.f32 %v6046_v63, %v5934_v36 }
 0x351   :  { %v5841_v63 = vadd.f32 %v19253_v0, %v19149_v18 }
 0x352   :  { %v19400_v5 = vpack.c.bf16 %v6221_v32, %v6219_v28  ;;  %v6222_v42 = vmax.f32 %v6158_v16, 0.0  ;;  %v6160_v56 = vadd.f32 %v6159_v7, %v6047_v37 }
 0x354   :  { %v6163_v62 = vpop.f32.mrf.mxu1  ;;  %v19402_v29 = vpack.c.bf16 %v6222_v42, %v6220_v43  ;;  %v6223_v25 = vmax.f32 %v6160_v56, 0.0  ;;  %6732 = vmatprep.mubr.bf16.mxu0 %v19400_v5 }
 0x355   :  { %6733 = vmatmul.mubr.bf16.gmra.mxu0 %v19398_v35 }
 0x356   :  { %v6165_v45 = vpop.f32.mrf.mxu1  ;;  %v19408_v28 = vpack.c.bf16 %v6223_v25, %v6221_v32  ;;  %6742 = vmatprep.mubr.bf16.mxu0 %v19002_v6 }
 0x358   :  { %v6167_v50 = vpop.f32.mrf.mxu1  ;;  %7135 = vmatprep.mubr.bf16.mxu1 %v19408_v28 }
 0x359   :  { %v6050_v27 = vpop.f32.mrf.mxu0  ;;  %7136 = vmatmul.mubr.bf16.gmra.mxu1 %v19402_v29 }
 0x35a   :  { %v6051_v49 = vadd.f32 %v6050_v27, %v19211_v20  ;;  %v19417_v19 = vpop.f32.mrf.mxu1  ;;  %7145 = vmatprep.mubr.bf16.mxu1 %v19002_v6 }
 0x35b   :  { %v6052_v17 = vpop.f32.mrf.mxu0 }
 0x35c   :  { %v6164_v3 = vadd.f32 %v6163_v62, %v6051_v49  ;;  %v6053_v57 = vadd.f32 %v6052_v17, %v19216_v4 }
 0x35d   :  { %v6054_v24 = vpop.f32.mrf.mxu0  ;;  %6743 = vmatmul.mubr.bf16.gmra.mxu0 %v19037_v13 }
 0x35e   :  { %v6224_v58 = vmax.f32 %v6164_v3, 0.0  ;;  %v19411_v8 = vadd.f32 %v6165_v45, %v6053_v57  ;;  %v6055_v53 = vadd.f32 %v6054_v24, %v19218_v31 }
 0x35f   :  { %v19415_v20 = vpop.f32.mrf.mxu0 }
 0x360   :  { %v19420_v7 = vpack.c.bf16 %v6224_v58, %v6222_v42  ;;  %v6225_v4 = vmax.f32 %v19411_v8, 0.0  ;;  %v19423_v36 = vadd.f32 %v6167_v50, %v6055_v53  ;;  %v15354_v8 = vld [vmem:[%s22093_s5 + $0x410] ss:$8 sps:$4 sm:$0xff]  }
 0x361   :  { %7146 = vmatmul.mubr.bf16.gmra.mxu1 %v19037_v13 }
 0x362   :  { %v19428_v43 = vpack.c.bf16 %v6225_v4, %v6223_v25  ;;  %v6226_v31 = vmax.f32 %v19423_v36, 0.0  ;;  %v5954_v25 = vadd.f32 %v19275_v48, %v5841_v63  ;;  %v15443_v36 = vld [vmem:[%s22095_s7 + $0xdc] ss:$36 sps:$4 sm:$0xff]  }
 0x364   :  { %v19436_v32 = vpack.c.bf16 %v6226_v31, %v6224_v58 }
 0x365   :  { %v6060_v47 = vpop.f32.mrf.mxu0  ;;  %v6173_v41 = vpop.f32.mrf.mxu1 }
 0x366   :  { %v6061_v16 = vadd.f32 %v6060_v47, %v19248_v61 }
 0x367   :  { %v6062_v37 = vpop.f32.mrf.mxu0  ;;  %v6175_v62 = vpop.f32.mrf.mxu1 }
 0x368   :  { %v6174_v42 = vadd.f32 %v6173_v41, %v6061_v16  ;;  %v6063_v56 = vadd.f32 %v6062_v37, %v19251_v11 }
 0x369   :  { %v6064_v27 = vpop.f32.mrf.mxu0  ;;  %v6177_v45 = vpop.f32.mrf.mxu1 }
 0x36a   :  { %v6176_v49 = vadd.f32 %v6175_v62, %v6063_v56  ;;  %v6065_v0 = vadd.f32 %v6064_v27, %v19261_v10  ;;  %v6228_v50 = vmax.f32 %v6174_v42, 0.0  ;;  %v5851_v10 = vadd.f32 %v19309_v14, %v19149_v18 }
 0x36b   :  { %v6066_v17 = vpop.f32.mrf.mxu0  ;;  %v6179_v61 = vpop.f32.mrf.mxu1 }
 0x36c   :  { %v6229_v3 = vmax.f32 %v6176_v49, 0.0  ;;  %v6178_v57 = vadd.f32 %v6177_v45, %v6065_v0  ;;  %v6067_v24 = vadd.f32 %v6066_v17, %v5954_v25  ;;  %v5964_v17 = vadd.f32 %v19318_v54, %v5851_v10 }
 0x36d   :  { %v5861_v54 = vadd.f32 %v19327_v30, %v19149_v18 }
 0x36e   :  { %v14137_v58 = vpack.c.bf16 %v6229_v3, %v6228_v50  ;;  %v6230_v53 = vmax.f32 %v6178_v57, 0.0  ;;  %v6180_v47 = vadd.f32 %v6179_v61, %v6067_v24 }
 0x36f   :  { %v5974_v30 = vadd.f32 %v19331_v60, %v5861_v54 }
 0x370   :  { %v19444_v11 = vcombine.low %v22303_v1, %v14137_v58  ;;  %v19446_v41 = vpack.c.bf16 %v6230_v53, %v6228_v50  ;;  %v6231_v16 = vmax.f32 %v6180_v47, 0.0  ;;  %v19449_v63 = vcombine.high %v22303_v1, %v14137_v58 }
 0x372   :  { %6752 = vmatprep.mubr.bf16.mxu0 %v19449_v63  ;;  %v19455_v27 = vpack.c.bf16 %v6231_v16, %v6229_v3 }
 0x373   :  { %6753 = vmatmul.mubr.bf16.gmra.mxu0 %v19444_v11 }
 0x374   :  { %7155 = vmatprep.mubr.bf16.mxu1 %v19455_v27 }
 0x375   :  { %v6070_v37 = vpop.f32.mrf.mxu0  ;;  %v6183_v48 = vpop.f32.mrf.mxu1  ;;  %7156 = vmatmul.mubr.bf16.gmra.mxu1 %v19446_v41 }
 0x376   :  { %v6071_v62 = vadd.f32 %v6070_v37, %v19306_v9 }
 0x377   :  { %v6072_v42 = vpop.f32.mrf.mxu0  ;;  %v6185_v56 = vpop.f32.mrf.mxu1 }
 0x378   :  { %v6184_v45 = vadd.f32 %v6183_v48, %v6071_v62  ;;  %v6073_v25 = vadd.f32 %v6072_v42, %v19314_v23 }
 0x379   :  { %v6074_v49 = vpop.f32.mrf.mxu0  ;;  %v6187_v0 = vpop.f32.mrf.mxu1 }
 0x37a   :  { %v6232_v14 = vmax.f32 %v6184_v45, 0.0  ;;  %v6186_v50 = vadd.f32 %v6185_v56, %v6073_v25  ;;  %v6075_v9 = vadd.f32 %v6074_v49, %v19316_v38 }
 0x37b   :  { %v6076_v57 = vpop.f32.mrf.mxu0  ;;  %v6189_v3 = vpop.f32.mrf.mxu1 }
 0x37c   :  { %v19463_v24 = vpack.c.bf16 %v6232_v14, %v6230_v53  ;;  %v6233_v61 = vmax.f32 %v6186_v50, 0.0  ;;  %v6188_v23 = vadd.f32 %v6187_v0, %v6075_v9  ;;  %v6077_v58 = vadd.f32 %v6076_v57, %v5964_v17 }
 0x37e   :  { %v19465_v47 = vpack.c.bf16 %v6233_v61, %v6231_v16  ;;  %v6234_v37 = vmax.f32 %v6188_v23, 0.0  ;;  %v6190_v48 = vadd.f32 %v6189_v3, %v6077_v58 }
 0x380   :  { %v19469_v10 = vpack.c.bf16 %v6234_v37, %v6232_v14  ;;  %v6235_v38 = vmax.f32 %v6190_v48, 0.0  ;;  %6762 = vmatprep.mubr.bf16.mxu0 %v19465_v47 }
 0x381   :  { %6763 = vmatmul.mubr.bf16.gmra.mxu0 %v19463_v24 }
 0x382   :  { %v6193_v42 = vpop.f32.mrf.mxu1  ;;  %v19475_v49 = vpack.c.bf16 %v6235_v38, %v6233_v61 }
 0x384   :  { %v6080_v62 = vpop.f32.mrf.mxu0  ;;  %v6195_v45 = vpop.f32.mrf.mxu1  ;;  %7165 = vmatprep.mubr.bf16.mxu1 %v19475_v49 }
 0x385   :  { %v6081_v56 = vadd.f32 %v6080_v62, %v19322_v33  ;;  %7166 = vmatmul.mubr.bf16.gmra.mxu1 %v19469_v10 }
 0x386   :  { %v6082_v53 = vpop.f32.mrf.mxu0  ;;  %v6197_v17 = vpop.f32.mrf.mxu1 }
 0x387   :  { %v6194_v16 = vadd.f32 %v6193_v42, %v6081_v56  ;;  %v6083_v25 = vadd.f32 %v6082_v53, %v19325_v34 }
 0x388   :  { %v6084_v0 = vpop.f32.mrf.mxu0  ;;  %v6199_v61 = vpop.f32.mrf.mxu1 }
 0x389   :  { %v6236_v14 = vmax.f32 %v6194_v16, 0.0  ;;  %v6196_v50 = vadd.f32 %v6195_v45, %v6083_v25  ;;  %v6085_v9 = vadd.f32 %v6084_v0, %v19329_v2 }
 0x38a   :  { %v6086_v33 = vpop.f32.mrf.mxu0 }
 0x38b   :  { %v19481_v57 = vpack.c.bf16 %v6236_v14, %v6234_v37  ;;  %v6237_v3 = vmax.f32 %v6196_v50, 0.0  ;;  %v6198_v23 = vadd.f32 %v6197_v17, %v6085_v9  ;;  %v6087_v34 = vadd.f32 %v6086_v33, %v5974_v30  ;;  %v15318_v17 = vld [vmem:[%s22093_s5 + $0x470] ss:$8 sps:$4 sm:$0xff]  }
 0x38c   :  { %v15321_v9 = vld [vmem:[%s22093_s5 + $0x570] ss:$8 sps:$4 sm:$0xff]  }
 0x38d   :  { %v19483_v58 = vpack.c.bf16 %v6237_v3, %v6235_v38  ;;  %v6238_v48 = vmax.f32 %v6198_v23, 0.0  ;;  %v19485_v62 = vadd.f32 %v6199_v61, %v6087_v34  ;;  %v15332_v34 = vld [vmem:[%s22093_s5 + $0x454] ss:$8 sps:$4 sm:$0xff]  }
 0x38f   :  { %v19487_v60 = vpack.c.bf16 %v6238_v48, %v6236_v14  ;;  %v6239_v2 = vmax.f32 %v19485_v62, 0.0  ;;  %v6090_v42 = vpop.f32.mrf.mxu0  ;;  %6772 = vmatprep.mubr.bf16.mxu0 %v19483_v58  ;;  %v15326_v14 = vld [vmem:[%s22093_s5 + $0x464] ss:$8 sps:$4 sm:$0xff]   ;;  %v15396_v62 = vld [vmem:[%s22093_s5 + $0x4a0] ss:$8 sps:$4 sm:$0xff]  }
 0x390   :  { %v6091_v54 = vadd.f32 %v6090_v42, %v19335_v26  ;;  %v6203_v37 = vpop.f32.mrf.mxu1  ;;  %6773 = vmatmul.mubr.bf16.gmra.mxu0 %v19481_v57 }
 0x391   :  { %v19493_v56 = vpop.f32.mrf.mxu0  ;;  %v19497_v38 = vpack.c.bf16 %v6239_v2, %v6237_v3  ;;  %7540 = vmatprep.mubr.bf16.mxu0 %v19368_v46 }
 0x392   :  { %v6204_v53 = vadd.f32 %v6203_v37, %v6091_v54  ;;  %v19500_v45 = vpop.f32.mrf.mxu1  ;;  %v22352_v54 = vld [vmem:[#allocation13_spill] sm:$0xff] }
 0x393   :  { %v6094_v16 = vpop.f32.mrf.mxu0  ;;  %7175 = vmatprep.mubr.bf16.mxu1 %v19497_v38 }
 0x394   :  { %v6240_v25 = vmax.f32 %v6204_v53, 0.0  ;;  %v6095_v26 = vadd.f32 %v6094_v16, %v19346_v21  ;;  %7176 = vmatmul.mubr.bf16.gmra.mxu1 %v19487_v60  ;;  %v6207_v0 = vpop.f32.mrf.mxu1  ;;  %v6418_v21 = vld [vmem:[%s22094_s6] sm:$0x3] }
 0x395   :  { %7974 = vmatprep.mubr.bf16.mxu1 %v19370_v52  ;;  %v5831_v52 = vadd.f32 %v19214_v15, %v19149_v18  ;;  %v19528_v33 = vrot.slane %v6418_v21, %v22346_v51  ;;  %v19534_v23 = vpop.f32.mrf.mxu0  ;;  %v15324_v15 = vld [vmem:[%s22093_s5 + $0x460] ss:$8 sps:$4 sm:$0xff]   ;;  %v19546_v61 = vrot.slane %v6418_v21, %v22347_v55 }
 0x396   :  { %v19509_v30 = vpack.c.bf16 %v6240_v25, %v6238_v48  ;;  %v19511_v46 = vadd.f32 %v6207_v0, %v6095_v26  ;;  %v19548_v48 = vpop.f32.mrf.mxu1  ;;  %v15327_v53 = vld [vmem:[%s22093_s5 + $0x560] ss:$8 sps:$4 sm:$0xff]  }
 0x397   :  { %v5944_v37 = vadd.f32 %v22352_v54, %v5831_v52  ;;  %v15341_v54 = vld [vmem:[%s22093_s5 + $0x544] ss:$8 sps:$4 sm:$0xff]  }
 0x398   :  { %v6242_v50 = vmax.f32 %v19511_v46, 0.0  ;;  %7541 = vmatmul.mubr.bf16.vlgmr.msra.gmra.mxu0 %v19364_v22  ;;  %v15329_v22 = vld [vmem:[%s22093_s5 + $0x564] ss:$8 sps:$4 sm:$0xff]   ;;  %v15491_v46 = vld [vmem:[%s22095_s7 + $0x31c] ss:$36 sps:$4 sm:$0xff]  }
 0x399   :  { %7550 = vmatprep.mubr.bf16.mxu0 %v19380_v40  ;;  %8378 = vmatpush1.bf16.msra.mxu0 %v15318_v17  ;;  %v6057_v17 = vadd.f32 %v19415_v20, %v5944_v37  ;;  %v15333_v20 = vld [vmem:[%s22093_s5 + $0x550] ss:$8 sps:$4 sm:$0xff]  }
 0x39a   :  { %v19532_v3 = vpack.c.bf16 %v6242_v50, %v6240_v25  ;;  %8379 = vmatprep.subr.bf16.mxu0 %v15326_v14  ;;  %v15330_v25 = vld [vmem:[%s22093_s5 + $0x450] ss:$8 sps:$4 sm:$0xff]   ;;  %v15338_v14 = vld [vmem:[%s22093_s5 + $0x444] ss:$8 sps:$4 sm:$0xff]  }
 0x39b   :  { %v6704_v42 = vpop.f32.mrf.mxu0 }
 0x39c   :  { %7975 = vmatmul.mubr.bf16.vlgmr.msra.gmra.mxu1 %v19372_v12  ;;  %v6705_v16 = vadd.f32 %v6704_v42, %v19528_v33  ;;  %v15335_v12 = vld [vmem:[%s22093_s5 + $0x554] ss:$8 sps:$4 sm:$0xff]   ;;  %v15336_v42 = vld [vmem:[%s22093_s5 + $0x440] ss:$8 sps:$4 sm:$0xff]  }
 0x39d   :  { %7984 = vmatprep.mubr.bf16.mxu1 %v19391_v39  ;;  %8813 = vmatpush1.bf16.msra.mxu1 %v15321_v9  ;;  %v6706_v26 = vpop.f32.mrf.mxu0  ;;  %v7107_v0 = vpop.f32.mrf.mxu1 }
 0x39e   :  { %8380 = vmatpush1.bf16.msra.mxu0 %v15324_v15  ;;  %8814 = vmatprep.subr.bf16.mxu1 %v15329_v22  ;;  %v6707_v21 = vadd.f32 %v6706_v26, %v19546_v61  ;;  %v19568_v52 = vadd.f32 %v7107_v0, %v6705_v16  ;;  %v15344_v16 = vld [vmem:[%s22093_s5 + $0x434] ss:$8 sps:$4 sm:$0xff]  }
 0x39f   :  { %8381 = vmatprep.subr.bf16.mxu0 %v15332_v34  ;;  %v6708_v9 = vpop.f32.mrf.mxu0  ;;  %v7109_v15 = vpop.f32.mrf.mxu1 }
 0x3a0   :  { %7551 = vmatmul.mubr.bf16.gmra.mxu0 %v19382_v59  ;;  %v6709_v22 = vadd.f32 %v6708_v9, %v19528_v33  ;;  %v19576_v34 = vadd.f32 %v7109_v15, %v6707_v21  ;;  %v15348_v21 = vld [vmem:[%s22093_s5 + $0x420] ss:$8 sps:$4 sm:$0xff]   ;;  %v15353_v9 = vld [vmem:[%s22093_s5 + $0x524] ss:$8 sps:$4 sm:$0xff]  }
 0x3a1   :  { %8815 = vmatpush1.bf16.msra.mxu1 %v15327_v53  ;;  %7560 = vmatprep.mubr.bf16.mxu0 %v19400_v5  ;;  %v7111_v37 = vpop.f32.mrf.mxu1  ;;  %v19585_v53 = vadd.f32 %v19417_v19, %v6057_v17  ;;  %v15342_v19 = vld [vmem:[%s22093_s5 + $0x430] ss:$8 sps:$4 sm:$0xff]   ;;  %v15350_v17 = vld [vmem:[%s22093_s5 + $0x424] ss:$8 sps:$4 sm:$0xff]  }
 0x3a2   :  { %8382 = vmatpush1.bf16.msra.mxu0 %v15330_v25  ;;  %8816 = vmatprep.subr.bf16.mxu1 %v15335_v12  ;;  %v19590_v26 = vadd.f32 %v7111_v37, %v6709_v22  ;;  %v15339_v25 = vld [vmem:[%s22093_s5 + $0x540] ss:$8 sps:$4 sm:$0xff]   ;;  %v15347_v12 = vld [vmem:[%s22093_s5 + $0x534] ss:$8 sps:$4 sm:$0xff]  }
 0x3a3   :  { %8383 = vmatprep.subr.bf16.mxu0 %v15338_v14  ;;  %v6227_v0 = vmax.f32 %v19585_v53, 0.0  ;;  %v15345_v14 = vld [vmem:[%s22093_s5 + $0x530] ss:$8 sps:$4 sm:$0xff]   ;;  %v15351_v22 = vld [vmem:[%s22093_s5 + $0x520] ss:$8 sps:$4 sm:$0xff]  }
 0x3a4   :  { %7985 = vmatmul.mubr.bf16.gmra.mxu1 %v19384_v44  ;;  %v15360_v37 = vld [vmem:[%s22093_s5 + $0x400] ss:$8 sps:$4 sm:$0xff]   ;;  %v15441_v53 = vld [vmem:[%s22095_s7 + $0xd8] ss:$36 sps:$4 sm:$0xff]  }
 0x3a5   :  { %7994 = vmatprep.mubr.bf16.mxu1 %v19408_v28  ;;  %8817 = vmatpush1.bf16.msra.mxu1 %v15333_v20  ;;  %v19622_v15 = vpack.c.bf16 %v6227_v0, %v6225_v4  ;;  %v15356_v20 = vld [vmem:[%s22093_s5 + $0x414] ss:$8 sps:$4 sm:$0xff]  }
 0x3a6   :  { %8384 = vmatpush1.bf16.msra.mxu0 %v15336_v42  ;;  %8818 = vmatprep.subr.bf16.mxu1 %v15341_v54  ;;  %v15359_v4 = vld [vmem:[%s22093_s5 + $0x514] ss:$8 sps:$4 sm:$0xff]   ;;  %v15362_v42 = vld [vmem:[%s22093_s5 + $0x404] ss:$8 sps:$4 sm:$0xff]   ;;  %v15357_v54 = vld [vmem:[%s22093_s5 + $0x510] ss:$8 sps:$4 sm:$0xff]  }
 0x3a7   :  { %8385 = vmatprep.subr.bf16.mxu0 %v15344_v16  ;;  %v15365_v16 = vld [vmem:[%s22093_s5 + $0x504] ss:$8 sps:$4 sm:$0xff]  }
 0x3a8   :  { %7561 = vmatmul.mubr.bf16.gmra.mxu0 %v19398_v35 }
 0x3a9   :  { %8819 = vmatpush1.bf16.msra.mxu1 %v15339_v25  ;;  %7570 = vmatprep.mubr.bf16.mxu0 %v19428_v43  ;;  %v15368_v25 = vld [vmem:[%s22093_s5 + $0x4f4] ss:$8 sps:$4 sm:$0xff]  }
 0x3aa   :  { %8386 = vmatpush1.bf16.msra.mxu0 %v15342_v19  ;;  %8820 = vmatprep.subr.bf16.mxu1 %v15347_v12  ;;  %v15366_v19 = vld [vmem:[%s22093_s5 + $0x4f0] ss:$8 sps:$4 sm:$0xff]   ;;  %v15371_v12 = vld [vmem:[%s22093_s5 + $0x5f4] ss:$8 sps:$4 sm:$0xff]  }
 0x3ab   :  { %8387 = vmatprep.subr.bf16.mxu0 %v15350_v17  ;;  %v22353_v17 = vld [vmem:[#allocation38_spill] sm:$0xff] }
 0x3ac   :  { %7995 = vmatmul.mubr.bf16.gmra.mxu1 %v19402_v29 }
 0x3ad   :  { %8004 = vmatprep.mubr.bf16.mxu1 %v19622_v15  ;;  %8821 = vmatpush1.bf16.msra.mxu1 %v15345_v14  ;;  %v5871_v14 = vadd.f32 %v22353_v17, %v19149_v18  ;;  %v15395_v17 = vld [vmem:[%s22093_s5 + $0x5b4] ss:$8 sps:$4 sm:$0xff]  }
 0x3ae   :  { %8388 = vmatpush1.bf16.msra.mxu0 %v15348_v21  ;;  %8822 = vmatprep.subr.bf16.mxu1 %v15353_v9  ;;  %v15369_v21 = vld [vmem:[%s22093_s5 + $0x5f0] ss:$8 sps:$4 sm:$0xff]   ;;  %v15372_v9 = vld [vmem:[%s22093_s5 + $0x4e0] ss:$8 sps:$4 sm:$0xff]  }
 0x3af   :  { %8389 = vmatprep.subr.bf16.mxu0 %v15356_v20  ;;  %v22354_v20 = vld [vmem:[#allocation37_spill] sm:$0xff] }
 0x3b0   :  { %7571 = vmatmul.mubr.bf16.gmra.mxu0 %v19420_v7  ;;  %v6093_v18 = vadd.f32 %v19493_v56, %v22354_v20  ;;  %v15378_v56 = vld [vmem:[%s22093_s5 + $0x4d0] ss:$8 sps:$4 sm:$0xff]  }
 0x3b1   :  { %8823 = vmatpush1.bf16.msra.mxu1 %v15351_v22  ;;  %7580 = vmatprep.mubr.bf16.mxu0 %v19449_v63  ;;  %v15363_v63 = vld [vmem:[%s22093_s5 + $0x500] ss:$8 sps:$4 sm:$0xff]   ;;  %v15380_v22 = vld [vmem:[%s22093_s5 + $0x4d4] ss:$8 sps:$4 sm:$0xff]  }
 0x3b2   :  { %8390 = vmatpush1.bf16.msra.mxu0 %v15354_v8  ;;  %8824 = vmatprep.subr.bf16.mxu1 %v15359_v4  ;;  %v22355_v8 = vld [vmem:[#allocation29_spill] sm:$0xff] }
 0x3b3   :  { %8391 = vmatprep.subr.bf16.mxu0 %v15362_v42  ;;  %v5984_v4 = vadd.f32 %v22355_v8, %v5871_v14  ;;  %v15375_v42 = vld [vmem:[%s22093_s5 + $0x5e0] ss:$8 sps:$4 sm:$0xff]   ;;  %v15402_v8 = vld [vmem:[%s22093_s5 + $0x490] ss:$8 sps:$4 sm:$0xff]  }
 0x3b4   :  { %8005 = vmatmul.mubr.bf16.gmra.mxu1 %v19436_v32 }
 0x3b5   :  { %8014 = vmatprep.mubr.bf16.mxu1 %v19455_v27  ;;  %8825 = vmatpush1.bf16.msra.mxu1 %v15357_v54  ;;  %v15374_v27 = vld [vmem:[%s22093_s5 + $0x4e4] ss:$8 sps:$4 sm:$0xff]   ;;  %v15383_v54 = vld [vmem:[%s22093_s5 + $0x5d4] ss:$8 sps:$4 sm:$0xff]  }
 0x3b6   :  { %8392 = vmatpush1.bf16.msra.mxu0 %v15360_v37  ;;  %8826 = vmatprep.subr.bf16.mxu1 %v15365_v16  ;;  %v6097_v37 = vadd.f32 %v19534_v23, %v5984_v4  ;;  %v15386_v16 = vld [vmem:[%s22093_s5 + $0x4c4] ss:$8 sps:$4 sm:$0xff]   ;;  %v15407_v4 = vld [vmem:[%s22093_s5 + $0x594] ss:$8 sps:$4 sm:$0xff]  }
 0x3b7   :  { %8393 = vmatprep.subr.bf16.mxu0 %v15368_v25  ;;  %v15381_v25 = vld [vmem:[%s22093_s5 + $0x5d0] ss:$8 sps:$4 sm:$0xff]   ;;  %v15389_v23 = vld [vmem:[%s22093_s5 + $0x5c4] ss:$8 sps:$4 sm:$0xff]  }
 0x3b8   :  { %7581 = vmatmul.mubr.bf16.gmra.mxu0 %v19444_v11  ;;  %v15377_v11 = vld [vmem:[%s22093_s5 + $0x5e4] ss:$8 sps:$4 sm:$0xff]  }
 0x3b9   :  { %8827 = vmatpush1.bf16.msra.mxu1 %v15363_v63  ;;  %7590 = vmatprep.mubr.bf16.mxu0 %v19465_v47 }
 0x3ba   :  { %8394 = vmatpush2.bf16.msra.mxu0 %v15366_v19  ;;  %8828 = vmatprep.subr.bf16.mxu1 %v15371_v12  ;;  %v19716_v19 = vadd.f32 %v19548_v48, %v6097_v37  ;;  %v15392_v12 = vld [vmem:[%s22093_s5 + $0x4b4] ss:$8 sps:$4 sm:$0xff]   ;;  %v15390_v48 = vld [vmem:[%s22093_s5 + $0x4b0] ss:$8 sps:$4 sm:$0xff]  }
 0x3bb   :  { %8395 = vmatprep.subr.bf16.mxu0 %v15374_v27  ;;  %v15387_v27 = vld [vmem:[%s22093_s5 + $0x5c0] ss:$8 sps:$4 sm:$0xff]   ;;  %v15416_v37 = vld [vmem:[%s22093_s5 + $0x674] ss:$8 sps:$4 sm:$0xff]  }
 0x3bc   :  { %8015 = vmatmul.mubr.bf16.gmra.mxu1 %v19446_v41  ;;  %v6206_v41 = vadd.f32 %v19500_v45, %v6093_v18  ;;  %v15384_v45 = vld [vmem:[%s22093_s5 + $0x4c0] ss:$8 sps:$4 sm:$0xff]   ;;  %v15404_v18 = vld [vmem:[%s22093_s5 + $0x494] ss:$8 sps:$4 sm:$0xff]  }
 0x3bd   :  { %8024 = vmatprep.mubr.bf16.mxu1 %v19475_v49  ;;  %8829 = vmatpush2.bf16.msra.mxu1 %v15369_v21  ;;  %v6243_v21 = vmax.f32 %v19716_v19, 0.0  ;;  %v15489_v19 = vld [vmem:[%s22095_s7 + $0x318] ss:$36 sps:$4 sm:$0xff]  }
 0x3be   :  { %8396 = vmatpush2.bf16.msra.mxu0 %v15372_v9  ;;  %8830 = vmatprep.subr.bf16.mxu1 %v15377_v11  ;;  %v6241_v63 = vmax.f32 %v6206_v41, 0.0  ;;  %v15398_v9 = vld [vmem:[%s22093_s5 + $0x4a4] ss:$8 sps:$4 sm:$0xff]   ;;  %v15393_v11 = vld [vmem:[%s22093_s5 + $0x5b0] ss:$8 sps:$4 sm:$0xff]  }
 0x3bf   :  { %8397 = vmatprep.subr.bf16.mxu0 %v15380_v22  ;;  %v15399_v22 = vld [vmem:[%s22093_s5 + $0x5a0] ss:$8 sps:$4 sm:$0xff]   ;;  %v15413_v41 = vld [vmem:[%s22093_s5 + $0x584] ss:$8 sps:$4 sm:$0xff]  }
 0x3c0   :  { %7591 = vmatmul.mubr.bf16.gmra.mxu0 %v19463_v24  ;;  %v19734_v14 = vpack.c.bf16 %v6241_v63, %v6239_v2  ;;  %v15401_v2 = vld [vmem:[%s22093_s5 + $0x5a4] ss:$8 sps:$4 sm:$0xff]   ;;  %v19753_v20 = vpack.c.bf16 %v6243_v21, %v6241_v63  ;;  %v15425_v63 = vld [vmem:[%s22095_s7 + $0x1b4] ss:$36 sps:$4 sm:$0xff]  }
 0x3c1   :  { %8831 = vmatpush2.bf16.msra.mxu1 %v15375_v42  ;;  %7600 = vmatprep.mubr.bf16.mxu0 %v19483_v58  ;;  %v15410_v42 = vld [vmem:[%s22093_s5 + $0x484] ss:$8 sps:$4 sm:$0xff]  }
 0x3c2   :  { %8398 = vmatpush2.bf16.msra.mxu0 %v15378_v56  ;;  %8832 = vmatprep.subr.bf16.mxu1 %v15383_v54  ;;  %v15405_v56 = vld [vmem:[%s22093_s5 + $0x590] ss:$8 sps:$4 sm:$0xff]   ;;  %v15408_v54 = vld [vmem:[%s22093_s5 + $0x480] ss:$8 sps:$4 sm:$0xff]  }
 0x3c3   :  { %8399 = vmatprep.subr.bf16.mxu0 %v15386_v16  ;;  %v15414_v16 = vld [vmem:[%s22093_s5 + $0x670] ss:$8 sps:$4 sm:$0xff]  }
 0x3c4   :  { %8025 = vmatmul.mubr.bf16.gmra.mxu1 %v19469_v10 }
 0x3c5   :  { %8034 = vmatprep.mubr.bf16.mxu1 %v19497_v38  ;;  %8833 = vmatpush2.bf16.msra.mxu1 %v15381_v25  ;;  %v15419_v25 = vld [vmem:[%s22095_s7 + $0x1fc] ss:$36 sps:$4 sm:$0xff]  }
 0x3c6   :  { %8400 = vmatpush2.bf16.msra.mxu0 %v15384_v45  ;;  %8834 = vmatprep.subr.bf16.mxu1 %v15389_v23  ;;  %v15422_v45 = vld [vmem:[%s22093_s5 + $0x664] ss:$8 sps:$4 sm:$0xff]   ;;  %v15420_v23 = vld [vmem:[%s22093_s5 + $0x660] ss:$8 sps:$4 sm:$0xff]  }
 0x3c7   :  { %8401 = vmatprep.subr.bf16.mxu0 %v15392_v12  ;;  %v15423_v12 = vld [vmem:[%s22095_s7 + $0x1b0] ss:$36 sps:$4 sm:$0xff]  }
 0x3c8   :  { %7601 = vmatmul.mubr.bf16.gmra.mxu0 %v19481_v57 }
 0x3c9   :  { %8835 = vmatpush2.bf16.msra.mxu1 %v15387_v27  ;;  %7610 = vmatprep.mubr.bf16.mxu0 %v19734_v14  ;;  %v15426_v27 = vld [vmem:[%s22093_s5 + $0x650] ss:$8 sps:$4 sm:$0xff]  }
 0x3ca   :  { %8402 = vmatpush2.bf16.msra.mxu0 %v15390_v48  ;;  %8836 = vmatprep.subr.bf16.mxu1 %v15395_v17  ;;  %v15431_v48 = vld [vmem:[%s22095_s7 + $0x16c] ss:$36 sps:$4 sm:$0xff]   ;;  %v15432_v17 = vld [vmem:[%s22093_s5 + $0x640] ss:$8 sps:$4 sm:$0xff]  }
 0x3cb   :  { %8403 = vmatprep.subr.bf16.mxu0 %v15398_v9  ;;  %v15437_v9 = vld [vmem:[%s22095_s7 + $0x124] ss:$36 sps:$4 sm:$0xff]  }
 0x3cc   :  { %8035 = vmatmul.mubr.bf16.gmra.mxu1 %v19487_v60 }
 0x3cd   :  { %8044 = vmatprep.mubr.bf16.mxu1 %v19753_v20  ;;  %8837 = vmatpush2.bf16.msra.mxu1 %v15393_v11  ;;  %v15440_v11 = vld [vmem:[%s22093_s5 + $0x634] ss:$8 sps:$4 sm:$0xff]  }
 0x3ce   :  { %8404 = vmatpush2.bf16.msra.mxu0 %v15396_v62  ;;  %8838 = vmatprep.subr.bf16.mxu1 %v15401_v2  ;;  %v14136_v62 = vpack.c.bf16 %v6227_v0, %v6226_v31  ;;  %v15435_v2 = vld [vmem:[%s22095_s7 + $0x120] ss:$36 sps:$4 sm:$0xff]  }
 0x3cf   :  { %8405 = vmatprep.subr.bf16.mxu0 %v15404_v18  ;;  %v15438_v18 = vld [vmem:[%s22093_s5 + $0x630] ss:$8 sps:$4 sm:$0xff]   ;;  %v15444_v0 = vld [vmem:[%s22093_s5 + $0x620] ss:$8 sps:$4 sm:$0xff]  }
 0x3d0   :  { %7611 = vmatmul.mubr.bf16.gmra.mxu0 %v19509_v30  ;;  %v19861_v31 = vcombine.high %v14136_v62, %v22303_v1 }
 0x3d1   :  { %8839 = vmatpush2.bf16.msra.mxu1 %v15399_v22  ;;  %8409 = vmatprep.mubr.bf16.mxu0 %v19380_v40  ;;  %v15411_v40 = vld [vmem:[%s22093_s5 + $0x580] ss:$8 sps:$4 sm:$0xff]   ;;  %v15452_v22 = vld [vmem:[%s22093_s5 + $0x614] ss:$8 sps:$4 sm:$0xff]  }
 0x3d2   :  { %8406 = vmatpush2.bf16.msra.mxu0 %v15402_v8  ;;  %8840 = vmatprep.subr.bf16.mxu1 %v15407_v4  ;;  %v15447_v8 = vld [vmem:[%s22095_s7 + $0x90] ss:$36 sps:$4 sm:$0xff]  }
 0x3d3   :  { %8407 = vmatprep.subr.bf16.mxu0 %v15410_v42  ;;  %v15450_v4 = vld [vmem:[%s22093_s5 + $0x610] ss:$8 sps:$4 sm:$0xff]   ;;  %v19886_v42 = vcombine.low %v14136_v62, %v22303_v1 }
 0x3d4   :  { %8045 = vmatmul.mubr.bf16.gmra.mxu1 %v19532_v3  ;;  %v15495_v62 = vld [vmem:[%s22095_s7 + $0x2d0] ss:$36 sps:$4 sm:$0xff]  }
 0x3d5   :  { %8841 = vmatpush2.bf16.msra.mxu1 %v15405_v56  ;;  %8844 = vmatprep.mubr.bf16.mxu1 %v19391_v39  ;;  %v15417_v39 = vld [vmem:[%s22095_s7 + $0x1f8] ss:$36 sps:$4 sm:$0xff]   ;;  %v15458_v56 = vld [vmem:[%s22093_s5 + $0x604] ss:$8 sps:$4 sm:$0xff]  }
 0x3d6   :  { %8408 = vmatpush2.bf16.msra.mxu0 %v15408_v54  ;;  %8842 = vmatprep.subr.bf16.mxu1 %v15413_v41  ;;  %v15453_v54 = vld [vmem:[%s22095_s7 + $0x48] ss:$36 sps:$4 sm:$0xff]  }
 0x3d7   :  { %9247 = vmatprep.subr.bf16.mxu0 %v15416_v37  ;;  %v15456_v41 = vld [vmem:[%s22093_s5 + $0x600] ss:$8 sps:$4 sm:$0xff]  }
 0x3d8   :  { %v15461_v37 = vld [vmem:[%s22095_s7 + $0x4] ss:$36 sps:$4 sm:$0xff]  }
 0x3d9   :  { %8843 = vmatpush2.bf16.msra.mxu1 %v15411_v40  ;;  %8410 = vmatmul.mubr.bf16.vlgmr.msra.gmra.mxu0 %v19382_v59  ;;  %v15428_v59 = vld [vmem:[%s22093_s5 + $0x654] ss:$8 sps:$4 sm:$0xff]  }
 0x3da   :  { %8419 = vmatprep.mubr.bf16.mxu0 %v19400_v5  ;;  %9248 = vmatpush1.bf16.msra.mxu0 %v15414_v16  ;;  %v15464_v40 = vld [vmem:[%s22093_s5 + $0x6f4] ss:$8 sps:$4 sm:$0xff]   ;;  %v15462_v16 = vld [vmem:[%s22093_s5 + $0x6f0] ss:$8 sps:$4 sm:$0xff]  }
 0x3db   :  { %11281 = vmatprep.subr.bf16.mxu1 %v15419_v25  ;;  %9249 = vmatprep.subr.bf16.mxu0 %v15422_v45  ;;  %v15467_v25 = vld [vmem:[%s22095_s7 + $0x43c] ss:$36 sps:$4 sm:$0xff]  }
 0x3dc   :  { %8845 = vmatmul.mubr.bf16.vlgmr.msra.gmra.mxu1 %v19384_v44  ;;  %v15434_v44 = vld [vmem:[%s22093_s5 + $0x644] ss:$8 sps:$4 sm:$0xff]   ;;  %v15465_v45 = vld [vmem:[%s22095_s7 + $0x438] ss:$36 sps:$4 sm:$0xff]  }
 0x3dd   :  { %8854 = vmatprep.mubr.bf16.mxu1 %v19408_v28  ;;  %11282 = vmatpush1.bf16.msra.mxu1 %v15417_v39  ;;  %v15429_v28 = vld [vmem:[%s22095_s7 + $0x168] ss:$36 sps:$4 sm:$0xff]  }
 0x3de   :  { %9250 = vmatpush1.bf16.msra.mxu0 %v15420_v23  ;;  %11283 = vmatprep.subr.bf16.mxu1 %v15425_v63  ;;  %v15468_v39 = vld [vmem:[%s22093_s5 + $0x6e0] ss:$8 sps:$4 sm:$0xff]   ;;  %v15473_v23 = vld [vmem:[%s22095_s7 + $0x3f4] ss:$36 sps:$4 sm:$0xff]  }
 0x3df   :  { %9251 = vmatprep.subr.bf16.mxu0 %v15428_v59  ;;  %v15471_v63 = vld [vmem:[%s22095_s7 + $0x3f0] ss:$36 sps:$4 sm:$0xff]  }
 0x3e0   :  { %v15474_v59 = vld [vmem:[%s22093_s5 + $0x6d0] ss:$8 sps:$4 sm:$0xff]  }
 0x3e1   :  { %11284 = vmatpush1.bf16.msra.mxu1 %v15423_v12  ;;  %8420 = vmatmul.mubr.bf16.gmra.mxu0 %v19398_v35  ;;  %v15479_v12 = vld [vmem:[%s22095_s7 + $0x3ac] ss:$36 sps:$4 sm:$0xff]  }
 0x3e2   :  { %8429 = vmatprep.mubr.bf16.mxu0 %v19428_v43  ;;  %9252 = vmatpush1.bf16.msra.mxu0 %v15426_v27  ;;  %v15480_v27 = vld [vmem:[%s22093_s5 + $0x6c0] ss:$8 sps:$4 sm:$0xff]  }
 0x3e3   :  { %11285 = vmatprep.subr.bf16.mxu1 %v15431_v48  ;;  %9253 = vmatprep.subr.bf16.mxu0 %v15434_v44  ;;  %v15485_v48 = vld [vmem:[%s22095_s7 + $0x364] ss:$36 sps:$4 sm:$0xff]   ;;  %v15488_v44 = vld [vmem:[%s22093_s5 + $0x6b4] ss:$8 sps:$4 sm:$0xff]  }
 0x3e4   :  { %8855 = vmatmul.mubr.bf16.gmra.mxu1 %v19402_v29  ;;  %v15446_v29 = vld [vmem:[%s22093_s5 + $0x624] ss:$8 sps:$4 sm:$0xff]  }
 0x3e5   :  { %8864 = vmatprep.mubr.bf16.mxu1 %v19622_v15  ;;  %11286 = vmatpush1.bf16.msra.mxu1 %v15429_v28  ;;  %v15449_v15 = vld [vmem:[%s22095_s7 + $0x94] ss:$36 sps:$4 sm:$0xff]   ;;  %v14144_v28 = vpack.c.bf16 %v6243_v21, %v6242_v50  ;;  %v15492_v21 = vld [vmem:[%s22093_s5 + $0x6a0] ss:$8 sps:$4 sm:$0xff]  }
 0x3e6   :  { %9254 = vmatpush1.bf16.msra.mxu0 %v15432_v17  ;;  %11287 = vmatprep.subr.bf16.mxu1 %v15437_v9  ;;  %v15483_v17 = vld [vmem:[%s22095_s7 + $0x360] ss:$36 sps:$4 sm:$0xff]   ;;  %v15486_v9 = vld [vmem:[%s22093_s5 + $0x6b0] ss:$8 sps:$4 sm:$0xff]  }
 0x3e7   :  { %9255 = vmatprep.subr.bf16.mxu0 %v15440_v11  ;;  %v19983_v50 = vcombine.high %v14144_v28, %v22303_v1  ;;  %v15500_v11 = vld [vmem:[%s22093_s5 + $0x694] ss:$8 sps:$4 sm:$0xff]  }
 0x3e9   :  { %11288 = vmatpush1.bf16.msra.mxu1 %v15435_v2  ;;  %8430 = vmatmul.mubr.bf16.gmra.mxu0 %v19420_v7  ;;  %v15498_v2 = vld [vmem:[%s22093_s5 + $0x690] ss:$8 sps:$4 sm:$0xff]  }
 0x3ea   :  { %8439 = vmatprep.mubr.bf16.mxu0 %v19861_v31  ;;  %9256 = vmatpush1.bf16.msra.mxu0 %v15438_v18  ;;  %v20008_v18 = vcombine.low %v14144_v28, %v22303_v1  ;;  %v15504_v1 = vld [vmem:[%s22093_s5 + $0x680] ss:$8 sps:$4 sm:$0xff]  }
 0x3eb   :  { %11289 = vmatprep.subr.bf16.mxu1 %v15443_v36  ;;  %9257 = vmatprep.subr.bf16.mxu0 %v15446_v29  ;;  %v15506_v36 = vld [vmem:[%s22093_s5 + $0x684] ss:$8 sps:$4 sm:$0xff]  }
 0x3ec   :  { %8865 = vmatmul.mubr.bf16.gmra.mxu1 %v19436_v32  ;;  %v15455_v32 = vld [vmem:[%s22095_s7 + $0x4c] ss:$36 sps:$4 sm:$0xff]  }
 0x3ed   :  { %11290 = vmatpush1.bf16.msra.mxu1 %v15441_v53  ;;  %8874 = vmatprep.mubr.bf16.mxu1 %v19002_v6  ;;  %v15501_v29 = vld [vmem:[%s22095_s7 + $0x288] ss:$36 sps:$4 sm:$0xff]  }
 0x3ee   :  { %9258 = vmatpush1.bf16.msra.mxu0 %v15444_v0  ;;  %11291 = vmatprep.subr.bf16.mxu1 %v15449_v15  ;;  %v15509_v53 = vld [vmem:[%s22095_s7 + $0x244] ss:$36 sps:$4 sm:$0xff]   ;;  %v20027_v0 = vpop.f32.mrf.mxu0  ;;  %v20030_v15 = vpop.f32.mrf.mxu1 }
 0x3ef   :  { %9259 = vmatprep.subr.bf16.mxu0 %v15452_v22  ;;  %22356 = vst [vmem:[#allocation43_spill] sm:$0xff] %v20027_v0  ;;  %22357 = vst [vmem:[#allocation22_spill] sm:$0xff] %v20030_v15  ;;  %v22358_v22 = vld [vmem:[#allocation15_spill] sm:$0xff]  ;;  %v15558_v15 = vld [vmem:[%s22095_s7 + $0x208] ss:$36 sps:$4 sm:$0xff]  }
 0x3f1   :  { %11292 = vmatpush1.bf16.msra.mxu1 %v15447_v8  ;;  %8440 = vmatmul.mubr.bf16.gmra.mxu0 %v19886_v42 }
 0x3f2   :  { %8449 = vmatprep.mubr.bf16.mxu0 %v19465_v47  ;;  %9260 = vmatpush1.bf16.msra.mxu0 %v15450_v4  ;;  %v15459_v47 = vld [vmem:[%s22095_s7] ss:$36 sps:$4 sm:$0xff]  }
 0x3f3   :  { %11293 = vmatprep.subr.bf16.mxu1 %v15455_v32  ;;  %9261 = vmatprep.subr.bf16.mxu0 %v15458_v56  ;;  %v15512_v4 = vld [vmem:[%s22095_s7 + $0x204] ss:$36 sps:$4 sm:$0xff]  }
 0x3f4   :  { %8875 = vmatmul.mubr.bf16.gmra.mxu1 %v19037_v13 }
 0x3f5   :  { %8884 = vmatprep.mubr.bf16.mxu1 %v19475_v49  ;;  %11294 = vmatpush1.bf16.msra.mxu1 %v15453_v54  ;;  %v15470_v49 = vld [vmem:[%s22093_s5 + $0x6e4] ss:$8 sps:$4 sm:$0xff]  }
 0x3f6   :  { %9262 = vmatpush1.bf16.msra.mxu0 %v15456_v41  ;;  %11295 = vmatprep.subr.bf16.mxu1 %v15461_v37 }
 0x3f7   :  { %9263 = vmatprep.subr.bf16.mxu0 %v15464_v40 }
 0x3f9   :  { %11296 = vmatpush1.bf16.msra.mxu1 %v15459_v47  ;;  %8450 = vmatmul.mubr.bf16.gmra.mxu0 %v19463_v24  ;;  %v15476_v24 = vld [vmem:[%s22093_s5 + $0x6d4] ss:$8 sps:$4 sm:$0xff]   ;;  %v15510_v47 = vld [vmem:[%s22095_s7 + $0x200] ss:$36 sps:$4 sm:$0xff]  }
 0x3fa   :  { %8459 = vmatprep.mubr.bf16.mxu0 %v19483_v58  ;;  %9264 = vmatpush2.bf16.msra.mxu0 %v15462_v16 }
 0x3fb   :  { %11297 = vmatprep.subr.bf16.mxu1 %v15467_v25  ;;  %9265 = vmatprep.subr.bf16.mxu0 %v15470_v49  ;;  %v15515_v25 = vld [vmem:[%s22095_s7 + $0x1bc] ss:$36 sps:$4 sm:$0xff]  }
 0x3fc   :  { %8885 = vmatmul.mubr.bf16.gmra.mxu1 %v19469_v10  ;;  %v15482_v10 = vld [vmem:[%s22093_s5 + $0x6c4] ss:$8 sps:$4 sm:$0xff]   ;;  %v6714_v8 = vpop.f32.mrf.mxu0 }
 0x3fd   :  { %8894 = vmatprep.mubr.bf16.mxu1 %v19497_v38  ;;  %11298 = vmatpush2.bf16.msra.mxu1 %v15465_v45  ;;  %v15477_v38 = vld [vmem:[%s22095_s7 + $0x3a8] ss:$36 sps:$4 sm:$0xff]   ;;  %v6715_v32 = vadd.f32 %v6714_v8, %v19528_v33 }
 0x3fe   :  { %9266 = vmatpush2.bf16.msra.mxu0 %v15468_v39  ;;  %11299 = vmatprep.subr.bf16.mxu1 %v15473_v23  ;;  %v7117_v56 = vpop.f32.mrf.mxu1  ;;  %v6716_v54 = vpop.f32.mrf.mxu0 }
 0x3ff   :  { %9267 = vmatprep.subr.bf16.mxu0 %v15476_v24  ;;  %v6717_v41 = vadd.f32 %v6716_v54, %v19546_v61  ;;  %v20041_v37 = vadd.f32 %v7117_v56, %v6715_v32  ;;  %v22359_v24 = vld [vmem:[#allocation18_spill] sm:$0xff]  ;;  %v15522_v32 = vld [vmem:[%s22095_s7 + $0xe0] ss:$36 sps:$4 sm:$0xff]  }
 0x400   :  { %v7119_v40 = vpop.f32.mrf.mxu1  ;;  %v6718_v16 = vpop.f32.mrf.mxu0  ;;  %v15615_v54 = vld [vmem:[%s22095_s7 + $0x678] ss:$36 sps:$4 sm:$0xff]  }
 0x401   :  { %11300 = vmatpush2.bf16.msra.mxu1 %v15471_v63  ;;  %8460 = vmatmul.mubr.bf16.gmra.mxu0 %v19481_v57  ;;  %v6719_v49 = vadd.f32 %v6718_v16, %v19528_v33  ;;  %v20052_v45 = vadd.f32 %v7119_v40, %v6717_v41  ;;  %v15617_v41 = vld [vmem:[%s22095_s7 + $0x67c] ss:$36 sps:$4 sm:$0xff]  }
 0x402   :  { %8469 = vmatprep.mubr.bf16.mxu0 %v19734_v14  ;;  %9268 = vmatpush2.bf16.msra.mxu0 %v15474_v59  ;;  %v7121_v39 = vpop.f32.mrf.mxu1  ;;  %v6720_v23 = vpop.f32.mrf.mxu0  ;;  %v15527_v40 = vld [vmem:[%s22095_s7 + $0x9c] ss:$36 sps:$4 sm:$0xff]  }
 0x403   :  { %11301 = vmatprep.subr.bf16.mxu1 %v15479_v12  ;;  %9269 = vmatprep.subr.bf16.mxu0 %v15482_v10  ;;  %v20056_v63 = vadd.f32 %v7121_v39, %v6719_v49  ;;  %v22360_v12 = vld [vmem:[#allocation12_spill] sm:$0xff] }
 0x404   :  { %8895 = vmatmul.mubr.bf16.gmra.mxu1 %v19487_v60  ;;  %v15494_v60 = vld [vmem:[%s22093_s5 + $0x6a4] ss:$8 sps:$4 sm:$0xff]   ;;  %v7123_v59 = vpop.f32.mrf.mxu1 }
 0x405   :  { %8904 = vmatprep.mubr.bf16.mxu1 %v19753_v20  ;;  %11302 = vmatpush2.bf16.msra.mxu1 %v15477_v38  ;;  %v15497_v20 = vld [vmem:[%s22095_s7 + $0x2d4] ss:$36 sps:$4 sm:$0xff]  }
 0x406   :  { %9270 = vmatpush2.bf16.msra.mxu0 %v15480_v27  ;;  %11303 = vmatprep.subr.bf16.mxu1 %v15485_v48  ;;  %v15518_v38 = vld [vmem:[%s22095_s7 + $0x174] ss:$36 sps:$4 sm:$0xff]  }
 0x407   :  { %9271 = vmatprep.subr.bf16.mxu0 %v15488_v44  ;;  %v6724_v10 = vpop.f32.mrf.mxu0 }
 0x408   :  { %v6725_v27 = vadd.f32 %v6724_v10, %v19528_v33  ;;  %v15621_v10 = vld [vmem:[%s22095_s7 + $0x630] ss:$36 sps:$4 sm:$0xff]  }
 0x409   :  { %11304 = vmatpush2.bf16.msra.mxu1 %v15483_v17  ;;  %8470 = vmatmul.mubr.bf16.gmra.mxu0 %v19509_v30  ;;  %v6726_v44 = vpop.f32.mrf.mxu0 }
 0x40a   :  { %8479 = vmatprep.mubr.bf16.mxu0 %v19983_v50  ;;  %9272 = vmatpush2.bf16.msra.mxu0 %v15486_v9  ;;  %v6727_v28 = vadd.f32 %v6726_v44, %v19546_v61  ;;  %v15516_v9 = vld [vmem:[%s22095_s7 + $0x170] ss:$36 sps:$4 sm:$0xff]  }
 0x40b   :  { %11305 = vmatprep.subr.bf16.mxu1 %v15491_v46  ;;  %9273 = vmatprep.subr.bf16.mxu0 %v15494_v60  ;;  %v7127_v17 = vpop.f32.mrf.mxu1  ;;  %v6728_v60 = vpop.f32.mrf.mxu0 }
 0x40c   :  { %8905 = vmatmul.mubr.bf16.gmra.mxu1 %v19532_v3  ;;  %v15503_v3 = vld [vmem:[%s22095_s7 + $0x28c] ss:$36 sps:$4 sm:$0xff]   ;;  %v20073_v46 = vadd.f32 %v7127_v17, %v6725_v27  ;;  %v15530_v27 = vld [vmem:[%s22095_s7 + $0x54] ss:$36 sps:$4 sm:$0xff]  }
 0x40d   :  { %11306 = vmatpush2.bf16.msra.mxu1 %v15489_v19  ;;  %8914 = vmatprep.mubr.bf16.mxu1 %v19002_v6  ;;  %v15521_v19 = vld [vmem:[%s22095_s7 + $0x12c] ss:$36 sps:$4 sm:$0xff]  }
 0x40e   :  { %9274 = vmatpush2.bf16.msra.mxu0 %v15492_v21  ;;  %11307 = vmatprep.subr.bf16.mxu1 %v15497_v20  ;;  %v6729_v21 = vadd.f32 %v6728_v60, %v19528_v33  ;;  %v7129_v20 = vpop.f32.mrf.mxu1 }
 0x40f   :  { %9275 = vmatprep.subr.bf16.mxu0 %v15500_v11  ;;  %v20080_v11 = vadd.f32 %v7129_v20, %v6727_v28 }
 0x411   :  { %11308 = vmatpush2.bf16.msra.mxu1 %v15495_v62  ;;  %8480 = vmatmul.mubr.bf16.gmra.mxu0 %v20008_v18  ;;  %v22361_v62 = vld [vmem:[#allocation24_spill] sm:$0xff] }
 0x412   :  { %9276 = vmatpush2.bf16.msra.mxu0 %v15498_v2  ;;  %9279 = vmatprep.mubr.bf16.mxu0 %v19400_v5  ;;  %v15507_v5 = vld [vmem:[%s22095_s7 + $0x240] ss:$36 sps:$4 sm:$0xff]  }
 0x413   :  { %11309 = vmatprep.subr.bf16.mxu1 %v15503_v3  ;;  %9277 = vmatprep.subr.bf16.mxu0 %v15506_v36  ;;  %v7131_v3 = vpop.f32.mrf.mxu1  ;;  %v22362_v36 = vld [vmem:[#allocation42_spill] sm:$0xff] }
 0x414   :  { %8915 = vmatmul.mubr.bf16.gmra.mxu1 %v19037_v13 }
 0x415   :  { %11310 = vmatpush2.bf16.msra.mxu1 %v15501_v29  ;;  %11313 = vmatprep.mubr.bf16.mxu1 %v22358_v22  ;;  %v20088_v29 = vadd.f32 %v7131_v3, %v6729_v21  ;;  %v15528_v21 = vld [vmem:[%s22095_s7 + $0x50] ss:$36 sps:$4 sm:$0xff]  }
 0x416   :  { %9278 = vmatpush2.bf16.msra.mxu0 %v15504_v1  ;;  %11311 = vmatprep.subr.bf16.mxu1 %v15509_v53  ;;  %v15524_v1 = vld [vmem:[%s22095_s7 + $0xe4] ss:$36 sps:$4 sm:$0xff]   ;;  %v7133_v53 = vpop.f32.mrf.mxu1  ;;  %v15629_v3 = vld [vmem:[%s22095_s7 + $0x5ec] ss:$36 sps:$4 sm:$0xff]  }
 0x417   :  { %11394 = vmatprep.subr.bf16.mxu0 %v15617_v41  ;;  %v15531_v41 = vld [vmem:[%s22095_s7 + $0x8] ss:$36 sps:$4 sm:$0xff]  }
 0x419   :  { %11312 = vmatpush2.bf16.msra.mxu1 %v15507_v5  ;;  %9280 = vmatmul.mubr.bf16.vlgmr.msra.gmra.mxu0 %v19398_v35  ;;  %v6721_v35 = vadd.f32 %v6720_v23, %v19546_v61  ;;  %v22364_v23 = vld [vmem:[#allocation16_spill] sm:$0xff] }
 0x41a   :  { %9289 = vmatprep.mubr.bf16.mxu0 %v19428_v43  ;;  %11507 = vmatprep.subr.bf16.mxu1 %v15512_v4  ;;  %v15513_v43 = vld [vmem:[%s22095_s7 + $0x1b8] ss:$36 sps:$4 sm:$0xff]  }
 0x41b   :  { %v20066_v48 = vadd.f32 %v7123_v59, %v6721_v35  ;;  %11395 = vmatpush1.bf16.msra.mxu0 %v15615_v54  ;;  %v15525_v35 = vld [vmem:[%s22095_s7 + $0x98] ss:$36 sps:$4 sm:$0xff]  }
 0x41c   :  { %11314 = vmatmul.mubr.bf16.vlgmr.msra.gmra.mxu1 %v22359_v24 }
 0x41d   :  { %11323 = vmatprep.mubr.bf16.mxu1 %v22360_v12  ;;  %11508 = vmatpush1.bf16.msra.mxu1 %v15510_v47  ;;  %v7137_v47 = vpop.f32.mrf.mxu1 }
 0x41e   :  { %11509 = vmatprep.subr.bf16.mxu1 %v15515_v25  ;;  %v22363_v25 = vld [vmem:[#allocation26_spill] sm:$0xff] }
 0x41f   :  { %v7139_v59 = vpop.f32.mrf.mxu1 }
 0x421   :  { %11510 = vmatpush1.bf16.msra.mxu1 %v15513_v43  ;;  %9290 = vmatmul.mubr.bf16.gmra.mxu0 %v19420_v7  ;;  %v6730_v7 = vpop.f32.mrf.mxu0  ;;  %v7141_v17 = vpop.f32.mrf.mxu1 }
 0x422   :  { %9299 = vmatprep.mubr.bf16.mxu0 %v19861_v31  ;;  %11511 = vmatprep.subr.bf16.mxu1 %v15518_v38  ;;  %v6731_v2 = vadd.f32 %v6730_v7, %v19546_v61  ;;  %v15519_v31 = vld [vmem:[%s22095_s7 + $0x128] ss:$36 sps:$4 sm:$0xff]   ;;  %v15623_v38 = vld [vmem:[%s22095_s7 + $0x634] ss:$36 sps:$4 sm:$0xff]  }
 0x423   :  { %v6734_v5 = vpop.f32.mrf.mxu0  ;;  %11396 = vmatprep.subr.bf16.mxu0 %v15623_v38  ;;  %v7143_v20 = vpop.f32.mrf.mxu1  ;;  %v15639_v38 = vld [vmem:[%s22095_s7 + $0x558] ss:$36 sps:$4 sm:$0xff]  }
 0x424   :  { %11324 = vmatmul.mubr.bf16.gmra.mxu1 %v22361_v62  ;;  %v20093_v8 = vadd.f32 %v7133_v53, %v6731_v2  ;;  %v6735_v4 = vadd.f32 %v6734_v5, %v19528_v33  ;;  %11397 = vmatpush1.bf16.msra.mxu0 %v15621_v10  ;;  %v15627_v2 = vld [vmem:[%s22095_s7 + $0x5e8] ss:$36 sps:$4 sm:$0xff]  }
 0x425   :  { %11333 = vmatprep.mubr.bf16.mxu1 %v22362_v36  ;;  %11512 = vmatpush1.bf16.msra.mxu1 %v15516_v9  ;;  %v6736_v56 = vpop.f32.mrf.mxu0  ;;  %v7147_v5 = vpop.f32.mrf.mxu1 }
 0x426   :  { %11513 = vmatprep.subr.bf16.mxu1 %v15521_v19  ;;  %v20112_v49 = vadd.f32 %v7137_v47, %v6735_v4  ;;  %11398 = vmatprep.subr.bf16.mxu0 %v15629_v3  ;;  %v15635_v47 = vld [vmem:[%s22095_s7 + $0x5a4] ss:$36 sps:$4 sm:$0xff]  }
 0x427   :  { %v6738_v16 = vpop.f32.mrf.mxu0 }
 0x428   :  { %v6739_v39 = vadd.f32 %v6738_v16, %v19528_v33  ;;  %11399 = vmatpush1.bf16.msra.mxu0 %v15627_v2  ;;  %v15536_v16 = vld [vmem:[%s22095_s7 + $0x444] ss:$36 sps:$4 sm:$0xff]   ;;  %v15542_v2 = vld [vmem:[%s22095_s7 + $0x3b4] ss:$36 sps:$4 sm:$0xff]  }
 0x429   :  { %11514 = vmatpush1.bf16.msra.mxu1 %v15519_v31  ;;  %9300 = vmatmul.mubr.bf16.gmra.mxu0 %v19886_v42  ;;  %v6737_v42 = vadd.f32 %v6736_v56, %v19546_v61  ;;  %v6740_v43 = vpop.f32.mrf.mxu0  ;;  %v15533_v31 = vld [vmem:[%s22095_s7 + $0xc] ss:$36 sps:$4 sm:$0xff]  }
 0x42a   :  { %11515 = vmatprep.subr.bf16.mxu1 %v15524_v1  ;;  %9309 = vmatprep.mubr.bf16.mxu0 %v19002_v6  ;;  %v6741_v28 = vadd.f32 %v6740_v43, %v19546_v61  ;;  %v20131_v60 = vadd.f32 %v7141_v17, %v6739_v39  ;;  %v15534_v43 = vld [vmem:[%s22095_s7 + $0x440] ss:$36 sps:$4 sm:$0xff]  }
 0x42b   :  { %v20128_v44 = vadd.f32 %v7139_v59, %v6737_v42  ;;  %v6744_v9 = vpop.f32.mrf.mxu0  ;;  %v15633_v42 = vld [vmem:[%s22095_s7 + $0x5a0] ss:$36 sps:$4 sm:$0xff]   ;;  %11400 = vmatprep.subr.bf16.mxu0 %v15635_v47 }
 0x42c   :  { %11334 = vmatmul.mubr.bf16.gmra.mxu1 %v22363_v25  ;;  %v6745_v19 = vadd.f32 %v6744_v9, %v19528_v33  ;;  %v20148_v1 = vadd.f32 %v7143_v20, %v6741_v28  ;;  %11401 = vmatpush1.bf16.msra.mxu0 %v15633_v42  ;;  %v22367_v17 = vld [vmem:[#allocation19_spill] sm:$0xff]  ;;  %v22368_v9 = vld [vmem:[#allocation14_spill] sm:$0xff]  ;;  %v15653_v42 = vld [vmem:[%s22095_s7 + $0x4cc] ss:$36 sps:$4 sm:$0xff]  }
 0x42d   :  { %11343 = vmatprep.mubr.bf16.mxu1 %v22364_v23  ;;  %11516 = vmatpush1.bf16.msra.mxu1 %v15522_v32  ;;  %v6746_v7 = vpop.f32.mrf.mxu0  ;;  %v22365_v32 = vld [vmem:[#allocation28_spill] sm:$0xff]  ;;  %v15647_v20 = vld [vmem:[%s22095_s7 + $0x514] ss:$36 sps:$4 sm:$0xff]  }
 0x42e   :  { %11517 = vmatprep.subr.bf16.mxu1 %v15527_v40  ;;  %v6747_v53 = vadd.f32 %v6746_v7, %v19546_v61  ;;  %v20152_v56 = vadd.f32 %v7147_v5, %v6745_v19  ;;  %v7149_v40 = vpop.f32.mrf.mxu1  ;;  %v15537_v19 = vld [vmem:[%s22095_s7 + $0x3f8] ss:$36 sps:$4 sm:$0xff]  }
 0x42f   :  { %v6748_v4 = vpop.f32.mrf.mxu0 }
 0x430   :  { %v6749_v54 = vadd.f32 %v6748_v4, %v19528_v33  ;;  %v20168_v39 = vadd.f32 %v7149_v40, %v6747_v53  ;;  %v15540_v4 = vld [vmem:[%s22095_s7 + $0x3b0] ss:$36 sps:$4 sm:$0xff]   ;;  %v15651_v40 = vld [vmem:[%s22095_s7 + $0x4c8] ss:$36 sps:$4 sm:$0xff]  }
 0x431   :  { %11518 = vmatpush1.bf16.msra.mxu1 %v15525_v35  ;;  %9310 = vmatmul.mubr.bf16.gmra.mxu0 %v19037_v13  ;;  %v7151_v35 = vpop.f32.mrf.mxu1  ;;  %v20176_v10 = vpop.f32.mrf.mxu0 }
 0x432   :  { %9319 = vmatprep.mubr.bf16.mxu0 %v19483_v58  ;;  %11519 = vmatprep.subr.bf16.mxu1 %v15530_v27  ;;  %v22366_v58 = vld [vmem:[#allocation31_spill] sm:$0xff]  ;;  %v20170_v59 = vadd.f32 %v7151_v35, %v6749_v54 }
 0x433   :  { %v15641_v27 = vld [vmem:[%s22095_s7 + $0x55c] ss:$36 sps:$4 sm:$0xff]   ;;  %v20188_v28 = vpop.f32.mrf.mxu1 }
 0x434   :  { %11344 = vmatmul.mubr.bf16.gmra.mxu1 %v22365_v32  ;;  %11402 = vmatprep.subr.bf16.mxu0 %v15641_v27 }
 0x435   :  { %11353 = vmatprep.mubr.bf16.mxu1 %v22366_v58  ;;  %11520 = vmatpush1.bf16.msra.mxu1 %v15528_v21  ;;  %v6754_v21 = vpop.f32.mrf.mxu0 }
 0x436   :  { %11521 = vmatprep.subr.bf16.mxu1 %v15533_v31  ;;  %11403 = vmatpush1.bf16.msra.mxu0 %v15639_v38  ;;  %v6755_v7 = vadd.f32 %v6754_v21, %v19528_v33  ;;  %v7157_v31 = vpop.f32.mrf.mxu1  ;;  %v22369_v38 = vld [vmem:[#allocation25_spill] sm:$0xff]  ;;  %v15659_v21 = vld [vmem:[%s22095_s7 + $0x484] ss:$36 sps:$4 sm:$0xff]  }
 0x437   :  { %v6756_v3 = vpop.f32.mrf.mxu0  ;;  %11404 = vmatprep.subr.bf16.mxu0 %v15647_v20 }
 0x438   :  { %v6757_v53 = vadd.f32 %v6756_v3, %v19546_v61  ;;  %v20206_v5 = vadd.f32 %v7157_v31, %v6755_v7  ;;  %v15548_v7 = vld [vmem:[%s22095_s7 + $0x324] ss:$36 sps:$4 sm:$0xff]  }
 0x439   :  { %11522 = vmatpush1.bf16.msra.mxu1 %v15531_v41  ;;  %9320 = vmatmul.mubr.bf16.gmra.mxu0 %v19481_v57  ;;  %v15539_v57 = vld [vmem:[%s22095_s7 + $0x3fc] ss:$36 sps:$4 sm:$0xff]   ;;  %v6758_v54 = vpop.f32.mrf.mxu0  ;;  %v7159_v41 = vpop.f32.mrf.mxu1 }
 0x43a   :  { %9329 = vmatprep.mubr.bf16.mxu0 %v19734_v14  ;;  %11523 = vmatprep.subr.bf16.mxu1 %v15536_v16  ;;  %v15645_v14 = vld [vmem:[%s22095_s7 + $0x510] ss:$36 sps:$4 sm:$0xff]   ;;  %v6759_v47 = vadd.f32 %v6758_v54, %v19528_v33  ;;  %v15665_v54 = vld [vmem:[%s22095_s7 + $0x8bc] ss:$36 sps:$4 sm:$0xff]  }
 0x43b   :  { %11405 = vmatpush1.bf16.msra.mxu0 %v15645_v14  ;;  %v15545_v16 = vld [vmem:[%s22095_s7 + $0x36c] ss:$36 sps:$4 sm:$0xff]   ;;  %v20225_v35 = vpop.f32.mrf.mxu0 }
 0x43c   :  { %11354 = vmatmul.mubr.bf16.gmra.mxu1 %v22367_v17  ;;  %11406 = vmatprep.subr.bf16.mxu0 %v15653_v42 }
 0x43d   :  { %11363 = vmatprep.mubr.bf16.mxu1 %v22368_v9  ;;  %11524 = vmatpush2.bf16.msra.mxu1 %v15534_v43  ;;  %v7161_v43 = vpop.f32.mrf.mxu1 }
 0x43e   :  { %11525 = vmatprep.subr.bf16.mxu1 %v15539_v57  ;;  %v20228_v27 = vadd.f32 %v7161_v43, %v6759_v47  ;;  %v22370_v57 = vld [vmem:[#allocation32_spill] sm:$0xff] }
 0x43f   :  { %11407 = vmatpush1.bf16.msra.mxu0 %v15651_v40  ;;  %v20240_v20 = vpop.f32.mrf.mxu1 }
 0x440   :  { %11408 = vmatprep.subr.bf16.mxu0 %v15659_v21 }
 0x441   :  { %11526 = vmatpush2.bf16.msra.mxu1 %v15537_v19  ;;  %9330 = vmatmul.mubr.bf16.gmra.mxu0 %v19509_v30  ;;  %v20220_v30 = vadd.f32 %v7159_v41, %v6757_v53  ;;  %v15657_v19 = vld [vmem:[%s22095_s7 + $0x480] ss:$36 sps:$4 sm:$0xff]   ;;  %v6764_v14 = vpop.f32.mrf.mxu0 }
 0x442   :  { %9339 = vmatprep.mubr.bf16.mxu0 %v19983_v50  ;;  %11527 = vmatprep.subr.bf16.mxu1 %v15542_v2  ;;  %v15543_v50 = vld [vmem:[%s22095_s7 + $0x368] ss:$36 sps:$4 sm:$0xff]   ;;  %v6765_v2 = vadd.f32 %v6764_v14, %v19528_v33  ;;  %v15546_v53 = vld [vmem:[%s22095_s7 + $0x320] ss:$36 sps:$4 sm:$0xff]   ;;  %v15669_v14 = vld [vmem:[%s22095_s7 + $0x870] ss:$36 sps:$4 sm:$0xff]  }
 0x443   :  { %v6766_v3 = vpop.f32.mrf.mxu0  ;;  %11409 = vmatpush1.bf16.msra.mxu0 %v15657_v19  ;;  %v22372_v19 = vld [vmem:[#allocation44_spill] sm:$0xff] }
 0x444   :  { %11364 = vmatmul.mubr.bf16.gmra.mxu1 %v22369_v38  ;;  %v6767_v31 = vadd.f32 %v6766_v3, %v19546_v61  ;;  %11410 = vmatprep.subr.bf16.mxu0 %v15665_v54  ;;  %v15554_v3 = vld [vmem:[%s22095_s7 + $0x294] ss:$36 sps:$4 sm:$0xff]  }
 0x445   :  { %11373 = vmatprep.mubr.bf16.mxu1 %v22370_v57  ;;  %11528 = vmatpush2.bf16.msra.mxu1 %v15540_v4  ;;  %v15663_v4 = vld [vmem:[%s22095_s7 + $0x8b8] ss:$36 sps:$4 sm:$0xff]   ;;  %v7167_v41 = vpop.f32.mrf.mxu1  ;;  %v6768_v40 = vpop.f32.mrf.mxu0 }
 0x446   :  { %11529 = vmatprep.subr.bf16.mxu1 %v15545_v16  ;;  %v20261_v42 = vadd.f32 %v7167_v41, %v6765_v2  ;;  %v6769_v47 = vadd.f32 %v6768_v40, %v19528_v33  ;;  %v22371_v16 = vld [vmem:[#allocation27_spill] sm:$0xff]  ;;  %v15552_v41 = vld [vmem:[%s22095_s7 + $0x290] ss:$36 sps:$4 sm:$0xff]   ;;  %v15675_v40 = vld [vmem:[%s22095_s7 + $0x828] ss:$36 sps:$4 sm:$0xff]  }
 0x447   :  { %v7169_v43 = vpop.f32.mrf.mxu1  ;;  %11411 = vmatpush2.bf16.msra.mxu0 %v15663_v4 }
 0x448   :  { %v20268_v21 = vadd.f32 %v7169_v43, %v6767_v31  ;;  %v15557_v43 = vld [vmem:[%s22095_s7 + $0x24c] ss:$36 sps:$4 sm:$0xff]  }
 0x449   :  { %11530 = vmatpush2.bf16.msra.mxu1 %v15543_v50  ;;  %9340 = vmatmul.mubr.bf16.gmra.mxu0 %v20008_v18  ;;  %v15551_v18 = vld [vmem:[%s22095_s7 + $0x2dc] ss:$36 sps:$4 sm:$0xff]   ;;  %v20265_v50 = vpop.f32.mrf.mxu0  ;;  %v7171_v2 = vpop.f32.mrf.mxu1 }
 0x44a   :  { %11531 = vmatprep.subr.bf16.mxu1 %v15548_v7  ;;  %9349 = vmatprep.mubr.bf16.mxu0 %v19002_v6  ;;  %v15549_v6 = vld [vmem:[%s22095_s7 + $0x2d8] ss:$36 sps:$4 sm:$0xff]   ;;  %v20282_v31 = vadd.f32 %v7171_v2, %v6769_v47 }
 0x44b   :  { %v15671_v7 = vld [vmem:[%s22095_s7 + $0x874] ss:$36 sps:$4 sm:$0xff]   ;;  %v20284_v4 = vpop.f32.mrf.mxu1 }
 0x44c   :  { %11374 = vmatmul.mubr.bf16.gmra.mxu1 %v22371_v16  ;;  %11412 = vmatprep.subr.bf16.mxu0 %v15671_v7 }
 0x44d   :  { %11383 = vmatprep.mubr.bf16.mxu1 %v22372_v19  ;;  %11532 = vmatpush2.bf16.msra.mxu1 %v15546_v53 }
 0x44e   :  { %11533 = vmatprep.subr.bf16.mxu1 %v15551_v18  ;;  %11413 = vmatpush2.bf16.msra.mxu0 %v15669_v14  ;;  %v15677_v18 = vld [vmem:[%s22095_s7 + $0x82c] ss:$36 sps:$4 sm:$0xff]   ;;  %v22373_v14 = vld [vmem:[#allocation30_spill] sm:$0xff] }
 0x44f   :  { %11414 = vmatprep.subr.bf16.mxu0 %v15677_v18  ;;  %v15681_v18 = vld [vmem:[%s22095_s7 + $0x7e0] ss:$36 sps:$4 sm:$0xff]  }
 0x450   :  { %v6774_v53 = vpop.f32.mrf.mxu0 }
 0x451   :  { %11534 = vmatpush2.bf16.msra.mxu1 %v15549_v6  ;;  %v6775_v54 = vadd.f32 %v6774_v53, %v19528_v33  ;;  %9350 = vmatmul.mubr.bf16.gmra.mxu0 %v19037_v13 }
 0x452   :  { %v6776_v47 = vpop.f32.mrf.mxu0  ;;  %11535 = vmatprep.subr.bf16.mxu1 %v15554_v3  ;;  %11415 = vmatpush2.bf16.msra.mxu0 %v15675_v40  ;;  %v15555_v3 = vld [vmem:[%s22095_s7 + $0x248] ss:$36 sps:$4 sm:$0xff]  }
 0x453   :  { %v6777_v13 = vadd.f32 %v6776_v47, %v19546_v61  ;;  %v15683_v47 = vld [vmem:[%s22095_s7 + $0x7e4] ss:$36 sps:$4 sm:$0xff]  }
 0x454   :  { %v7177_v6 = vpop.f32.mrf.mxu1  ;;  %11384 = vmatmul.mubr.bf16.gmra.mxu1 %v22373_v14  ;;  %v6778_v7 = vpop.f32.mrf.mxu0  ;;  %11416 = vmatprep.subr.bf16.mxu0 %v15683_v47 }
 0x455   :  { %v20302_v2 = vadd.f32 %v7177_v6, %v6775_v54  ;;  %11536 = vmatpush2.bf16.msra.mxu1 %v15552_v41  ;;  %11539 = vmatprep.mubr.bf16.mxu1 %v22358_v22  ;;  %v6779_v53 = vadd.f32 %v6778_v7, %v19528_v33  ;;  %v15560_v33 = vld [vmem:[%s22095_s7 + $0x20c] ss:$36 sps:$4 sm:$0xff]  }
 0x456   :  { %v7179_v40 = vpop.f32.mrf.mxu1  ;;  %v20315_v54 = vpop.f32.mrf.mxu0  ;;  %11537 = vmatprep.subr.bf16.mxu1 %v15557_v43  ;;  %11417 = vmatpush2.bf16.msra.mxu0 %v15681_v18  ;;  %v15687_v43 = vld [vmem:[%s22095_s7 + $0x798] ss:$36 sps:$4 sm:$0xff]  }
 0x457   :  { %v20320_v41 = vadd.f32 %v7179_v40, %v6777_v13  ;;  %v15689_v13 = vld [vmem:[%s22095_s7 + $0x79c] ss:$36 sps:$4 sm:$0xff]  }
 0x458   :  { %v7181_v6 = vpop.f32.mrf.mxu1  ;;  %v7542_v7 = vpop.f32.mrf.mxu0  ;;  %11418 = vmatprep.subr.bf16.mxu0 %v15689_v13 }
 0x459   :  { %v20322_v55 = vadd.f32 %v7181_v6, %v6779_v53  ;;  %11538 = vmatpush2.bf16.msra.mxu1 %v15555_v3  ;;  %v7621_v51 = vadd.f32 %v7542_v7, %v19568_v52  ;;  %v15563_v52 = vld [vmem:[%s22095_s7 + $0x1c4] ss:$36 sps:$4 sm:$0xff]  }
 0x45a   :  { %v20334_v47 = vpop.f32.mrf.mxu1  ;;  %v7544_v18 = vpop.f32.mrf.mxu0  ;;  %11733 = vmatprep.subr.bf16.mxu1 %v15560_v33  ;;  %11419 = vmatpush2.bf16.msra.mxu0 %v15687_v43  ;;  %v15561_v33 = vld [vmem:[%s22095_s7 + $0x1c0] ss:$36 sps:$4 sm:$0xff]  }
 0x45b   :  { %22374 = vst [vmem:[#allocation39_spill] sm:$0xff] %v20322_v55  ;;  %v7622_v53 = vadd.f32 %v7544_v18, %v19576_v34  ;;  %v15566_v34 = vld [vmem:[%s22095_s7 + $0x17c] ss:$36 sps:$4 sm:$0xff]  }
 0x45c   :  { %v7976_v3 = vpop.f32.mrf.mxu1  ;;  %11540 = vmatmul.mubr.bf16.vlgmr.msra.gmra.mxu1 %v22359_v24  ;;  %v7546_v40 = vpop.f32.mrf.mxu0 }
 0x45d   :  { %v20341_v6 = vadd.f32 %v7976_v3, %v7621_v51  ;;  %11549 = vmatprep.mubr.bf16.mxu1 %v22360_v12  ;;  %11734 = vmatpush1.bf16.msra.mxu1 %v15558_v15  ;;  %v7623_v7 = vadd.f32 %v7546_v40, %v19590_v26  ;;  %v15693_v51 = vld [vmem:[%s22095_s7 + $0x750] ss:$36 sps:$4 sm:$0xff]   ;;  %v15564_v3 = vld [vmem:[%s22095_s7 + $0x178] ss:$36 sps:$4 sm:$0xff]  }
 0x45e   :  { %v7978_v0 = vpop.f32.mrf.mxu1  ;;  %v20348_v55 = vpop.f32.mrf.mxu0  ;;  %11735 = vmatprep.subr.bf16.mxu1 %v15563_v52  ;;  %v15695_v26 = vld [vmem:[%s22095_s7 + $0x754] ss:$36 sps:$4 sm:$0xff]  }
 0x45f   :  { %22375 = vst [vmem:[#allocation33_spill] sm:$0xff] %v20348_v55  ;;  %v20359_v15 = vadd.f32 %v7978_v0, %v7622_v53  ;;  %11420 = vmatprep.subr.bf16.mxu0 %v15695_v26  ;;  %v15569_v0 = vld [vmem:[%s22095_s7 + $0x134] ss:$36 sps:$4 sm:$0xff]  }
 0x460   :  { %v7980_v43 = vpop.f32.mrf.mxu1  ;;  %v7552_v13 = vpop.f32.mrf.mxu0  ;;  %11421 = vmatpush2.bf16.msra.mxu0 %v15693_v51  ;;  %v15698_v51 = vld [vmem:[%s22095_s7 + $0x70c] ss:$36 sps:$4 sm:$0xff]  }
 0x461   :  { %v20361_v18 = vadd.f32 %v7980_v43, %v7623_v7  ;;  %11736 = vmatpush1.bf16.msra.mxu1 %v15561_v33  ;;  %v7625_v52 = vadd.f32 %v7552_v13, %v20041_v37  ;;  %v15696_v37 = vld [vmem:[%s22095_s7 + $0x708] ss:$36 sps:$4 sm:$0xff]   ;;  %11422 = vmatprep.subr.bf16.mxu0 %v15698_v51 }
 0x462   :  { %v20367_v40 = vpop.f32.mrf.mxu1  ;;  %v7554_v55 = vpop.f32.mrf.mxu0  ;;  %11737 = vmatprep.subr.bf16.mxu1 %v15566_v34  ;;  %v15572_v13 = vld [vmem:[%s22095_s7 + $0xec] ss:$36 sps:$4 sm:$0xff]  }
 0x463   :  { %22376 = vst [vmem:[#allocation21_spill] sm:$0xff] %v20361_v18  ;;  %22377 = vst [vmem:[#allocation23_spill] sm:$0xff] %v20367_v40  ;;  %v7626_v53 = vadd.f32 %v7554_v55, %v20052_v45  ;;  %v15567_v55 = vld [vmem:[%s22095_s7 + $0x130] ss:$36 sps:$4 sm:$0xff]  }
 0x464   :  { %v7986_v7 = vpop.f32.mrf.mxu1  ;;  %11550 = vmatmul.mubr.bf16.gmra.mxu1 %v22361_v62  ;;  %v7556_v33 = vpop.f32.mrf.mxu0  ;;  %11423 = vmatpush2.bf16.msra.mxu0 %v15696_v37 }
 0x465   :  { %v20380_v26 = vadd.f32 %v7986_v7, %v7625_v52  ;;  %11559 = vmatprep.mubr.bf16.mxu1 %v22362_v36  ;;  %11738 = vmatpush1.bf16.msra.mxu1 %v15564_v3  ;;  %v7627_v34 = vadd.f32 %v7556_v33, %v20056_v63  ;;  %v15701_v52 = vld [vmem:[%s22095_s7 + $0x6c4] ss:$36 sps:$4 sm:$0xff]  }
 0x466   :  { %v7988_v45 = vpop.f32.mrf.mxu1  ;;  %v7558_v43 = vpop.f32.mrf.mxu0  ;;  %11739 = vmatprep.subr.bf16.mxu1 %v15569_v0  ;;  %v15699_v3 = vld [vmem:[%s22095_s7 + $0x6c0] ss:$36 sps:$4 sm:$0xff]   ;;  %11424 = vmatprep.subr.bf16.mxu0 %v15701_v52 }
 0x467   :  { %v20393_v7 = vadd.f32 %v7988_v45, %v7626_v53  ;;  %v7628_v63 = vadd.f32 %v7558_v43, %v20066_v48  ;;  %v15570_v53 = vld [vmem:[%s22095_s7 + $0xe8] ss:$36 sps:$4 sm:$0xff]  }
 0x468   :  { %v7990_v33 = vpop.f32.mrf.mxu1  ;;  %v7562_v0 = vpop.f32.mrf.mxu0  ;;  %v15575_v48 = vld [vmem:[%s22095_s7 + $0xa4] ss:$36 sps:$4 sm:$0xff]   ;;  %11425 = vmatpush2.bf16.msra.mxu0 %v15699_v3  ;;  %v15578_v3 = vld [vmem:[%s22095_s7 + $0x5c] ss:$36 sps:$4 sm:$0xff]  }
 0x469   :  { %v20399_v18 = vadd.f32 %v7990_v33, %v7627_v34  ;;  %11740 = vmatpush1.bf16.msra.mxu1 %v15567_v55  ;;  %v7629_v51 = vadd.f32 %v7562_v0, %v20073_v46  ;;  %v15704_v55 = vld [vmem:[%s22095_s7 + $0x684] ss:$36 sps:$4 sm:$0xff]  }
 0x46a   :  { %v7992_v45 = vpop.f32.mrf.mxu1  ;;  %v7564_v40 = vpop.f32.mrf.mxu0  ;;  %11741 = vmatprep.subr.bf16.mxu1 %v15572_v13  ;;  %11620 = vmatprep.subr.bf16.mxu0 %v15704_v55 }
 0x46b   :  { %v20408_v37 = vadd.f32 %v7992_v45, %v7628_v63  ;;  %v7630_v43 = vadd.f32 %v7564_v40, %v20080_v11  ;;  %v15573_v11 = vld [vmem:[%s22095_s7 + $0xa0] ss:$36 sps:$4 sm:$0xff]  }
 0x46c   :  { %v7996_v34 = vpop.f32.mrf.mxu1  ;;  %11560 = vmatmul.mubr.bf16.gmra.mxu1 %v22363_v25  ;;  %v7566_v46 = vpop.f32.mrf.mxu0 }
 0x46d   :  { %v20415_v52 = vadd.f32 %v7996_v34, %v7629_v51  ;;  %11569 = vmatprep.mubr.bf16.mxu1 %v22364_v23  ;;  %11742 = vmatpush1.bf16.msra.mxu1 %v15570_v53  ;;  %v7631_v13 = vadd.f32 %v7566_v46, %v20088_v29 }
 0x46e   :  { %v7998_v40 = vpop.f32.mrf.mxu1  ;;  %v7568_v63 = vpop.f32.mrf.mxu0  ;;  %11743 = vmatprep.subr.bf16.mxu1 %v15575_v48  ;;  %v15576_v48 = vld [vmem:[%s22095_s7 + $0x58] ss:$36 sps:$4 sm:$0xff]  }
 0x46f   :  { %v20425_v33 = vadd.f32 %v7998_v40, %v7630_v43  ;;  %v7632_v0 = vadd.f32 %v7568_v63, %v20093_v8  ;;  %v15581_v43 = vld [vmem:[%s22095_s7 + $0x14] ss:$36 sps:$4 sm:$0xff]  }
 0x470   :  { %v8000_v51 = vpop.f32.mrf.mxu1  ;;  %v7572_v53 = vpop.f32.mrf.mxu0  ;;  %v15579_v63 = vld [vmem:[%s22095_s7 + $0x10] ss:$36 sps:$4 sm:$0xff]  }
 0x471   :  { %v20428_v45 = vadd.f32 %v8000_v51, %v7631_v13  ;;  %11744 = vmatpush1.bf16.msra.mxu1 %v15573_v11  ;;  %v7633_v29 = vadd.f32 %v7572_v53, %v20112_v49 }
 0x472   :  { %v8002_v34 = vpop.f32.mrf.mxu1  ;;  %v7574_v46 = vpop.f32.mrf.mxu0  ;;  %11745 = vmatprep.subr.bf16.mxu1 %v15578_v3 }
 0x473   :  { %v20437_v55 = vadd.f32 %v8002_v34, %v7632_v0  ;;  %v7634_v8 = vadd.f32 %v7574_v46, %v20128_v44  ;;  %v15584_v44 = vld [vmem:[%s22095_s7 + $0x44c] ss:$36 sps:$4 sm:$0xff]  }
 0x474   :  { %v8006_v13 = vpop.f32.mrf.mxu1  ;;  %11570 = vmatmul.mubr.bf16.gmra.mxu1 %v22365_v32  ;;  %v7576_v11 = vpop.f32.mrf.mxu0 }
 0x475   :  { %v20441_v49 = vadd.f32 %v8006_v13, %v7633_v29  ;;  %11579 = vmatprep.mubr.bf16.mxu1 %v22366_v58  ;;  %11746 = vmatpush1.bf16.msra.mxu1 %v15576_v48  ;;  %v7635_v40 = vadd.f32 %v7576_v11, %v20131_v60  ;;  %v6751_v60 = vadd.f32 %v20176_v10, %v19546_v61 }
 0x476   :  { %v8008_v3 = vpop.f32.mrf.mxu1  ;;  %v7578_v0 = vpop.f32.mrf.mxu0  ;;  %11747 = vmatprep.subr.bf16.mxu1 %v15581_v43  ;;  %v15582_v43 = vld [vmem:[%s22095_s7 + $0x448] ss:$36 sps:$4 sm:$0xff]  }
 0x477   :  { %v20451_v51 = vadd.f32 %v8008_v3, %v7634_v8  ;;  %v7636_v53 = vadd.f32 %v7578_v0, %v20148_v1  ;;  %v15587_v1 = vld [vmem:[%s22095_s7 + $0x404] ss:$36 sps:$4 sm:$0xff]  }
 0x478   :  { %v8010_v29 = vpop.f32.mrf.mxu1  ;;  %v7582_v34 = vpop.f32.mrf.mxu0 }
 0x479   :  { %v20456_v48 = vadd.f32 %v8010_v29, %v7635_v40  ;;  %11748 = vmatpush1.bf16.msra.mxu1 %v15579_v63  ;;  %v7637_v46 = vadd.f32 %v7582_v34, %v20152_v56  ;;  %v7205_v56 = vadd.f32 %v20188_v28, %v6751_v60 }
 0x47a   :  { %v8012_v13 = vpop.f32.mrf.mxu1  ;;  %v7584_v11 = vpop.f32.mrf.mxu0  ;;  %11749 = vmatprep.subr.bf16.mxu1 %v15584_v44  ;;  %v15585_v44 = vld [vmem:[%s22095_s7 + $0x400] ss:$36 sps:$4 sm:$0xff]  }
 0x47b   :  { %v20465_v8 = vadd.f32 %v8012_v13, %v7636_v53  ;;  %v7638_v10 = vadd.f32 %v7584_v11, %v20168_v39  ;;  %v15590_v39 = vld [vmem:[%s22095_s7 + $0x3bc] ss:$36 sps:$4 sm:$0xff]  }
 0x47c   :  { %v8016_v40 = vpop.f32.mrf.mxu1  ;;  %11580 = vmatmul.mubr.bf16.gmra.mxu1 %v22367_v17  ;;  %v7586_v63 = vpop.f32.mrf.mxu0  ;;  %v15588_v11 = vld [vmem:[%s22095_s7 + $0x3b8] ss:$36 sps:$4 sm:$0xff]  }
 0x47d   :  { %22378 = vst [vmem:[#allocation20_spill] sm:$0xff] %v20465_v8  ;;  %v20470_v3 = vadd.f32 %v8016_v40, %v7637_v46  ;;  %11589 = vmatprep.mubr.bf16.mxu1 %v22368_v9  ;;  %11750 = vmatpush2.bf16.msra.mxu1 %v15582_v43  ;;  %v7639_v0 = vadd.f32 %v7586_v63, %v20170_v59 }
 0x47e   :  { %v8018_v53 = vpop.f32.mrf.mxu1  ;;  %v7588_v29 = vpop.f32.mrf.mxu0  ;;  %11751 = vmatprep.subr.bf16.mxu1 %v15587_v1  ;;  %v6761_v43 = vadd.f32 %v20225_v35, %v19546_v61 }
 0x47f   :  { %v20480_v34 = vadd.f32 %v8018_v53, %v7638_v10  ;;  %v7640_v28 = vadd.f32 %v7588_v29, %v7205_v56  ;;  %v15593_v10 = vld [vmem:[%s22095_s7 + $0x374] ss:$36 sps:$4 sm:$0xff]  }
 0x480   :  { %v8020_v60 = vpop.f32.mrf.mxu1  ;;  %v7592_v46 = vpop.f32.mrf.mxu0  ;;  %v15591_v29 = vld [vmem:[%s22095_s7 + $0x370] ss:$36 sps:$4 sm:$0xff]  }
 0x481   :  { %v20484_v59 = vadd.f32 %v8020_v60, %v7639_v0  ;;  %11752 = vmatpush2.bf16.msra.mxu1 %v15585_v44  ;;  %v7641_v13 = vadd.f32 %v7592_v46, %v20206_v5  ;;  %v7209_v5 = vadd.f32 %v20240_v20, %v6761_v43 }
 0x482   :  { %v8022_v1 = vpop.f32.mrf.mxu1  ;;  %v7594_v40 = vpop.f32.mrf.mxu0  ;;  %11753 = vmatprep.subr.bf16.mxu1 %v15590_v39 }
 0x483   :  { %22379 = vst [vmem:[#allocation40_spill] sm:$0xff] %v20484_v59  ;;  %v20493_v63 = vadd.f32 %v8022_v1, %v7640_v28  ;;  %v7642_v35 = vadd.f32 %v7594_v40, %v20220_v30  ;;  %v15596_v30 = vld [vmem:[%s22095_s7 + $0x32c] ss:$36 sps:$4 sm:$0xff]  }
 0x484   :  { %v8026_v56 = vpop.f32.mrf.mxu1  ;;  %11590 = vmatmul.mubr.bf16.gmra.mxu1 %v22369_v38  ;;  %v7596_v0 = vpop.f32.mrf.mxu0  ;;  %v15594_v1 = vld [vmem:[%s22095_s7 + $0x328] ss:$36 sps:$4 sm:$0xff]  }
 0x485   :  { %22380 = vst [vmem:[#allocation17_spill] sm:$0xff] %v20493_v63  ;;  %v20498_v44 = vadd.f32 %v8026_v56, %v7641_v13  ;;  %11599 = vmatprep.mubr.bf16.mxu1 %v22370_v57  ;;  %11754 = vmatpush2.bf16.msra.mxu1 %v15588_v11  ;;  %v7643_v53 = vadd.f32 %v7596_v0, %v20228_v27 }
 0x486   :  { %v8028_v39 = vpop.f32.mrf.mxu1  ;;  %v7598_v28 = vpop.f32.mrf.mxu0  ;;  %11755 = vmatprep.subr.bf16.mxu1 %v15593_v10  ;;  %v6771_v13 = vadd.f32 %v20265_v50, %v19546_v61 }
 0x487   :  { %v20508_v60 = vadd.f32 %v8028_v39, %v7642_v35  ;;  %v7644_v20 = vadd.f32 %v7598_v28, %v7209_v5  ;;  %v15599_v35 = vld [vmem:[%s22095_s7 + $0x2e4] ss:$36 sps:$4 sm:$0xff]  }
 0x488   :  { %v8030_v46 = vpop.f32.mrf.mxu1  ;;  %v7602_v43 = vpop.f32.mrf.mxu0  ;;  %v15597_v39 = vld [vmem:[%s22095_s7 + $0x2e0] ss:$36 sps:$4 sm:$0xff]  }
 0x489   :  { %v20512_v27 = vadd.f32 %v8030_v46, %v7643_v53  ;;  %11756 = vmatpush2.bf16.msra.mxu1 %v15591_v29  ;;  %v7645_v11 = vadd.f32 %v7602_v43, %v20261_v42  ;;  %v7213_v42 = vadd.f32 %v20284_v4, %v6771_v13  ;;  %v6781_v13 = vadd.f32 %v20315_v54, %v19546_v61 }
 0x48a   :  { %v8032_v40 = vpop.f32.mrf.mxu1  ;;  %v7604_v10 = vpop.f32.mrf.mxu0  ;;  %11757 = vmatprep.subr.bf16.mxu1 %v15596_v30 }
 0x48b   :  { %22381 = vst [vmem:[#allocation41_spill] sm:$0xff] %v20512_v27  ;;  %v20521_v56 = vadd.f32 %v8032_v40, %v7644_v20  ;;  %v7646_v50 = vadd.f32 %v7604_v10, %v20268_v21  ;;  %v15602_v21 = vld [vmem:[%s22095_s7 + $0x29c] ss:$36 sps:$4 sm:$0xff]  }
 0x48c   :  { %v8036_v0 = vpop.f32.mrf.mxu1  ;;  %11600 = vmatmul.mubr.bf16.gmra.mxu1 %v22371_v16  ;;  %v7606_v5 = vpop.f32.mrf.mxu0 }
 0x48d   :  { %22382 = vst [vmem:[#allocation11_spill] sm:$0xff] %v20521_v56  ;;  %v20526_v53 = vadd.f32 %v8036_v0, %v7645_v11  ;;  %11609 = vmatprep.mubr.bf16.mxu1 %v22372_v19  ;;  %11758 = vmatpush2.bf16.msra.mxu1 %v15594_v1  ;;  %v7647_v29 = vadd.f32 %v7606_v5, %v20282_v31  ;;  %v15600_v1 = vld [vmem:[%s22095_s7 + $0x298] ss:$36 sps:$4 sm:$0xff]  }
 0x48e   :  { %v8038_v28 = vpop.f32.mrf.mxu1  ;;  %v7608_v30 = vpop.f32.mrf.mxu0  ;;  %11759 = vmatprep.subr.bf16.mxu1 %v15599_v35  ;;  %v15605_v35 = vld [vmem:[%s22095_s7 + $0x254] ss:$36 sps:$4 sm:$0xff]  }
 0x48f   :  { %v20536_v20 = vadd.f32 %v8038_v28, %v7646_v50  ;;  %v7648_v4 = vadd.f32 %v7608_v30, %v7213_v42  ;;  %v15603_v28 = vld [vmem:[%s22095_s7 + $0x250] ss:$36 sps:$4 sm:$0xff]  }
 0x490   :  { %v8040_v46 = vpop.f32.mrf.mxu1  ;;  %v7612_v43 = vpop.f32.mrf.mxu0 }
 0x491   :  { %v20540_v31 = vadd.f32 %v8040_v46, %v7647_v29  ;;  %11760 = vmatpush2.bf16.msra.mxu1 %v15597_v39  ;;  %v7649_v11 = vadd.f32 %v7612_v43, %v20302_v2  ;;  %v7217_v2 = vadd.f32 %v20334_v47, %v6781_v13  ;;  %v22385_v29 = vld [vmem:[#allocation39_spill] sm:$0xff] }
 0x492   :  { %v8042_v40 = vpop.f32.mrf.mxu1  ;;  %v7614_v10 = vpop.f32.mrf.mxu0  ;;  %11761 = vmatprep.subr.bf16.mxu1 %v15602_v21 }
 0x493   :  { %22383 = vst [vmem:[#allocation13_spill] sm:$0xff] %v20540_v31  ;;  %v20549_v50 = vadd.f32 %v8042_v40, %v7648_v4  ;;  %v7650_v54 = vadd.f32 %v7614_v10, %v20320_v41  ;;  %v15608_v41 = vld [vmem:[%s22095_s7 + $0x214] ss:$36 sps:$4 sm:$0xff]   ;;  %v15611_v10 = vld [vmem:[%s22095_s7 + $0x1cc] ss:$36 sps:$4 sm:$0xff]  }
 0x494   :  { %v8046_v0 = vpop.f32.mrf.mxu1  ;;  %11610 = vmatmul.mubr.bf16.gmra.mxu1 %v22373_v14  ;;  %v7616_v5 = vpop.f32.mrf.mxu0 }
 0x495   :  { %22384 = vst [vmem:[#allocation38_spill] sm:$0xff] %v20549_v50  ;;  %v20554_v42 = vadd.f32 %v8046_v0, %v7649_v11  ;;  %11762 = vmatpush2.bf16.msra.mxu1 %v15600_v1  ;;  %11765 = vmatprep.mubr.bf16.mxu1 %v22358_v22  ;;  %v7651_v39 = vadd.f32 %v7616_v5, %v22385_v29  ;;  %v15606_v11 = vld [vmem:[%s22095_s7 + $0x210] ss:$36 sps:$4 sm:$0xff]  }
 0x496   :  { %v8048_v30 = vpop.f32.mrf.mxu1  ;;  %v7618_v21 = vpop.f32.mrf.mxu0  ;;  %11763 = vmatprep.subr.bf16.mxu1 %v15605_v35 }
 0x497   :  { %v20564_v4 = vadd.f32 %v8048_v30, %v7650_v54  ;;  %v7652_v47 = vadd.f32 %v7618_v21, %v7217_v2  ;;  %v15609_v2 = vld [vmem:[%s22095_s7 + $0x1c8] ss:$36 sps:$4 sm:$0xff]   ;;  %v15612_v21 = vld [vmem:[%s22095_s7 + $0x180] ss:$36 sps:$4 sm:$0xff]  }
 0x498   :  { %v8050_v46 = vpop.f32.mrf.mxu1 }
 0x499   :  { %v20566_v43 = vadd.f32 %v8050_v46, %v7651_v39  ;;  %11764 = vmatpush2.bf16.msra.mxu1 %v15603_v28  ;;  %v8411_v13 = vpop.f32.mrf.mxu0  ;;  %v15620_v46 = vld [vmem:[%s22095_s7 + $0x13c] ss:$36 sps:$4 sm:$0xff]  }
 0x49a   :  { %v8052_v1 = vpop.f32.mrf.mxu1  ;;  %v20572_v40 = vadd.f32 %v8411_v13, %v20341_v6  ;;  %11959 = vmatprep.subr.bf16.mxu1 %v15608_v41 }
 0x49b   :  { %22386 = vst [vmem:[#allocation37_spill] sm:$0xff] %v20566_v43  ;;  %v20577_v35 = vadd.f32 %v8052_v1, %v7652_v47  ;;  %v8413_v54 = vpop.f32.mrf.mxu0 }
 0x49c   :  { %v20580_v0 = vadd.f32 %v8413_v54, %v20359_v15  ;;  %v20582_v5 = vpop.f32.mrf.mxu1  ;;  %11766 = vmatmul.mubr.bf16.vlgmr.msra.gmra.mxu1 %v22359_v24  ;;  %v15614_v15 = vld [vmem:[%s22095_s7 + $0x184] ss:$36 sps:$4 sm:$0xff]  }
 0x49d   :  { %22387 = vst [vmem:[#allocation29_spill] sm:$0xff] %v20577_v35  ;;  %11775 = vmatprep.mubr.bf16.mxu1 %v22360_v12  ;;  %11960 = vmatpush1.bf16.msra.mxu1 %v15606_v11  ;;  %v20586_v6 = vpop.f32.mrf.mxu0 }
 0x49e   :  { %v20591_v29 = vpop.f32.mrf.mxu1  ;;  %11961 = vmatprep.subr.bf16.mxu1 %v15611_v10  ;;  %v15618_v10 = vld [vmem:[%s22095_s7 + $0x138] ss:$36 sps:$4 sm:$0xff]  }
 0x49f   :  { %v20596_v39 = vpop.f32.mrf.mxu0 }
 0x4a0   :  { %v20598_v28 = vpop.f32.mrf.mxu1 }
 0x4a1   :  { %11962 = vmatpush1.bf16.msra.mxu1 %v15609_v2  ;;  %v8421_v30 = vpop.f32.mrf.mxu0 }
 0x4a2   :  { %v20604_v41 = vadd.f32 %v8421_v30, %v20380_v26  ;;  %v20606_v47 = vpop.f32.mrf.mxu1  ;;  %11963 = vmatprep.subr.bf16.mxu1 %v15614_v15 }
 0x4a3   :  { %v8423_v13 = vpop.f32.mrf.mxu0 }
 0x4a4   :  { %v20612_v11 = vadd.f32 %v8423_v13, %v20393_v7  ;;  %v20614_v1 = vpop.f32.mrf.mxu1  ;;  %11776 = vmatmul.mubr.bf16.gmra.mxu1 %v22361_v62  ;;  %v15626_v7 = vld [vmem:[%s22095_s7 + $0xf4] ss:$36 sps:$4 sm:$0xff]  }
 0x4a5   :  { %11785 = vmatprep.mubr.bf16.mxu1 %v22362_v36  ;;  %11964 = vmatpush1.bf16.msra.mxu1 %v15612_v21  ;;  %v20618_v26 = vpop.f32.mrf.mxu0  ;;  %v15624_v21 = vld [vmem:[%s22095_s7 + $0xf0] ss:$36 sps:$4 sm:$0xff]  }
 0x4a6   :  { %v20623_v54 = vpop.f32.mrf.mxu1  ;;  %11965 = vmatprep.subr.bf16.mxu1 %v15620_v46  ;;  %v15632_v46 = vld [vmem:[%s22095_s7 + $0xac] ss:$36 sps:$4 sm:$0xff]  }
 0x4a7   :  { %v20628_v2 = vpop.f32.mrf.mxu0 }
 0x4a8   :  { %v20630_v15 = vpop.f32.mrf.mxu1 }
 0x4a9   :  { %11966 = vmatpush1.bf16.msra.mxu1 %v15618_v10  ;;  %v8431_v30 = vpop.f32.mrf.mxu0 }
 0x4aa   :  { %v20636_v13 = vadd.f32 %v8431_v30, %v20415_v52  ;;  %v20638_v35 = vpop.f32.mrf.mxu1  ;;  %11967 = vmatprep.subr.bf16.mxu1 %v15626_v7  ;;  %v15630_v7 = vld [vmem:[%s22095_s7 + $0xa8] ss:$36 sps:$4 sm:$0xff]  }
 0x4ab   :  { %v8433_v43 = vpop.f32.mrf.mxu0 }
 0x4ac   :  { %v20644_v50 = vadd.f32 %v8433_v43, %v20425_v33  ;;  %v20646_v10 = vpop.f32.mrf.mxu1  ;;  %11786 = vmatmul.mubr.bf16.gmra.mxu1 %v22363_v25  ;;  %v15638_v33 = vld [vmem:[%s22095_s7 + $0x64] ss:$36 sps:$4 sm:$0xff]  }
 0x4ad   :  { %11795 = vmatprep.mubr.bf16.mxu1 %v22364_v23  ;;  %11968 = vmatpush1.bf16.msra.mxu1 %v15624_v21  ;;  %v20650_v52 = vpop.f32.mrf.mxu0  ;;  %v15636_v21 = vld [vmem:[%s22095_s7 + $0x60] ss:$36 sps:$4 sm:$0xff]  }
 0x4ae   :  { %v20655_v30 = vpop.f32.mrf.mxu1  ;;  %11969 = vmatprep.subr.bf16.mxu1 %v15632_v46  ;;  %v15644_v46 = vld [vmem:[%s22095_s7 + $0x1c] ss:$36 sps:$4 sm:$0xff]  }
 0x4af   :  { %v20660_v43 = vpop.f32.mrf.mxu0 }
 0x4b0   :  { %v20662_v31 = vpop.f32.mrf.mxu1 }
 0x4b1   :  { %11970 = vmatpush1.bf16.msra.mxu1 %v15630_v7  ;;  %v8441_v56 = vpop.f32.mrf.mxu0 }
 0x4b2   :  { %v20668_v27 = vadd.f32 %v8441_v56, %v20441_v49  ;;  %v20670_v63 = vpop.f32.mrf.mxu1  ;;  %11971 = vmatprep.subr.bf16.mxu1 %v15638_v33  ;;  %v15642_v56 = vld [vmem:[%s22095_s7 + $0x18] ss:$36 sps:$4 sm:$0xff]  }
 0x4b3   :  { %v8443_v59 = vpop.f32.mrf.mxu0 }
 0x4b4   :  { %v20676_v8 = vadd.f32 %v8443_v59, %v20451_v51  ;;  %v20678_v7 = vpop.f32.mrf.mxu1  ;;  %11796 = vmatmul.mubr.bf16.gmra.mxu1 %v22365_v32  ;;  %v15650_v51 = vld [vmem:[%s22095_s7 + $0x454] ss:$36 sps:$4 sm:$0xff]  }
 0x4b5   :  { %22389 = vst [vmem:[#allocation12_spill] sm:$0xff] %v20678_v7  ;;  %11805 = vmatprep.mubr.bf16.mxu1 %v22366_v58  ;;  %11972 = vmatpush1.bf16.msra.mxu1 %v15636_v21  ;;  %v20682_v49 = vpop.f32.mrf.mxu0  ;;  %v15648_v21 = vld [vmem:[%s22095_s7 + $0x450] ss:$36 sps:$4 sm:$0xff]  }
 0x4b6   :  { %22388 = vst [vmem:[#allocation18_spill] sm:$0xff] %v20676_v8  ;;  %v20687_v33 = vpop.f32.mrf.mxu1  ;;  %11973 = vmatprep.subr.bf16.mxu1 %v15644_v46  ;;  %v15656_v46 = vld [vmem:[%s22095_s7 + $0x40c] ss:$36 sps:$4 sm:$0xff]  }
 0x4b7   :  { %22390 = vst [vmem:[#allocation24_spill] sm:$0xff] %v20687_v33  ;;  %v20692_v59 = vpop.f32.mrf.mxu0 }
 0x4b8   :  { %22391 = vst [vmem:[#allocation42_spill] sm:$0xff] %v20692_v59  ;;  %v20694_v8 = vpop.f32.mrf.mxu1 }
 0x4b9   :  { %11974 = vmatpush1.bf16.msra.mxu1 %v15642_v56  ;;  %v8451_v58 = vpop.f32.mrf.mxu0 }
 0x4ba   :  { %v20700_v32 = vadd.f32 %v8451_v58, %v20470_v3  ;;  %v20702_v7 = vpop.f32.mrf.mxu1  ;;  %11975 = vmatprep.subr.bf16.mxu1 %v15650_v51  ;;  %v15654_v3 = vld [vmem:[%s22095_s7 + $0x408] ss:$36 sps:$4 sm:$0xff]  }
 0x4bb   :  { %v8453_v33 = vpop.f32.mrf.mxu0 }
 0x4bc   :  { %v20708_v59 = vadd.f32 %v8453_v33, %v20480_v34  ;;  %v20710_v56 = vpop.f32.mrf.mxu1  ;;  %11806 = vmatmul.mubr.bf16.gmra.mxu1 %v22367_v17  ;;  %v15662_v34 = vld [vmem:[%s22095_s7 + $0x3c4] ss:$36 sps:$4 sm:$0xff]  }
 0x4bd   :  { %22393 = vst [vmem:[#allocation16_spill] sm:$0xff] %v20710_v56  ;;  %11815 = vmatprep.mubr.bf16.mxu1 %v22368_v9  ;;  %11976 = vmatpush2.bf16.msra.mxu1 %v15648_v21  ;;  %v20714_v58 = vpop.f32.mrf.mxu0  ;;  %v15660_v21 = vld [vmem:[%s22095_s7 + $0x3c0] ss:$36 sps:$4 sm:$0xff]  }
 0x4be   :  { %22392 = vst [vmem:[#allocation26_spill] sm:$0xff] %v20708_v59  ;;  %v20719_v51 = vpop.f32.mrf.mxu1  ;;  %11977 = vmatprep.subr.bf16.mxu1 %v15656_v46  ;;  %v15668_v46 = vld [vmem:[%s22095_s7 + $0x37c] ss:$36 sps:$4 sm:$0xff]  }
 0x4bf   :  { %22394 = vst [vmem:[#allocation39_spill] sm:$0xff] %v20719_v51  ;;  %v20724_v33 = vpop.f32.mrf.mxu0 }
 0x4c0   :  { %22395 = vst [vmem:[#allocation45_spill] sm:$0xff] %v20724_v33  ;;  %v20726_v59 = vpop.f32.mrf.mxu1 }
 0x4c1   :  { %11978 = vmatpush2.bf16.msra.mxu1 %v15654_v3  ;;  %v8461_v9 = vpop.f32.mrf.mxu0 }
 0x4c2   :  { %v20732_v17 = vadd.f32 %v8461_v9, %v20498_v44  ;;  %v20734_v56 = vpop.f32.mrf.mxu1  ;;  %11979 = vmatprep.subr.bf16.mxu1 %v15662_v34  ;;  %v15666_v44 = vld [vmem:[%s22095_s7 + $0x378] ss:$36 sps:$4 sm:$0xff]  }
 0x4c3   :  { %v8463_v51 = vpop.f32.mrf.mxu0 }
 0x4c4   :  { %v20740_v33 = vadd.f32 %v8463_v51, %v20508_v60  ;;  %v20742_v3 = vpop.f32.mrf.mxu1  ;;  %11816 = vmatmul.mubr.bf16.gmra.mxu1 %v22369_v38  ;;  %v15674_v60 = vld [vmem:[%s22095_s7 + $0x334] ss:$36 sps:$4 sm:$0xff]  }
 0x4c5   :  { %22397 = vst [vmem:[#allocation47_spill] sm:$0xff] %v20742_v3  ;;  %11825 = vmatprep.mubr.bf16.mxu1 %v22370_v57  ;;  %11980 = vmatpush2.bf16.msra.mxu1 %v15660_v21  ;;  %v20746_v9 = vpop.f32.mrf.mxu0  ;;  %v15672_v21 = vld [vmem:[%s22095_s7 + $0x330] ss:$36 sps:$4 sm:$0xff]  }
 0x4c6   :  { %22396 = vst [vmem:[#allocation46_spill] sm:$0xff] %v20740_v33  ;;  %v20751_v34 = vpop.f32.mrf.mxu1  ;;  %11981 = vmatprep.subr.bf16.mxu1 %v15668_v46  ;;  %v15680_v46 = vld [vmem:[%s22095_s7 + $0x2ec] ss:$36 sps:$4 sm:$0xff]  }
 0x4c7   :  { %22398 = vst [vmem:[#allocation48_spill] sm:$0xff] %v20751_v34  ;;  %v20756_v51 = vpop.f32.mrf.mxu0 }
 0x4c8   :  { %22399 = vst [vmem:[#allocation49_spill] sm:$0xff] %v20756_v51  ;;  %v20758_v33 = vpop.f32.mrf.mxu1 }
 0x4c9   :  { %11982 = vmatpush2.bf16.msra.mxu1 %v15666_v44  ;;  %v8471_v57 = vpop.f32.mrf.mxu0 }
 0x4ca   :  { %v20764_v38 = vadd.f32 %v8471_v57, %v20526_v53  ;;  %v20766_v3 = vpop.f32.mrf.mxu1  ;;  %11983 = vmatprep.subr.bf16.mxu1 %v15674_v60  ;;  %v15678_v53 = vld [vmem:[%s22095_s7 + $0x2e8] ss:$36 sps:$4 sm:$0xff]   ;;  %v22405_v60 = vld [vmem:[#allocation43_spill] sm:$0xff] }
 0x4cb   :  { %22401 = vst [vmem:[#allocation51_spill] sm:$0xff] %v20766_v3  ;;  %v8473_v34 = vpop.f32.mrf.mxu0 }
 0x4cc   :  { %22400 = vst [vmem:[#allocation50_spill] sm:$0xff] %v20764_v38  ;;  %v20772_v51 = vadd.f32 %v8473_v34, %v20536_v20  ;;  %v20774_v44 = vpop.f32.mrf.mxu1  ;;  %11826 = vmatmul.mubr.bf16.gmra.mxu1 %v22371_v16  ;;  %v6711_v38 = vadd.f32 %v22405_v60, %v19546_v61  ;;  %v15686_v20 = vld [vmem:[%s22095_s7 + $0x2a4] ss:$36 sps:$4 sm:$0xff]   ;;  %v15692_v60 = vld [vmem:[%s22095_s7 + $0x25c] ss:$36 sps:$4 sm:$0xff]  }
 0x4cd   :  { %22403 = vst [vmem:[#allocation53_spill] sm:$0xff] %v20774_v44  ;;  %11835 = vmatprep.mubr.bf16.mxu1 %v22372_v19  ;;  %11984 = vmatpush2.bf16.msra.mxu1 %v15672_v21  ;;  %v20778_v57 = vpop.f32.mrf.mxu0  ;;  %v15684_v16 = vld [vmem:[%s22095_s7 + $0x2a0] ss:$36 sps:$4 sm:$0xff]  }
 0x4ce   :  { %22402 = vst [vmem:[#allocation52_spill] sm:$0xff] %v20772_v51  ;;  %22404 = vst [vmem:[#allocation54_spill] sm:$0xff] %v20778_v57  ;;  %v20785_v3 = vpop.f32.mrf.mxu1  ;;  %11985 = vmatprep.subr.bf16.mxu1 %v15680_v46  ;;  %v22409_v51 = vld [vmem:[#allocation22_spill] sm:$0xff] }
 0x4cf   :  { %22406 = vst [vmem:[#allocation43_spill] sm:$0xff] %v20785_v3  ;;  %v20790_v34 = vpop.f32.mrf.mxu0  ;;  %v7189_v44 = vadd.f32 %v22409_v51, %v6711_v38 }
 0x4d0   :  { %22407 = vst [vmem:[#allocation55_spill] sm:$0xff] %v20790_v34  ;;  %v20792_v19 = vpop.f32.mrf.mxu1 }
 0x4d1   :  { %22408 = vst [vmem:[#allocation56_spill] sm:$0xff] %v20792_v19  ;;  %11986 = vmatpush2.bf16.msra.mxu1 %v15678_v53  ;;  %v8481_v21 = vpop.f32.mrf.mxu0  ;;  %v22410_v19 = vld [vmem:[#allocation33_spill] sm:$0xff] }
 0x4d2   :  { %v20799_v61 = vadd.f32 %v8481_v21, %v20554_v42  ;;  %v20801_v46 = vpop.f32.mrf.mxu1  ;;  %11987 = vmatprep.subr.bf16.mxu1 %v15686_v20  ;;  %v7624_v53 = vadd.f32 %v22410_v19, %v7189_v44  ;;  %v15690_v42 = vld [vmem:[%s22095_s7 + $0x258] ss:$36 sps:$4 sm:$0xff]  }
 0x4d3   :  { %v8483_v3 = vpop.f32.mrf.mxu0  ;;  %v15720_v19 = vld [vmem:[%s22095_s7 + $0x458] ss:$36 sps:$4 sm:$0xff]  }
 0x4d4   :  { %v20808_v34 = vadd.f32 %v8483_v3, %v20564_v4  ;;  %v20810_v57 = vpop.f32.mrf.mxu1  ;;  %11836 = vmatmul.mubr.bf16.gmra.mxu1 %v22373_v14  ;;  %v22413_v3 = vld [vmem:[#allocation23_spill] sm:$0xff]  ;;  %v15721_v14 = vld [vmem:[%s22095_s7 + $0x218] ss:$36 sps:$4 sm:$0xff]  }
 0x4d5   :  { %11988 = vmatpush2.bf16.msra.mxu1 %v15684_v16  ;;  %11991 = vmatprep.mubr.bf16.mxu1 %v22358_v22  ;;  %v20814_v38 = vpop.f32.mrf.mxu0  ;;  %v8058_v44 = vadd.f32 %v22413_v3, %v7624_v53  ;;  %v22414_v16 = vld [vmem:[#allocation21_spill] sm:$0xff] }
 0x4d6   :  { %22411 = vst [vmem:[#allocation22_spill] sm:$0xff] %v20808_v34  ;;  %v20819_v51 = vpop.f32.mrf.mxu1  ;;  %11989 = vmatprep.subr.bf16.mxu1 %v15692_v60  ;;  %v8492_v20 = vadd.f32 %v20586_v6, %v22414_v16  ;;  %v8925_v60 = vadd.f32 %v20582_v5, %v20572_v40  ;;  %v15725_v6 = vld [vmem:[%s22095_s7 + $0x410] ss:$36 sps:$4 sm:$0xff]  }
 0x4d7   :  { %22412 = vst [vmem:[#allocation33_spill] sm:$0xff] %v20819_v51  ;;  %v20824_v4 = vpop.f32.mrf.mxu0  ;;  %v8493_v51 = vadd.f32 %v20596_v39, %v8058_v44  ;;  %v15726_v5 = vld [vmem:[%s22095_s7 + $0x1d0] ss:$36 sps:$4 sm:$0xff]  }
 0x4d8   :  { %v20829_v21 = vpop.f32.mrf.mxu1  ;;  %v8927_v3 = vadd.f32 %v20598_v28, %v8492_v20  ;;  %v8496_v28 = vadd.f32 %v20618_v26, %v20399_v18 }
 0x4d9   :  { %22415 = vst [vmem:[#allocation23_spill] sm:$0xff] %v20829_v21  ;;  %11990 = vmatpush2.bf16.msra.mxu1 %v15690_v42  ;;  %v9281_v22 = vpop.f32.mrf.mxu0  ;;  %v8926_v42 = vadd.f32 %v20591_v29, %v20580_v0  ;;  %v8928_v39 = vadd.f32 %v20606_v47, %v8493_v51  ;;  %v8929_v47 = vadd.f32 %v20614_v1, %v20604_v41  ;;  %v15735_v41 = vld [vmem:[%s22095_s7 + $0x380] ss:$36 sps:$4 sm:$0xff]  }
 0x4da   :  { %v20837_v34 = vpop.f32.mrf.mxu1  ;;  %14441 = vmatprep.subr.bf16.mxu1 %v15720_v19  ;;  %v9360_v16 = vadd.f32 %v9281_v22, %v8925_v60  ;;  %v15730_v22 = vld [vmem:[%s22095_s7 + $0x3c8] ss:$36 sps:$4 sm:$0xff]  }
 0x4db   :  { %v9283_v53 = vpop.f32.mrf.mxu0 }
 0x4dc   :  { %v20845_v21 = vpop.f32.mrf.mxu1  ;;  %11992 = vmatmul.mubr.bf16.vlgmr.msra.gmra.mxu1 %v22359_v24  ;;  %v9361_v19 = vadd.f32 %v9283_v53, %v8926_v42  ;;  %v8497_v53 = vadd.f32 %v20628_v2, %v20408_v37 }
 0x4dd   :  { %22416 = vst [vmem:[#allocation21_spill] sm:$0xff] %v20845_v21  ;;  %12001 = vmatprep.mubr.bf16.mxu1 %v22360_v12  ;;  %v9285_v40 = vpop.f32.mrf.mxu0  ;;  %14442 = vmatpush3.bf16.msra.mxu1 %v15721_v14  ;;  %v9392_v14 = vmax.f32 %v9360_v16, 0.0  ;;  %v8930_v16 = vadd.f32 %v20623_v54, %v20612_v11  ;;  %v15707_v11 = vld [vmem:[%s22095_s7 + $0x63c] ss:$36 sps:$4 sm:$0xff]  }
 0x4de   :  { %v9362_v44 = vadd.f32 %v9285_v40, %v8927_v3  ;;  %v20853_v0 = vpop.f32.mrf.mxu1  ;;  %14443 = vmatprep.subr.bf16.mxu1 %v15725_v6  ;;  %v15731_v6 = vld [vmem:[%s22095_s7 + $0x188] ss:$36 sps:$4 sm:$0xff]   ;;  %v9393_v42 = vmax.f32 %v9361_v19, 0.0  ;;  %v8931_v40 = vadd.f32 %v20630_v15, %v8496_v28  ;;  %v15736_v54 = vld [vmem:[%s22095_s7 + $0x140] ss:$36 sps:$4 sm:$0xff]   ;;  %v8932_v15 = vadd.f32 %v20638_v35, %v8497_v53 }
 0x4df   :  { %v9287_v29 = vpop.f32.mrf.mxu0  ;;  %v15740_v28 = vld [vmem:[%s22095_s7 + $0x338] ss:$36 sps:$4 sm:$0xff]   ;;  %v8933_v53 = vadd.f32 %v20646_v10, %v20636_v13  ;;  %v8934_v10 = vadd.f32 %v20655_v30, %v20644_v50 }
 0x4e0   :  { %v9394_v20 = vmax.f32 %v9362_v44, 0.0  ;;  %v9363_v60 = vadd.f32 %v9287_v29, %v8928_v39  ;;  %v20860_v21 = vpop.f32.mrf.mxu1  ;;  %v15702_v39 = vld [vmem:[%s22095_s7 + $0x680] ss:$36 sps:$4 sm:$0xff]   ;;  %v15741_v13 = vld [vmem:[%s22095_s7 + $0xf8] ss:$36 sps:$4 sm:$0xff]  }
 0x4e1   :  { %v9291_v51 = vpop.f32.mrf.mxu0  ;;  %14444 = vmatpush3.bf16.msra.mxu1 %v15726_v5 }
 0x4e2   :  { %v20869_v3 = vpack.c.bf16 %v9394_v20, %v9392_v14  ;;  %v9395_v18 = vmax.f32 %v9363_v60, 0.0  ;;  %v20871_v26 = vpop.f32.mrf.mxu1  ;;  %14445 = vmatprep.subr.bf16.mxu1 %v15730_v22  ;;  %v9364_v37 = vadd.f32 %v9291_v51, %v8929_v47  ;;  %v8500_v20 = vadd.f32 %v20650_v52, %v20428_v45 }
 0x4e3   :  { %v9293_v1 = vpop.f32.mrf.mxu0  ;;  %v8501_v45 = vadd.f32 %v20660_v43, %v20437_v55 }
 0x4e4   :  { %v20879_v5 = vpack.c.bf16 %v9395_v18, %v9393_v42  ;;  %v20881_v2 = vpop.f32.mrf.mxu1  ;;  %12002 = vmatmul.mubr.bf16.gmra.mxu1 %v22361_v62  ;;  %v9365_v44 = vadd.f32 %v9293_v1, %v8930_v16  ;;  %v9396_v60 = vmax.f32 %v9364_v37, 0.0  ;;  %v15710_v18 = vld [vmem:[%s22095_s7 + $0x5f4] ss:$36 sps:$4 sm:$0xff]   ;;  %v8935_v55 = vadd.f32 %v20662_v31, %v8500_v20  ;;  %v15713_v31 = vld [vmem:[%s22095_s7 + $0x5ac] ss:$36 sps:$4 sm:$0xff]  }
 0x4e5   :  { %12011 = vmatprep.mubr.bf16.mxu1 %v22362_v36  ;;  %v9295_v19 = vpop.f32.mrf.mxu0  ;;  %14446 = vmatpush3.bf16.msra.mxu1 %v15731_v6  ;;  %v15705_v6 = vld [vmem:[%s22095_s7 + $0x638] ss:$36 sps:$4 sm:$0xff]   ;;  %v15745_v37 = vld [vmem:[%s22095_s7 + $0x2f0] ss:$36 sps:$4 sm:$0xff]   ;;  %v8936_v30 = vadd.f32 %v20670_v63, %v8501_v45  ;;  %v8504_v63 = vadd.f32 %v20682_v49, %v20456_v48  ;;  %v15716_v45 = vld [vmem:[%s22095_s7 + $0x564] ss:$36 sps:$4 sm:$0xff]  }
 0x4e6   :  { %v9366_v22 = vadd.f32 %v9295_v19, %v8931_v40  ;;  %v20895_v29 = vpop.f32.mrf.mxu1  ;;  %11426 = vmatprep.mubr.bf16.mxu0 %v20879_v5  ;;  %14447 = vmatprep.subr.bf16.mxu1 %v15735_v41  ;;  %v9397_v52 = vmax.f32 %v9365_v44, 0.0  ;;  %v22418_v48 = vld [vmem:[#allocation20_spill] sm:$0xff]  ;;  %v22419_v49 = vld [vmem:[#allocation42_spill] sm:$0xff] }
 0x4e7   :  { %v9297_v14 = vpop.f32.mrf.mxu0  ;;  %11427 = vmatmul.mubr.bf16.vlgmr.msra.gmra.mxu0 %v20869_v3 }
 0x4e8   :  { %v9398_v47 = vmax.f32 %v9366_v22, 0.0  ;;  %v9367_v35 = vadd.f32 %v9297_v14, %v8932_v15  ;;  %v20904_v51 = vpop.f32.mrf.mxu1  ;;  %11621 = vmatpush1.bf16.msra.mxu0 %v15702_v39  ;;  %v15746_v22 = vld [vmem:[%s22095_s7 + $0xb0] ss:$36 sps:$4 sm:$0xff]   ;;  %v15750_v14 = vld [vmem:[%s22095_s7 + $0x2a8] ss:$36 sps:$4 sm:$0xff]  }
 0x4e9   :  { %v9301_v42 = vpop.f32.mrf.mxu0  ;;  %11622 = vmatprep.subr.bf16.mxu0 %v15707_v11  ;;  %14448 = vmatpush3.bf16.msra.mxu1 %v15736_v54  ;;  %v15708_v11 = vld [vmem:[%s22095_s7 + $0x5f0] ss:$36 sps:$4 sm:$0xff]  }
 0x4ea   :  { %v20916_v41 = vpack.c.bf16 %v9398_v47, %v9396_v60  ;;  %v9399_v1 = vmax.f32 %v9367_v35, 0.0  ;;  %v20918_v16 = vpop.f32.mrf.mxu1  ;;  %14449 = vmatprep.subr.bf16.mxu1 %v15740_v28  ;;  %v9368_v39 = vadd.f32 %v9301_v42, %v8933_v53  ;;  %v22417_v53 = vld [vmem:[#allocation12_spill] sm:$0xff] }
 0x4eb   :  { %v9303_v40 = vpop.f32.mrf.mxu0  ;;  %v8937_v42 = vadd.f32 %v22417_v53, %v20668_v27  ;;  %v15751_v27 = vld [vmem:[%s22095_s7 + $0x68] ss:$36 sps:$4 sm:$0xff]  }
 0x4ec   :  { %v20929_v43 = vpack.c.bf16 %v9399_v1, %v9397_v52  ;;  %v20931_v19 = vpop.f32.mrf.mxu1  ;;  %12012 = vmatmul.mubr.bf16.gmra.mxu1 %v22363_v25  ;;  %11623 = vmatpush1.bf16.msra.mxu0 %v15705_v6  ;;  %v9369_v54 = vadd.f32 %v9303_v40, %v8934_v10  ;;  %v9400_v20 = vmax.f32 %v9368_v39, 0.0  ;;  %v15711_v6 = vld [vmem:[%s22095_s7 + $0x5a8] ss:$36 sps:$4 sm:$0xff]   ;;  %v8505_v52 = vadd.f32 %v22419_v49, %v22418_v48 }
 0x4ed   :  { %12021 = vmatprep.mubr.bf16.mxu1 %v22364_v23  ;;  %v9305_v50 = vpop.f32.mrf.mxu0  ;;  %11624 = vmatprep.subr.bf16.mxu0 %v15710_v18 }
 0x4ee   :  { %v9370_v15 = vadd.f32 %v9305_v50, %v8935_v55  ;;  %v20942_v44 = vpop.f32.mrf.mxu1  ;;  %11436 = vmatprep.mubr.bf16.mxu0 %v20929_v43  ;;  %14450 = vmatpush3.bf16.msra.mxu1 %v15741_v13  ;;  %v9401_v1 = vmax.f32 %v9369_v54, 0.0  ;;  %v22422_v55 = vld [vmem:[#allocation24_spill] sm:$0xff]  ;;  %v15755_v50 = vld [vmem:[%s22095_s7 + $0x260] ss:$36 sps:$4 sm:$0xff]  }
 0x4ef   :  { %v9307_v28 = vpop.f32.mrf.mxu0  ;;  %11437 = vmatmul.mubr.bf16.gmra.mxu0 %v20916_v41  ;;  %14451 = vmatprep.subr.bf16.mxu1 %v15745_v37  ;;  %v22421_v37 = vld [vmem:[#allocation18_spill] sm:$0xff] }
 0x4f0   :  { %v9402_v60 = vmax.f32 %v9370_v15, 0.0  ;;  %v9371_v47 = vadd.f32 %v9307_v28, %v8936_v30  ;;  %v20954_v35 = vpop.f32.mrf.mxu1  ;;  %11625 = vmatpush1.bf16.msra.mxu0 %v15708_v11  ;;  %v8938_v39 = vadd.f32 %v22422_v55, %v22421_v37  ;;  %v15714_v28 = vld [vmem:[%s22095_s7 + $0x560] ss:$36 sps:$4 sm:$0xff]   ;;  %v15724_v55 = vld [vmem:[%s22095_s7 + $0x4d4] ss:$36 sps:$4 sm:$0xff]  }
 0x4f1   :  { %v9311_v18 = vpop.f32.mrf.mxu0  ;;  %11626 = vmatprep.subr.bf16.mxu0 %v15713_v31  ;;  %v8939_v31 = vadd.f32 %v20694_v8, %v8504_v63  ;;  %v15719_v8 = vld [vmem:[%s22095_s7 + $0x51c] ss:$36 sps:$4 sm:$0xff]   ;;  %v8940_v63 = vadd.f32 %v20702_v7, %v8505_v52 }
 0x4f2   :  { %v20966_v13 = vpack.c.bf16 %v9402_v60, %v9400_v20  ;;  %v9403_v10 = vmax.f32 %v9371_v47, 0.0  ;;  %v20968_v40 = vpop.f32.mrf.mxu1  ;;  %14452 = vmatpush3.bf16.msra.mxu1 %v15746_v22  ;;  %v9372_v54 = vadd.f32 %v9311_v18, %v8937_v42  ;;  %v22424_v22 = vld [vmem:[#allocation28_spill] sm:$0xff]  ;;  %v22425_v20 = vld [vmem:[#allocation31_spill] sm:$0xff] }
 0x4f3   :  { %22420 = vst [vmem:[#allocation12_spill] sm:$0xff] %v20968_v40  ;;  %v9313_v11 = vpop.f32.mrf.mxu0  ;;  %14453 = vmatprep.subr.bf16.mxu1 %v15750_v14  ;;  %v22427_v18 = vld [vmem:[#allocation40_spill] sm:$0xff]  ;;  %v22463_v40 = vld [vmem:[#allocation27_spill] sm:$0xff] }
 0x4f4   :  { %v20979_v30 = vpack.c.bf16 %v9403_v10, %v9401_v1  ;;  %v20981_v15 = vpop.f32.mrf.mxu1  ;;  %12022 = vmatmul.mubr.bf16.gmra.mxu1 %v22424_v22  ;;  %11627 = vmatpush1.bf16.msra.mxu0 %v15711_v6  ;;  %v9373_v60 = vadd.f32 %v9313_v11, %v8938_v39  ;;  %v15756_v6 = vld [vmem:[%s22095_s7 + $0x20] ss:$36 sps:$4 sm:$0xff]   ;;  %v9404_v48 = vmax.f32 %v9372_v54, 0.0  ;;  %v15717_v1 = vld [vmem:[%s22095_s7 + $0x518] ss:$36 sps:$4 sm:$0xff]   ;;  %v22429_v10 = vld [vmem:[#allocation16_spill] sm:$0xff] }
 0x4f5   :  { %22423 = vst [vmem:[#allocation20_spill] sm:$0xff] %v20981_v15  ;;  %12031 = vmatprep.mubr.bf16.mxu1 %v22425_v20  ;;  %v9315_v14 = vpop.f32.mrf.mxu0  ;;  %11628 = vmatprep.subr.bf16.mxu0 %v15716_v45  ;;  %v8508_v45 = vadd.f32 %v20714_v58, %v22427_v18  ;;  %v22430_v58 = vld [vmem:[#allocation17_spill] sm:$0xff] }
 0x4f6   :  { %v9374_v47 = vadd.f32 %v9315_v14, %v8939_v31  ;;  %v20992_v53 = vpop.f32.mrf.mxu1  ;;  %11446 = vmatprep.mubr.bf16.mxu0 %v20979_v30  ;;  %14454 = vmatpush3.bf16.msra.mxu1 %v15751_v27  ;;  %v8941_v27 = vadd.f32 %v22429_v10, %v20700_v32  ;;  %v22431_v39 = vld [vmem:[#allocation45_spill] sm:$0xff]  ;;  %v22433_v14 = vld [vmem:[#allocation26_spill] sm:$0xff] }
 0x4f7   :  { %22426 = vst [vmem:[#allocation42_spill] sm:$0xff] %v20992_v53  ;;  %v9317_v42 = vpop.f32.mrf.mxu0  ;;  %11447 = vmatmul.mubr.bf16.gmra.mxu0 %v20966_v13  ;;  %14455 = vmatprep.subr.bf16.mxu1 %v15755_v50  ;;  %v8509_v11 = vadd.f32 %v22431_v39, %v22430_v58  ;;  %v9405_v50 = vmax.f32 %v9373_v60, 0.0  ;;  %v15722_v60 = vld [vmem:[%s22095_s7 + $0x4d0] ss:$36 sps:$4 sm:$0xff]  }
 0x4f8   :  { %v9406_v7 = vmax.f32 %v9374_v47, 0.0  ;;  %v9375_v49 = vadd.f32 %v9317_v42, %v8940_v63  ;;  %v21001_v52 = vpop.f32.mrf.mxu1  ;;  %11629 = vmatpush1.bf16.msra.mxu0 %v15714_v28  ;;  %v22434_v63 = vld [vmem:[#allocation39_spill] sm:$0xff] }
 0x4f9   :  { %22428 = vst [vmem:[#allocation18_spill] sm:$0xff] %v21001_v52  ;;  %v9321_v37 = vpop.f32.mrf.mxu0  ;;  %11630 = vmatprep.subr.bf16.mxu0 %v15719_v8  ;;  %v8942_v47 = vadd.f32 %v22434_v63, %v22433_v14  ;;  %v8943_v8 = vadd.f32 %v20726_v59, %v8508_v45  ;;  %v22436_v52 = vld [vmem:[#allocation19_spill] sm:$0xff]  ;;  %v15729_v59 = vld [vmem:[%s22095_s7 + $0x48c] ss:$36 sps:$4 sm:$0xff]   ;;  %v8944_v45 = vadd.f32 %v20734_v56, %v8509_v11 }
 0x4fa   :  { %v21013_v31 = vpack.c.bf16 %v9406_v7, %v9404_v48  ;;  %v9407_v54 = vmax.f32 %v9375_v49, 0.0  ;;  %v21015_v28 = vpop.f32.mrf.mxu1  ;;  %14456 = vmatpush3.bf16.msra.mxu1 %v15756_v6  ;;  %v9376_v18 = vadd.f32 %v9321_v37, %v8941_v27  ;;  %v22437_v48 = vld [vmem:[#allocation14_spill] sm:$0xff]  ;;  %v22439_v37 = vld [vmem:[#allocation41_spill] sm:$0xff]  ;;  %v15727_v56 = vld [vmem:[%s22095_s7 + $0x488] ss:$36 sps:$4 sm:$0xff]  }
 0x4fb   :  { %22432 = vst [vmem:[#allocation24_spill] sm:$0xff] %v21015_v28  ;;  %v9323_v32 = vpop.f32.mrf.mxu0  ;;  %v8512_v58 = vadd.f32 %v20746_v9, %v22439_v37  ;;  %v22441_v11 = vld [vmem:[#allocation47_spill] sm:$0xff] }
 0x4fc   :  { %v21020_v42 = vpack.c.bf16 %v9407_v54, %v9405_v50  ;;  %v21022_v10 = vpop.f32.mrf.mxu1  ;;  %12032 = vmatmul.mubr.bf16.gmra.mxu1 %v22436_v52  ;;  %11631 = vmatpush1.bf16.msra.mxu0 %v15717_v1  ;;  %v9377_v7 = vadd.f32 %v9323_v32, %v8942_v47  ;;  %v9408_v39 = vmax.f32 %v9376_v18, 0.0  ;;  %v8945_v14 = vadd.f32 %v22441_v11, %v20732_v17  ;;  %v15734_v47 = vld [vmem:[%s22095_s7 + $0x8c4] ss:$36 sps:$4 sm:$0xff]   ;;  %v22443_v32 = vld [vmem:[#allocation49_spill] sm:$0xff] }
 0x4fd   :  { %22435 = vst [vmem:[#allocation28_spill] sm:$0xff] %v21022_v10  ;;  %12041 = vmatprep.mubr.bf16.mxu1 %v22437_v48  ;;  %v9325_v6 = vpop.f32.mrf.mxu0  ;;  %11632 = vmatprep.subr.bf16.mxu0 %v15724_v55  ;;  %v22442_v9 = vld [vmem:[#allocation11_spill] sm:$0xff]  ;;  %v8947_v17 = vadd.f32 %v20758_v33, %v8512_v58  ;;  %v22448_v10 = vld [vmem:[#allocation25_spill] sm:$0xff] }
 0x4fe   :  { %v9378_v49 = vadd.f32 %v9325_v6, %v8943_v8  ;;  %v21033_v27 = vpop.f32.mrf.mxu1  ;;  %11456 = vmatprep.mubr.bf16.mxu0 %v21020_v42  ;;  %v8513_v8 = vadd.f32 %v22443_v32, %v22442_v9  ;;  %v9409_v18 = vmax.f32 %v9377_v7, 0.0  ;;  %v15732_v7 = vld [vmem:[%s22095_s7 + $0x8c0] ss:$36 sps:$4 sm:$0xff]   ;;  %v22452_v32 = vld [vmem:[#allocation13_spill] sm:$0xff] }
 0x4ff   :  { %22438 = vst [vmem:[#allocation31_spill] sm:$0xff] %v21033_v27  ;;  %v9327_v1 = vpop.f32.mrf.mxu0  ;;  %11457 = vmatmul.mubr.bf16.gmra.mxu0 %v21013_v31  ;;  %v15739_v33 = vld [vmem:[%s22095_s7 + $0x87c] ss:$36 sps:$4 sm:$0xff]  }
 0x500   :  { %v9410_v55 = vmax.f32 %v9378_v49, 0.0  ;;  %v9379_v50 = vadd.f32 %v9327_v1, %v8944_v45  ;;  %v21039_v54 = vpop.f32.mrf.mxu1  ;;  %11633 = vmatpush1.bf16.msra.mxu0 %v15722_v60  ;;  %v22445_v49 = vld [vmem:[#allocation46_spill] sm:$0xff]  ;;  %v22446_v1 = vld [vmem:[#allocation48_spill] sm:$0xff]  ;;  %v22450_v58 = vld [vmem:[#allocation51_spill] sm:$0xff] }
 0x501   :  { %22440 = vst [vmem:[#allocation40_spill] sm:$0xff] %v21039_v54  ;;  %v9331_v63 = vpop.f32.mrf.mxu0  ;;  %11634 = vmatprep.subr.bf16.mxu0 %v15729_v59  ;;  %v8946_v37 = vadd.f32 %v22446_v1, %v22445_v49 }
 0x502   :  { %v21051_v6 = vpack.c.bf16 %v9410_v55, %v9408_v39  ;;  %v9411_v60 = vmax.f32 %v9379_v50, 0.0  ;;  %v21053_v45 = vpop.f32.mrf.mxu1  ;;  %v9380_v11 = vadd.f32 %v9331_v63, %v8945_v14  ;;  %v22449_v39 = vld [vmem:[#allocation32_spill] sm:$0xff]  ;;  %v8948_v50 = vadd.f32 %v22450_v58, %v8513_v8  ;;  %v22455_v8 = vld [vmem:[#allocation50_spill] sm:$0xff] }
 0x503   :  { %22444 = vst [vmem:[#allocation16_spill] sm:$0xff] %v21053_v45  ;;  %v9333_v54 = vpop.f32.mrf.mxu0  ;;  %v15744_v58 = vld [vmem:[%s22095_s7 + $0x834] ss:$36 sps:$4 sm:$0xff]  }
 0x504   :  { %v21058_v59 = vpack.c.bf16 %v9411_v60, %v9409_v18  ;;  %v21060_v27 = vpop.f32.mrf.mxu1  ;;  %12042 = vmatmul.mubr.bf16.gmra.mxu1 %v22448_v10  ;;  %11635 = vmatpush1.bf16.msra.mxu0 %v15727_v56  ;;  %v9381_v14 = vadd.f32 %v9333_v54, %v8946_v37  ;;  %v22453_v18 = vld [vmem:[#allocation54_spill] sm:$0xff]  ;;  %v9412_v49 = vmax.f32 %v9380_v11, 0.0  ;;  %v22456_v37 = vld [vmem:[#allocation53_spill] sm:$0xff]  ;;  %v22458_v11 = vld [vmem:[#allocation55_spill] sm:$0xff] }
 0x505   :  { %22447 = vst [vmem:[#allocation17_spill] sm:$0xff] %v21060_v27  ;;  %12051 = vmatprep.mubr.bf16.mxu1 %v22449_v39  ;;  %v9335_v55 = vpop.f32.mrf.mxu0  ;;  %11636 = vmatprep.subr.bf16.mxu0 %v15734_v47  ;;  %v8516_v60 = vadd.f32 %v22453_v18, %v22452_v32  ;;  %v15737_v54 = vld [vmem:[%s22095_s7 + $0x878] ss:$36 sps:$4 sm:$0xff]  }
 0x506   :  { %v9382_v63 = vadd.f32 %v9335_v55, %v8947_v17  ;;  %v21071_v9 = vpop.f32.mrf.mxu1  ;;  %11466 = vmatprep.mubr.bf16.mxu0 %v21058_v59  ;;  %v8949_v17 = vadd.f32 %v22456_v37, %v22455_v8  ;;  %v22457_v32 = vld [vmem:[#allocation38_spill] sm:$0xff]  ;;  %v22461_v8 = vld [vmem:[#allocation56_spill] sm:$0xff] }
 0x507   :  { %22451 = vst [vmem:[#allocation45_spill] sm:$0xff] %v21071_v9  ;;  %v9337_v56 = vpop.f32.mrf.mxu0  ;;  %11467 = vmatmul.mubr.bf16.gmra.mxu0 %v21051_v6  ;;  %v22460_v9 = vld [vmem:[#allocation43_spill] sm:$0xff]  ;;  %v8951_v37 = vadd.f32 %v22461_v8, %v8516_v60 }
 0x508   :  { %v9414_v47 = vmax.f32 %v9382_v63, 0.0  ;;  %v9383_v1 = vadd.f32 %v9337_v56, %v8948_v50  ;;  %v21077_v27 = vpop.f32.mrf.mxu1  ;;  %11637 = vmatpush2.bf16.msra.mxu0 %v15732_v7  ;;  %v8517_v63 = vadd.f32 %v22458_v11, %v22457_v32  ;;  %v9413_v50 = vmax.f32 %v9381_v14, 0.0  ;;  %v15742_v14 = vld [vmem:[%s22095_s7 + $0x830] ss:$36 sps:$4 sm:$0xff]  }
 0x509   :  { %22454 = vst [vmem:[#allocation26_spill] sm:$0xff] %v21077_v27  ;;  %v9341_v55 = vpop.f32.mrf.mxu0  ;;  %11638 = vmatprep.subr.bf16.mxu0 %v15739_v33  ;;  %v22459_v27 = vld [vmem:[#allocation52_spill] sm:$0xff] }
 0x50a   :  { %v21089_v56 = vpack.c.bf16 %v9414_v47, %v9412_v49  ;;  %v9415_v7 = vmax.f32 %v9383_v1, 0.0  ;;  %v21091_v18 = vpop.f32.mrf.mxu1  ;;  %v8950_v45 = vadd.f32 %v22460_v9, %v22459_v27  ;;  %v9384_v53 = vadd.f32 %v9341_v55, %v8949_v17  ;;  %v22464_v49 = vld [vmem:[#allocation44_spill] sm:$0xff]  ;;  %v22466_v55 = vld [vmem:[#allocation37_spill] sm:$0xff] }
 0x50b   :  { %v9343_v28 = vpop.f32.mrf.mxu0  ;;  %v15749_v27 = vld [vmem:[%s22095_s7 + $0x7ec] ss:$36 sps:$4 sm:$0xff]   ;;  %v8952_v9 = vadd.f32 %v20801_v46, %v8517_v63  ;;  %v8520_v32 = vadd.f32 %v20814_v38, %v22466_v55  ;;  %v15754_v63 = vld [vmem:[%s22095_s7 + $0x7a4] ss:$36 sps:$4 sm:$0xff]  }
 0x50c   :  { %v21096_v33 = vpack.c.bf16 %v9415_v7, %v9413_v50  ;;  %v21098_v15 = vpop.f32.mrf.mxu1  ;;  %12052 = vmatmul.mubr.bf16.gmra.mxu1 %v22463_v40  ;;  %11639 = vmatpush2.bf16.msra.mxu0 %v15737_v54  ;;  %v9385_v60 = vadd.f32 %v9343_v28, %v8950_v45  ;;  %v9416_v11 = vmax.f32 %v9384_v53, 0.0  ;;  %v15747_v46 = vld [vmem:[%s22095_s7 + $0x7e8] ss:$36 sps:$4 sm:$0xff]   ;;  %v8953_v28 = vadd.f32 %v20810_v57, %v20799_v61  ;;  %v22468_v38 = vld [vmem:[#allocation29_spill] sm:$0xff]  ;;  %v22471_v57 = vld [vmem:[#allocation23_spill] sm:$0xff] }
 0x50d   :  { %22462 = vst [vmem:[#allocation39_spill] sm:$0xff] %v21098_v15  ;;  %12061 = vmatprep.mubr.bf16.mxu1 %v22464_v49  ;;  %v9345_v47 = vpop.f32.mrf.mxu0  ;;  %11640 = vmatprep.subr.bf16.mxu0 %v15744_v58  ;;  %v8521_v53 = vadd.f32 %v20824_v4, %v22468_v38  ;;  %v8955_v61 = vadd.f32 %v22471_v57, %v8520_v32  ;;  %v22472_v15 = vld [vmem:[#allocation30_spill] sm:$0xff]  ;;  %v15752_v4 = vld [vmem:[%s22095_s7 + $0x7a0] ss:$36 sps:$4 sm:$0xff]  }
 0x50e   :  { %v9386_v1 = vadd.f32 %v9345_v47, %v8951_v37  ;;  %v21109_v17 = vpop.f32.mrf.mxu1  ;;  %11476 = vmatprep.mubr.bf16.mxu0 %v21096_v33  ;;  %v9417_v8 = vmax.f32 %v9385_v60, 0.0  ;;  %v22473_v60 = vld [vmem:[#allocation15_spill] sm:$0xff] }
 0x50f   :  { %22465 = vst [vmem:[#allocation19_spill] sm:$0xff] %v21109_v17  ;;  %v9347_v54 = vpop.f32.mrf.mxu0  ;;  %11477 = vmatmul.mubr.bf16.gmra.mxu0 %v21089_v56  ;;  %v15759_v32 = vld [vmem:[%s22095_s7 + $0x75c] ss:$36 sps:$4 sm:$0xff]  }
 0x510   :  { %v9418_v58 = vmax.f32 %v9386_v1, 0.0  ;;  %v9387_v50 = vadd.f32 %v9347_v54, %v8952_v9  ;;  %v21115_v7 = vpop.f32.mrf.mxu1  ;;  %11641 = vmatpush2.bf16.msra.mxu0 %v15742_v14  ;;  %v22469_v9 = vld [vmem:[#allocation22_spill] sm:$0xff]  ;;  %v22470_v1 = vld [vmem:[#allocation33_spill] sm:$0xff] }
 0x511   :  { %22467 = vst [vmem:[#allocation14_spill] sm:$0xff] %v21115_v7  ;;  %v9351_v45 = vpop.f32.mrf.mxu0  ;;  %11642 = vmatprep.subr.bf16.mxu0 %v15749_v27  ;;  %v8954_v54 = vadd.f32 %v22470_v1, %v22469_v9 }
 0x512   :  { %v21127_v37 = vpack.c.bf16 %v9418_v58, %v9416_v11  ;;  %v9419_v14 = vmax.f32 %v9387_v50, 0.0  ;;  %v21129_v47 = vpop.f32.mrf.mxu1  ;;  %v9388_v7 = vadd.f32 %v9351_v45, %v8953_v28  ;;  %v8956_v58 = vadd.f32 %v20837_v34, %v8521_v53  ;;  %v15762_v34 = vld [vmem:[%s22095_s7 + $0x714] ss:$36 sps:$4 sm:$0xff]  }
 0x513   :  { %v9353_v55 = vpop.f32.mrf.mxu0 }
 0x514   :  { %v21134_v27 = vpack.c.bf16 %v9419_v14, %v9417_v8  ;;  %v21136_v17 = vpop.f32.mrf.mxu1  ;;  %12062 = vmatmul.mubr.bf16.gmra.mxu1 %v22472_v15  ;;  %11643 = vmatpush2.bf16.msra.mxu0 %v15747_v46  ;;  %v9389_v50 = vadd.f32 %v9353_v55, %v8954_v54  ;;  %v9420_v38 = vmax.f32 %v9388_v7, 0.0 }
 0x515   :  { %12217 = vmatprep.mubr.bf16.mxu1 %v22473_v60  ;;  %v9355_v11 = vpop.f32.mrf.mxu0  ;;  %11644 = vmatprep.subr.bf16.mxu0 %v15754_v63  ;;  %v15757_v63 = vld [vmem:[%s22095_s7 + $0x758] ss:$36 sps:$4 sm:$0xff]  }
 0x516   :  { %v9390_v28 = vadd.f32 %v9355_v11, %v8955_v61  ;;  %v21147_v45 = vpop.f32.mrf.mxu1  ;;  %11486 = vmatprep.mubr.bf16.mxu0 %v21134_v27  ;;  %v9421_v53 = vmax.f32 %v9389_v50, 0.0  ;;  %v15760_v61 = vld [vmem:[%s22095_s7 + $0x710] ss:$36 sps:$4 sm:$0xff]   ;;  %v15766_v50 = vld [vmem:[%s22095_s7 + $0x688] ss:$36 sps:$4 sm:$0xff]  }
 0x517   :  { %v9357_v46 = vpop.f32.mrf.mxu0  ;;  %11487 = vmatmul.mubr.bf16.gmra.mxu0 %v21127_v37 }
 0x518   :  { %v9422_v8 = vmax.f32 %v9390_v28, 0.0  ;;  %v9391_v14 = vadd.f32 %v9357_v46, %v8956_v58  ;;  %v21151_v9 = vpop.f32.mrf.mxu1  ;;  %11645 = vmatpush2.bf16.msra.mxu0 %v15752_v4  ;;  %v15765_v4 = vld [vmem:[%s22095_s7 + $0x6cc] ss:$36 sps:$4 sm:$0xff]   ;;  %v15771_v28 = vld [vmem:[%s22095_s7 + $0x644] ss:$36 sps:$4 sm:$0xff]  }
 0x519   :  { %11646 = vmatprep.subr.bf16.mxu0 %v15759_v32 }
 0x51a   :  { %v21159_v1 = vpack.c.bf16 %v9422_v8, %v9420_v38  ;;  %v9423_v54 = vmax.f32 %v9391_v14, 0.0  ;;  %v21161_v55 = vpop.f32.mrf.mxu1 }
 0x51c   :  { %v21163_v7 = vpack.c.bf16 %v9423_v54, %v9421_v53  ;;  %v21165_v57 = vpop.f32.mrf.mxu1  ;;  %12218 = vmatmul.mubr.bf16.vlgmr.msra.gmra.mxu1 %v22359_v24  ;;  %11647 = vmatpush2.bf16.msra.mxu0 %v15757_v63  ;;  %v15763_v24 = vld [vmem:[%s22095_s7 + $0x6c8] ss:$36 sps:$4 sm:$0xff]   ;;  %v15772_v63 = vld [vmem:[%s22095_s7 + $0x5f8] ss:$36 sps:$4 sm:$0xff]  }
 0x51d   :  { %12225 = vmatprep.mubr.bf16.mxu1 %v22360_v12  ;;  %11648 = vmatprep.subr.bf16.mxu0 %v15762_v34  ;;  %v15768_v12 = vld [vmem:[%s22095_s7 + $0x68c] ss:$36 sps:$4 sm:$0xff]   ;;  %v15777_v34 = vld [vmem:[%s22095_s7 + $0x5b4] ss:$36 sps:$4 sm:$0xff]  }
 0x51e   :  { %v21175_v60 = vpop.f32.mrf.mxu1  ;;  %11496 = vmatprep.mubr.bf16.mxu0 %v21163_v7 }
 0x51f   :  { %11497 = vmatmul.mubr.bf16.gmra.mxu0 %v21159_v1 }
 0x520   :  { %v21179_v11 = vpop.f32.mrf.mxu1  ;;  %11649 = vmatpush2.bf16.msra.mxu0 %v15760_v61  ;;  %11652 = vmatprep.mubr.bf16.mxu0 %v20879_v5 }
 0x521   :  { %11650 = vmatprep.subr.bf16.mxu0 %v15765_v4 }
 0x522   :  { %v21188_v32 = vpop.f32.mrf.mxu1 }
 0x524   :  { %v21190_v58 = vpop.f32.mrf.mxu1  ;;  %12226 = vmatmul.mubr.bf16.gmra.mxu1 %v22361_v62  ;;  %11651 = vmatpush2.bf16.msra.mxu0 %v15763_v24  ;;  %v15769_v62 = vld [vmem:[%s22095_s7 + $0x640] ss:$36 sps:$4 sm:$0xff]   ;;  %v15778_v24 = vld [vmem:[%s22095_s7 + $0x568] ss:$36 sps:$4 sm:$0xff]  }
 0x525   :  { %12233 = vmatprep.mubr.bf16.mxu1 %v22362_v36  ;;  %11846 = vmatprep.subr.bf16.mxu0 %v15768_v12  ;;  %v15774_v36 = vld [vmem:[%s22095_s7 + $0x5fc] ss:$36 sps:$4 sm:$0xff]   ;;  %v15783_v12 = vld [vmem:[%s22095_s7 + $0x524] ss:$36 sps:$4 sm:$0xff]  }
 0x526   :  { %v21200_v46 = vpop.f32.mrf.mxu1 }
 0x527   :  { %11653 = vmatmul.mubr.bf16.vlgmr.msra.gmra.mxu0 %v20869_v3 }
 0x528   :  { %v21203_v38 = vpop.f32.mrf.mxu1  ;;  %11662 = vmatprep.mubr.bf16.mxu0 %v20929_v43  ;;  %11847 = vmatpush1.bf16.msra.mxu0 %v15766_v50 }
 0x529   :  { %11848 = vmatprep.subr.bf16.mxu0 %v15771_v28 }
 0x52a   :  { %v21212_v8 = vpop.f32.mrf.mxu1 }
 0x52c   :  { %v21214_v14 = vpop.f32.mrf.mxu1  ;;  %12234 = vmatmul.mubr.bf16.gmra.mxu1 %v22363_v25  ;;  %11849 = vmatpush1.bf16.msra.mxu0 %v15769_v62  ;;  %v15775_v25 = vld [vmem:[%s22095_s7 + $0x5b0] ss:$36 sps:$4 sm:$0xff]  }
 0x52d   :  { %12241 = vmatprep.mubr.bf16.mxu1 %v22364_v23  ;;  %11850 = vmatprep.subr.bf16.mxu0 %v15774_v36  ;;  %v15780_v23 = vld [vmem:[%s22095_s7 + $0x56c] ss:$36 sps:$4 sm:$0xff]  }
 0x52e   :  { %v21224_v53 = vpop.f32.mrf.mxu1 }
 0x52f   :  { %11663 = vmatmul.mubr.bf16.gmra.mxu0 %v20916_v41 }
 0x530   :  { %v21227_v54 = vpop.f32.mrf.mxu1  ;;  %11672 = vmatprep.mubr.bf16.mxu0 %v20979_v30  ;;  %11851 = vmatpush1.bf16.msra.mxu0 %v15772_v63  ;;  %v15784_v63 = vld [vmem:[%s22095_s7 + $0x4d8] ss:$36 sps:$4 sm:$0xff]  }
 0x531   :  { %11852 = vmatprep.subr.bf16.mxu0 %v15777_v34  ;;  %v15789_v34 = vld [vmem:[%s22095_s7 + $0x494] ss:$36 sps:$4 sm:$0xff]  }
 0x532   :  { %v21236_v61 = vpop.f32.mrf.mxu1 }
 0x534   :  { %v21238_v4 = vpop.f32.mrf.mxu1  ;;  %12242 = vmatmul.mubr.bf16.gmra.mxu1 %v22424_v22  ;;  %11853 = vmatpush1.bf16.msra.mxu0 %v15775_v25  ;;  %v15781_v22 = vld [vmem:[%s22095_s7 + $0x520] ss:$36 sps:$4 sm:$0xff]  }
 0x535   :  { %22474 = vst [vmem:[#allocation41_spill] sm:$0xff] %v21238_v4  ;;  %12249 = vmatprep.mubr.bf16.mxu1 %v22425_v20  ;;  %11854 = vmatprep.subr.bf16.mxu0 %v15780_v23  ;;  %v15786_v20 = vld [vmem:[%s22095_s7 + $0x4dc] ss:$36 sps:$4 sm:$0xff]  }
 0x536   :  { %v21248_v50 = vpop.f32.mrf.mxu1 }
 0x537   :  { %22475 = vst [vmem:[#allocation47_spill] sm:$0xff] %v21248_v50  ;;  %11673 = vmatmul.mubr.bf16.gmra.mxu0 %v20966_v13  ;;  %v15867_v50 = vld [vmem:[%s22095_s7 + $0x608] ss:$36 sps:$4 sm:$0xff]  }
 0x538   :  { %v21251_v28 = vpop.f32.mrf.mxu1  ;;  %11682 = vmatprep.mubr.bf16.mxu0 %v21020_v42  ;;  %11855 = vmatpush1.bf16.msra.mxu0 %v15778_v24 }
 0x539   :  { %22476 = vst [vmem:[#allocation11_spill] sm:$0xff] %v21251_v28  ;;  %11856 = vmatprep.subr.bf16.mxu0 %v15783_v12 }
 0x53a   :  { %v21260_v62 = vpop.f32.mrf.mxu1 }
 0x53b   :  { %22477 = vst [vmem:[#allocation49_spill] sm:$0xff] %v21260_v62  ;;  %v15880_v62 = vld [vmem:[#allocation5 + $0x8] sm:$0xff] }
 0x53c   :  { %v21262_v36 = vpop.f32.mrf.mxu1  ;;  %12250 = vmatmul.mubr.bf16.gmra.mxu1 %v22436_v52  ;;  %11857 = vmatpush1.bf16.msra.mxu0 %v15781_v22  ;;  %v15787_v52 = vld [vmem:[%s22095_s7 + $0x490] ss:$36 sps:$4 sm:$0xff]   ;;  %v15790_v22 = vld [vmem:[%s22095_s7 + $0x8c8] ss:$36 sps:$4 sm:$0xff]  }
 0x53d   :  { %22478 = vst [vmem:[#allocation46_spill] sm:$0xff] %v21262_v36  ;;  %12257 = vmatprep.mubr.bf16.mxu1 %v22437_v48  ;;  %11858 = vmatprep.subr.bf16.mxu0 %v15786_v20  ;;  %v15792_v48 = vld [vmem:[%s22095_s7 + $0x8cc] ss:$36 sps:$4 sm:$0xff]   ;;  %v15795_v20 = vld [vmem:[%s22095_s7 + $0x884] ss:$36 sps:$4 sm:$0xff]  }
 0x53e   :  { %v21272_v25 = vpop.f32.mrf.mxu1 }
 0x53f   :  { %22479 = vst [vmem:[#allocation48_spill] sm:$0xff] %v21272_v25  ;;  %11683 = vmatmul.mubr.bf16.gmra.mxu0 %v21013_v31 }
 0x540   :  { %v21275_v23 = vpop.f32.mrf.mxu1  ;;  %11692 = vmatprep.mubr.bf16.mxu0 %v21058_v59  ;;  %11859 = vmatpush1.bf16.msra.mxu0 %v15784_v63 }
 0x541   :  { %22480 = vst [vmem:[#allocation25_spill] sm:$0xff] %v21275_v23  ;;  %11860 = vmatprep.subr.bf16.mxu0 %v15789_v34  ;;  %v15879_v23 = vld [vmem:[#allocation5] sm:$0xff] }
 0x542   :  { %v21284_v24 = vpop.f32.mrf.mxu1 }
 0x543   :  { %22481 = vst [vmem:[#allocation32_spill] sm:$0xff] %v21284_v24 }
 0x544   :  { %v21286_v12 = vpop.f32.mrf.mxu1  ;;  %12258 = vmatmul.mubr.bf16.gmra.mxu1 %v22448_v10  ;;  %11861 = vmatpush1.bf16.msra.mxu0 %v15787_v52  ;;  %v15793_v10 = vld [vmem:[%s22095_s7 + $0x880] ss:$36 sps:$4 sm:$0xff]  }
 0x545   :  { %22482 = vst [vmem:[#allocation51_spill] sm:$0xff] %v21286_v12  ;;  %12265 = vmatprep.mubr.bf16.mxu1 %v22449_v39  ;;  %11862 = vmatprep.subr.bf16.mxu0 %v15792_v48  ;;  %v15798_v39 = vld [vmem:[%s22095_s7 + $0x83c] ss:$36 sps:$4 sm:$0xff]  }
 0x546   :  { %v21296_v63 = vpop.f32.mrf.mxu1 }
 0x547   :  { %22483 = vst [vmem:[#allocation13_spill] sm:$0xff] %v21296_v63  ;;  %11693 = vmatmul.mubr.bf16.gmra.mxu0 %v21051_v6  ;;  %v22513_v63 = vld [vmem:[#allocation21_spill] sm:$0xff] }
 0x548   :  { %v21299_v34 = vpop.f32.mrf.mxu1  ;;  %11702 = vmatprep.mubr.bf16.mxu0 %v21096_v33  ;;  %11863 = vmatpush2.bf16.msra.mxu0 %v15790_v22  ;;  %v15796_v22 = vld [vmem:[%s22095_s7 + $0x838] ss:$36 sps:$4 sm:$0xff]  }
 0x549   :  { %22484 = vst [vmem:[#allocation54_spill] sm:$0xff] %v21299_v34  ;;  %11864 = vmatprep.subr.bf16.mxu0 %v15795_v20  ;;  %v15801_v20 = vld [vmem:[%s22095_s7 + $0x7f4] ss:$36 sps:$4 sm:$0xff]  }
 0x54a   :  { %v21308_v52 = vpop.f32.mrf.mxu1 }
 0x54b   :  { %22485 = vst [vmem:[#allocation50_spill] sm:$0xff] %v21308_v52 }
 0x54c   :  { %v21310_v48 = vpop.f32.mrf.mxu1  ;;  %12266 = vmatmul.mubr.bf16.gmra.mxu1 %v22463_v40  ;;  %11865 = vmatpush2.bf16.msra.mxu0 %v15793_v10  ;;  %v15799_v40 = vld [vmem:[%s22095_s7 + $0x7f0] ss:$36 sps:$4 sm:$0xff]  }
 0x54d   :  { %22486 = vst [vmem:[#allocation53_spill] sm:$0xff] %v21310_v48  ;;  %12273 = vmatprep.mubr.bf16.mxu1 %v22464_v49  ;;  %11866 = vmatprep.subr.bf16.mxu0 %v15798_v39  ;;  %v15804_v49 = vld [vmem:[%s22095_s7 + $0x7ac] ss:$36 sps:$4 sm:$0xff]   ;;  %v15863_v48 = vld [vmem:[%s22095_s7 + $0x698] ss:$36 sps:$4 sm:$0xff]  }
 0x54e   :  { %v21320_v34 = vpop.f32.mrf.mxu1 }
 0x54f   :  { %22487 = vst [vmem:[#allocation38_spill] sm:$0xff] %v21320_v34  ;;  %11703 = vmatmul.mubr.bf16.gmra.mxu0 %v21089_v56 }
 0x550   :  { %v21323_v52 = vpop.f32.mrf.mxu1  ;;  %11712 = vmatprep.mubr.bf16.mxu0 %v21134_v27  ;;  %11867 = vmatpush2.bf16.msra.mxu0 %v15796_v22  ;;  %v15802_v22 = vld [vmem:[%s22095_s7 + $0x7a8] ss:$36 sps:$4 sm:$0xff]  }
 0x551   :  { %22488 = vst [vmem:[#allocation55_spill] sm:$0xff] %v21323_v52  ;;  %11868 = vmatprep.subr.bf16.mxu0 %v15801_v20  ;;  %v15807_v20 = vld [vmem:[%s22095_s7 + $0x764] ss:$36 sps:$4 sm:$0xff]  }
 0x552   :  { %v21332_v10 = vpop.f32.mrf.mxu1 }
 0x553   :  { %22489 = vst [vmem:[#allocation52_spill] sm:$0xff] %v21332_v10 }
 0x554   :  { %v21334_v39 = vpop.f32.mrf.mxu1  ;;  %12274 = vmatmul.mubr.bf16.gmra.mxu1 %v22472_v15  ;;  %11869 = vmatpush2.bf16.msra.mxu0 %v15799_v40  ;;  %v15805_v15 = vld [vmem:[%s22095_s7 + $0x760] ss:$36 sps:$4 sm:$0xff]  }
 0x555   :  { %22490 = vst [vmem:[#allocation43_spill] sm:$0xff] %v21334_v39  ;;  %11870 = vmatprep.subr.bf16.mxu0 %v15804_v49  ;;  %v15810_v40 = vld [vmem:[%s22095_s7 + $0x71c] ss:$36 sps:$4 sm:$0xff]  }
 0x556   :  { %v21343_v52 = vpop.f32.mrf.mxu1 }
 0x557   :  { %22491 = vst [vmem:[#allocation56_spill] sm:$0xff] %v21343_v52  ;;  %11713 = vmatmul.mubr.bf16.gmra.mxu0 %v21127_v37  ;;  %v15808_v52 = vld [vmem:[%s22095_s7 + $0x718] ss:$36 sps:$4 sm:$0xff]  }
 0x558   :  { %11722 = vmatprep.mubr.bf16.mxu0 %v21163_v7  ;;  %11871 = vmatpush2.bf16.msra.mxu0 %v15802_v22  ;;  %v21353_v49 = vpop.f32.mrf.mxu1  ;;  %v15813_v22 = vld [vmem:[%s22095_s7 + $0x6d4] ss:$36 sps:$4 sm:$0xff]  }
 0x559   :  { %11872 = vmatprep.subr.bf16.mxu0 %v15807_v20  ;;  %22492 = vst [vmem:[#allocation27_spill] sm:$0xff] %v21353_v49  ;;  %v15811_v20 = vld [vmem:[%s22095_s7 + $0x6d0] ss:$36 sps:$4 sm:$0xff]  }
 0x55a   :  { %v21361_v39 = vpop.f32.mrf.mxu1 }
 0x55b   :  { %22493 = vst [vmem:[#allocation44_spill] sm:$0xff] %v21361_v39  ;;  %v15814_v39 = vld [vmem:[%s22095_s7 + $0x690] ss:$36 sps:$4 sm:$0xff]  }
 0x55c   :  { %11873 = vmatpush2.bf16.msra.mxu0 %v15805_v15  ;;  %v15816_v15 = vld [vmem:[%s22095_s7 + $0x694] ss:$36 sps:$4 sm:$0xff]  }
 0x55d   :  { %11874 = vmatprep.subr.bf16.mxu0 %v15810_v40  ;;  %v21371_v40 = vpop.f32.mrf.mxu1 }
 0x55e   :  { %22494 = vst [vmem:[#allocation37_spill] sm:$0xff] %v21371_v40 }
 0x55f   :  { %11723 = vmatmul.mubr.bf16.gmra.mxu0 %v21159_v1  ;;  %v21379_v49 = vpop.f32.mrf.mxu1 }
 0x560   :  { %11875 = vmatpush2.bf16.msra.mxu0 %v15808_v52  ;;  %11878 = vmatprep.mubr.bf16.mxu0 %v20879_v5  ;;  %v15819_v52 = vld [vmem:[%s22095_s7 + $0x64c] ss:$36 sps:$4 sm:$0xff]   ;;  %22495 = vst [vmem:[#allocation29_spill] sm:$0xff] %v21379_v49  ;;  %v15820_v49 = vld [vmem:[%s22095_s7 + $0x600] ss:$36 sps:$4 sm:$0xff]  }
 0x561   :  { %11876 = vmatprep.subr.bf16.mxu0 %v15813_v22  ;;  %v15817_v22 = vld [vmem:[%s22095_s7 + $0x648] ss:$36 sps:$4 sm:$0xff]  }
 0x564   :  { %11877 = vmatpush2.bf16.msra.mxu0 %v15811_v20  ;;  %v15822_v20 = vld [vmem:[%s22095_s7 + $0x604] ss:$36 sps:$4 sm:$0xff]  }
 0x565   :  { %12072 = vmatprep.subr.bf16.mxu0 %v15816_v15  ;;  %v21389_v15 = vpop.f32.mrf.mxu1 }
 0x566   :  { %22496 = vst [vmem:[#allocation22_spill] sm:$0xff] %v21389_v15 }
 0x567   :  { %11879 = vmatmul.mubr.bf16.vlgmr.msra.gmra.mxu0 %v20869_v3  ;;  %v21397_v40 = vpop.f32.mrf.mxu1 }
 0x568   :  { %11888 = vmatprep.mubr.bf16.mxu0 %v20929_v43  ;;  %12073 = vmatpush1.bf16.msra.mxu0 %v15814_v39  ;;  %v15825_v39 = vld [vmem:[%s22095_s7 + $0x5bc] ss:$36 sps:$4 sm:$0xff]   ;;  %22497 = vst [vmem:[#allocation33_spill] sm:$0xff] %v21397_v40  ;;  %v15826_v40 = vld [vmem:[%s22095_s7 + $0x570] ss:$36 sps:$4 sm:$0xff]  }
 0x569   :  { %12074 = vmatprep.subr.bf16.mxu0 %v15819_v52  ;;  %v15823_v52 = vld [vmem:[%s22095_s7 + $0x5b8] ss:$36 sps:$4 sm:$0xff]  }
 0x56c   :  { %12075 = vmatpush1.bf16.msra.mxu0 %v15817_v22  ;;  %v15828_v22 = vld [vmem:[%s22095_s7 + $0x574] ss:$36 sps:$4 sm:$0xff]  }
 0x56d   :  { %12076 = vmatprep.subr.bf16.mxu0 %v15822_v20  ;;  %v21407_v20 = vpop.f32.mrf.mxu1 }
 0x56e   :  { %22498 = vst [vmem:[#allocation23_spill] sm:$0xff] %v21407_v20 }
 0x56f   :  { %11889 = vmatmul.mubr.bf16.gmra.mxu0 %v20916_v41  ;;  %v21415_v15 = vpop.f32.mrf.mxu1 }
 0x570   :  { %11898 = vmatprep.mubr.bf16.mxu0 %v20979_v30  ;;  %12077 = vmatpush1.bf16.msra.mxu0 %v15820_v49  ;;  %v15831_v49 = vld [vmem:[%s22095_s7 + $0x52c] ss:$36 sps:$4 sm:$0xff]   ;;  %22499 = vst [vmem:[#allocation30_spill] sm:$0xff] %v21415_v15  ;;  %v15832_v15 = vld [vmem:[%s22095_s7 + $0x4e0] ss:$36 sps:$4 sm:$0xff]  }
 0x571   :  { %12078 = vmatprep.subr.bf16.mxu0 %v15825_v39  ;;  %v15829_v39 = vld [vmem:[%s22095_s7 + $0x528] ss:$36 sps:$4 sm:$0xff]  }
 0x574   :  { %12079 = vmatpush1.bf16.msra.mxu0 %v15823_v52  ;;  %v15834_v52 = vld [vmem:[%s22095_s7 + $0x4e4] ss:$36 sps:$4 sm:$0xff]  }
 0x575   :  { %12080 = vmatprep.subr.bf16.mxu0 %v15828_v22  ;;  %v21425_v22 = vpop.f32.mrf.mxu1 }
 0x576   :  { %22500 = vst [vmem:[#allocation15_spill] sm:$0xff] %v21425_v22 }
 0x577   :  { %11899 = vmatmul.mubr.bf16.gmra.mxu0 %v20966_v13  ;;  %v21433_v20 = vpop.f32.mrf.mxu1 }
 0x578   :  { %11908 = vmatprep.mubr.bf16.mxu0 %v21020_v42  ;;  %12081 = vmatpush1.bf16.msra.mxu0 %v15826_v40  ;;  %v15837_v40 = vld [vmem:[%s22095_s7 + $0x49c] ss:$36 sps:$4 sm:$0xff]   ;;  %22501 = vst [vmem:[#allocation57_spill] sm:$0xff] %v21433_v20  ;;  %v15838_v20 = vld [vmem:[%s22095_s7 + $0x8d0] ss:$36 sps:$4 sm:$0xff]  }
 0x579   :  { %12082 = vmatprep.subr.bf16.mxu0 %v15831_v49  ;;  %v15835_v49 = vld [vmem:[%s22095_s7 + $0x498] ss:$36 sps:$4 sm:$0xff]  }
 0x57c   :  { %12083 = vmatpush1.bf16.msra.mxu0 %v15829_v39  ;;  %v15840_v39 = vld [vmem:[%s22095_s7 + $0x8d4] ss:$36 sps:$4 sm:$0xff]  }
 0x57d   :  { %12084 = vmatprep.subr.bf16.mxu0 %v15834_v52  ;;  %v21443_v52 = vpop.f32.mrf.mxu1 }
 0x57e   :  { %22502 = vst [vmem:[#allocation58_spill] sm:$0xff] %v21443_v52 }
 0x57f   :  { %11909 = vmatmul.mubr.bf16.gmra.mxu0 %v21013_v31  ;;  %v21451_v22 = vpop.f32.mrf.mxu1 }
 0x580   :  { %11918 = vmatprep.mubr.bf16.mxu0 %v21058_v59  ;;  %12085 = vmatpush1.bf16.msra.mxu0 %v15832_v15  ;;  %v15843_v15 = vld [vmem:[%s22095_s7 + $0x88c] ss:$36 sps:$4 sm:$0xff]   ;;  %22503 = vst [vmem:[#allocation59_spill] sm:$0xff] %v21451_v22  ;;  %v15844_v22 = vld [vmem:[%s22095_s7 + $0x840] ss:$36 sps:$4 sm:$0xff]  }
 0x581   :  { %12086 = vmatprep.subr.bf16.mxu0 %v15837_v40  ;;  %v15841_v40 = vld [vmem:[%s22095_s7 + $0x888] ss:$36 sps:$4 sm:$0xff]  }
 0x584   :  { %12087 = vmatpush1.bf16.msra.mxu0 %v15835_v49  ;;  %v15846_v49 = vld [vmem:[%s22095_s7 + $0x844] ss:$36 sps:$4 sm:$0xff]  }
 0x585   :  { %12088 = vmatprep.subr.bf16.mxu0 %v15840_v39  ;;  %v21461_v39 = vpop.f32.mrf.mxu1 }
 0x586   :  { %22504 = vst [vmem:[#allocation60_spill] sm:$0xff] %v21461_v39 }
 0x587   :  { %11919 = vmatmul.mubr.bf16.gmra.mxu0 %v21051_v6  ;;  %v21469_v52 = vpop.f32.mrf.mxu1 }
 0x588   :  { %11928 = vmatprep.mubr.bf16.mxu0 %v21096_v33  ;;  %12089 = vmatpush2.bf16.msra.mxu0 %v15838_v20  ;;  %v15849_v20 = vld [vmem:[%s22095_s7 + $0x7fc] ss:$36 sps:$4 sm:$0xff]   ;;  %22505 = vst [vmem:[#allocation61_spill] sm:$0xff] %v21469_v52  ;;  %v15850_v52 = vld [vmem:[%s22095_s7 + $0x7b0] ss:$36 sps:$4 sm:$0xff]  }
 0x589   :  { %12090 = vmatprep.subr.bf16.mxu0 %v15843_v15  ;;  %v15847_v15 = vld [vmem:[%s22095_s7 + $0x7f8] ss:$36 sps:$4 sm:$0xff]  }
 0x58c   :  { %12091 = vmatpush2.bf16.msra.mxu0 %v15841_v40  ;;  %v15852_v40 = vld [vmem:[%s22095_s7 + $0x7b4] ss:$36 sps:$4 sm:$0xff]  }
 0x58d   :  { %12092 = vmatprep.subr.bf16.mxu0 %v15846_v49  ;;  %v21479_v49 = vpop.f32.mrf.mxu1 }
 0x58e   :  { %22506 = vst [vmem:[#allocation62_spill] sm:$0xff] %v21479_v49 }
 0x58f   :  { %11929 = vmatmul.mubr.bf16.gmra.mxu0 %v21089_v56  ;;  %v21487_v39 = vpop.f32.mrf.mxu1 }
 0x590   :  { %11938 = vmatprep.mubr.bf16.mxu0 %v21134_v27  ;;  %12093 = vmatpush2.bf16.msra.mxu0 %v15844_v22  ;;  %v15855_v22 = vld [vmem:[%s22095_s7 + $0x76c] ss:$36 sps:$4 sm:$0xff]   ;;  %22507 = vst [vmem:[#allocation63_spill] sm:$0xff] %v21487_v39  ;;  %v15856_v39 = vld [vmem:[%s22095_s7 + $0x720] ss:$36 sps:$4 sm:$0xff]  }
 0x591   :  { %12094 = vmatprep.subr.bf16.mxu0 %v15849_v20  ;;  %v15853_v20 = vld [vmem:[%s22095_s7 + $0x768] ss:$36 sps:$4 sm:$0xff]  }
 0x594   :  { %12095 = vmatpush2.bf16.msra.mxu0 %v15847_v15  ;;  %v15858_v15 = vld [vmem:[%s22095_s7 + $0x724] ss:$36 sps:$4 sm:$0xff]  }
 0x595   :  { %12096 = vmatprep.subr.bf16.mxu0 %v15852_v40  ;;  %v21497_v40 = vpop.f32.mrf.mxu1 }
 0x596   :  { %22508 = vst [vmem:[#allocation64_spill] sm:$0xff] %v21497_v40  ;;  %v22510_v40 = vld [vmem:[#allocation35_spill] sm:$0xff] }
 0x597   :  { %11939 = vmatmul.mubr.bf16.gmra.mxu0 %v21127_v37  ;;  %v21510_v49 = vpop.f32.mrf.mxu1 }
 0x598   :  { %11948 = vmatprep.mubr.bf16.mxu0 %v21163_v7  ;;  %12097 = vmatpush2.bf16.msra.mxu0 %v15850_v52  ;;  %v15861_v52 = vld [vmem:[%s22095_s7 + $0x6dc] ss:$36 sps:$4 sm:$0xff]   ;;  %22509 = vst [vmem:[#allocation65_spill] sm:$0xff] %v21510_v49  ;;  %v22512_v49 = vld [vmem:[#allocation36_spill] sm:$0xff] }
 0x599   :  { %12098 = vmatprep.subr.bf16.mxu0 %v15855_v22  ;;  %v21508_v22 = vld [vmem:[%s22096_s8] sm:$0xff]  ;;  %v21524_v34 = vpop.f32.mrf.mxu1 }
 0x59a   :  { %v21522_v10 = vrot.slane %v21508_v22, %v22510_v40  ;;  %22511 = vst [vmem:[#allocation35_spill] sm:$0xff] %v21524_v34 }
 0x59b   :  { %v21538_v12 = vpop.f32.mrf.mxu1 }
 0x59c   :  { %12099 = vmatpush2.bf16.msra.mxu0 %v15853_v20  ;;  %v15859_v20 = vld [vmem:[%s22095_s7 + $0x6d8] ss:$36 sps:$4 sm:$0xff]   ;;  %v11316_v40 = vadd.f32 %v22513_v63, %v21522_v10  ;;  %22514 = vst [vmem:[#allocation36_spill] sm:$0xff] %v21538_v12  ;;  %v15866_v63 = vld [vmem:[%s22095_s7 + $0x848] ss:$36 sps:$4 sm:$0xff]   ;;  %v11320_v12 = vadd.f32 %v20860_v21, %v21522_v10 }
 0x59d   :  { %12100 = vmatprep.subr.bf16.mxu0 %v15858_v15  ;;  %v15862_v15 = vld [vmem:[%s22095_s7 + $0x8d8] ss:$36 sps:$4 sm:$0xff]   ;;  %v15868_v21 = vld [vmem:[%s22095_s7 + $0x800] ss:$36 sps:$4 sm:$0xff]  }
 0x59f   :  { %11949 = vmatmul.mubr.bf16.gmra.mxu0 %v21159_v1 }
 0x5a0   :  { %12101 = vmatpush2.bf16.msra.mxu0 %v15856_v39  ;;  %12104 = vmatprep.mubr.bf16.mxu0 %v20879_v5  ;;  %v21528_v39 = vrot.slane %v21508_v22, %v22512_v49 }
 0x5a1   :  { %12102 = vmatprep.subr.bf16.mxu0 %v15861_v52  ;;  %v15864_v52 = vld [vmem:[%s22095_s7 + $0x890] ss:$36 sps:$4 sm:$0xff]  }
 0x5a2   :  { %v11318_v49 = vadd.f32 %v20853_v0, %v21528_v39 }
 0x5a4   :  { %12103 = vmatpush2.bf16.msra.mxu0 %v15859_v20 }
 0x5a5   :  { %14505 = vmatprep.subr.bf16.mxu0 %v15862_v15  ;;  %v15865_v15 = vld [vmem:[%s22095_s7 + $0x650] ss:$36 sps:$4 sm:$0xff]  }
 0x5a7   :  { %v11428_v34 = vpop.f32.mrf.mxu0  ;;  %12105 = vmatmul.mubr.bf16.vlgmr.msra.gmra.mxu0 %v20869_v3 }
 0x5a8   :  { %v11429_v20 = vadd.f32 %v11428_v34, %v11316_v40  ;;  %12114 = vmatprep.mubr.bf16.mxu0 %v20929_v43  ;;  %14506 = vmatpush3.bf16.msra.mxu0 %v15863_v48  ;;  %v21552_v34 = vpop.f32.mrf.mxu1  ;;  %v11322_v48 = vadd.f32 %v20871_v26, %v21528_v39 }
 0x5a9   :  { %v11430_v24 = vpop.f32.mrf.mxu0  ;;  %14507 = vmatprep.subr.bf16.mxu0 %v15864_v52 }
 0x5aa   :  { %v12379_v25 = vadd.f32 %v15879_v23, %v11429_v20  ;;  %v11431_v0 = vadd.f32 %v11430_v24, %v11318_v49  ;;  %v11326_v23 = vadd.f32 %v20881_v2, %v21522_v10  ;;  %v11328_v20 = vadd.f32 %v20895_v29, %v21528_v39  ;;  %v15869_v2 = vld [vmem:[%s22095_s7 + $0x5c0] ss:$36 sps:$4 sm:$0xff]  }
 0x5ab   :  { %v11432_v40 = vpop.f32.mrf.mxu0  ;;  %v11330_v29 = vadd.f32 %v20904_v51, %v21522_v10  ;;  %v15871_v51 = vld [vmem:[%s22095_s7 + $0x578] ss:$36 sps:$4 sm:$0xff]  }
 0x5ac   :  { %v12523_v36 = vmax.f32 %v12379_v25, 0.0  ;;  %v12380_v28 = vadd.f32 %v15880_v62, %v11431_v0  ;;  %v11433_v52 = vadd.f32 %v11432_v40, %v11320_v12  ;;  %14508 = vmatpush3.bf16.msra.mxu0 %v15865_v15  ;;  %v15881_v25 = vld [vmem:[#allocation5 + $0x48] sm:$0xff]  ;;  %v21564_v12 = vpop.f32.mrf.mxu1 }
 0x5ad   :  { %v11434_v4 = vpop.f32.mrf.mxu0  ;;  %14509 = vmatprep.subr.bf16.mxu0 %v15866_v63  ;;  %v15882_v63 = vld [vmem:[#allocation5 + $0x50] sm:$0xff] }
 0x5ae   :  { %12667 = vst [vmem:[#allocation8] sm:$0xff] %v12523_v36  ;;  %v12524_v26 = vmax.f32 %v12380_v28, 0.0  ;;  %v12388_v24 = vadd.f32 %v15881_v25, %v11433_v52  ;;  %v11435_v62 = vadd.f32 %v11434_v4, %v11322_v48  ;;  %v15870_v28 = vld [vmem:[%s22095_s7 + $0x7b8] ss:$36 sps:$4 sm:$0xff]   ;;  %v15883_v48 = vld [vmem:[#allocation5 + $0x90] sm:$0xff]  ;;  %v11332_v25 = vadd.f32 %v20918_v16, %v21528_v39 }
 0x5af   :  { %v11438_v49 = vpop.f32.mrf.mxu0  ;;  %12115 = vmatmul.mubr.bf16.gmra.mxu0 %v20916_v41 }
 0x5b0   :  { %12668 = vst [vmem:[#allocation8 + $0x8] sm:$0xff] %v12524_v26  ;;  %v12532_v15 = vmax.f32 %v12388_v24, 0.0  ;;  %v12389_v0 = vadd.f32 %v15882_v63, %v11435_v62  ;;  %v11439_v40 = vadd.f32 %v11438_v49, %v11326_v23  ;;  %12124 = vmatprep.mubr.bf16.mxu0 %v20979_v30  ;;  %14510 = vmatpush3.bf16.msra.mxu0 %v15867_v50  ;;  %v21578_v26 = vpop.f32.mrf.mxu1  ;;  %v15884_v24 = vld [vmem:[#allocation5 + $0x98] sm:$0xff] }
 0x5b1   :  { %v11440_v4 = vpop.f32.mrf.mxu0  ;;  %14511 = vmatprep.subr.bf16.mxu0 %v15868_v21  ;;  %v11336_v63 = vadd.f32 %v20931_v19, %v21522_v10  ;;  %v15873_v19 = vld [vmem:[%s22095_s7 + $0x530] ss:$36 sps:$4 sm:$0xff]  }
 0x5b2   :  { %12676 = vst [vmem:[#allocation8 + $0x48] sm:$0xff] %v12532_v15  ;;  %v12533_v36 = vmax.f32 %v12389_v0, 0.0  ;;  %v12397_v52 = vadd.f32 %v15883_v48, %v11439_v40  ;;  %v11441_v23 = vadd.f32 %v11440_v4, %v11328_v20  ;;  %v15872_v20 = vld [vmem:[%s22095_s7 + $0x770] ss:$36 sps:$4 sm:$0xff]   ;;  %v15885_v0 = vld [vmem:[#allocation5 + $0xd8] sm:$0xff]  ;;  %v15886_v48 = vld [vmem:[#allocation5 + $0xe0] sm:$0xff] }
 0x5b3   :  { %v11442_v50 = vpop.f32.mrf.mxu0 }
 0x5b4   :  { %12677 = vst [vmem:[#allocation8 + $0x50] sm:$0xff] %v12533_v36  ;;  %v12541_v21 = vmax.f32 %v12397_v52, 0.0  ;;  %v12398_v62 = vadd.f32 %v15884_v24, %v11441_v23  ;;  %v11443_v49 = vadd.f32 %v11442_v50, %v11330_v29  ;;  %14512 = vmatpush3.bf16.msra.mxu0 %v15869_v2  ;;  %v21590_v29 = vpop.f32.mrf.mxu1  ;;  %v15887_v24 = vld [vmem:[#allocation5 + $0x120] sm:$0xff] }
 0x5b5   :  { %v11444_v15 = vpop.f32.mrf.mxu0  ;;  %14513 = vmatprep.subr.bf16.mxu0 %v15870_v28  ;;  %v11338_v28 = vadd.f32 %v20942_v44, %v21528_v39  ;;  %v11340_v44 = vadd.f32 %v20954_v35, %v21522_v10  ;;  %v15875_v35 = vld [vmem:[%s22095_s7 + $0x4e8] ss:$36 sps:$4 sm:$0xff]  }
 0x5b6   :  { %12685 = vst [vmem:[#allocation8 + $0x90] sm:$0xff] %v12541_v21  ;;  %v12542_v16 = vmax.f32 %v12398_v62, 0.0  ;;  %v12406_v40 = vadd.f32 %v15885_v0, %v11443_v49  ;;  %v11445_v4 = vadd.f32 %v11444_v15, %v11332_v25  ;;  %v15874_v25 = vld [vmem:[%s22095_s7 + $0x728] ss:$36 sps:$4 sm:$0xff]   ;;  %v21604_v15 = vpop.f32.mrf.mxu1 }
 0x5b7   :  { %v11448_v2 = vpop.f32.mrf.mxu0  ;;  %12125 = vmatmul.mubr.bf16.gmra.mxu0 %v20966_v13  ;;  %v15888_v0 = vld [vmem:[#allocation5 + $0x128] sm:$0xff] }
 0x5b8   :  { %12686 = vst [vmem:[#allocation8 + $0x98] sm:$0xff] %v12542_v16  ;;  %v12550_v36 = vmax.f32 %v12406_v40, 0.0  ;;  %v12407_v52 = vadd.f32 %v15886_v48, %v11445_v4  ;;  %v11449_v23 = vadd.f32 %v11448_v2, %v11336_v63  ;;  %12134 = vmatprep.mubr.bf16.mxu0 %v21020_v42  ;;  %14514 = vmatpush3.bf16.msra.mxu0 %v15871_v51  ;;  %v22515_v63 = vld [vmem:[#allocation12_spill] sm:$0xff] }
 0x5b9   :  { %v11450_v50 = vpop.f32.mrf.mxu0  ;;  %14515 = vmatprep.subr.bf16.mxu0 %v15872_v20  ;;  %v11342_v16 = vadd.f32 %v22515_v63, %v21528_v39 }
 0x5ba   :  { %12694 = vst [vmem:[#allocation8 + $0xd8] sm:$0xff] %v12550_v36  ;;  %v12551_v21 = vmax.f32 %v12407_v52, 0.0  ;;  %v12415_v62 = vadd.f32 %v15887_v24, %v11449_v23  ;;  %v11451_v49 = vadd.f32 %v11450_v50, %v11338_v28  ;;  %v15876_v28 = vld [vmem:[%s22095_s7 + $0x6e0] ss:$36 sps:$4 sm:$0xff]   ;;  %v22516_v36 = vld [vmem:[#allocation20_spill] sm:$0xff]  ;;  %v22517_v24 = vld [vmem:[#allocation42_spill] sm:$0xff] }
 0x5bb   :  { %v11452_v51 = vpop.f32.mrf.mxu0  ;;  %v11346_v48 = vadd.f32 %v22516_v36, %v21522_v10  ;;  %v15889_v23 = vld [vmem:[#allocation5 + $0x168] sm:$0xff] }
 0x5bc   :  { %12695 = vst [vmem:[#allocation8 + $0xe0] sm:$0xff] %v12551_v21  ;;  %v12559_v20 = vmax.f32 %v12415_v62, 0.0  ;;  %v12416_v40 = vadd.f32 %v15888_v0, %v11451_v49  ;;  %v11453_v4 = vadd.f32 %v11452_v51, %v11340_v44  ;;  %14516 = vmatpush3.bf16.msra.mxu0 %v15873_v19  ;;  %v21616_v44 = vpop.f32.mrf.mxu1  ;;  %v15890_v49 = vld [vmem:[#allocation5 + $0x170] sm:$0xff]  ;;  %v22518_v0 = vld [vmem:[#allocation18_spill] sm:$0xff] }
 0x5bd   :  { %v11454_v2 = vpop.f32.mrf.mxu0  ;;  %14517 = vmatprep.subr.bf16.mxu0 %v15874_v25  ;;  %v11348_v25 = vadd.f32 %v22517_v24, %v21528_v39 }
 0x5be   :  { %12703 = vst [vmem:[#allocation8 + $0x120] sm:$0xff] %v12559_v20  ;;  %v12560_v52 = vmax.f32 %v12416_v40, 0.0  ;;  %v12424_v50 = vadd.f32 %v15889_v23, %v11453_v4  ;;  %v11455_v21 = vadd.f32 %v11454_v2, %v11342_v16  ;;  %v15877_v16 = vld [vmem:[%s22095_s7 + $0x4a0] ss:$36 sps:$4 sm:$0xff]   ;;  %v11350_v40 = vadd.f32 %v22518_v0, %v21522_v10  ;;  %v15891_v2 = vld [vmem:[#allocation5 + $0x1b0] sm:$0xff]  ;;  %v21627_v23 = vpop.f32.mrf.mxu1  ;;  %v22521_v0 = vld [vmem:[#allocation28_spill] sm:$0xff] }
 0x5bf   :  { %v11458_v19 = vpop.f32.mrf.mxu0  ;;  %12135 = vmatmul.mubr.bf16.gmra.mxu0 %v21013_v31  ;;  %22519 = vst [vmem:[#allocation21_spill] sm:$0xff] %v21627_v23 }
 0x5c0   :  { %12704 = vst [vmem:[#allocation8 + $0x128] sm:$0xff] %v12560_v52  ;;  %v12568_v62 = vmax.f32 %v12424_v50, 0.0  ;;  %v12425_v51 = vadd.f32 %v15890_v49, %v11455_v21  ;;  %v11459_v63 = vadd.f32 %v11458_v19, %v11346_v48  ;;  %12144 = vmatprep.mubr.bf16.mxu0 %v21058_v59  ;;  %14518 = vmatpush3.bf16.msra.mxu0 %v15875_v35  ;;  %v22520_v50 = vld [vmem:[#allocation24_spill] sm:$0xff]  ;;  %v15892_v19 = vld [vmem:[#allocation5 + $0x1b8] sm:$0xff] }
 0x5c1   :  { %v11460_v20 = vpop.f32.mrf.mxu0  ;;  %14519 = vmatprep.subr.bf16.mxu0 %v15876_v28  ;;  %v11352_v35 = vadd.f32 %v22520_v50, %v21528_v39 }
 0x5c2   :  { %12712 = vst [vmem:[#allocation8 + $0x168] sm:$0xff] %v12568_v62  ;;  %v12569_v4 = vmax.f32 %v12425_v51, 0.0  ;;  %v12433_v36 = vadd.f32 %v15891_v2, %v11459_v63  ;;  %v11461_v52 = vadd.f32 %v11460_v20, %v11348_v25  ;;  %v11356_v62 = vadd.f32 %v22521_v0, %v21522_v10  ;;  %v15893_v63 = vld [vmem:[#allocation5 + $0x1f8] sm:$0xff]  ;;  %v21633_v2 = vpop.f32.mrf.mxu1 }
 0x5c3   :  { %v11462_v48 = vpop.f32.mrf.mxu0  ;;  %22522 = vst [vmem:[#allocation12_spill] sm:$0xff] %v21633_v2  ;;  %v22526_v2 = vld [vmem:[#allocation17_spill] sm:$0xff] }
 0x5c4   :  { %12713 = vst [vmem:[#allocation8 + $0x170] sm:$0xff] %v12569_v4  ;;  %v12577_v21 = vmax.f32 %v12433_v36, 0.0  ;;  %v12434_v24 = vadd.f32 %v15892_v19, %v11461_v52  ;;  %v11463_v49 = vadd.f32 %v11462_v48, %v11350_v40  ;;  %14520 = vmatpush3.bf16.msra.mxu0 %v15877_v16  ;;  %v22523_v4 = vld [vmem:[#allocation31_spill] sm:$0xff]  ;;  %v21641_v0 = vpop.f32.mrf.mxu1 }
 0x5c5   :  { %v11464_v28 = vpop.f32.mrf.mxu0  ;;  %v11358_v36 = vadd.f32 %v22523_v4, %v21528_v39  ;;  %v15894_v16 = vld [vmem:[#allocation5 + $0x200] sm:$0xff] }
 0x5c6   :  { %12721 = vst [vmem:[#allocation8 + $0x1b0] sm:$0xff] %v12577_v21  ;;  %v12578_v51 = vmax.f32 %v12434_v24, 0.0  ;;  %v12442_v25 = vadd.f32 %v15893_v63, %v11463_v49  ;;  %v11465_v20 = vadd.f32 %v11464_v28, %v11352_v35  ;;  %v22524_v21 = vld [vmem:[#allocation40_spill] sm:$0xff]  ;;  %v15895_v24 = vld [vmem:[#allocation5 + $0x240] sm:$0xff] }
 0x5c7   :  { %v11468_v23 = vpop.f32.mrf.mxu0  ;;  %12145 = vmatmul.mubr.bf16.gmra.mxu0 %v21051_v6  ;;  %v11360_v19 = vadd.f32 %v22524_v21, %v21522_v10  ;;  %v11366_v21 = vadd.f32 %v22526_v2, %v21522_v10 }
 0x5c8   :  { %12722 = vst [vmem:[#allocation8 + $0x1b8] sm:$0xff] %v12578_v51  ;;  %v12586_v40 = vmax.f32 %v12442_v25, 0.0  ;;  %v12443_v52 = vadd.f32 %v15894_v16, %v11465_v20  ;;  %v11469_v48 = vadd.f32 %v11468_v23, %v11356_v62  ;;  %12154 = vmatprep.mubr.bf16.mxu0 %v21096_v33  ;;  %v22525_v51 = vld [vmem:[#allocation16_spill] sm:$0xff] }
 0x5c9   :  { %v11470_v50 = vpop.f32.mrf.mxu0  ;;  %v11362_v25 = vadd.f32 %v22525_v51, %v21528_v39  ;;  %v15896_v23 = vld [vmem:[#allocation5 + $0x248] sm:$0xff] }
 0x5ca   :  { %12730 = vst [vmem:[#allocation8 + $0x1f8] sm:$0xff] %v12586_v40  ;;  %v12587_v35 = vmax.f32 %v12443_v52, 0.0  ;;  %v12451_v49 = vadd.f32 %v15895_v24, %v11469_v48  ;;  %v11471_v28 = vadd.f32 %v11470_v50, %v11358_v36  ;;  %v15897_v52 = vld [vmem:[#allocation5 + $0x288] sm:$0xff]  ;;  %v21647_v50 = vpop.f32.mrf.mxu1 }
 0x5cb   :  { %v11472_v63 = vpop.f32.mrf.mxu0  ;;  %22527 = vst [vmem:[#allocation20_spill] sm:$0xff] %v21647_v50 }
 0x5cc   :  { %12731 = vst [vmem:[#allocation8 + $0x200] sm:$0xff] %v12587_v35  ;;  %v12595_v20 = vmax.f32 %v12451_v49, 0.0  ;;  %v12452_v62 = vadd.f32 %v15896_v23, %v11471_v28  ;;  %v11473_v4 = vadd.f32 %v11472_v63, %v11360_v19  ;;  %v22528_v35 = vld [vmem:[#allocation45_spill] sm:$0xff] }
 0x5cd   :  { %v11474_v16 = vpop.f32.mrf.mxu0  ;;  %v11368_v49 = vadd.f32 %v22528_v35, %v21528_v39  ;;  %v15898_v19 = vld [vmem:[#allocation5 + $0x290] sm:$0xff] }
 0x5ce   :  { %12739 = vst [vmem:[#allocation8 + $0x240] sm:$0xff] %v12595_v20  ;;  %v12596_v40 = vmax.f32 %v12452_v62, 0.0  ;;  %v12460_v48 = vadd.f32 %v15897_v52, %v11473_v4  ;;  %v11475_v36 = vadd.f32 %v11474_v16, %v11362_v25  ;;  %v22529_v20 = vld [vmem:[#allocation26_spill] sm:$0xff]  ;;  %v15899_v62 = vld [vmem:[#allocation5 + $0x2d0] sm:$0xff]  ;;  %v21655_v52 = vpop.f32.mrf.mxu1 }
 0x5cf   :  { %v11478_v24 = vpop.f32.mrf.mxu0  ;;  %12155 = vmatmul.mubr.bf16.gmra.mxu0 %v21089_v56  ;;  %v11370_v23 = vadd.f32 %v22529_v20, %v21522_v10 }
 0x5d0   :  { %12740 = vst [vmem:[#allocation8 + $0x248] sm:$0xff] %v12596_v40  ;;  %v12604_v28 = vmax.f32 %v12460_v48, 0.0  ;;  %v12461_v63 = vadd.f32 %v15898_v19, %v11475_v36  ;;  %v11479_v51 = vadd.f32 %v11478_v24, %v11366_v21  ;;  %12164 = vmatprep.mubr.bf16.mxu0 %v21134_v27  ;;  %v11372_v40 = vadd.f32 %v21091_v18, %v21528_v39  ;;  %v15900_v21 = vld [vmem:[#allocation5 + $0x2d8] sm:$0xff]  ;;  %v22530_v19 = vld [vmem:[#allocation39_spill] sm:$0xff] }
 0x5d1   :  { %v11480_v2 = vpop.f32.mrf.mxu0  ;;  %v11376_v20 = vadd.f32 %v22530_v19, %v21522_v10  ;;  %v22532_v18 = vld [vmem:[#allocation19_spill] sm:$0xff] }
 0x5d2   :  { %12748 = vst [vmem:[#allocation8 + $0x288] sm:$0xff] %v12604_v28  ;;  %v12605_v25 = vmax.f32 %v12461_v63, 0.0  ;;  %v12469_v4 = vadd.f32 %v15899_v62, %v11479_v51  ;;  %v11481_v16 = vadd.f32 %v11480_v2, %v11368_v49  ;;  %v15901_v63 = vld [vmem:[#allocation5 + $0x318] sm:$0xff]  ;;  %v21661_v2 = vpop.f32.mrf.mxu1 }
 0x5d3   :  { %v11482_v50 = vpop.f32.mrf.mxu0  ;;  %22531 = vst [vmem:[#allocation42_spill] sm:$0xff] %v21661_v2 }
 0x5d4   :  { %12749 = vst [vmem:[#allocation8 + $0x290] sm:$0xff] %v12605_v25  ;;  %v12613_v48 = vmax.f32 %v12469_v4, 0.0  ;;  %v12470_v36 = vadd.f32 %v15900_v21, %v11481_v16  ;;  %v11483_v24 = vadd.f32 %v11482_v50, %v11370_v23  ;;  %v11378_v25 = vadd.f32 %v22532_v18, %v21528_v39  ;;  %v15902_v50 = vld [vmem:[#allocation5 + $0x320] sm:$0xff]  ;;  %v22533_v21 = vld [vmem:[#allocation14_spill] sm:$0xff] }
 0x5d5   :  { %v11484_v35 = vpop.f32.mrf.mxu0 }
 0x5d6   :  { %12757 = vst [vmem:[#allocation8 + $0x2d0] sm:$0xff] %v12613_v48  ;;  %v12614_v28 = vmax.f32 %v12470_v36, 0.0  ;;  %v12478_v51 = vadd.f32 %v15901_v63, %v11483_v24  ;;  %v11485_v49 = vadd.f32 %v11484_v35, %v11372_v40  ;;  %v11380_v36 = vadd.f32 %v22533_v21, %v21522_v10  ;;  %v15903_v24 = vld [vmem:[#allocation5 + $0x360] sm:$0xff]  ;;  %v21669_v63 = vpop.f32.mrf.mxu1 }
 0x5d7   :  { %v11488_v62 = vpop.f32.mrf.mxu0  ;;  %12165 = vmatmul.mubr.bf16.gmra.mxu0 %v21127_v37  ;;  %22534 = vst [vmem:[#allocation18_spill] sm:$0xff] %v21669_v63 }
 0x5d8   :  { %12758 = vst [vmem:[#allocation8 + $0x2d8] sm:$0xff] %v12614_v28  ;;  %v12622_v4 = vmax.f32 %v12478_v51, 0.0  ;;  %v12479_v23 = vadd.f32 %v15902_v50, %v11485_v49  ;;  %v11489_v16 = vadd.f32 %v11488_v62, %v11376_v20  ;;  %12174 = vmatprep.mubr.bf16.mxu0 %v21163_v7  ;;  %v11382_v28 = vadd.f32 %v21129_v47, %v21528_v39  ;;  %v15904_v20 = vld [vmem:[#allocation5 + $0x368] sm:$0xff] }
 0x5d9   :  { %v11490_v48 = vpop.f32.mrf.mxu0  ;;  %v11386_v50 = vadd.f32 %v21136_v17, %v21522_v10  ;;  %v11388_v47 = vadd.f32 %v21147_v45, %v21528_v39 }
 0x5da   :  { %12766 = vst [vmem:[#allocation8 + $0x318] sm:$0xff] %v12622_v4  ;;  %v12623_v40 = vmax.f32 %v12479_v23, 0.0  ;;  %v12487_v35 = vadd.f32 %v15903_v24, %v11489_v16  ;;  %v11491_v19 = vadd.f32 %v11490_v48, %v11378_v25  ;;  %v15905_v23 = vld [vmem:[#allocation5 + $0x3a8] sm:$0xff]  ;;  %v22535_v48 = vld [vmem:[#allocation34_spill] sm:$0xff]  ;;  %v21676_v24 = vpop.f32.mrf.mxu1 }
 0x5db   :  { %v11492_v2 = vpop.f32.mrf.mxu0  ;;  %v9778_v21 = vsub.s32 3, %v22535_v48 }
 0x5dc   :  { %12767 = vst [vmem:[#allocation8 + $0x320] sm:$0xff] %v12623_v40  ;;  %v12631_v51 = vmax.f32 %v12487_v35, 0.0  ;;  %v12488_v49 = vadd.f32 %v15904_v20, %v11491_v19  ;;  %v11493_v62 = vadd.f32 %v11492_v2, %v11380_v36  ;;  %v15906_v36 = vld [vmem:[#allocation5 + $0x3b0] sm:$0xff]  ;;  %v22536_v35 = vsub.s32 2, %v22535_v48 }
 0x5dd   :  { %v11494_v18 = vpop.f32.mrf.mxu0 }
 0x5de   :  { %12775 = vst [vmem:[#allocation8 + $0x360] sm:$0xff] %v12631_v51  ;;  %v12632_v4 = vmax.f32 %v12488_v49, 0.0  ;;  %v12496_v16 = vadd.f32 %v15905_v23, %v11493_v62  ;;  %v11495_v25 = vadd.f32 %v11494_v18, %v11382_v28  ;;  %v21685_v19 = vrot.slane %v21508_v22, %v22536_v35  ;;  %v15907_v49 = vld [vmem:[#allocation5 + $0x3f0] sm:$0xff]  ;;  %v15908_v23 = vld [vmem:[#allocation5 + $0x3f8] sm:$0xff]  ;;  %v15910_v35 = vld [vmem:[#allocation5 + $0x440] sm:$0xff] }
 0x5df   :  { %v11498_v63 = vpop.f32.mrf.mxu0  ;;  %12175 = vmatmul.mubr.bf16.gmra.mxu0 %v21159_v1  ;;  %v11390_v51 = vadd.f32 %v21151_v9, %v21522_v10  ;;  %v21690_v18 = vrot.slane %v21508_v22, %v9778_v21 }
 0x5e0   :  { %12776 = vst [vmem:[#allocation8 + $0x368] sm:$0xff] %v12632_v4  ;;  %v12640_v2 = vmax.f32 %v12496_v16, 0.0  ;;  %v12497_v40 = vadd.f32 %v15906_v36, %v11495_v25  ;;  %v11499_v17 = vadd.f32 %v11498_v63, %v11386_v50  ;;  %12314 = vmatprep.mubr.bf16.mxu0 %v20879_v5  ;;  %v21692_v63 = vpop.f32.mrf.mxu1  ;;  %v11392_v50 = vadd.f32 %v21161_v55, %v21528_v39 }
 0x5e1   :  { %v11500_v28 = vpop.f32.mrf.mxu0  ;;  %v11542_v10 = vadd.f32 %v21165_v57, %v21685_v19  ;;  %v11544_v55 = vadd.f32 %v21175_v60, %v21690_v18  ;;  %v11548_v60 = vadd.f32 %v21188_v32, %v21690_v18  ;;  %v11554_v32 = vadd.f32 %v21200_v46, %v21690_v18 }
 0x5e2   :  { %12784 = vst [vmem:[#allocation8 + $0x3a8] sm:$0xff] %v12640_v2  ;;  %v12641_v20 = vmax.f32 %v12497_v40, 0.0  ;;  %v12505_v45 = vadd.f32 %v15907_v49, %v11499_v17  ;;  %v11501_v62 = vadd.f32 %v11500_v28, %v11388_v47  ;;  %v15909_v2 = vld [vmem:[#allocation5 + $0x438] sm:$0xff]  ;;  %v21698_v40 = vpop.f32.mrf.mxu1  ;;  %v11558_v46 = vadd.f32 %v21212_v8, %v21690_v18 }
 0x5e3   :  { %v11502_v5 = vpop.f32.mrf.mxu0  ;;  %v11564_v8 = vadd.f32 %v21224_v53, %v21690_v18  ;;  %v11568_v53 = vadd.f32 %v21236_v61, %v21690_v18  ;;  %v22538_v61 = vld [vmem:[#allocation47_spill] sm:$0xff] }
 0x5e4   :  { %12785 = vst [vmem:[#allocation8 + $0x3b0] sm:$0xff] %v12641_v20  ;;  %v12649_v4 = vmax.f32 %v12505_v45, 0.0  ;;  %v12506_v16 = vadd.f32 %v15908_v23, %v11501_v62  ;;  %v11503_v25 = vadd.f32 %v11502_v5, %v11390_v51  ;;  %v11546_v20 = vadd.f32 %v21179_v11, %v21685_v19  ;;  %v15911_v45 = vld [vmem:[#allocation5 + $0x10] sm:$0xff]  ;;  %v15912_v23 = vld [vmem:[#allocation5 + $0x18] sm:$0xff] }
 0x5e5   :  { %v11504_v9 = vpop.f32.mrf.mxu0  ;;  %v11552_v11 = vadd.f32 %v21190_v58, %v21685_v19 }
 0x5e6   :  { %12793 = vst [vmem:[#allocation8 + $0x3f0] sm:$0xff] %v12649_v4  ;;  %v12650_v47 = vmax.f32 %v12506_v16, 0.0  ;;  %v12514_v21 = vadd.f32 %v15909_v2, %v11503_v25  ;;  %v11505_v36 = vadd.f32 %v11504_v9, %v11392_v50 }
 0x5e7   :  { %v11654_v17 = vpop.f32.mrf.mxu0  ;;  %12315 = vmatmul.mubr.bf16.vlgmr.msra.gmra.mxu0 %v20869_v3  ;;  %v21706_v3 = vpop.f32.mrf.mxu1 }
 0x5e8   :  { %12794 = vst [vmem:[#allocation8 + $0x3f8] sm:$0xff] %v12650_v47  ;;  %v12658_v39 = vmax.f32 %v12514_v21, 0.0  ;;  %v12515_v28 = vadd.f32 %v15910_v35, %v11505_v36  ;;  %v11655_v51 = vadd.f32 %v11654_v17, %v11542_v10  ;;  %12322 = vmatprep.mubr.bf16.mxu0 %v20929_v43  ;;  %v15913_v10 = vld [vmem:[#allocation5 + $0x58] sm:$0xff] }
 0x5e9   :  { %v11656_v57 = vpop.f32.mrf.mxu0  ;;  %v21712_v21 = vpop.f32.mrf.mxu1 }
 0x5ea   :  { %12802 = vst [vmem:[#allocation8 + $0x438] sm:$0xff] %v12658_v39  ;;  %v12659_v49 = vmax.f32 %v12515_v28, 0.0  ;;  %v12381_v62 = vadd.f32 %v15911_v45, %v11655_v51  ;;  %v11657_v5 = vadd.f32 %v11656_v57, %v11544_v55  ;;  %v15914_v55 = vld [vmem:[#allocation5 + $0x60] sm:$0xff]  ;;  %v11556_v28 = vadd.f32 %v21203_v38, %v21685_v19 }
 0x5eb   :  { %v11658_v50 = vpop.f32.mrf.mxu0  ;;  %v15915_v57 = vld [vmem:[#allocation5 + $0xa0] sm:$0xff]  ;;  %v11562_v38 = vadd.f32 %v21214_v14, %v21685_v19 }
 0x5ec   :  { %12803 = vst [vmem:[#allocation8 + $0x440] sm:$0xff] %v12659_v49  ;;  %v12525_v4 = vmax.f32 %v12381_v62, 0.0  ;;  %v12382_v16 = vadd.f32 %v15912_v23, %v11657_v5  ;;  %v11659_v43 = vadd.f32 %v11658_v50, %v11546_v20  ;;  %v15916_v5 = vld [vmem:[#allocation5 + $0xa8] sm:$0xff] }
 0x5ed   :  { %v11660_v25 = vpop.f32.mrf.mxu0  ;;  %v15917_v23 = vld [vmem:[#allocation5 + $0xe8] sm:$0xff] }
 0x5ee   :  { %12669 = vst [vmem:[#allocation8 + $0x10] sm:$0xff] %v12525_v4  ;;  %v12526_v9 = vmax.f32 %v12382_v16, 0.0  ;;  %v12390_v47 = vadd.f32 %v15913_v10, %v11659_v43  ;;  %v11661_v2 = vadd.f32 %v11660_v25, %v11548_v60  ;;  %v15918_v10 = vld [vmem:[#allocation5 + $0xf0] sm:$0xff] }
 0x5ef   :  { %v11664_v36 = vpop.f32.mrf.mxu0  ;;  %12323 = vmatmul.mubr.bf16.gmra.mxu0 %v20916_v41  ;;  %v21720_v41 = vpop.f32.mrf.mxu1 }
 0x5f0   :  { %12670 = vst [vmem:[#allocation8 + $0x18] sm:$0xff] %v12526_v9  ;;  %v12534_v17 = vmax.f32 %v12390_v47, 0.0  ;;  %v12391_v39 = vadd.f32 %v15914_v55, %v11661_v2  ;;  %v11665_v35 = vadd.f32 %v11664_v36, %v11552_v11  ;;  %12330 = vmatprep.mubr.bf16.mxu0 %v20979_v30  ;;  %v11566_v36 = vadd.f32 %v21227_v54, %v21685_v19 }
 0x5f1   :  { %v11666_v58 = vpop.f32.mrf.mxu0  ;;  %v21726_v25 = vpop.f32.mrf.mxu1 }
 0x5f2   :  { %12678 = vst [vmem:[#allocation8 + $0x58] sm:$0xff] %v12534_v17  ;;  %v12535_v51 = vmax.f32 %v12391_v39, 0.0  ;;  %v12399_v20 = vadd.f32 %v15915_v57, %v11665_v35  ;;  %v11667_v49 = vadd.f32 %v11666_v58, %v11554_v32  ;;  %v15919_v17 = vld [vmem:[#allocation5 + $0x130] sm:$0xff] }
 0x5f3   :  { %v11668_v45 = vpop.f32.mrf.mxu0 }
 0x5f4   :  { %12679 = vst [vmem:[#allocation8 + $0x60] sm:$0xff] %v12535_v51  ;;  %v12543_v62 = vmax.f32 %v12399_v20, 0.0  ;;  %v12400_v50 = vadd.f32 %v15916_v5, %v11667_v49  ;;  %v11669_v30 = vadd.f32 %v11668_v45, %v11556_v28  ;;  %v15920_v28 = vld [vmem:[#allocation5 + $0x138] sm:$0xff]  ;;  %v22537_v20 = vld [vmem:[#allocation41_spill] sm:$0xff] }
 0x5f5   :  { %v11670_v60 = vpop.f32.mrf.mxu0  ;;  %v11572_v54 = vadd.f32 %v22537_v20, %v21685_v19  ;;  %v15921_v45 = vld [vmem:[#allocation5 + $0x178] sm:$0xff] }
 0x5f6   :  { %12687 = vst [vmem:[#allocation8 + $0xa0] sm:$0xff] %v12543_v62  ;;  %v12544_v4 = vmax.f32 %v12400_v50, 0.0  ;;  %v12408_v16 = vadd.f32 %v15917_v23, %v11669_v30  ;;  %v11671_v43 = vadd.f32 %v11670_v60, %v11558_v46  ;;  %v11574_v30 = vadd.f32 %v22538_v61, %v21690_v18 }
 0x5f7   :  { %v11674_v11 = vpop.f32.mrf.mxu0  ;;  %12331 = vmatmul.mubr.bf16.gmra.mxu0 %v20966_v13  ;;  %v21734_v13 = vpop.f32.mrf.mxu1 }
 0x5f8   :  { %12688 = vst [vmem:[#allocation8 + $0xa8] sm:$0xff] %v12544_v4  ;;  %v12552_v9 = vmax.f32 %v12408_v16, 0.0  ;;  %v12409_v47 = vadd.f32 %v15918_v10, %v11671_v43  ;;  %v11675_v2 = vadd.f32 %v11674_v11, %v11562_v38  ;;  %12338 = vmatprep.mubr.bf16.mxu0 %v21020_v42  ;;  %v15922_v38 = vld [vmem:[#allocation5 + $0x180] sm:$0xff] }
 0x5f9   :  { %v11676_v14 = vpop.f32.mrf.mxu0  ;;  %v21740_v5 = vpop.f32.mrf.mxu1  ;;  %v22539_v43 = vld [vmem:[#allocation11_spill] sm:$0xff] }
 0x5fa   :  { %12696 = vst [vmem:[#allocation8 + $0xe8] sm:$0xff] %v12552_v9  ;;  %v12553_v32 = vmax.f32 %v12409_v47, 0.0  ;;  %v12417_v55 = vadd.f32 %v15919_v17, %v11675_v2  ;;  %v11677_v39 = vadd.f32 %v11676_v14, %v11564_v8  ;;  %v11576_v11 = vadd.f32 %v22539_v43, %v21685_v19  ;;  %v15923_v9 = vld [vmem:[#allocation5 + $0x1c0] sm:$0xff]  ;;  %v22540_v14 = vld [vmem:[#allocation49_spill] sm:$0xff]  ;;  %v15924_v17 = vld [vmem:[#allocation5 + $0x1c8] sm:$0xff] }
 0x5fb   :  { %v11678_v35 = vpop.f32.mrf.mxu0 }
 0x5fc   :  { %12697 = vst [vmem:[#allocation8 + $0xf0] sm:$0xff] %v12553_v32  ;;  %v12561_v58 = vmax.f32 %v12417_v55, 0.0  ;;  %v12418_v51 = vadd.f32 %v15920_v28, %v11677_v39  ;;  %v11679_v42 = vadd.f32 %v11678_v35, %v11566_v36  ;;  %v11578_v36 = vadd.f32 %v22540_v14, %v21690_v18  ;;  %v22541_v35 = vld [vmem:[#allocation46_spill] sm:$0xff]  ;;  %v15925_v28 = vld [vmem:[#allocation5 + $0x208] sm:$0xff]  ;;  %v22545_v14 = vld [vmem:[#allocation51_spill] sm:$0xff] }
 0x5fd   :  { %v11680_v57 = vpop.f32.mrf.mxu0 }
 0x5fe   :  { %12705 = vst [vmem:[#allocation8 + $0x130] sm:$0xff] %v12561_v58  ;;  %v12562_v49 = vmax.f32 %v12418_v51, 0.0  ;;  %v12426_v46 = vadd.f32 %v15921_v45, %v11679_v42  ;;  %v11681_v62 = vadd.f32 %v11680_v57, %v11568_v53  ;;  %v11582_v53 = vadd.f32 %v22541_v35, %v21685_v19 }
 0x5ff   :  { %v11684_v50 = vpop.f32.mrf.mxu0  ;;  %12339 = vmatmul.mubr.bf16.gmra.mxu0 %v21013_v31  ;;  %v21748_v31 = vpop.f32.mrf.mxu1 }
 0x600   :  { %12706 = vst [vmem:[#allocation8 + $0x138] sm:$0xff] %v12562_v49  ;;  %v12570_v60 = vmax.f32 %v12426_v46, 0.0  ;;  %v12427_v4 = vadd.f32 %v15922_v38, %v11681_v62  ;;  %v11685_v23 = vadd.f32 %v11684_v50, %v11572_v54  ;;  %12346 = vmatprep.mubr.bf16.mxu0 %v21058_v59  ;;  %v22542_v54 = vld [vmem:[#allocation48_spill] sm:$0xff]  ;;  %v15926_v46 = vld [vmem:[#allocation5 + $0x210] sm:$0xff] }
 0x601   :  { %v11686_v16 = vpop.f32.mrf.mxu0  ;;  %v21754_v57 = vpop.f32.mrf.mxu1  ;;  %v11584_v49 = vadd.f32 %v22542_v54, %v21690_v18 }
 0x602   :  { %12714 = vst [vmem:[#allocation8 + $0x178] sm:$0xff] %v12570_v60  ;;  %v12571_v8 = vmax.f32 %v12427_v4, 0.0  ;;  %v12435_v10 = vadd.f32 %v15923_v9, %v11685_v23  ;;  %v11687_v47 = vadd.f32 %v11686_v16, %v11574_v30  ;;  %v22543_v30 = vld [vmem:[#allocation25_spill] sm:$0xff] }
 0x603   :  { %v11688_v2 = vpop.f32.mrf.mxu0  ;;  %v11586_v60 = vadd.f32 %v22543_v30, %v21685_v19  ;;  %v15927_v4 = vld [vmem:[#allocation5 + $0x250] sm:$0xff] }
 0x604   :  { %12715 = vst [vmem:[#allocation8 + $0x180] sm:$0xff] %v12571_v8  ;;  %v12579_v32 = vmax.f32 %v12435_v10, 0.0  ;;  %v12436_v55 = vadd.f32 %v15924_v17, %v11687_v47  ;;  %v11689_v59 = vadd.f32 %v11688_v2, %v11576_v11  ;;  %v22544_v11 = vld [vmem:[#allocation32_spill] sm:$0xff]  ;;  %v15928_v10 = vld [vmem:[#allocation5 + $0x258] sm:$0xff] }
 0x605   :  { %v11690_v39 = vpop.f32.mrf.mxu0  ;;  %v11588_v8 = vadd.f32 %v22544_v11, %v21690_v18  ;;  %v15929_v17 = vld [vmem:[#allocation5 + $0x298] sm:$0xff]  ;;  %v22549_v11 = vld [vmem:[#allocation53_spill] sm:$0xff] }
 0x606   :  { %12723 = vst [vmem:[#allocation8 + $0x1c0] sm:$0xff] %v12579_v32  ;;  %v12580_v58 = vmax.f32 %v12436_v55, 0.0  ;;  %v12444_v51 = vadd.f32 %v15925_v28, %v11689_v59  ;;  %v11691_v42 = vadd.f32 %v11690_v39, %v11578_v36  ;;  %v11592_v36 = vadd.f32 %v22545_v14, %v21685_v19 }
 0x607   :  { %v11694_v20 = vpop.f32.mrf.mxu0  ;;  %12347 = vmatmul.mubr.bf16.gmra.mxu0 %v21051_v6  ;;  %v21762_v6 = vpop.f32.mrf.mxu1 }
 0x608   :  { %12724 = vst [vmem:[#allocation8 + $0x1c8] sm:$0xff] %v12580_v58  ;;  %v12588_v45 = vmax.f32 %v12444_v51, 0.0  ;;  %v12445_v62 = vadd.f32 %v15926_v46, %v11691_v42  ;;  %v11695_v50 = vadd.f32 %v11694_v20, %v11582_v53  ;;  %12354 = vmatprep.mubr.bf16.mxu0 %v21096_v33  ;;  %v22546_v53 = vld [vmem:[#allocation13_spill] sm:$0xff]  ;;  %v15930_v51 = vld [vmem:[#allocation5 + $0x2a0] sm:$0xff] }
 0x609   :  { %v11696_v61 = vpop.f32.mrf.mxu0  ;;  %v21768_v39 = vpop.f32.mrf.mxu1  ;;  %v11594_v58 = vadd.f32 %v22546_v53, %v21690_v18 }
 0x60a   :  { %12732 = vst [vmem:[#allocation8 + $0x208] sm:$0xff] %v12588_v45  ;;  %v12589_v38 = vmax.f32 %v12445_v62, 0.0  ;;  %v12453_v23 = vadd.f32 %v15927_v4, %v11695_v50  ;;  %v11697_v16 = vadd.f32 %v11696_v61, %v11584_v49  ;;  %v22547_v49 = vld [vmem:[#allocation54_spill] sm:$0xff]  ;;  %v15931_v62 = vld [vmem:[#allocation5 + $0x2e0] sm:$0xff] }
 0x60b   :  { %v11698_v43 = vpop.f32.mrf.mxu0  ;;  %v11596_v45 = vadd.f32 %v22547_v49, %v21685_v19 }
 0x60c   :  { %12733 = vst [vmem:[#allocation8 + $0x210] sm:$0xff] %v12589_v38  ;;  %v12597_v9 = vmax.f32 %v12453_v23, 0.0  ;;  %v12454_v47 = vadd.f32 %v15928_v10, %v11697_v16  ;;  %v11699_v33 = vadd.f32 %v11698_v43, %v11586_v60  ;;  %v22548_v60 = vld [vmem:[#allocation50_spill] sm:$0xff]  ;;  %v15932_v23 = vld [vmem:[#allocation5 + $0x2e8] sm:$0xff] }
 0x60d   :  { %v11700_v2 = vpop.f32.mrf.mxu0  ;;  %v11598_v38 = vadd.f32 %v22548_v60, %v21690_v18  ;;  %v15933_v10 = vld [vmem:[#allocation5 + $0x328] sm:$0xff] }
 0x60e   :  { %12741 = vst [vmem:[#allocation8 + $0x250] sm:$0xff] %v12597_v9  ;;  %v12598_v32 = vmax.f32 %v12454_v47, 0.0  ;;  %v12462_v55 = vadd.f32 %v15929_v17, %v11699_v33  ;;  %v11701_v59 = vadd.f32 %v11700_v2, %v11588_v8  ;;  %v11602_v8 = vadd.f32 %v22549_v11, %v21685_v19 }
 0x60f   :  { %v11704_v35 = vpop.f32.mrf.mxu0  ;;  %12355 = vmatmul.mubr.bf16.gmra.mxu0 %v21089_v56  ;;  %v21776_v56 = vpop.f32.mrf.mxu1  ;;  %v9786_v11 = vsub.s32 5, %v22535_v48 }
 0x610   :  { %12742 = vst [vmem:[#allocation8 + $0x258] sm:$0xff] %v12598_v32  ;;  %v12606_v28 = vmax.f32 %v12462_v55, 0.0  ;;  %v12463_v42 = vadd.f32 %v15930_v51, %v11701_v59  ;;  %v11705_v20 = vadd.f32 %v11704_v35, %v11592_v36  ;;  %12362 = vmatprep.mubr.bf16.mxu0 %v21134_v27  ;;  %v22550_v36 = vld [vmem:[#allocation38_spill] sm:$0xff]  ;;  %v15934_v55 = vld [vmem:[#allocation5 + $0x330] sm:$0xff] }
 0x611   :  { %v11706_v54 = vpop.f32.mrf.mxu0  ;;  %v21782_v2 = vpop.f32.mrf.mxu1  ;;  %v11604_v32 = vadd.f32 %v22550_v36, %v21690_v18 }
 0x612   :  { %12750 = vst [vmem:[#allocation8 + $0x298] sm:$0xff] %v12606_v28  ;;  %v12607_v46 = vmax.f32 %v12463_v42, 0.0  ;;  %v12471_v50 = vadd.f32 %v15931_v62, %v11705_v20  ;;  %v11707_v61 = vadd.f32 %v11706_v54, %v11594_v58  ;;  %v22551_v58 = vld [vmem:[#allocation55_spill] sm:$0xff]  ;;  %v15935_v42 = vld [vmem:[#allocation5 + $0x370] sm:$0xff] }
 0x613   :  { %v11708_v30 = vpop.f32.mrf.mxu0  ;;  %v11606_v28 = vadd.f32 %v22551_v58, %v21685_v19  ;;  %v15939_v58 = vld [vmem:[#allocation5 + $0x400] sm:$0xff] }
 0x614   :  { %12751 = vst [vmem:[#allocation8 + $0x2a0] sm:$0xff] %v12607_v46  ;;  %v12615_v4 = vmax.f32 %v12471_v50, 0.0  ;;  %v12472_v16 = vadd.f32 %v15932_v23, %v11707_v61  ;;  %v11709_v27 = vadd.f32 %v11708_v30, %v11596_v45  ;;  %v22552_v45 = vld [vmem:[#allocation52_spill] sm:$0xff]  ;;  %v15936_v50 = vld [vmem:[#allocation5 + $0x378] sm:$0xff]  ;;  %v9782_v30 = vsub.s32 4, %v22535_v48 }
 0x615   :  { %v11710_v43 = vpop.f32.mrf.mxu0  ;;  %v11608_v46 = vadd.f32 %v22552_v45, %v21690_v18 }
 0x616   :  { %12759 = vst [vmem:[#allocation8 + $0x2e0] sm:$0xff] %v12615_v4  ;;  %v12616_v9 = vmax.f32 %v12472_v16, 0.0  ;;  %v12480_v47 = vadd.f32 %v15933_v10, %v11709_v27  ;;  %v11711_v33 = vadd.f32 %v11710_v43, %v11598_v38  ;;  %v22553_v38 = vld [vmem:[#allocation43_spill] sm:$0xff]  ;;  %v15937_v16 = vld [vmem:[#allocation5 + $0x3b8] sm:$0xff]  ;;  %v22554_v10 = vld [vmem:[#allocation56_spill] sm:$0xff] }
 0x617   :  { %v11714_v14 = vpop.f32.mrf.mxu0  ;;  %12363 = vmatmul.mubr.bf16.gmra.mxu0 %v21127_v37  ;;  %v21790_v37 = vpop.f32.mrf.mxu1  ;;  %v11612_v4 = vadd.f32 %v22553_v38, %v21685_v19 }
 0x618   :  { %12760 = vst [vmem:[#allocation8 + $0x2e8] sm:$0xff] %v12616_v9  ;;  %v12624_v17 = vmax.f32 %v12480_v47, 0.0  ;;  %v12481_v59 = vadd.f32 %v15934_v55, %v11711_v33  ;;  %v11715_v35 = vadd.f32 %v11714_v14, %v11602_v8  ;;  %12370 = vmatprep.mubr.bf16.mxu0 %v21163_v7  ;;  %v11614_v47 = vadd.f32 %v22554_v10, %v21690_v18  ;;  %v15938_v14 = vld [vmem:[#allocation5 + $0x3c0] sm:$0xff] }
 0x619   :  { %v11716_v53 = vpop.f32.mrf.mxu0  ;;  %v21798_v8 = vpop.f32.mrf.mxu1 }
 0x61a   :  { %12768 = vst [vmem:[#allocation8 + $0x328] sm:$0xff] %v12624_v17  ;;  %v12625_v51 = vmax.f32 %v12481_v59, 0.0  ;;  %v12489_v20 = vadd.f32 %v15935_v42, %v11715_v35  ;;  %v11717_v54 = vadd.f32 %v11716_v53, %v11604_v32  ;;  %v21804_v17 = vrot.slane %v21508_v22, %v9782_v30  ;;  %v22555_v59 = vld [vmem:[#allocation27_spill] sm:$0xff] }
 0x61b   :  { %v11718_v49 = vpop.f32.mrf.mxu0  ;;  %v11616_v35 = vadd.f32 %v22555_v59, %v21685_v19  ;;  %v21811_v42 = vpop.f32.mrf.mxu1 }
 0x61c   :  { %12769 = vst [vmem:[#allocation8 + $0x330] sm:$0xff] %v12625_v51  ;;  %v12633_v62 = vmax.f32 %v12489_v20, 0.0  ;;  %v12490_v61 = vadd.f32 %v15936_v50, %v11717_v54  ;;  %v11719_v7 = vadd.f32 %v11718_v49, %v11606_v28  ;;  %v21809_v51 = vrot.slane %v21508_v22, %v9786_v11  ;;  %v22556_v54 = vld [vmem:[#allocation44_spill] sm:$0xff] }
 0x61d   :  { %v11720_v60 = vpop.f32.mrf.mxu0  ;;  %v11618_v49 = vadd.f32 %v22556_v54, %v21690_v18 }
 0x61e   :  { %12777 = vst [vmem:[#allocation8 + $0x370] sm:$0xff] %v12633_v62  ;;  %v12634_v23 = vmax.f32 %v12490_v61, 0.0  ;;  %v12498_v27 = vadd.f32 %v15937_v16, %v11719_v7  ;;  %v11721_v43 = vadd.f32 %v11720_v60, %v11608_v46  ;;  %v15940_v46 = vld [vmem:[#allocation5 + $0x408] sm:$0xff]  ;;  %v22557_v61 = vld [vmem:[#allocation37_spill] sm:$0xff] }
 0x61f   :  { %v11724_v9 = vpop.f32.mrf.mxu0  ;;  %12371 = vmatmul.mubr.bf16.gmra.mxu0 %v21159_v1  ;;  %v11768_v7 = vadd.f32 %v22557_v61, %v21804_v17  ;;  %v15941_v60 = vld [vmem:[#allocation5 + $0x448] sm:$0xff]  ;;  %v22558_v16 = vld [vmem:[#allocation29_spill] sm:$0xff] }
 0x620   :  { %12778 = vst [vmem:[#allocation8 + $0x378] sm:$0xff] %v12634_v23  ;;  %v12642_v33 = vmax.f32 %v12498_v27, 0.0  ;;  %v12499_v36 = vadd.f32 %v15938_v14, %v11721_v43  ;;  %v11725_v32 = vadd.f32 %v11724_v9, %v11612_v4  ;;  %v21817_v4 = vpop.f32.mrf.mxu1  ;;  %v11770_v18 = vadd.f32 %v22558_v16, %v21809_v51  ;;  %v15942_v43 = vld [vmem:[#allocation5 + $0x450] sm:$0xff] }
 0x621   :  { %v11726_v55 = vpop.f32.mrf.mxu0 }
 0x622   :  { %12786 = vst [vmem:[#allocation8 + $0x3b8] sm:$0xff] %v12642_v33  ;;  %v12643_v53 = vmax.f32 %v12499_v36, 0.0  ;;  %v12507_v28 = vadd.f32 %v15939_v58, %v11725_v32  ;;  %v11727_v1 = vadd.f32 %v11726_v55, %v11614_v47  ;;  %v22559_v47 = vld [vmem:[#allocation22_spill] sm:$0xff]  ;;  %v15943_v36 = vld [vmem:[#allocation5 + $0x20] sm:$0xff]  ;;  %v21823_v59 = vpop.f32.mrf.mxu1 }
 0x623   :  { %v11728_v20 = vpop.f32.mrf.mxu0  ;;  %v11772_v33 = vadd.f32 %v22559_v47, %v21804_v17 }
 0x624   :  { %12787 = vst [vmem:[#allocation8 + $0x3c0] sm:$0xff] %v12643_v53  ;;  %v12651_v45 = vmax.f32 %v12507_v28, 0.0  ;;  %v12508_v62 = vadd.f32 %v15940_v46, %v11727_v1  ;;  %v11729_v50 = vadd.f32 %v11728_v20, %v11616_v35  ;;  %v22560_v53 = vld [vmem:[#allocation33_spill] sm:$0xff]  ;;  %v15944_v1 = vld [vmem:[#allocation5 + $0x28] sm:$0xff] }
 0x625   :  { %v11730_v19 = vpop.f32.mrf.mxu0  ;;  %v11774_v58 = vadd.f32 %v22560_v53, %v21809_v51  ;;  %v15948_v53 = vld [vmem:[#allocation5 + $0xb8] sm:$0xff] }
 0x626   :  { %12795 = vst [vmem:[#allocation8 + $0x400] sm:$0xff] %v12651_v45  ;;  %v12652_v30 = vmax.f32 %v12508_v62, 0.0  ;;  %v12516_v22 = vadd.f32 %v15941_v60, %v11729_v50  ;;  %v11731_v38 = vadd.f32 %v11730_v19, %v11618_v49  ;;  %v22561_v45 = vld [vmem:[#allocation23_spill] sm:$0xff]  ;;  %v15945_v50 = vld [vmem:[#allocation5 + $0x68] sm:$0xff]  ;;  %v22562_v60 = vld [vmem:[#allocation30_spill] sm:$0xff] }
 0x627   :  { %v11880_v23 = vpop.f32.mrf.mxu0  ;;  %v11778_v46 = vadd.f32 %v22561_v45, %v21804_v17  ;;  %v15949_v45 = vld [vmem:[#allocation5 + $0xf8] sm:$0xff] }
 0x628   :  { %12796 = vst [vmem:[#allocation8 + $0x408] sm:$0xff] %v12652_v30  ;;  %v12660_v27 = vmax.f32 %v12516_v22, 0.0  ;;  %v12517_v11 = vadd.f32 %v15942_v43, %v11731_v38  ;;  %v11881_v9 = vadd.f32 %v11880_v23, %v11768_v7  ;;  %v21829_v7 = vpop.f32.mrf.mxu1  ;;  %v11780_v22 = vadd.f32 %v22562_v60, %v21809_v51  ;;  %v15946_v23 = vld [vmem:[#allocation5 + $0x70] sm:$0xff]  ;;  %v22563_v43 = vld [vmem:[#allocation15_spill] sm:$0xff] }
 0x629   :  { %v11882_v10 = vpop.f32.mrf.mxu0 }
 0x62a   :  { %12804 = vst [vmem:[#allocation8 + $0x448] sm:$0xff] %v12660_v27  ;;  %v12661_v14 = vmax.f32 %v12517_v11, 0.0  ;;  %v12383_v32 = vadd.f32 %v15943_v36, %v11881_v9  ;;  %v11883_v55 = vadd.f32 %v11882_v10, %v11770_v18  ;;  %v11782_v11 = vadd.f32 %v22563_v43, %v21804_v17  ;;  %v15947_v10 = vld [vmem:[#allocation5 + $0xb0] sm:$0xff] }
 0x62b   :  { %v11884_v35 = vpop.f32.mrf.mxu0 }
 0x62c   :  { %12805 = vst [vmem:[#allocation8 + $0x450] sm:$0xff] %v12661_v14  ;;  %v12527_v28 = vmax.f32 %v12383_v32, 0.0  ;;  %v12384_v20 = vadd.f32 %v15944_v1, %v11883_v55  ;;  %v11885_v54 = vadd.f32 %v11884_v35, %v11772_v33  ;;  %v21835_v14 = vpop.f32.mrf.mxu1  ;;  %v22564_v32 = vld [vmem:[#allocation57_spill] sm:$0xff] }
 0x62d   :  { %v11886_v49 = vpop.f32.mrf.mxu0  ;;  %v11784_v55 = vadd.f32 %v22564_v32, %v21809_v51 }
 0x62e   :  { %12671 = vst [vmem:[#allocation8 + $0x20] sm:$0xff] %v12527_v28  ;;  %v12528_v62 = vmax.f32 %v12384_v20, 0.0  ;;  %v12392_v19 = vadd.f32 %v15945_v50, %v11885_v54  ;;  %v11887_v61 = vadd.f32 %v11886_v49, %v11774_v58  ;;  %v22565_v20 = vld [vmem:[#allocation58_spill] sm:$0xff]  ;;  %v21841_v50 = vpop.f32.mrf.mxu1 }
 0x62f   :  { %v11890_v30 = vpop.f32.mrf.mxu0  ;;  %v11788_v54 = vadd.f32 %v22565_v20, %v21804_v17 }
 0x630   :  { %12672 = vst [vmem:[#allocation8 + $0x28] sm:$0xff] %v12528_v62  ;;  %v12536_v38 = vmax.f32 %v12392_v19, 0.0  ;;  %v12393_v16 = vadd.f32 %v15946_v23, %v11887_v61  ;;  %v11891_v18 = vadd.f32 %v11890_v30, %v11778_v46  ;;  %v22566_v61 = vld [vmem:[#allocation59_spill] sm:$0xff] }
 0x631   :  { %v11892_v27 = vpop.f32.mrf.mxu0  ;;  %v11790_v30 = vadd.f32 %v22566_v61, %v21809_v51  ;;  %v22570_v61 = vld [vmem:[#allocation63_spill] sm:$0xff] }
 0x632   :  { %12680 = vst [vmem:[#allocation8 + $0x68] sm:$0xff] %v12536_v38  ;;  %v12537_v9 = vmax.f32 %v12393_v16, 0.0  ;;  %v12401_v47 = vadd.f32 %v15947_v10, %v11891_v18  ;;  %v11893_v33 = vadd.f32 %v11892_v27, %v11780_v22  ;;  %v15950_v22 = vld [vmem:[#allocation5 + $0x100] sm:$0xff]  ;;  %v22567_v18 = vld [vmem:[#allocation60_spill] sm:$0xff] }
 0x633   :  { %v11894_v36 = vpop.f32.mrf.mxu0  ;;  %v11792_v27 = vadd.f32 %v22567_v18, %v21804_v17  ;;  %v22571_v18 = vld [vmem:[#allocation64_spill] sm:$0xff] }
 0x634   :  { %12681 = vst [vmem:[#allocation8 + $0x70] sm:$0xff] %v12537_v9  ;;  %v12545_v35 = vmax.f32 %v12401_v47, 0.0  ;;  %v12402_v58 = vadd.f32 %v15948_v53, %v11893_v33  ;;  %v11895_v28 = vadd.f32 %v11894_v36, %v11782_v11  ;;  %v15951_v11 = vld [vmem:[#allocation5 + $0x140] sm:$0xff]  ;;  %v21847_v47 = vpop.f32.mrf.mxu1  ;;  %v22568_v36 = vld [vmem:[#allocation61_spill] sm:$0xff] }
 0x635   :  { %v11896_v1 = vpop.f32.mrf.mxu0  ;;  %v11794_v32 = vadd.f32 %v22568_v36, %v21809_v51 }
 0x636   :  { %12689 = vst [vmem:[#allocation8 + $0xb0] sm:$0xff] %v12545_v35  ;;  %v12546_v49 = vmax.f32 %v12402_v58, 0.0  ;;  %v12410_v46 = vadd.f32 %v15949_v45, %v11895_v28  ;;  %v11897_v62 = vadd.f32 %v11896_v1, %v11784_v55  ;;  %v15952_v35 = vld [vmem:[#allocation5 + $0x148] sm:$0xff]  ;;  %v22569_v1 = vld [vmem:[#allocation62_spill] sm:$0xff] }
 0x637   :  { %v11900_v19 = vpop.f32.mrf.mxu0  ;;  %v11798_v20 = vadd.f32 %v22569_v1, %v21804_v17 }
 0x638   :  { %12690 = vst [vmem:[#allocation8 + $0xb8] sm:$0xff] %v12546_v49  ;;  %v12554_v60 = vmax.f32 %v12410_v46, 0.0  ;;  %v12411_v38 = vadd.f32 %v15950_v22, %v11897_v62  ;;  %v11901_v23 = vadd.f32 %v11900_v19, %v11788_v54  ;;  %v15953_v49 = vld [vmem:[#allocation5 + $0x188] sm:$0xff]  ;;  %v21853_v62 = vpop.f32.mrf.mxu1  ;;  %v15954_v22 = vld [vmem:[#allocation5 + $0x190] sm:$0xff] }
 0x639   :  { %v11902_v16 = vpop.f32.mrf.mxu0 }
 0x63a   :  { %12698 = vst [vmem:[#allocation8 + $0xf8] sm:$0xff] %v12554_v60  ;;  %v12555_v43 = vmax.f32 %v12411_v38, 0.0  ;;  %v12419_v9 = vadd.f32 %v15951_v11, %v11901_v23  ;;  %v11903_v10 = vadd.f32 %v11902_v16, %v11790_v30  ;;  %v11800_v30 = vadd.f32 %v22570_v61, %v21809_v51  ;;  %v15955_v11 = vld [vmem:[#allocation5 + $0x1d0] sm:$0xff] }
 0x63b   :  { %v11904_v33 = vpop.f32.mrf.mxu0 }
 0x63c   :  { %12699 = vst [vmem:[#allocation8 + $0x100] sm:$0xff] %v12555_v43  ;;  %v12563_v55 = vmax.f32 %v12419_v9, 0.0  ;;  %v12420_v53 = vadd.f32 %v15952_v35, %v11903_v10  ;;  %v11905_v58 = vadd.f32 %v11904_v33, %v11792_v27  ;;  %v11802_v27 = vadd.f32 %v22571_v18, %v21804_v17  ;;  %v21859_v33 = vpop.f32.mrf.mxu1 }
 0x63d   :  { %v11906_v28 = vpop.f32.mrf.mxu0 }
 0x63e   :  { %12707 = vst [vmem:[#allocation8 + $0x140] sm:$0xff] %v12563_v55  ;;  %v12564_v54 = vmax.f32 %v12420_v53, 0.0  ;;  %v12428_v45 = vadd.f32 %v15953_v49, %v11905_v58  ;;  %v11907_v46 = vadd.f32 %v11906_v28, %v11794_v32  ;;  %v22572_v32 = vld [vmem:[#allocation65_spill] sm:$0xff]  ;;  %v15956_v53 = vld [vmem:[#allocation5 + $0x1d8] sm:$0xff]  ;;  %v21865_v61 = vpop.f32.mrf.mxu1 }
 0x63f   :  { %v11910_v19 = vpop.f32.mrf.mxu0  ;;  %v11804_v55 = vadd.f32 %v22572_v32, %v21809_v51 }
 0x640   :  { %12708 = vst [vmem:[#allocation8 + $0x148] sm:$0xff] %v12564_v54  ;;  %v12572_v60 = vmax.f32 %v12428_v45, 0.0  ;;  %v12429_v38 = vadd.f32 %v15954_v22, %v11907_v46  ;;  %v11911_v23 = vadd.f32 %v11910_v19, %v11798_v20  ;;  %v22573_v20 = vld [vmem:[#allocation35_spill] sm:$0xff]  ;;  %v15957_v45 = vld [vmem:[#allocation5 + $0x218] sm:$0xff]  ;;  %v21871_v32 = vpop.f32.mrf.mxu1 }
 0x641   :  { %v11912_v16 = vpop.f32.mrf.mxu0  ;;  %v11808_v54 = vadd.f32 %v22573_v20, %v21804_v17 }
 0x642   :  { %12716 = vst [vmem:[#allocation8 + $0x188] sm:$0xff] %v12572_v60  ;;  %v12573_v43 = vmax.f32 %v12429_v38, 0.0  ;;  %v12437_v9 = vadd.f32 %v15955_v11, %v11911_v23  ;;  %v11913_v10 = vadd.f32 %v11912_v16, %v11800_v30  ;;  %v22574_v60 = vld [vmem:[#allocation36_spill] sm:$0xff]  ;;  %v15958_v23 = vld [vmem:[#allocation5 + $0x220] sm:$0xff] }
 0x643   :  { %v11914_v36 = vpop.f32.mrf.mxu0  ;;  %v11810_v22 = vadd.f32 %v22574_v60, %v21809_v51 }
 0x644   :  { %12717 = vst [vmem:[#allocation8 + $0x190] sm:$0xff] %v12573_v43  ;;  %v12581_v35 = vmax.f32 %v12437_v9, 0.0  ;;  %v12438_v58 = vadd.f32 %v15956_v53, %v11913_v10  ;;  %v11915_v28 = vadd.f32 %v11914_v36, %v11802_v27  ;;  %v11812_v43 = vadd.f32 %v21552_v34, %v21804_v17  ;;  %v15959_v9 = vld [vmem:[#allocation5 + $0x260] sm:$0xff] }
 0x645   :  { %v11916_v1 = vpop.f32.mrf.mxu0  ;;  %v11818_v34 = vadd.f32 %v21578_v26, %v21804_v17  ;;  %v11822_v26 = vadd.f32 %v21604_v15, %v21804_v17 }
 0x646   :  { %12725 = vst [vmem:[#allocation8 + $0x1d0] sm:$0xff] %v12581_v35  ;;  %v12582_v49 = vmax.f32 %v12438_v58, 0.0  ;;  %v12446_v46 = vadd.f32 %v15957_v45, %v11915_v28  ;;  %v11917_v19 = vadd.f32 %v11916_v1, %v11804_v55  ;;  %v11814_v35 = vadd.f32 %v21564_v12, %v21809_v51  ;;  %v15960_v58 = vld [vmem:[#allocation5 + $0x268] sm:$0xff] }
 0x647   :  { %v11920_v30 = vpop.f32.mrf.mxu0  ;;  %v11820_v12 = vadd.f32 %v21590_v29, %v21809_v51  ;;  %v11824_v29 = vadd.f32 %v21616_v44, %v21809_v51 }
 0x648   :  { %12726 = vst [vmem:[#allocation8 + $0x1d8] sm:$0xff] %v12582_v49  ;;  %v12590_v38 = vmax.f32 %v12446_v46, 0.0  ;;  %v12447_v16 = vadd.f32 %v15958_v23, %v11917_v19  ;;  %v11921_v18 = vadd.f32 %v11920_v30, %v11808_v54  ;;  %v15961_v49 = vld [vmem:[#allocation5 + $0x2a8] sm:$0xff]  ;;  %v21877_v19 = vpop.f32.mrf.mxu1 }
 0x649   :  { %v11922_v27 = vpop.f32.mrf.mxu0 }
 0x64a   :  { %12734 = vst [vmem:[#allocation8 + $0x218] sm:$0xff] %v12590_v38  ;;  %v12591_v11 = vmax.f32 %v12447_v16, 0.0  ;;  %v12455_v10 = vadd.f32 %v15959_v9, %v11921_v18  ;;  %v11923_v36 = vadd.f32 %v11922_v27, %v11810_v22  ;;  %v15962_v22 = vld [vmem:[#allocation5 + $0x2b0] sm:$0xff]  ;;  %v21883_v9 = vpop.f32.mrf.mxu1 }
 0x64b   :  { %v11924_v55 = vpop.f32.mrf.mxu0  ;;  %v15963_v27 = vld [vmem:[#allocation5 + $0x2f0] sm:$0xff] }
 0x64c   :  { %12735 = vst [vmem:[#allocation8 + $0x220] sm:$0xff] %v12591_v11  ;;  %v12599_v53 = vmax.f32 %v12455_v10, 0.0  ;;  %v12456_v28 = vadd.f32 %v15960_v58, %v11923_v36  ;;  %v11925_v1 = vadd.f32 %v11924_v55, %v11812_v43  ;;  %v15964_v55 = vld [vmem:[#allocation5 + $0x2f8] sm:$0xff] }
 0x64d   :  { %v11926_v20 = vpop.f32.mrf.mxu0 }
 0x64e   :  { %12743 = vst [vmem:[#allocation8 + $0x260] sm:$0xff] %v12599_v53  ;;  %v12600_v54 = vmax.f32 %v12456_v28, 0.0  ;;  %v12464_v45 = vadd.f32 %v15961_v49, %v11925_v1  ;;  %v11927_v46 = vadd.f32 %v11926_v20, %v11814_v35  ;;  %v22575_v28 = vld [vmem:[#allocation21_spill] sm:$0xff]  ;;  %v15965_v20 = vld [vmem:[#allocation5 + $0x338] sm:$0xff]  ;;  %v21889_v49 = vpop.f32.mrf.mxu1 }
 0x64f   :  { %v11930_v30 = vpop.f32.mrf.mxu0  ;;  %v11828_v15 = vadd.f32 %v22575_v28, %v21804_v17 }
 0x650   :  { %12744 = vst [vmem:[#allocation8 + $0x268] sm:$0xff] %v12600_v54  ;;  %v12608_v60 = vmax.f32 %v12464_v45, 0.0  ;;  %v12465_v38 = vadd.f32 %v15962_v22, %v11927_v46  ;;  %v11931_v23 = vadd.f32 %v11930_v30, %v11818_v34  ;;  %v22576_v46 = vld [vmem:[#allocation12_spill] sm:$0xff] }
 0x651   :  { %v11932_v16 = vpop.f32.mrf.mxu0  ;;  %v11830_v44 = vadd.f32 %v22576_v46, %v21809_v51 }
 0x652   :  { %12752 = vst [vmem:[#allocation8 + $0x2a8] sm:$0xff] %v12608_v60  ;;  %v12609_v18 = vmax.f32 %v12465_v38, 0.0  ;;  %v12473_v43 = vadd.f32 %v15963_v27, %v11931_v23  ;;  %v11933_v11 = vadd.f32 %v11932_v16, %v11820_v12  ;;  %v15966_v12 = vld [vmem:[#allocation5 + $0x340] sm:$0xff]  ;;  %v11832_v23 = vadd.f32 %v21641_v0, %v21804_v17 }
 0x653   :  { %v11934_v10 = vpop.f32.mrf.mxu0  ;;  %v11838_v0 = vadd.f32 %v21655_v52, %v21804_v17  ;;  %v15971_v52 = vld [vmem:[%s22096_s8] sm:$0xff] }
 0x654   :  { %12753 = vst [vmem:[#allocation8 + $0x2b0] sm:$0xff] %v12609_v18  ;;  %v12617_v36 = vmax.f32 %v12473_v43, 0.0  ;;  %v12474_v35 = vadd.f32 %v15964_v55, %v11933_v11  ;;  %v11935_v53 = vadd.f32 %v11934_v10, %v11822_v26  ;;  %v15967_v26 = vld [vmem:[#allocation5 + $0x380] sm:$0xff]  ;;  %v21895_v43 = vpop.f32.mrf.mxu1  ;;  %v22577_v10 = vld [vmem:[#allocation20_spill] sm:$0xff] }
 0x655   :  { %v11936_v58 = vpop.f32.mrf.mxu0  ;;  %v15968_v55 = vld [vmem:[#allocation5 + $0x388] sm:$0xff] }
 0x656   :  { %12761 = vst [vmem:[#allocation8 + $0x2f0] sm:$0xff] %v12617_v36  ;;  %v12618_v1 = vmax.f32 %v12474_v35, 0.0  ;;  %v12482_v34 = vadd.f32 %v15965_v20, %v11935_v53  ;;  %v11937_v54 = vadd.f32 %v11936_v58, %v11824_v29  ;;  %v11834_v29 = vadd.f32 %v22577_v10, %v21809_v51 }
 0x657   :  { %v11940_v45 = vpop.f32.mrf.mxu0  ;;  %v9790_v58 = vsub.s32 6, %v22535_v48 }
 0x658   :  { %12762 = vst [vmem:[#allocation8 + $0x2f8] sm:$0xff] %v12618_v1  ;;  %v12626_v30 = vmax.f32 %v12482_v34, 0.0  ;;  %v12483_v60 = vadd.f32 %v15966_v12, %v11937_v54  ;;  %v11941_v22 = vadd.f32 %v11940_v45, %v11828_v15  ;;  %v15969_v1 = vld [vmem:[#allocation5 + $0x3c8] sm:$0xff]  ;;  %v9794_v54 = vsub.s32 7, %v22535_v48  ;;  %v21903_v45 = vpop.f32.mrf.mxu1  ;;  %v22579_v48 = vld [vmem:[#allocation18_spill] sm:$0xff] }
 0x659   :  { %v11942_v38 = vpop.f32.mrf.mxu0 }
 0x65a   :  { %12770 = vst [vmem:[#allocation8 + $0x338] sm:$0xff] %v12626_v30  ;;  %v12627_v16 = vmax.f32 %v12483_v60, 0.0  ;;  %v12491_v18 = vadd.f32 %v15967_v26, %v11941_v22  ;;  %v11943_v27 = vadd.f32 %v11942_v38, %v11830_v44  ;;  %v22578_v44 = vld [vmem:[#allocation42_spill] sm:$0xff]  ;;  %v15970_v60 = vld [vmem:[#allocation5 + $0x3d0] sm:$0xff]  ;;  %v11842_v26 = vadd.f32 %v22579_v48, %v21804_v17 }
 0x65b   :  { %v11944_v11 = vpop.f32.mrf.mxu0  ;;  %v11840_v30 = vadd.f32 %v22578_v44, %v21809_v51 }
 0x65c   :  { %12771 = vst [vmem:[#allocation8 + $0x340] sm:$0xff] %v12627_v16  ;;  %v12635_v36 = vmax.f32 %v12491_v18, 0.0  ;;  %v12492_v35 = vadd.f32 %v15968_v55, %v11943_v27  ;;  %v11945_v53 = vadd.f32 %v11944_v11, %v11832_v23  ;;  %v21910_v23 = vrot.slane %v15971_v52, %v9790_v58  ;;  %v15972_v27 = vld [vmem:[#allocation5 + $0x410] sm:$0xff]  ;;  %v15973_v58 = vld [vmem:[#allocation5 + $0x418] sm:$0xff] }
 0x65d   :  { %v11946_v28 = vpop.f32.mrf.mxu0 }
 0x65e   :  { %12779 = vst [vmem:[#allocation8 + $0x380] sm:$0xff] %v12635_v36  ;;  %v12636_v15 = vmax.f32 %v12492_v35, 0.0  ;;  %v12500_v20 = vadd.f32 %v15969_v1, %v11945_v53  ;;  %v11947_v34 = vadd.f32 %v11946_v28, %v11834_v29  ;;  %v21914_v29 = vrot.slane %v15971_v52, %v9794_v54  ;;  %v21916_v36 = vpop.f32.mrf.mxu1  ;;  %v15976_v52 = vld [vmem:[#allocation5 + $0x30] sm:$0xff] }
 0x65f   :  { %v11950_v46 = vpop.f32.mrf.mxu0  ;;  %v11844_v35 = vadd.f32 %v21676_v24, %v21809_v51  ;;  %v11994_v17 = vadd.f32 %v21692_v63, %v21910_v23  ;;  %v11998_v63 = vadd.f32 %v21706_v3, %v21910_v23  ;;  %v12004_v3 = vadd.f32 %v21720_v41, %v21910_v23 }
 0x660   :  { %12780 = vst [vmem:[#allocation8 + $0x388] sm:$0xff] %v12636_v15  ;;  %v12644_v12 = vmax.f32 %v12500_v20, 0.0  ;;  %v12501_v22 = vadd.f32 %v15970_v60, %v11947_v34  ;;  %v11951_v38 = vadd.f32 %v11950_v46, %v11838_v0  ;;  %v15974_v20 = vld [vmem:[#allocation5 + $0x458] sm:$0xff]  ;;  %v21922_v46 = vpop.f32.mrf.mxu1  ;;  %v11996_v24 = vadd.f32 %v21698_v40, %v21914_v29 }
 0x661   :  { %v11952_v16 = vpop.f32.mrf.mxu0  ;;  %v12000_v40 = vadd.f32 %v21712_v21, %v21914_v29  ;;  %v12006_v21 = vadd.f32 %v21726_v25, %v21914_v29  ;;  %v12008_v41 = vadd.f32 %v21734_v13, %v21910_v23  ;;  %v12010_v25 = vadd.f32 %v21740_v5, %v21914_v29 }
 0x662   :  { %12788 = vst [vmem:[#allocation8 + $0x3c8] sm:$0xff] %v12644_v12  ;;  %v12645_v18 = vmax.f32 %v12501_v22, 0.0  ;;  %v12509_v11 = vadd.f32 %v15972_v27, %v11951_v38  ;;  %v11953_v10 = vadd.f32 %v11952_v16, %v11840_v30  ;;  %v15975_v30 = vld [vmem:[#allocation5 + $0x460] sm:$0xff]  ;;  %v12014_v13 = vadd.f32 %v21748_v31, %v21910_v23 }
 0x663   :  { %v11954_v55 = vpop.f32.mrf.mxu0  ;;  %v12016_v5 = vadd.f32 %v21754_v57, %v21914_v29  ;;  %v12018_v31 = vadd.f32 %v21762_v6, %v21910_v23  ;;  %v12020_v57 = vadd.f32 %v21768_v39, %v21914_v29  ;;  %v12024_v6 = vadd.f32 %v21776_v56, %v21910_v23 }
 0x664   :  { %12789 = vst [vmem:[#allocation8 + $0x3d0] sm:$0xff] %v12645_v18  ;;  %v12653_v53 = vmax.f32 %v12509_v11, 0.0  ;;  %v12510_v28 = vadd.f32 %v15973_v58, %v11953_v10  ;;  %v11955_v0 = vadd.f32 %v11954_v55, %v11842_v26  ;;  %v21928_v26 = vpop.f32.mrf.mxu1  ;;  %v15977_v11 = vld [vmem:[#allocation5 + $0x38] sm:$0xff]  ;;  %v12026_v39 = vadd.f32 %v21782_v2, %v21914_v29 }
 0x665   :  { %v11956_v15 = vpop.f32.mrf.mxu0  ;;  %v15978_v58 = vld [vmem:[#allocation5 + $0x78] sm:$0xff]  ;;  %v12028_v56 = vadd.f32 %v21790_v37, %v21910_v23  ;;  %v12030_v2 = vadd.f32 %v21798_v8, %v21914_v29  ;;  %v12034_v37 = vadd.f32 %v21811_v42, %v21910_v23  ;;  %v12036_v8 = vadd.f32 %v21817_v4, %v21914_v29 }
 0x666   :  { %12797 = vst [vmem:[#allocation8 + $0x410] sm:$0xff] %v12653_v53  ;;  %v12654_v1 = vmax.f32 %v12510_v28, 0.0  ;;  %v12518_v34 = vadd.f32 %v15974_v20, %v11955_v0  ;;  %v11957_v54 = vadd.f32 %v11956_v15, %v11844_v35  ;;  %v21934_v15 = vpop.f32.mrf.mxu1  ;;  %v15979_v20 = vld [vmem:[#allocation5 + $0x80] sm:$0xff]  ;;  %v12038_v42 = vadd.f32 %v21823_v59, %v21910_v23 }
 0x667   :  { %v12106_v44 = vpop.f32.mrf.mxu0  ;;  %v12040_v4 = vadd.f32 %v21829_v7, %v21914_v29  ;;  %v12044_v59 = vadd.f32 %v21835_v14, %v21910_v23  ;;  %v12046_v7 = vadd.f32 %v21841_v50, %v21914_v29  ;;  %v12048_v14 = vadd.f32 %v21847_v47, %v21910_v23 }
 0x668   :  { %12798 = vst [vmem:[#allocation8 + $0x418] sm:$0xff] %v12654_v1  ;;  %v12662_v51 = vmax.f32 %v12518_v34, 0.0  ;;  %v12519_v12 = vadd.f32 %v15975_v30, %v11957_v54  ;;  %v12107_v60 = vadd.f32 %v12106_v44, %v11994_v17  ;;  %v12050_v50 = vadd.f32 %v21853_v62, %v21914_v29 }
 0x669   :  { %v12108_v22 = vpop.f32.mrf.mxu0  ;;  %v12054_v47 = vadd.f32 %v21859_v33, %v21910_v23  ;;  %v12056_v62 = vadd.f32 %v21865_v61, %v21914_v29  ;;  %v12058_v33 = vadd.f32 %v21871_v32, %v21910_v23  ;;  %v12060_v61 = vadd.f32 %v21877_v19, %v21914_v29 }
 0x66a   :  { %12806 = vst [vmem:[#allocation8 + $0x458] sm:$0xff] %v12662_v51  ;;  %v12663_v38 = vmax.f32 %v12519_v12, 0.0  ;;  %v12385_v16 = vadd.f32 %v15976_v52, %v12107_v60  ;;  %v12109_v48 = vadd.f32 %v12108_v22, %v11996_v24  ;;  %v15980_v51 = vld [vmem:[#allocation5 + $0xc0] sm:$0xff]  ;;  %v21940_v60 = vpop.f32.mrf.mxu1  ;;  %v12064_v32 = vadd.f32 %v21883_v9, %v21910_v23 }
 0x66b   :  { %v12110_v18 = vpop.f32.mrf.mxu0  ;;  %v12066_v19 = vadd.f32 %v21889_v49, %v21914_v29  ;;  %v12068_v9 = vadd.f32 %v21895_v43, %v21910_v23  ;;  %v12070_v49 = vadd.f32 %v21903_v45, %v21914_v29  ;;  %v14459_v43 = vadd.f32 %v21922_v46, %v21916_v36 }
 0x66c   :  { %12807 = vst [vmem:[#allocation8 + $0x460] sm:$0xff] %v12663_v38  ;;  %v12529_v27 = vmax.f32 %v12385_v16, 0.0  ;;  %v12386_v10 = vadd.f32 %v15977_v11, %v12109_v48  ;;  %v12111_v55 = vadd.f32 %v12110_v18, %v11998_v63  ;;  %v15981_v38 = vld [vmem:[#allocation5 + $0xc8] sm:$0xff]  ;;  %v14462_v46 = vadd.f32 %v21934_v15, %v21928_v26 }
 0x66d   :  { %v12112_v35 = vpop.f32.mrf.mxu0 }
 0x66e   :  { %12673 = vst [vmem:[#allocation8 + $0x30] sm:$0xff] %v12529_v27  ;;  %v12530_v53 = vmax.f32 %v12386_v10, 0.0  ;;  %v12394_v28 = vadd.f32 %v15978_v58, %v12111_v55  ;;  %v12113_v0 = vadd.f32 %v12112_v35, %v12000_v40  ;;  %v15982_v40 = vld [vmem:[#allocation5 + $0x108] sm:$0xff]  ;;  %v21946_v10 = vpop.f32.mrf.mxu1 }
 0x66f   :  { %v12116_v17 = vpop.f32.mrf.mxu0 }
 0x670   :  { %12674 = vst [vmem:[#allocation8 + $0x38] sm:$0xff] %v12530_v53  ;;  %v12538_v1 = vmax.f32 %v12394_v28, 0.0  ;;  %v12395_v34 = vadd.f32 %v15979_v20, %v12113_v0  ;;  %v12117_v54 = vadd.f32 %v12116_v17, %v12004_v3  ;;  %v15983_v3 = vld [vmem:[#allocation5 + $0x110] sm:$0xff]  ;;  %v21952_v20 = vpop.f32.mrf.mxu1 }
 0x671   :  { %v12118_v44 = vpop.f32.mrf.mxu0  ;;  %v15984_v17 = vld [vmem:[#allocation5 + $0x150] sm:$0xff] }
 0x672   :  { %12682 = vst [vmem:[#allocation8 + $0x78] sm:$0xff] %v12538_v1  ;;  %v12539_v24 = vmax.f32 %v12395_v34, 0.0  ;;  %v12403_v30 = vadd.f32 %v15980_v51, %v12117_v54  ;;  %v12119_v12 = vadd.f32 %v12118_v44, %v12006_v21  ;;  %v15985_v44 = vld [vmem:[#allocation5 + $0x158] sm:$0xff] }
 0x673   :  { %v12120_v22 = vpop.f32.mrf.mxu0 }
 0x674   :  { %12683 = vst [vmem:[#allocation8 + $0x80] sm:$0xff] %v12539_v24  ;;  %v12547_v63 = vmax.f32 %v12403_v30, 0.0  ;;  %v12404_v52 = vadd.f32 %v15981_v38, %v12119_v12  ;;  %v12121_v16 = vadd.f32 %v12120_v22, %v12008_v41  ;;  %v15986_v12 = vld [vmem:[#allocation5 + $0x198] sm:$0xff] }
 0x675   :  { %v12122_v48 = vpop.f32.mrf.mxu0 }
 0x676   :  { %12691 = vst [vmem:[#allocation8 + $0xc0] sm:$0xff] %v12547_v63  ;;  %v12548_v18 = vmax.f32 %v12404_v52, 0.0  ;;  %v12412_v27 = vadd.f32 %v15982_v40, %v12121_v16  ;;  %v12123_v11 = vadd.f32 %v12122_v48, %v12010_v25  ;;  %v21958_v63 = vpop.f32.mrf.mxu1  ;;  %v15987_v16 = vld [vmem:[#allocation5 + $0x1a0] sm:$0xff] }
 0x677   :  { %v12126_v55 = vpop.f32.mrf.mxu0 }
 0x678   :  { %12692 = vst [vmem:[#allocation8 + $0xc8] sm:$0xff] %v12548_v18  ;;  %v12556_v35 = vmax.f32 %v12412_v27, 0.0  ;;  %v12413_v53 = vadd.f32 %v15983_v3, %v12123_v11  ;;  %v12127_v58 = vadd.f32 %v12126_v55, %v12014_v13  ;;  %v15988_v27 = vld [vmem:[#allocation5 + $0x1e0] sm:$0xff] }
 0x679   :  { %v12128_v28 = vpop.f32.mrf.mxu0 }
 0x67a   :  { %12700 = vst [vmem:[#allocation8 + $0x108] sm:$0xff] %v12556_v35  ;;  %v12557_v0 = vmax.f32 %v12413_v53, 0.0  ;;  %v12421_v21 = vadd.f32 %v15984_v17, %v12127_v58  ;;  %v12129_v1 = vadd.f32 %v12128_v28, %v12016_v5  ;;  %v21964_v5 = vpop.f32.mrf.mxu1  ;;  %v15989_v53 = vld [vmem:[#allocation5 + $0x1e8] sm:$0xff] }
 0x67b   :  { %v12130_v34 = vpop.f32.mrf.mxu0  ;;  %v15990_v17 = vld [vmem:[#allocation5 + $0x228] sm:$0xff] }
 0x67c   :  { %12701 = vst [vmem:[#allocation8 + $0x110] sm:$0xff] %v12557_v0  ;;  %v12565_v54 = vmax.f32 %v12421_v21, 0.0  ;;  %v12422_v41 = vadd.f32 %v15985_v44, %v12129_v1  ;;  %v12131_v24 = vadd.f32 %v12130_v34, %v12018_v31  ;;  %v21970_v34 = vpop.f32.mrf.mxu1  ;;  %v15991_v44 = vld [vmem:[#allocation5 + $0x230] sm:$0xff] }
 0x67d   :  { %v12132_v51 = vpop.f32.mrf.mxu0 }
 0x67e   :  { %12709 = vst [vmem:[#allocation8 + $0x150] sm:$0xff] %v12565_v54  ;;  %v12566_v30 = vmax.f32 %v12422_v41, 0.0  ;;  %v12430_v22 = vadd.f32 %v15986_v12, %v12131_v24  ;;  %v12133_v25 = vadd.f32 %v12132_v51, %v12020_v57 }
 0x67f   :  { %v12136_v38 = vpop.f32.mrf.mxu0 }
 0x680   :  { %12710 = vst [vmem:[#allocation8 + $0x158] sm:$0xff] %v12566_v30  ;;  %v12574_v52 = vmax.f32 %v12430_v22, 0.0  ;;  %v12431_v48 = vadd.f32 %v15987_v16, %v12133_v25  ;;  %v12137_v13 = vadd.f32 %v12136_v38, %v12024_v6  ;;  %v15992_v30 = vld [vmem:[#allocation5 + $0x270] sm:$0xff]  ;;  %v21976_v25 = vpop.f32.mrf.mxu1 }
 0x681   :  { %v12138_v18 = vpop.f32.mrf.mxu0 }
 0x682   :  { %12718 = vst [vmem:[#allocation8 + $0x198] sm:$0xff] %v12574_v52  ;;  %v12575_v40 = vmax.f32 %v12431_v48, 0.0  ;;  %v12439_v11 = vadd.f32 %v15988_v27, %v12137_v13  ;;  %v12139_v55 = vadd.f32 %v12138_v18, %v12026_v39  ;;  %v15993_v52 = vld [vmem:[#allocation5 + $0x278] sm:$0xff] }
 0x683   :  { %v12140_v35 = vpop.f32.mrf.mxu0 }
 0x684   :  { %12719 = vst [vmem:[#allocation8 + $0x1a0] sm:$0xff] %v12575_v40  ;;  %v12583_v3 = vmax.f32 %v12439_v11, 0.0  ;;  %v12440_v58 = vadd.f32 %v15989_v53, %v12139_v55  ;;  %v12141_v28 = vadd.f32 %v12140_v35, %v12028_v56  ;;  %v15994_v56 = vld [vmem:[#allocation5 + $0x2b8] sm:$0xff]  ;;  %v21982_v11 = vpop.f32.mrf.mxu1 }
 0x685   :  { %v12142_v31 = vpop.f32.mrf.mxu0 }
 0x686   :  { %12727 = vst [vmem:[#allocation8 + $0x1e0] sm:$0xff] %v12583_v3  ;;  %v12584_v0 = vmax.f32 %v12440_v58, 0.0  ;;  %v12448_v21 = vadd.f32 %v15990_v17, %v12141_v28  ;;  %v12143_v1 = vadd.f32 %v12142_v31, %v12030_v2  ;;  %v15995_v2 = vld [vmem:[#allocation5 + $0x2c0] sm:$0xff]  ;;  %v21988_v17 = vpop.f32.mrf.mxu1 }
 0x687   :  { %v12146_v57 = vpop.f32.mrf.mxu0  ;;  %v15996_v31 = vld [vmem:[#allocation5 + $0x300] sm:$0xff] }
 0x688   :  { %12728 = vst [vmem:[#allocation8 + $0x1e8] sm:$0xff] %v12584_v0  ;;  %v12592_v54 = vmax.f32 %v12448_v21, 0.0  ;;  %v12449_v41 = vadd.f32 %v15991_v44, %v12143_v1  ;;  %v12147_v24 = vadd.f32 %v12146_v57, %v12034_v37  ;;  %v15997_v57 = vld [vmem:[#allocation5 + $0x308] sm:$0xff] }
 0x689   :  { %v12148_v51 = vpop.f32.mrf.mxu0 }
 0x68a   :  { %12736 = vst [vmem:[#allocation8 + $0x228] sm:$0xff] %v12592_v54  ;;  %v12593_v6 = vmax.f32 %v12449_v41, 0.0  ;;  %v12457_v12 = vadd.f32 %v15992_v30, %v12147_v24  ;;  %v12149_v22 = vadd.f32 %v12148_v51, %v12036_v8  ;;  %v15998_v24 = vld [vmem:[#allocation5 + $0x348] sm:$0xff] }
 0x68b   :  { %v12150_v38 = vpop.f32.mrf.mxu0 }
 0x68c   :  { %12737 = vst [vmem:[#allocation8 + $0x230] sm:$0xff] %v12593_v6  ;;  %v12601_v39 = vmax.f32 %v12457_v12, 0.0  ;;  %v12458_v16 = vadd.f32 %v15993_v52, %v12149_v22  ;;  %v12151_v48 = vadd.f32 %v12150_v38, %v12038_v42  ;;  %v21994_v6 = vpop.f32.mrf.mxu1  ;;  %v15999_v22 = vld [vmem:[#allocation5 + $0x350] sm:$0xff] }
 0x68d   :  { %v12152_v13 = vpop.f32.mrf.mxu0 }
 0x68e   :  { %12745 = vst [vmem:[#allocation8 + $0x270] sm:$0xff] %v12601_v39  ;;  %v12602_v18 = vmax.f32 %v12458_v16, 0.0  ;;  %v12466_v40 = vadd.f32 %v15994_v56, %v12151_v48  ;;  %v12153_v27 = vadd.f32 %v12152_v13, %v12040_v4  ;;  %v16000_v16 = vld [vmem:[#allocation5 + $0x390] sm:$0xff] }
 0x68f   :  { %v12156_v55 = vpop.f32.mrf.mxu0 }
 0x690   :  { %12746 = vst [vmem:[#allocation8 + $0x278] sm:$0xff] %v12602_v18  ;;  %v12610_v35 = vmax.f32 %v12466_v40, 0.0  ;;  %v12467_v3 = vadd.f32 %v15995_v2, %v12153_v27  ;;  %v12157_v53 = vadd.f32 %v12156_v55, %v12044_v59  ;;  %v22000_v59 = vpop.f32.mrf.mxu1  ;;  %v16001_v40 = vld [vmem:[#allocation5 + $0x398] sm:$0xff] }
 0x691   :  { %v12158_v58 = vpop.f32.mrf.mxu0  ;;  %v16002_v2 = vld [vmem:[#allocation5 + $0x3d8] sm:$0xff] }
 0x692   :  { %12754 = vst [vmem:[#allocation8 + $0x2b8] sm:$0xff] %v12610_v35  ;;  %v12611_v28 = vmax.f32 %v12467_v3, 0.0  ;;  %v12475_v37 = vadd.f32 %v15996_v31, %v12157_v53  ;;  %v12159_v0 = vadd.f32 %v12158_v58, %v12046_v7  ;;  %v22006_v58 = vpop.f32.mrf.mxu1  ;;  %v16003_v31 = vld [vmem:[#allocation5 + $0x3e0] sm:$0xff] }
 0x693   :  { %v12160_v21 = vpop.f32.mrf.mxu0 }
 0x694   :  { %12755 = vst [vmem:[#allocation8 + $0x2c0] sm:$0xff] %v12611_v28  ;;  %v12619_v1 = vmax.f32 %v12475_v37, 0.0  ;;  %v12476_v8 = vadd.f32 %v15997_v57, %v12159_v0  ;;  %v12161_v54 = vadd.f32 %v12160_v21, %v12048_v14 }
 0x695   :  { %v12162_v44 = vpop.f32.mrf.mxu0 }
 0x696   :  { %12763 = vst [vmem:[#allocation8 + $0x300] sm:$0xff] %v12619_v1  ;;  %v12620_v41 = vmax.f32 %v12476_v8, 0.0  ;;  %v12484_v51 = vadd.f32 %v15998_v24, %v12161_v54  ;;  %v12163_v42 = vadd.f32 %v12162_v44, %v12050_v50  ;;  %v16004_v1 = vld [vmem:[#allocation5 + $0x420] sm:$0xff]  ;;  %v22012_v54 = vpop.f32.mrf.mxu1 }
 0x697   :  { %v12166_v30 = vpop.f32.mrf.mxu0 }
 0x698   :  { %12764 = vst [vmem:[#allocation8 + $0x308] sm:$0xff] %v12620_v41  ;;  %v12628_v12 = vmax.f32 %v12484_v51, 0.0  ;;  %v12485_v38 = vadd.f32 %v15999_v22, %v12163_v42  ;;  %v12167_v4 = vadd.f32 %v12166_v30, %v12054_v47  ;;  %v16005_v41 = vld [vmem:[#allocation5 + $0x428] sm:$0xff]  ;;  %v22023_v45 = vpop.f32.mrf.mxu1 }
 0x699   :  { %v12168_v39 = vpop.f32.mrf.mxu0  ;;  %v16006_v30 = vld [vmem:[#allocation5 + $0x468] sm:$0xff] }
 0x69a   :  { %12772 = vst [vmem:[#allocation8 + $0x348] sm:$0xff] %v12628_v12  ;;  %v12629_v52 = vmax.f32 %v12485_v38, 0.0  ;;  %v12493_v48 = vadd.f32 %v16000_v16, %v12167_v4  ;;  %v12169_v13 = vadd.f32 %v12168_v39, %v12056_v62  ;;  %v22021_v22 = vld [vmem:[%s22096_s8 + $0x8] ss:$0 sm:$0xff]  ;;  %v16007_v4 = vld [vmem:[#allocation5 + $0x470] sm:$0xff]  ;;  %s16072_s8 = smov [#allocation8]  }
 0x69b   :  { %v12170_v18 = vpop.f32.mrf.mxu0  ;;  %v12220_v36 = vadd.f32 %v14459_v43, %v22021_v22  ;;  %s12816_s1 = sshll.u32 %s16072_s8, 4  ;;  %s12817_s1 = int_to_ptr.vmem [resolvable:$true] %s12816_s1 }
 0x69c   :  { %12773 = vst [vmem:[#allocation8 + $0x350] sm:$0xff] %v12629_v52  ;;  %v12637_v56 = vmax.f32 %v12493_v48, 0.0  ;;  %v12494_v27 = vadd.f32 %v16001_v40, %v12169_v13  ;;  %v12171_v55 = vadd.f32 %v12170_v18, %v12058_v33  ;;  %v22028_v48 = vpop.f32.mrf.mxu1  ;;  %v14465_v40 = vadd.f32 %v21946_v10, %v21940_v60  ;;  %s16044_s20 = scalar_lea.vmem %s12817_s1, 18432  ;;  %p16049_p6 = scmp.lt.s32.totalorder %s12817_s1, %s12817_s1 }
 0x69d   :  { %v12172_v7 = vpop.f32.mrf.mxu0  ;;  %p16045_p5 = scmp.ne.s32.totalorder %s12817_s1, %s16044_s20  ;;  %p16050_p7 = scmp.lt.s32.totalorder %s16044_s20, %s16044_s20 }
 0x69e   :  { %12781 = vst [vmem:[#allocation8 + $0x390] sm:$0xff] %v12637_v56  ;;  %v12638_v35 = vmax.f32 %v12494_v27, 0.0  ;;  %v12502_v3 = vadd.f32 %v16002_v2, %v12171_v55  ;;  %v12173_v53 = vadd.f32 %v12172_v7, %v12060_v61  ;;  %v12223_v56 = vadd.f32 %v14462_v46, %v22021_v22  ;;  %v16008_v27 = vld [vmem:[#allocation5 + $0x40] sm:$0xff] }
 0x69f   :  { %v12176_v14 = vpop.f32.mrf.mxu0  ;;  %p16051_p8 = por %p16050_p7, %p16049_p6 }
 0x6a0   :  { %12782 = vst [vmem:[#allocation8 + $0x398] sm:$0xff] %v12638_v35  ;;  %v12646_v28 = vmax.f32 %v12502_v3, 0.0  ;;  %v12503_v37 = vadd.f32 %v16003_v31, %v12173_v53  ;;  %v12177_v0 = vadd.f32 %v12176_v14, %v12064_v32  ;;  %v22033_v32 = vpop.f32.mrf.mxu1  ;;  %v12228_v3 = vadd.f32 %v14465_v40, %v22021_v22  ;;  %v16009_v14 = vld [vmem:[#allocation5 + $0x88] sm:$0xff] }
 0x6a1   :  { %v12178_v21 = vpop.f32.mrf.mxu0  ;;  %v14468_v53 = vadd.f32 %v21958_v63, %v21952_v20  ;;  %p16052_p9 = pnand %p16051_p8, %p16045_p5 }
 0x6a2   :  { %12790 = vst [vmem:[#allocation8 + $0x3d8] sm:$0xff] %v12646_v28  ;;  %v12647_v50 = vmax.f32 %v12503_v37, 0.0  ;;  %v12511_v57 = vadd.f32 %v16004_v1, %v12177_v0  ;;  %v12179_v8 = vadd.f32 %v12178_v21, %v12066_v19  ;;  %v22039_v60 = vpop.f32.mrf.mxu1 }
 0x6a3   :  { %v12180_v44 = vpop.f32.mrf.mxu0  ;;  %v12231_v21 = vadd.f32 %v14468_v53, %v22021_v22 }
 0x6a4   :  { %12791 = vst [vmem:[#allocation8 + $0x3e0] sm:$0xff] %v12647_v50  ;;  %v12655_v47 = vmax.f32 %v12511_v57, 0.0  ;;  %v12512_v24 = vadd.f32 %v16005_v41, %v12179_v8  ;;  %v12181_v51 = vadd.f32 %v12180_v44, %v12068_v9  ;;  %v14471_v9 = vadd.f32 %v21970_v34, %v21964_v5  ;;  %v16010_v50 = vld [vmem:[#allocation5 + $0xd0] sm:$0xff]  ;;  %v14488_v1 = vpop.f32.mrf.mxu1 }
 0x6a5   :  { %v12182_v42 = vpop.f32.mrf.mxu0  ;;  %v14474_v41 = vadd.f32 %v21982_v11, %v21976_v25 }
 0x6a6   :  { %12799 = vst [vmem:[#allocation8 + $0x420] sm:$0xff] %v12655_v47  ;;  %v12656_v23 = vmax.f32 %v12512_v24, 0.0  ;;  %v12520_v62 = vadd.f32 %v16006_v30, %v12181_v51  ;;  %v12183_v12 = vadd.f32 %v12182_v42, %v12070_v49  ;;  %v12236_v47 = vadd.f32 %v14471_v9, %v22021_v22  ;;  %v16011_v24 = vld [vmem:[#allocation5 + $0x118] sm:$0xff]  ;;  %v14490_v34 = vpop.f32.mrf.mxu1 }
 0x6a7   :  { %v14521_v29 = vpop.f32.mrf.mxu0  ;;  %v14489_v9 = vadd.f32 %v14488_v1, %v22039_v60 }
 0x6a8   :  { %12800 = vst [vmem:[#allocation8 + $0x428] sm:$0xff] %v12656_v23  ;;  %v12664_v38 = vmax.f32 %v12520_v62, 0.0  ;;  %v12521_v39 = vadd.f32 %v16007_v4, %v12183_v12  ;;  %v12239_v62 = vadd.f32 %v14474_v41, %v22021_v22  ;;  %v14477_v12 = vadd.f32 %v21994_v6, %v21988_v17  ;;  %v14491_v11 = vpop.f32.mrf.mxu1  ;;  %v16017_v41 = vld [vmem:[#allocation5 + $0x2c8] sm:$0xff] }
 0x6a9   :  { %v14522_v33 = vpop.f32.mrf.mxu0 }
 0x6aa   :  { %12808 = vst [vmem:[#allocation8 + $0x468] sm:$0xff] %v12664_v38  ;;  %v12665_v52 = vmax.f32 %v12521_v39, 0.0  ;;  %v14523_v16 = vadd.f32 %v14522_v33, %v14521_v29  ;;  %v16012_v29 = vld [vmem:[#allocation5 + $0x160] sm:$0xff]  ;;  %v12244_v46 = vadd.f32 %v14477_v12, %v22021_v22  ;;  %v14493_v6 = vpop.f32.mrf.mxu1 }
 0x6ab   :  { %v14524_v13 = vpop.f32.mrf.mxu0 }
 0x6ac   :  { %12809 = vst [vmem:[#allocation8 + $0x470] sm:$0xff] %v12665_v52  ;;  %v12317_v18 = vadd.f32 %v14523_v16, %v12220_v36  ;;  %v14480_v52 = vadd.f32 %v22006_v58, %v22000_v59  ;;  %v16013_v16 = vld [vmem:[#allocation5 + $0x1a8] sm:$0xff]  ;;  %v14494_v58 = vpop.f32.mrf.mxu1 }
 0x6ad   :  { %v14525_v61 = vpop.f32.mrf.mxu0 }
 0x6ae   :  { %v12387_v55 = vadd.f32 %v16008_v27, %v12317_v18  ;;  %v14526_v7 = vadd.f32 %v14525_v61, %v14524_v13  ;;  %v12247_v27 = vadd.f32 %v14480_v52, %v22021_v22 }
 0x6af   :  { %v14527_v26 = vpop.f32.mrf.mxu0 }
 0x6b0   :  { %v12531_v15 = vmax.f32 %v12387_v55, 0.0  ;;  %v12320_v35 = vadd.f32 %v14526_v7, %v12223_v56  ;;  %v14483_v55 = vadd.f32 %v22023_v45, %v22012_v54  ;;  %v16014_v7 = vld [vmem:[#allocation5 + $0x1f0] sm:$0xff]  ;;  %v14496_v45 = vpop.f32.mrf.mxu1 }
 0x6b1   :  { %v14528_v2 = vpop.f32.mrf.mxu0 }
 0x6b2   :  { %12675 = vst.msk [vmem:[#allocation8 + $0x40] sm:$0xff] %vm1641_vm0, %v12531_v15  ;;  %v12396_v19 = vadd.f32 %v16009_v14, %v12320_v35  ;;  %v14529_v28 = vadd.f32 %v14528_v2, %v14527_v26  ;;  %v12252_v53 = vadd.f32 %v14483_v55, %v22021_v22  ;;  %v14486_v14 = vadd.f32 %v22033_v32, %v22028_v48  ;;  %v14497_v48 = vpop.f32.mrf.mxu1 }
 0x6b3   :  { %v14530_v10 = vpop.f32.mrf.mxu0 }
 0x6b4   :  { %v12540_v31 = vmax.f32 %v12396_v19, 0.0  ;;  %v12325_v37 = vadd.f32 %v14529_v28, %v12228_v3  ;;  %v16015_v19 = vld [vmem:[#allocation5 + $0x238] sm:$0xff] }
 0x6b5   :  { %v14531_v0 = vpop.f32.mrf.mxu0 }
 0x6b6   :  { %12684 = vst.msk [vmem:[#allocation8 + $0x88] sm:$0xff] %vm1641_vm0, %v12540_v31  ;;  %v12405_v20 = vadd.f32 %v16010_v50, %v12325_v37  ;;  %v14532_v63 = vadd.f32 %v14531_v0, %v14530_v10  ;;  %v16016_v50 = vld [vmem:[#allocation5 + $0x280] sm:$0xff] }
 0x6b7   :  { %v14533_v57 = vpop.f32.mrf.mxu0 }
 0x6b8   :  { %v12549_v8 = vmax.f32 %v12405_v20, 0.0  ;;  %v12328_v44 = vadd.f32 %v14532_v63, %v12231_v21  ;;  %v12255_v21 = vadd.f32 %v14486_v14, %v22021_v22 }
 0x6b9   :  { %v14534_v49 = vpop.f32.mrf.mxu0 }
 0x6ba   :  { %12693 = vst.msk [vmem:[#allocation8 + $0xd0] sm:$0xff] %vm1641_vm0, %v12549_v8  ;;  %v12414_v51 = vadd.f32 %v16011_v24, %v12328_v44  ;;  %v14535_v5 = vadd.f32 %v14534_v49, %v14533_v57  ;;  %v12260_v49 = vadd.f32 %v14489_v9, %v22021_v22 }
 0x6bb   :  { %v14536_v42 = vpop.f32.mrf.mxu0 }
 0x6bc   :  { %v12558_v43 = vmax.f32 %v12414_v51, 0.0  ;;  %v12333_v23 = vadd.f32 %v14535_v5, %v12236_v47  ;;  %v14492_v47 = vadd.f32 %v14491_v11, %v14490_v34  ;;  %v14499_v5 = vpop.f32.mrf.mxu1 }
 0x6bd   :  { %v14537_v30 = vpop.f32.mrf.mxu0 }
 0x6be   :  { %12702 = vst.msk [vmem:[#allocation8 + $0x118] sm:$0xff] %vm1641_vm0, %v12558_v43  ;;  %v12423_v38 = vadd.f32 %v16012_v29, %v12333_v23  ;;  %v14538_v25 = vadd.f32 %v14537_v30, %v14536_v42  ;;  %v12263_v23 = vadd.f32 %v14492_v47, %v22021_v22  ;;  %v14495_v30 = vadd.f32 %v14494_v58, %v14493_v6 }
 0x6bf   :  { %v14539_v4 = vpop.f32.mrf.mxu0 }
 0x6c0   :  { %v12567_v39 = vmax.f32 %v12423_v38, 0.0  ;;  %v12336_v33 = vadd.f32 %v14538_v25, %v12239_v62  ;;  %v16018_v62 = vld [vmem:[#allocation5 + $0x310] sm:$0xff]  ;;  %v14500_v38 = vpop.f32.mrf.mxu1 }
 0x6c1   :  { %v14540_v36 = vpop.f32.mrf.mxu0 }
 0x6c2   :  { %12711 = vst.msk [vmem:[#allocation8 + $0x160] sm:$0xff] %vm1641_vm0, %v12567_v39  ;;  %v12432_v13 = vadd.f32 %v16013_v16, %v12336_v33  ;;  %v14541_v17 = vadd.f32 %v14540_v36, %v14539_v4  ;;  %v12268_v39 = vadd.f32 %v14495_v30, %v22021_v22  ;;  %v14498_v33 = vadd.f32 %v14497_v48, %v14496_v45  ;;  %v16019_v36 = vld [vmem:[#allocation5 + $0x358] sm:$0xff]  ;;  %v14502_v16 = vpop.f32.mrf.mxu1 }
 0x6c3   :  { %v14542_v18 = vpop.f32.mrf.mxu0 }
 0x6c4   :  { %v12576_v61 = vmax.f32 %v12432_v13, 0.0  ;;  %v12341_v56 = vadd.f32 %v14541_v17, %v12244_v46 }
 0x6c5   :  { %v14543_v40 = vpop.f32.mrf.mxu0 }
 0x6c6   :  { %12720 = vst.msk [vmem:[#allocation8 + $0x1a8] sm:$0xff] %vm1641_vm0, %v12576_v61  ;;  %v12441_v26 = vadd.f32 %v16014_v7, %v12341_v56  ;;  %v14544_v59 = vadd.f32 %v14543_v40, %v14542_v18  ;;  %v12271_v61 = vadd.f32 %v14498_v33, %v22021_v22  ;;  %v14501_v56 = vadd.f32 %v14500_v38, %v14499_v5  ;;  %v16020_v40 = vld [vmem:[#allocation5 + $0x3a0] sm:$0xff]  ;;  %v14503_v7 = vpop.f32.mrf.mxu1 }
 0x6c7   :  { %v14545_v15 = vpop.f32.mrf.mxu0 }
 0x6c8   :  { %v12585_v35 = vmax.f32 %v12441_v26, 0.0  ;;  %v12344_v2 = vadd.f32 %v14544_v59, %v12247_v27 }
 0x6c9   :  { %v14546_v3 = vpop.f32.mrf.mxu0 }
 0x6ca   :  { %12729 = vst.msk [vmem:[#allocation8 + $0x1f0] sm:$0xff] %vm1641_vm0, %v12585_v35  ;;  %v12450_v28 = vadd.f32 %v16015_v19, %v12344_v2  ;;  %v14547_v54 = vadd.f32 %v14546_v3, %v14545_v15  ;;  %v12276_v35 = vadd.f32 %v14501_v56, %v22021_v22  ;;  %v14504_v2 = vadd.f32 %v14503_v7, %v14502_v16  ;;  %v16021_v3 = vld [vmem:[#allocation5 + $0x3e8] sm:$0xff] }
 0x6cb   :  { %v14548_v10 = vpop.f32.mrf.mxu0 }
 0x6cc   :  { %v12594_v31 = vmax.f32 %v12450_v28, 0.0  ;;  %v12349_v37 = vadd.f32 %v14547_v54, %v12252_v53 }
 0x6cd   :  { %v14549_v0 = vpop.f32.mrf.mxu0 }
 0x6ce   :  { %12738 = vst.msk [vmem:[#allocation8 + $0x238] sm:$0xff] %vm1641_vm0, %v12594_v31  ;;  %v12459_v20 = vadd.f32 %v16016_v50, %v12349_v37  ;;  %v14550_v63 = vadd.f32 %v14549_v0, %v14548_v10  ;;  %v12279_v10 = vadd.f32 %v14504_v2, %v22021_v22  ;;  %v16022_v31 = vld [vmem:[#allocation5 + $0x430] sm:$0xff]  ;;  %v16023_v50 = vld [vmem:[#allocation5 + $0x478] sm:$0xff] }
 0x6cf   :  { %v14551_v32 = vpop.f32.mrf.mxu0 }
 0x6d0   :  { %v12603_v57 = vmax.f32 %v12459_v20, 0.0  ;;  %v12352_v8 = vadd.f32 %v14550_v63, %v12255_v21 }
 0x6d1   :  { %v14552_v44 = vpop.f32.mrf.mxu0 }
 0x6d2   :  { %12747 = vst.msk [vmem:[#allocation8 + $0x280] sm:$0xff] %vm1641_vm0, %v12603_v57  ;;  %v12468_v24 = vadd.f32 %v16017_v41, %v12352_v8  ;;  %v14553_v51 = vadd.f32 %v14552_v44, %v14551_v32 }
 0x6d3   :  { %v14554_v60 = vpop.f32.mrf.mxu0 }
 0x6d4   :  { %v12612_v1 = vmax.f32 %v12468_v24, 0.0  ;;  %v12357_v42 = vadd.f32 %v14553_v51, %v12260_v49 }
 0x6d5   :  { %v14555_v43 = vpop.f32.mrf.mxu0 }
 0x6d6   :  { %12756 = vst.msk [vmem:[#allocation8 + $0x2c8] sm:$0xff] %vm1641_vm0, %v12612_v1  ;;  %v12477_v12 = vadd.f32 %v16018_v62, %v12357_v42  ;;  %v14556_v29 = vadd.f32 %v14555_v43, %v14554_v60 }
 0x6d7   :  { %v14557_v34 = vpop.f32.mrf.mxu0 }
 0x6d8   :  { %v12621_v25 = vmax.f32 %v12477_v12, 0.0  ;;  %v12360_v11 = vadd.f32 %v14556_v29, %v12263_v23 }
 0x6d9   :  { %v14558_v4 = vpop.f32.mrf.mxu0 }
 0x6da   :  { %12765 = vst.msk [vmem:[#allocation8 + $0x310] sm:$0xff] %vm1641_vm0, %v12621_v25  ;;  %v12486_v46 = vadd.f32 %v16019_v36, %v12360_v11  ;;  %v14559_v52 = vadd.f32 %v14558_v4, %v14557_v34 }
 0x6db   :  { %v14560_v13 = vpop.f32.mrf.mxu0 }
 0x6dc   :  { %v12630_v17 = vmax.f32 %v12486_v46, 0.0  ;;  %v12365_v6 = vadd.f32 %v14559_v52, %v12268_v39 }
 0x6dd   :  { %v14561_v18 = vpop.f32.mrf.mxu0 }
 0x6de   :  { %12774 = vst.msk [vmem:[#allocation8 + $0x358] sm:$0xff] %vm1641_vm0, %v12630_v17  ;;  %v12495_v27 = vadd.f32 %v16020_v40, %v12365_v6  ;;  %v14562_v55 = vadd.f32 %v14561_v18, %v14560_v13 }
 0x6df   :  { %v14563_v26 = vpop.f32.mrf.mxu0 }
 0x6e0   :  { %v12639_v59 = vmax.f32 %v12495_v27, 0.0  ;;  %v12368_v58 = vadd.f32 %v14562_v55, %v12271_v61 }
 0x6e1   :  { %v14564_v15 = vpop.f32.mrf.mxu0 }
 0x6e2   :  { %12783 = vst.msk [vmem:[#allocation8 + $0x3a0] sm:$0xff] %vm1641_vm0, %v12639_v59  ;;  %v12504_v53 = vadd.f32 %v16021_v3, %v12368_v58  ;;  %v14565_v14 = vadd.f32 %v14564_v15, %v14563_v26 }
 0x6e3   :  { %v14566_v19 = vpop.f32.mrf.mxu0 }
 0x6e4   :  { %v12648_v28 = vmax.f32 %v12504_v53, 0.0  ;;  %v12373_v54 = vadd.f32 %v14565_v14, %v12276_v35 }
 0x6e5   :  { %v14567_v45 = vpop.f32.mrf.mxu0 }
 0x6e6   :  { %12792 = vst.msk [vmem:[#allocation8 + $0x3e8] sm:$0xff] %vm1641_vm0, %v12648_v28  ;;  %v12513_v37 = vadd.f32 %v16022_v31, %v12373_v54  ;;  %v14568_v0 = vadd.f32 %v14567_v45, %v14566_v19 }
 0x6e8   :  { %v12657_v21 = vmax.f32 %v12513_v37, 0.0  ;;  %v12376_v9 = vadd.f32 %v14568_v0, %v12279_v10 }
 0x6ea   :  { %12801 = vst.msk [vmem:[#allocation8 + $0x430] sm:$0xff] %vm1641_vm0, %v12657_v21  ;;  %v12522_v20 = vadd.f32 %v16023_v50, %v12376_v9 }
 0x6ec   :  { %v12666_v63 = vmax.f32 %v12522_v20, 0.0 }
 0x6ee   :  { %12810 = vst.msk [vmem:[#allocation8 + $0x478] sm:$0xff] %vm1641_vm0, %v12666_v63 }
 0x6ef   :  { %16055 = shalt.err (!%p16052_p9)
}
 0x6f0   :  { %12822 = dma.vmem_to_hbm [thread:$0]  %s12817_s1, 18432, %s22097_s9, [#allocation7], %s16069_s12, %s16069_s12, %s16070_s13  }
 0x6f1   :  { %16066 = dma.done.wait [#allocation7], 18432  }
 0x6f2   :  { %16067 = vsyncadd [#allocation7], 4294948864 }
 0x6f3   :  { %12826 = vsyncpa [#allocation6], 1 }
 0x6f4   :  { %12827 = vsyncpa [#allocation7], 1 }

</bundles_post_ra>
